<compile_context>
chip_gen: v7x
topology: tpu7x:2x2x1
jax: 0.10.0
libtpu: 0.0.40
codegen_flags: <defaults>
</compile_context>

<pallas_src>
import math
import jax
import jax.numpy as jnp
from jax.experimental import pallas as pl
from jax.experimental.pallas import tpu as pltpu

# The reference (plain jnp matmuls) must be true-f32 so it agrees with the kernel, which
# requests fp32 contraction precision explicitly on every MXU op.
jax.config.update("jax_default_matmul_precision", "highest")

NUM_UNITS = 32
NUM_TEST = 16            # num_units // 2
PACK_LANES = 32          # widest parameter out-dim
HIGHEST = jax.lax.Precision.HIGHEST   # fp32 MXU contraction (tpu.contract_precision<fp32>)

PARAM_SHAPES = [
    # Actor_att (with_action=True) parameters, stored [in, out] / [1, out]
    ("a_self1_w", (4, NUM_UNITS)), ("a_self1_b", (1, NUM_UNITS)),
    ("a_self2_w", (NUM_UNITS, NUM_TEST)), ("a_self2_b", (1, NUM_TEST)),
    ("a_food1_w", (2, NUM_UNITS)), ("a_food1_b", (1, NUM_UNITS)),
    ("a_food2_w", (NUM_UNITS, NUM_TEST)), ("a_food2_b", (1, NUM_TEST)),
    ("a_fnorm_g", (1, NUM_TEST)), ("a_fnorm_b", (1, NUM_TEST)),
    ("a_other1_w", (2, NUM_UNITS)), ("a_other1_b", (1, NUM_UNITS)),
    ("a_other2_w", (NUM_UNITS, NUM_TEST)), ("a_other2_b", (1, NUM_TEST)),
    ("a_onorm_g", (1, NUM_TEST)), ("a_onorm_b", (1, NUM_TEST)),
    ("a_merge1_w", (NUM_TEST * 3, NUM_UNITS)), ("a_merge1_b", (1, NUM_UNITS)),
    ("a_merge2_w", (NUM_UNITS, NUM_UNITS)), ("a_merge2_b", (1, NUM_UNITS)),
    ("a_mout_w", (NUM_UNITS, NUM_TEST)), ("a_mout_b", (1, NUM_TEST)),
    # Critic_att1 parameters
    ("c_act1_w", (NUM_TEST, NUM_TEST)), ("c_act1_b", (1, NUM_TEST)),
    ("c_act2_w", (NUM_TEST, NUM_TEST)), ("c_act2_b", (1, NUM_TEST)),
    ("c_act3_w", (NUM_TEST, NUM_TEST)), ("c_act3_b", (1, NUM_TEST)),
    ("c_norm1_g", (1, NUM_TEST)), ("c_norm1_b", (1, NUM_TEST)),
    ("c_norm2_g", (1, NUM_TEST)), ("c_norm2_b", (1, NUM_TEST)),
    ("c_merge1_w", (NUM_TEST * 2, NUM_UNITS)), ("c_merge1_b", (1, NUM_UNITS)),
    ("c_merge2_w", (NUM_UNITS, NUM_UNITS)), ("c_merge2_b", (1, NUM_UNITS)),
    ("c_merge3_w", (NUM_UNITS, 1)), ("c_merge3_b", (1, 1)),
]


def _build_layout():
    """Row layout of the single packed parameter slab (8-row aligned blocks)."""
    layout, row = {}, 0
    for name, (r, c) in PARAM_SHAPES:
        layout[name] = (row, r, c)
        row += ((r + 7) // 8) * 8
    return layout, row


PARAM_LAYOUT, PACK_ROWS = _build_layout()


def pack_params(params):
    """Pack the param dict into one [PACK_ROWS, 32] f32 array (done once, outside jit)."""
    buf = jnp.zeros((PACK_ROWS, PACK_LANES), jnp.float32)
    for name, _ in PARAM_SHAPES:
        r0, r, c = PARAM_LAYOUT[name]
        buf = buf.at[r0:r0 + r, 0:c].set(params[name].astype(jnp.float32))
    return buf


# --------------------------------- kernel ----------------------------------------
def make_critic_kernel(n_agents, batch, length_obs, index):
    A = n_agents
    n_food = n_agents
    n_other = n_agents - 1
    L = length_obs
    obs_total = A * L
    B = batch
    N = A * B
    feat = L + 2
    inv_sqrt = 1.0 / math.sqrt(NUM_TEST)
    order = [index] + [i for i in range(A) if i != index]

    def kernel(x_ref, p_ref, out_ref):
        relu = lambda v: jnp.maximum(v, 0.0)
        leaky = lambda v: jnp.where(v > 0, v, 0.01 * v)     # F.leaky_relu default slope

        def getp(name):                         # load a param slice at its use site
            r0, r, c = PARAM_LAYOUT[name]
            return p_ref[r0:r0 + r, 0:c]

        def lin(v, wname, bname):               # MXU matmul + bias (true-f32 contraction)
            w = getp(wname)
            return jnp.dot(v, w, preferred_element_type=jnp.float32,
                           precision=HIGHEST) + getp(bname)

        def layernorm(v, gname, bname):         # torch LayerNorm (eps=1e-5, biased var)
            mu = jnp.mean(v, axis=-1, keepdims=True)
            var = jnp.mean((v - mu) ** 2, axis=-1, keepdims=True)
            return (v - mu) * jax.lax.rsqrt(var + 1e-5) * getp(gname) + getp(bname)

        def attend(query, feats):
            # softmax(<query, f_i> / sqrt(d))-weighted sum of feats, streamed so that
            # no [rows, count] score slab (masked column stores) is materialized.
            s = [jnp.sum(query * f, axis=-1, keepdims=True) * inv_sqrt for f in feats]
            m = s[0]
            for si in s[1:]:
                m = jnp.maximum(m, si)
            e = [jnp.exp(si - m) for si in s]
            num, den = e[0] * feats[0], e[0]
            for ei, fi in zip(e[1:], feats[1:]):
                num = num + ei * fi
                den = den + ei
            return num / den                    # exact division (matches reference softmax)

        x = x_ref[...]                                          # [B, A*L + 2*A]

        # ---- stack per-agent actor inputs [A*B, L+2]; rows of agent `index` first ---
        blocks = []
        for a in order:
            ob = x[:, a * L:(a + 1) * L]
            ac = x[:, obs_total + 2 * a: obs_total + 2 * a + 2]
            blocks.append(jnp.concatenate([ob, ac], axis=1))
        ax = jnp.concatenate(blocks, axis=0)                    # [N, feat]

        # -------------------- Actor_att (with_action=True), all agents --------------
        ws = getp("a_self1_w")                                  # [4, 32]
        h = relu(ax[:, 0:1] * ws[0:1] + ax[:, 1:2] * ws[1:2]
                 + ax[:, feat - 2:feat - 1] * ws[2:3]
                 + ax[:, feat - 1:feat] * ws[3:4]
                 + getp("a_self1_b"))
        self_out = relu(lin(h, "a_self2_w", "a_self2_b"))       # [N, 16]

        def attn_branch(col0, count, w1n, b1n, w2n, b2n, ngn, nbn):
            w1 = getp(w1n)                                      # hoisted out of the loop
            w1x, w1y = w1[0:1], w1[1:2]
            b1 = getp(b1n)
            hh = jnp.concatenate(
                [relu(ax[:, col0 + 2 * i:col0 + 2 * i + 1] * w1x
                      + ax[:, col0 + 2 * i + 1:col0 + 2 * i + 2] * w1y + b1)
                 for i in range(count)], axis=0)                # [count*N, 32]
            f = relu(lin(hh, w2n, b2n))                         # one fused matmul
            feats = [f[i * N:(i + 1) * N, :] for i in range(count)]
            agg = attend(self_out, feats)                       # [N, 16]
            return relu(layernorm(agg, ngn, nbn))

        food_out = attn_branch(2, n_food, "a_food1_w", "a_food1_b",
                               "a_food2_w", "a_food2_b", "a_fnorm_g", "a_fnorm_b")
        other_out = attn_branch(2 + 2 * n_food, n_other, "a_other1_w", "a_other1_b",
                                "a_other2_w", "a_other2_b", "a_onorm_g", "a_onorm_b")

        merged = jnp.concatenate([self_out, food_out, other_out], axis=1)   # [N, 48]
        m1 = relu(lin(merged, "a_merge1_w", "a_merge1_b"))
        m2 = relu(lin(m1, "a_merge2_w", "a_merge2_b"))
        actor_out = lin(m2, "a_mout_w", "a_mout_b")             # [N, 16]

        # -------------------- Critic feature-feature attention ----------------------
        theta = lin(actor_out, "c_act1_w", "c_act1_b")          # one matmul, was A
        phi = lin(actor_out, "c_act2_w", "c_act2_b")
        g = lin(actor_out, "c_act3_w", "c_act3_b")

        def to_bda(t):                                          # [A*B, 16] -> [B, 16, A]
            return jnp.concatenate(
                [t[a * B:(a + 1) * B, :][:, :, None] for a in range(A)], axis=2)

        th, ph, gg = to_bda(theta), to_bda(phi), to_bda(g)

        # S[b,d,e] = sum_a theta[b,d,a] * phi[b,e,a]   (MXU batched contraction)
        S = jnp.einsum("bda,bea->bde", th, ph,
                       preferred_element_type=jnp.float32,
                       precision=HIGHEST) * inv_sqrt                         # [B,16,16]
        smax = jnp.max(S, axis=-1, keepdims=True)
        E = jnp.exp(S - smax)
        attn = E / jnp.sum(E, axis=-1, keepdims=True)
        # IA[b,d,a] = sum_e attn[b,d,e] * g[b,e,a]
        IA = jnp.einsum("bde,bea->bda", attn, gg,
                        preferred_element_type=jnp.float32,
                        precision=HIGHEST)                                   # [B,16,A]

        # per-agent LayerNorm + ReLU fused into a single row-wise pass
        ia_rows = jnp.concatenate([IA[:, :, a] for a in range(A)], axis=0)   # [A*B,16]
        ia_rows = relu(layernorm(ia_rows, "c_norm1_g", "c_norm1_b"))
        ia = [ia_rows[a * B:(a + 1) * B, :] for a in range(A)]

        other = attend(ia[0], ia[1:])                                        # [B,16]
        other = relu(layernorm(other, "c_norm2_g", "c_norm2_b"))

        mg = jnp.concatenate([actor_out[0:B, :], other], axis=1)             # [B,32]
        o1 = leaky(lin(mg, "c_merge1_w", "c_merge1_b"))
        o2 = leaky(lin(o1, "c_merge2_w", "c_merge2_b"))
        res = lin(o2, "c_merge3_w", "c_merge3_b")                            # [B,1]
        # lane-dense store: broadcast the result column across all 128 lanes
        out_ref[...] = jnp.broadcast_to(res, (B, 128))

    return kernel


# --------------------------------- wrapper ---------------------------------------
def critic_att1_pallas(packed_params, o_list, u_list, n_agents, index):
    """One concat in the wrapper, all slicing/reordering + compute inside the kernel."""
    x = jnp.concatenate(list(o_list) + list(u_list), axis=1).astype(jnp.float32)
    B = x.shape[0]                           # multiple of 8 keeps row slices tile-aligned
    length_obs = 2 + n_agents * 2 + (n_agents - 1) * 2
    kernel = make_critic_kernel(n_agents, B, length_obs, index)
    out = pl.pallas_call(
        kernel,
        out_shape=jax.ShapeDtypeStruct((B, 128), jnp.float32),
        in_specs=[pl.BlockSpec(memory_space=pltpu.MemorySpace.VMEM),
                  pl.BlockSpec(memory_space=pltpu.MemorySpace.VMEM)],
        out_specs=pl.BlockSpec(memory_space=pltpu.MemorySpace.VMEM),
    )(x, packed_params)
    # TODO(synk): for large batches add a batch grid (blocks of 512-2048 rows, marked
    # "parallel" for v7x's two TensorCores, with explicit vmem_limit_bytes).
    return out[:, :1]


# ----------------------------- deterministic params ------------------------------
def init_params(key):
    params = {}
    for name, shape in PARAM_SHAPES:
        if "norm" in name and name.endswith("_g"):
            params[name] = jnp.ones(shape, jnp.float32)
        elif "norm" in name and name.endswith("_b"):
            params[name] = jnp.zeros(shape, jnp.float32)
        elif name.endswith("_w"):
            key, sub = jax.random.split(key)
            bound = 1.0 / math.sqrt(shape[0])
            params[name] = jax.random.uniform(sub, shape, jnp.float32, -bound, bound)
        else:  # linear bias
            key, sub = jax.random.split(key)
            params[name] = jax.random.uniform(sub, shape, jnp.float32, -0.05, 0.05)
    return params


# ----------------------------- pure-JAX reference (mirrors torch code) -----------
def _layernorm_ref(v, g, bt):
    mu = jnp.mean(v, axis=-1, keepdims=True)
    var = jnp.mean((v - mu) ** 2, axis=-1, keepdims=True)
    return (v - mu) * jax.lax.rsqrt(var + 1e-5) * g + bt


def actor_reference(P, inp, n_good, n_food):
    relu = jax.nn.relu
    self_in = jnp.concatenate([inp[:, :2], inp[:, -2:]], axis=1)
    s = relu(self_in @ P["a_self1_w"] + P["a_self1_b"])
    s = relu(s @ P["a_self2_w"] + P["a_self2_b"])

    food = jnp.stack(jnp.split(inp[:, 2:2 + 2 * n_food], n_food, axis=1), axis=0)
    f2 = relu(relu(food @ P["a_food1_w"] + P["a_food1_b"]) @ P["a_food2_w"] + P["a_food2_b"])
    fo = jnp.transpose(f2, (1, 2, 0))
    at = jax.nn.softmax(jnp.matmul(s[:, None, :], fo) / math.sqrt(NUM_TEST), axis=2)
    fo = jnp.matmul(at, jnp.transpose(fo, (0, 2, 1)))[:, 0, :]
    fo = relu(_layernorm_ref(fo, P["a_fnorm_g"], P["a_fnorm_b"]))

    oth = inp[:, 2 + 2 * n_food:2 + 2 * n_food + 2 * (n_good - 1)]
    oth = jnp.stack(jnp.split(oth, n_good - 1, axis=1), axis=0)
    o2 = relu(relu(oth @ P["a_other1_w"] + P["a_other1_b"]) @ P["a_other2_w"] + P["a_other2_b"])
    oo = jnp.transpose(o2, (1, 2, 0))
    at = jax.nn.softmax(jnp.matmul(s[:, None, :], oo) / math.sqrt(NUM_TEST), axis=2)
    oo = jnp.matmul(at, jnp.transpose(oo, (0, 2, 1)))[:, 0, :]
    oo = relu(_layernorm_ref(oo, P["a_onorm_g"], P["a_onorm_b"]))

    mg = jnp.concatenate([s, fo, oo], axis=1)
    m = relu(mg @ P["a_merge1_w"] + P["a_merge1_b"])
    m = relu(m @ P["a_merge2_w"] + P["a_merge2_b"])
    return m @ P["a_mout_w"] + P["a_mout_b"]


def critic_reference(P, o_list, u_list, n_agents, index):
    relu, leaky = jax.nn.relu, lambda v: jnp.where(v > 0, v, 0.01 * v)
    n_good = n_food = n_agents
    inp = jnp.concatenate(list(o_list) + list(u_list), axis=1)
    length_obs = 2 + n_food * 2 + (n_good - 1) * 2
    input_action = inp[:, -2 * n_good:]
    self_action = input_action[:, index * 2:(index + 1) * 2]
    self_start = index * length_obs
    self_in = jnp.concatenate([inp[:, self_start:self_start + length_obs], self_action], axis=1)
    self_out = actor_reference(P, self_in, n_good, n_food)

    others = []
    for i in range(n_good):
        if i == index:
            continue
        ob = inp[:, i * length_obs:(i + 1) * length_obs]
        others.append(jnp.concatenate([ob, input_action[:, i * 2:(i + 1) * 2]], axis=1))
    oo = actor_reference(P, jnp.concatenate(others, axis=0), n_good, n_food)
    oo = oo.reshape(n_good - 1, -1, NUM_TEST)

    stack = jnp.concatenate([self_out[None], oo], axis=0)  # [A, B, 16]
    theta = jnp.transpose(stack @ P["c_act1_w"] + P["c_act1_b"], (1, 2, 0))
    phi = jnp.transpose(stack @ P["c_act2_w"] + P["c_act2_b"], (1, 2, 0))
    g = jnp.transpose(stack @ P["c_act3_w"] + P["c_act3_b"], (1, 2, 0))
    sa = jax.nn.softmax(jnp.matmul(theta, jnp.transpose(phi, (0, 2, 1))) / math.sqrt(NUM_TEST), axis=2)
    ia = jnp.matmul(sa, g)
    ia = jnp.stack([_layernorm_ref(ia[:, :, i], P["c_norm1_g"], P["c_norm1_b"])
                    for i in range(n_good)], axis=2)
    ia = relu(ia)
    self_new, good_new = ia[:, :, 0], ia[:, :, 1:n_good]
    at = jax.nn.softmax(jnp.matmul(self_new[:, None, :], good_new) / math.sqrt(NUM_TEST), axis=2)
    other = jnp.matmul(at, jnp.transpose(good_new, (0, 2, 1)))[:, 0, :]
    other = relu(_layernorm_ref(other, P["c_norm2_g"], P["c_norm2_b"]))
    mg = jnp.concatenate([self_out, other], axis=1)
    o = leaky(mg @ P["c_merge1_w"] + P["c_merge1_b"])
    o = leaky(o @ P["c_merge2_w"] + P["c_merge2_b"])
    return o @ P["c_merge3_w"] + P["c_merge3_b"]


if __name__ == "__main__":
    n_agents = 3      # args.n_agents
    index = 1         # critic index
    B = 8             # batch (multiple of 8 keeps per-agent row slices tile-aligned)
    length_obs = 2 + n_agents * 2 + (n_agents - 1) * 2  # 12

    key = jax.random.PRNGKey(0)
    key, pkey = jax.random.split(key)
    params = init_params(pkey)
    packed = pack_params(params)              # packed once, reused every call

    keys = jax.random.split(key, 2 * n_agents)
    o = [jax.random.normal(keys[i], (B, length_obs), jnp.float32) for i in range(n_agents)]
    u = [jax.random.normal(keys[n_agents + i], (B, 2), jnp.float32) for i in range(n_agents)]

    fwd = jax.jit(critic_att1_pallas, static_argnums=(3, 4))
    out = jax.block_until_ready(fwd(packed, o, u, n_agents, index))
    assert out.shape == (B, 1), out.shape

    ref = critic_reference(params, o, u, n_agents, index)
    max_err = float(jnp.max(jnp.abs(out - ref)))
    if max_err > 5e-2:
        raise AssertionError(f"Pallas kernel mismatch vs reference: {max_err}")

    print("KERNEL_OK")
</pallas_src>

<mosaic_0001>
module attributes {stable_mosaic.version = 11 : i64} {
  func.func @kernel(%arg0: memref<8x42xf32, #tpu.memory_space<vmem>>, %arg1: memref<560x32xf32, #tpu.memory_space<vmem>>, %arg2: memref<8x128xf32, #tpu.memory_space<vmem>>) attributes {dimension_semantics = [], scalar_prefetch = 0 : i64, scratch_operands = 0 : i64, tpu.core_type = #tpu.core_type<tc>} {
    %c0 = arith.constant 0 : index
    %c0_0 = arith.constant 0 : index
    %0 = vector.load %arg0[%c0, %c0_0] : memref<8x42xf32, #tpu.memory_space<vmem>>, vector<8x42xf32>
    %1 = vector.extract_strided_slice %0 {offsets = [0, 12], sizes = [8, 12], strides = [1, 1]} : vector<8x42xf32> to vector<8x12xf32>
    %2 = vector.extract_strided_slice %0 {offsets = [0, 38], sizes = [8, 2], strides = [1, 1]} : vector<8x42xf32> to vector<8x2xf32>
    %3 = tpu.concatenate %1, %2 in 1 : vector<8x12xf32>, vector<8x2xf32> -> vector<8x14xf32>
    %4 = vector.extract_strided_slice %0 {offsets = [0, 0], sizes = [8, 12], strides = [1, 1]} : vector<8x42xf32> to vector<8x12xf32>
    %5 = vector.extract_strided_slice %0 {offsets = [0, 36], sizes = [8, 2], strides = [1, 1]} : vector<8x42xf32> to vector<8x2xf32>
    %6 = tpu.concatenate %4, %5 in 1 : vector<8x12xf32>, vector<8x2xf32> -> vector<8x14xf32>
    %7 = vector.extract_strided_slice %0 {offsets = [0, 24], sizes = [8, 12], strides = [1, 1]} : vector<8x42xf32> to vector<8x12xf32>
    %8 = vector.extract_strided_slice %0 {offsets = [0, 40], sizes = [8, 2], strides = [1, 1]} : vector<8x42xf32> to vector<8x2xf32>
    %9 = tpu.concatenate %7, %8 in 1 : vector<8x12xf32>, vector<8x2xf32> -> vector<8x14xf32>
    %10 = tpu.concatenate %3, %6, %9 in 0 : vector<8x14xf32>, vector<8x14xf32>, vector<8x14xf32> -> vector<24x14xf32>
    %c0_1 = arith.constant 0 : index
    %c0_2 = arith.constant 0 : index
    %11 = vector.load %arg1[%c0_1, %c0_2] : memref<560x32xf32, #tpu.memory_space<vmem>>, vector<4x32xf32>
    %12 = vector.extract_strided_slice %10 {offsets = [0, 0], sizes = [24, 1], strides = [1, 1]} : vector<24x14xf32> to vector<24x1xf32>
    %13 = vector.extract_strided_slice %11 {offsets = [0, 0], sizes = [1, 32], strides = [1, 1]} : vector<4x32xf32> to vector<1x32xf32>
    %14 = vector.broadcast %12 : vector<24x1xf32> to vector<24x32xf32>
    %15 = vector.broadcast %13 : vector<1x32xf32> to vector<24x32xf32>
    %16 = arith.mulf %14, %15 : vector<24x32xf32>
    %17 = vector.extract_strided_slice %10 {offsets = [0, 1], sizes = [24, 1], strides = [1, 1]} : vector<24x14xf32> to vector<24x1xf32>
    %18 = vector.extract_strided_slice %11 {offsets = [1, 0], sizes = [1, 32], strides = [1, 1]} : vector<4x32xf32> to vector<1x32xf32>
    %19 = vector.broadcast %17 : vector<24x1xf32> to vector<24x32xf32>
    %20 = vector.broadcast %18 : vector<1x32xf32> to vector<24x32xf32>
    %21 = arith.mulf %19, %20 : vector<24x32xf32>
    %22 = arith.addf %16, %21 : vector<24x32xf32>
    %23 = vector.extract_strided_slice %10 {offsets = [0, 12], sizes = [24, 1], strides = [1, 1]} : vector<24x14xf32> to vector<24x1xf32>
    %24 = vector.extract_strided_slice %11 {offsets = [2, 0], sizes = [1, 32], strides = [1, 1]} : vector<4x32xf32> to vector<1x32xf32>
    %25 = vector.broadcast %23 : vector<24x1xf32> to vector<24x32xf32>
    %26 = vector.broadcast %24 : vector<1x32xf32> to vector<24x32xf32>
    %27 = arith.mulf %25, %26 : vector<24x32xf32>
    %28 = arith.addf %22, %27 : vector<24x32xf32>
    %29 = vector.extract_strided_slice %10 {offsets = [0, 13], sizes = [24, 1], strides = [1, 1]} : vector<24x14xf32> to vector<24x1xf32>
    %30 = vector.extract_strided_slice %11 {offsets = [3, 0], sizes = [1, 32], strides = [1, 1]} : vector<4x32xf32> to vector<1x32xf32>
    %31 = vector.broadcast %29 : vector<24x1xf32> to vector<24x32xf32>
    %32 = vector.broadcast %30 : vector<1x32xf32> to vector<24x32xf32>
    %33 = arith.mulf %31, %32 : vector<24x32xf32>
    %34 = arith.addf %28, %33 : vector<24x32xf32>
    %c8 = arith.constant 8 : index
    %c0_3 = arith.constant 0 : index
    %35 = vector.load %arg1[%c8, %c0_3] : memref<560x32xf32, #tpu.memory_space<vmem>>, vector<1x32xf32>
    %36 = vector.broadcast %35 : vector<1x32xf32> to vector<24x32xf32>
    %37 = arith.addf %34, %36 : vector<24x32xf32>
    %cst = arith.constant 0.000000e+00 : f32
    %38 = vector.broadcast %cst : f32 to vector<24x32xf32>
    %39 = arith.maximumf %37, %38 : vector<24x32xf32>
    %c16 = arith.constant 16 : index
    %c0_4 = arith.constant 0 : index
    %40 = vector.load %arg1[%c16, %c0_4] : memref<560x32xf32, #tpu.memory_space<vmem>>, vector<32x16xf32>
    %cst_5 = arith.constant dense<0.000000e+00> : vector<24x16xf32>
    %41 = tpu.matmul %39, %40, %cst_5 {dimension_numbers = #tpu.dot_dimension_numbers<[1], [0], [0], [1], [0, 0, 1, 1], [], []>, precision = #tpu.contract_precision<fp32>} : vector<24x32xf32>, vector<32x16xf32>, vector<24x16xf32> -> vector<24x16xf32>
    %c48 = arith.constant 48 : index
    %c0_6 = arith.constant 0 : index
    %42 = vector.load %arg1[%c48, %c0_6] : memref<560x32xf32, #tpu.memory_space<vmem>>, vector<1x16xf32>
    %43 = vector.broadcast %42 : vector<1x16xf32> to vector<24x16xf32>
    %44 = arith.addf %41, %43 : vector<24x16xf32>
    %cst_7 = arith.constant 0.000000e+00 : f32
    %45 = vector.broadcast %cst_7 : f32 to vector<24x16xf32>
    %46 = arith.maximumf %44, %45 : vector<24x16xf32>
    %c56 = arith.constant 56 : index
    %c0_8 = arith.constant 0 : index
    %47 = vector.load %arg1[%c56, %c0_8] : memref<560x32xf32, #tpu.memory_space<vmem>>, vector<2x32xf32>
    %48 = vector.extract_strided_slice %47 {offsets = [0, 0], sizes = [1, 32], strides = [1, 1]} : vector<2x32xf32> to vector<1x32xf32>
    %49 = vector.extract_strided_slice %47 {offsets = [1, 0], sizes = [1, 32], strides = [1, 1]} : vector<2x32xf32> to vector<1x32xf32>
    %c64 = arith.constant 64 : index
    %c0_9 = arith.constant 0 : index
    %50 = vector.load %arg1[%c64, %c0_9] : memref<560x32xf32, #tpu.memory_space<vmem>>, vector<1x32xf32>
    %51 = vector.extract_strided_slice %10 {offsets = [0, 2], sizes = [24, 1], strides = [1, 1]} : vector<24x14xf32> to vector<24x1xf32>
    %52 = vector.broadcast %51 : vector<24x1xf32> to vector<24x32xf32>
    %53 = vector.broadcast %48 : vector<1x32xf32> to vector<24x32xf32>
    %54 = arith.mulf %52, %53 : vector<24x32xf32>
    %55 = vector.extract_strided_slice %10 {offsets = [0, 3], sizes = [24, 1], strides = [1, 1]} : vector<24x14xf32> to vector<24x1xf32>
    %56 = vector.broadcast %55 : vector<24x1xf32> to vector<24x32xf32>
    %57 = vector.broadcast %49 : vector<1x32xf32> to vector<24x32xf32>
    %58 = arith.mulf %56, %57 : vector<24x32xf32>
    %59 = arith.addf %54, %58 : vector<24x32xf32>
    %60 = vector.broadcast %50 : vector<1x32xf32> to vector<24x32xf32>
    %61 = arith.addf %59, %60 : vector<24x32xf32>
    %cst_10 = arith.constant 0.000000e+00 : f32
    %62 = vector.broadcast %cst_10 : f32 to vector<24x32xf32>
    %63 = arith.maximumf %61, %62 : vector<24x32xf32>
    %64 = vector.extract_strided_slice %10 {offsets = [0, 4], sizes = [24, 1], strides = [1, 1]} : vector<24x14xf32> to vector<24x1xf32>
    %65 = vector.broadcast %64 : vector<24x1xf32> to vector<24x32xf32>
    %66 = vector.broadcast %48 : vector<1x32xf32> to vector<24x32xf32>
    %67 = arith.mulf %65, %66 : vector<24x32xf32>
    %68 = vector.extract_strided_slice %10 {offsets = [0, 5], sizes = [24, 1], strides = [1, 1]} : vector<24x14xf32> to vector<24x1xf32>
    %69 = vector.broadcast %68 : vector<24x1xf32> to vector<24x32xf32>
    %70 = vector.broadcast %49 : vector<1x32xf32> to vector<24x32xf32>
    %71 = arith.mulf %69, %70 : vector<24x32xf32>
    %72 = arith.addf %67, %71 : vector<24x32xf32>
    %73 = vector.broadcast %50 : vector<1x32xf32> to vector<24x32xf32>
    %74 = arith.addf %72, %73 : vector<24x32xf32>
    %cst_11 = arith.constant 0.000000e+00 : f32
    %75 = vector.broadcast %cst_11 : f32 to vector<24x32xf32>
    %76 = arith.maximumf %74, %75 : vector<24x32xf32>
    %77 = vector.extract_strided_slice %10 {offsets = [0, 6], sizes = [24, 1], strides = [1, 1]} : vector<24x14xf32> to vector<24x1xf32>
    %78 = vector.broadcast %77 : vector<24x1xf32> to vector<24x32xf32>
    %79 = vector.broadcast %48 : vector<1x32xf32> to vector<24x32xf32>
    %80 = arith.mulf %78, %79 : vector<24x32xf32>
    %81 = vector.extract_strided_slice %10 {offsets = [0, 7], sizes = [24, 1], strides = [1, 1]} : vector<24x14xf32> to vector<24x1xf32>
    %82 = vector.broadcast %81 : vector<24x1xf32> to vector<24x32xf32>
    %83 = vector.broadcast %49 : vector<1x32xf32> to vector<24x32xf32>
    %84 = arith.mulf %82, %83 : vector<24x32xf32>
    %85 = arith.addf %80, %84 : vector<24x32xf32>
    %86 = vector.broadcast %50 : vector<1x32xf32> to vector<24x32xf32>
    %87 = arith.addf %85, %86 : vector<24x32xf32>
    %cst_12 = arith.constant 0.000000e+00 : f32
    %88 = vector.broadcast %cst_12 : f32 to vector<24x32xf32>
    %89 = arith.maximumf %87, %88 : vector<24x32xf32>
    %90 = tpu.concatenate %63, %76, %89 in 0 : vector<24x32xf32>, vector<24x32xf32>, vector<24x32xf32> -> vector<72x32xf32>
    %c72 = arith.constant 72 : index
    %c0_13 = arith.constant 0 : index
    %91 = vector.load %arg1[%c72, %c0_13] : memref<560x32xf32, #tpu.memory_space<vmem>>, vector<32x16xf32>
    %cst_14 = arith.constant dense<0.000000e+00> : vector<72x16xf32>
    %92 = tpu.matmul %90, %91, %cst_14 {dimension_numbers = #tpu.dot_dimension_numbers<[1], [0], [0], [1], [0, 0, 1, 1], [], []>, precision = #tpu.contract_precision<fp32>} : vector<72x32xf32>, vector<32x16xf32>, vector<72x16xf32> -> vector<72x16xf32>
    %c104 = arith.constant 104 : index
    %c0_15 = arith.constant 0 : index
    %93 = vector.load %arg1[%c104, %c0_15] : memref<560x32xf32, #tpu.memory_space<vmem>>, vector<1x16xf32>
    %94 = vector.broadcast %93 : vector<1x16xf32> to vector<72x16xf32>
    %95 = arith.addf %92, %94 : vector<72x16xf32>
    %cst_16 = arith.constant 0.000000e+00 : f32
    %96 = vector.broadcast %cst_16 : f32 to vector<72x16xf32>
    %97 = arith.maximumf %95, %96 : vector<72x16xf32>
    %98 = vector.extract_strided_slice %97 {offsets = [0, 0], sizes = [24, 16], strides = [1, 1]} : vector<72x16xf32> to vector<24x16xf32>
    %99 = vector.extract_strided_slice %97 {offsets = [24, 0], sizes = [24, 16], strides = [1, 1]} : vector<72x16xf32> to vector<24x16xf32>
    %100 = vector.extract_strided_slice %97 {offsets = [48, 0], sizes = [24, 16], strides = [1, 1]} : vector<72x16xf32> to vector<24x16xf32>
    %101 = arith.mulf %46, %98 : vector<24x16xf32>
    %cst_17 = arith.constant dense<0.000000e+00> : vector<24xf32>
    %102 = vector.multi_reduction <add>, %101, %cst_17 [1] : vector<24x16xf32> to vector<24xf32>
    %103 = vector.shape_cast %102 : vector<24xf32> to vector<24x1xf32>
    %cst_18 = arith.constant 2.500000e-01 : f32
    %104 = vector.broadcast %cst_18 : f32 to vector<24x1xf32>
    %105 = arith.mulf %103, %104 : vector<24x1xf32>
    %106 = arith.mulf %46, %99 : vector<24x16xf32>
    %cst_19 = arith.constant dense<0.000000e+00> : vector<24xf32>
    %107 = vector.multi_reduction <add>, %106, %cst_19 [1] : vector<24x16xf32> to vector<24xf32>
    %108 = vector.shape_cast %107 : vector<24xf32> to vector<24x1xf32>
    %cst_20 = arith.constant 2.500000e-01 : f32
    %109 = vector.broadcast %cst_20 : f32 to vector<24x1xf32>
    %110 = arith.mulf %108, %109 : vector<24x1xf32>
    %111 = arith.mulf %46, %100 : vector<24x16xf32>
    %cst_21 = arith.constant dense<0.000000e+00> : vector<24xf32>
    %112 = vector.multi_reduction <add>, %111, %cst_21 [1] : vector<24x16xf32> to vector<24xf32>
    %113 = vector.shape_cast %112 : vector<24xf32> to vector<24x1xf32>
    %cst_22 = arith.constant 2.500000e-01 : f32
    %114 = vector.broadcast %cst_22 : f32 to vector<24x1xf32>
    %115 = arith.mulf %113, %114 : vector<24x1xf32>
    %116 = arith.maximumf %105, %110 : vector<24x1xf32>
    %117 = arith.maximumf %116, %115 : vector<24x1xf32>
    %118 = arith.subf %105, %117 : vector<24x1xf32>
    %119 = math.exp %118 : vector<24x1xf32>
    %120 = arith.subf %110, %117 : vector<24x1xf32>
    %121 = math.exp %120 : vector<24x1xf32>
    %122 = arith.subf %115, %117 : vector<24x1xf32>
    %123 = math.exp %122 : vector<24x1xf32>
    %124 = vector.broadcast %119 : vector<24x1xf32> to vector<24x16xf32>
    %125 = arith.mulf %124, %98 : vector<24x16xf32>
    %126 = vector.broadcast %121 : vector<24x1xf32> to vector<24x16xf32>
    %127 = arith.mulf %126, %99 : vector<24x16xf32>
    %128 = arith.addf %125, %127 : vector<24x16xf32>
    %129 = arith.addf %119, %121 : vector<24x1xf32>
    %130 = vector.broadcast %123 : vector<24x1xf32> to vector<24x16xf32>
    %131 = arith.mulf %130, %100 : vector<24x16xf32>
    %132 = arith.addf %128, %131 : vector<24x16xf32>
    %133 = arith.addf %129, %123 : vector<24x1xf32>
    %134 = vector.broadcast %133 : vector<24x1xf32> to vector<24x16xf32>
    %135 = arith.divf %132, %134 : vector<24x16xf32>
    %cst_23 = arith.constant dense<0.000000e+00> : vector<24xf32>
    %136 = vector.multi_reduction <add>, %135, %cst_23 [1] : vector<24x16xf32> to vector<24xf32>
    %137 = vector.shape_cast %136 : vector<24xf32> to vector<24x1xf32>
    %cst_24 = arith.constant 1.600000e+01 : f32
    %138 = vector.broadcast %cst_24 : f32 to vector<24x1xf32>
    %139 = arith.divf %137, %138 : vector<24x1xf32>
    %140 = vector.broadcast %139 : vector<24x1xf32> to vector<24x16xf32>
    %141 = arith.subf %135, %140 : vector<24x16xf32>
    %142 = arith.mulf %141, %141 : vector<24x16xf32>
    %cst_25 = arith.constant dense<0.000000e+00> : vector<24xf32>
    %143 = vector.multi_reduction <add>, %142, %cst_25 [1] : vector<24x16xf32> to vector<24xf32>
    %144 = vector.shape_cast %143 : vector<24xf32> to vector<24x1xf32>
    %cst_26 = arith.constant 1.600000e+01 : f32
    %145 = vector.broadcast %cst_26 : f32 to vector<24x1xf32>
    %146 = arith.divf %144, %145 : vector<24x1xf32>
    %147 = vector.broadcast %139 : vector<24x1xf32> to vector<24x16xf32>
    %148 = arith.subf %135, %147 : vector<24x16xf32>
    %cst_27 = arith.constant 9.99999974E-6 : f32
    %149 = vector.broadcast %cst_27 : f32 to vector<24x1xf32>
    %150 = arith.addf %146, %149 : vector<24x1xf32>
    %151 = math.rsqrt %150 : vector<24x1xf32>
    %152 = vector.broadcast %151 : vector<24x1xf32> to vector<24x16xf32>
    %153 = arith.mulf %148, %152 : vector<24x16xf32>
    %c112 = arith.constant 112 : index
    %c0_28 = arith.constant 0 : index
    %154 = vector.load %arg1[%c112, %c0_28] : memref<560x32xf32, #tpu.memory_space<vmem>>, vector<1x16xf32>
    %155 = vector.broadcast %154 : vector<1x16xf32> to vector<24x16xf32>
    %156 = arith.mulf %153, %155 : vector<24x16xf32>
    %c120 = arith.constant 120 : index
    %c0_29 = arith.constant 0 : index
    %157 = vector.load %arg1[%c120, %c0_29] : memref<560x32xf32, #tpu.memory_space<vmem>>, vector<1x16xf32>
    %158 = vector.broadcast %157 : vector<1x16xf32> to vector<24x16xf32>
    %159 = arith.addf %156, %158 : vector<24x16xf32>
    %cst_30 = arith.constant 0.000000e+00 : f32
    %160 = vector.broadcast %cst_30 : f32 to vector<24x16xf32>
    %161 = arith.maximumf %159, %160 : vector<24x16xf32>
    %c128 = arith.constant 128 : index
    %c0_31 = arith.constant 0 : index
    %162 = vector.load %arg1[%c128, %c0_31] : memref<560x32xf32, #tpu.memory_space<vmem>>, vector<2x32xf32>
    %163 = vector.extract_strided_slice %162 {offsets = [0, 0], sizes = [1, 32], strides = [1, 1]} : vector<2x32xf32> to vector<1x32xf32>
    %164 = vector.extract_strided_slice %162 {offsets = [1, 0], sizes = [1, 32], strides = [1, 1]} : vector<2x32xf32> to vector<1x32xf32>
    %c136 = arith.constant 136 : index
    %c0_32 = arith.constant 0 : index
    %165 = vector.load %arg1[%c136, %c0_32] : memref<560x32xf32, #tpu.memory_space<vmem>>, vector<1x32xf32>
    %166 = vector.extract_strided_slice %10 {offsets = [0, 8], sizes = [24, 1], strides = [1, 1]} : vector<24x14xf32> to vector<24x1xf32>
    %167 = vector.broadcast %166 : vector<24x1xf32> to vector<24x32xf32>
    %168 = vector.broadcast %163 : vector<1x32xf32> to vector<24x32xf32>
    %169 = arith.mulf %167, %168 : vector<24x32xf32>
    %170 = vector.extract_strided_slice %10 {offsets = [0, 9], sizes = [24, 1], strides = [1, 1]} : vector<24x14xf32> to vector<24x1xf32>
    %171 = vector.broadcast %170 : vector<24x1xf32> to vector<24x32xf32>
    %172 = vector.broadcast %164 : vector<1x32xf32> to vector<24x32xf32>
    %173 = arith.mulf %171, %172 : vector<24x32xf32>
    %174 = arith.addf %169, %173 : vector<24x32xf32>
    %175 = vector.broadcast %165 : vector<1x32xf32> to vector<24x32xf32>
    %176 = arith.addf %174, %175 : vector<24x32xf32>
    %cst_33 = arith.constant 0.000000e+00 : f32
    %177 = vector.broadcast %cst_33 : f32 to vector<24x32xf32>
    %178 = arith.maximumf %176, %177 : vector<24x32xf32>
    %179 = vector.extract_strided_slice %10 {offsets = [0, 10], sizes = [24, 1], strides = [1, 1]} : vector<24x14xf32> to vector<24x1xf32>
    %180 = vector.broadcast %179 : vector<24x1xf32> to vector<24x32xf32>
    %181 = vector.broadcast %163 : vector<1x32xf32> to vector<24x32xf32>
    %182 = arith.mulf %180, %181 : vector<24x32xf32>
    %183 = vector.extract_strided_slice %10 {offsets = [0, 11], sizes = [24, 1], strides = [1, 1]} : vector<24x14xf32> to vector<24x1xf32>
    %184 = vector.broadcast %183 : vector<24x1xf32> to vector<24x32xf32>
    %185 = vector.broadcast %164 : vector<1x32xf32> to vector<24x32xf32>
    %186 = arith.mulf %184, %185 : vector<24x32xf32>
    %187 = arith.addf %182, %186 : vector<24x32xf32>
    %188 = vector.broadcast %165 : vector<1x32xf32> to vector<24x32xf32>
    %189 = arith.addf %187, %188 : vector<24x32xf32>
    %cst_34 = arith.constant 0.000000e+00 : f32
    %190 = vector.broadcast %cst_34 : f32 to vector<24x32xf32>
    %191 = arith.maximumf %189, %190 : vector<24x32xf32>
    %192 = tpu.concatenate %178, %191 in 0 : vector<24x32xf32>, vector<24x32xf32> -> vector<48x32xf32>
    %c144 = arith.constant 144 : index
    %c0_35 = arith.constant 0 : index
    %193 = vector.load %arg1[%c144, %c0_35] : memref<560x32xf32, #tpu.memory_space<vmem>>, vector<32x16xf32>
    %cst_36 = arith.constant dense<0.000000e+00> : vector<48x16xf32>
    %194 = tpu.matmul %192, %193, %cst_36 {dimension_numbers = #tpu.dot_dimension_numbers<[1], [0], [0], [1], [0, 0, 1, 1], [], []>, precision = #tpu.contract_precision<fp32>} : vector<48x32xf32>, vector<32x16xf32>, vector<48x16xf32> -> vector<48x16xf32>
    %c176 = arith.constant 176 : index
    %c0_37 = arith.constant 0 : index
    %195 = vector.load %arg1[%c176, %c0_37] : memref<560x32xf32, #tpu.memory_space<vmem>>, vector<1x16xf32>
    %196 = vector.broadcast %195 : vector<1x16xf32> to vector<48x16xf32>
    %197 = arith.addf %194, %196 : vector<48x16xf32>
    %cst_38 = arith.constant 0.000000e+00 : f32
    %198 = vector.broadcast %cst_38 : f32 to vector<48x16xf32>
    %199 = arith.maximumf %197, %198 : vector<48x16xf32>
    %200 = vector.extract_strided_slice %199 {offsets = [0, 0], sizes = [24, 16], strides = [1, 1]} : vector<48x16xf32> to vector<24x16xf32>
    %201 = vector.extract_strided_slice %199 {offsets = [24, 0], sizes = [24, 16], strides = [1, 1]} : vector<48x16xf32> to vector<24x16xf32>
    %202 = arith.mulf %46, %200 : vector<24x16xf32>
    %cst_39 = arith.constant dense<0.000000e+00> : vector<24xf32>
    %203 = vector.multi_reduction <add>, %202, %cst_39 [1] : vector<24x16xf32> to vector<24xf32>
    %204 = vector.shape_cast %203 : vector<24xf32> to vector<24x1xf32>
    %cst_40 = arith.constant 2.500000e-01 : f32
    %205 = vector.broadcast %cst_40 : f32 to vector<24x1xf32>
    %206 = arith.mulf %204, %205 : vector<24x1xf32>
    %207 = arith.mulf %46, %201 : vector<24x16xf32>
    %cst_41 = arith.constant dense<0.000000e+00> : vector<24xf32>
    %208 = vector.multi_reduction <add>, %207, %cst_41 [1] : vector<24x16xf32> to vector<24xf32>
    %209 = vector.shape_cast %208 : vector<24xf32> to vector<24x1xf32>
    %cst_42 = arith.constant 2.500000e-01 : f32
    %210 = vector.broadcast %cst_42 : f32 to vector<24x1xf32>
    %211 = arith.mulf %209, %210 : vector<24x1xf32>
    %212 = arith.maximumf %206, %211 : vector<24x1xf32>
    %213 = arith.subf %206, %212 : vector<24x1xf32>
    %214 = math.exp %213 : vector<24x1xf32>
    %215 = arith.subf %211, %212 : vector<24x1xf32>
    %216 = math.exp %215 : vector<24x1xf32>
    %217 = vector.broadcast %214 : vector<24x1xf32> to vector<24x16xf32>
    %218 = arith.mulf %217, %200 : vector<24x16xf32>
    %219 = vector.broadcast %216 : vector<24x1xf32> to vector<24x16xf32>
    %220 = arith.mulf %219, %201 : vector<24x16xf32>
    %221 = arith.addf %218, %220 : vector<24x16xf32>
    %222 = arith.addf %214, %216 : vector<24x1xf32>
    %223 = vector.broadcast %222 : vector<24x1xf32> to vector<24x16xf32>
    %224 = arith.divf %221, %223 : vector<24x16xf32>
    %cst_43 = arith.constant dense<0.000000e+00> : vector<24xf32>
    %225 = vector.multi_reduction <add>, %224, %cst_43 [1] : vector<24x16xf32> to vector<24xf32>
    %226 = vector.shape_cast %225 : vector<24xf32> to vector<24x1xf32>
    %cst_44 = arith.constant 1.600000e+01 : f32
    %227 = vector.broadcast %cst_44 : f32 to vector<24x1xf32>
    %228 = arith.divf %226, %227 : vector<24x1xf32>
    %229 = vector.broadcast %228 : vector<24x1xf32> to vector<24x16xf32>
    %230 = arith.subf %224, %229 : vector<24x16xf32>
    %231 = arith.mulf %230, %230 : vector<24x16xf32>
    %cst_45 = arith.constant dense<0.000000e+00> : vector<24xf32>
    %232 = vector.multi_reduction <add>, %231, %cst_45 [1] : vector<24x16xf32> to vector<24xf32>
    %233 = vector.shape_cast %232 : vector<24xf32> to vector<24x1xf32>
    %cst_46 = arith.constant 1.600000e+01 : f32
    %234 = vector.broadcast %cst_46 : f32 to vector<24x1xf32>
    %235 = arith.divf %233, %234 : vector<24x1xf32>
    %236 = vector.broadcast %228 : vector<24x1xf32> to vector<24x16xf32>
    %237 = arith.subf %224, %236 : vector<24x16xf32>
    %cst_47 = arith.constant 9.99999974E-6 : f32
    %238 = vector.broadcast %cst_47 : f32 to vector<24x1xf32>
    %239 = arith.addf %235, %238 : vector<24x1xf32>
    %240 = math.rsqrt %239 : vector<24x1xf32>
    %241 = vector.broadcast %240 : vector<24x1xf32> to vector<24x16xf32>
    %242 = arith.mulf %237, %241 : vector<24x16xf32>
    %c184 = arith.constant 184 : index
    %c0_48 = arith.constant 0 : index
    %243 = vector.load %arg1[%c184, %c0_48] : memref<560x32xf32, #tpu.memory_space<vmem>>, vector<1x16xf32>
    %244 = vector.broadcast %243 : vector<1x16xf32> to vector<24x16xf32>
    %245 = arith.mulf %242, %244 : vector<24x16xf32>
    %c192 = arith.constant 192 : index
    %c0_49 = arith.constant 0 : index
    %246 = vector.load %arg1[%c192, %c0_49] : memref<560x32xf32, #tpu.memory_space<vmem>>, vector<1x16xf32>
    %247 = vector.broadcast %246 : vector<1x16xf32> to vector<24x16xf32>
    %248 = arith.addf %245, %247 : vector<24x16xf32>
    %cst_50 = arith.constant 0.000000e+00 : f32
    %249 = vector.broadcast %cst_50 : f32 to vector<24x16xf32>
    %250 = arith.maximumf %248, %249 : vector<24x16xf32>
    %251 = tpu.concatenate %46, %161, %250 in 1 : vector<24x16xf32>, vector<24x16xf32>, vector<24x16xf32> -> vector<24x48xf32>
    %c200 = arith.constant 200 : index
    %c0_51 = arith.constant 0 : index
    %252 = vector.load %arg1[%c200, %c0_51] : memref<560x32xf32, #tpu.memory_space<vmem>>, vector<48x32xf32>
    %cst_52 = arith.constant dense<0.000000e+00> : vector<24x32xf32>
    %253 = tpu.matmul %251, %252, %cst_52 {dimension_numbers = #tpu.dot_dimension_numbers<[1], [0], [0], [1], [0, 0, 1, 1], [], []>, precision = #tpu.contract_precision<fp32>} : vector<24x48xf32>, vector<48x32xf32>, vector<24x32xf32> -> vector<24x32xf32>
    %c248 = arith.constant 248 : index
    %c0_53 = arith.constant 0 : index
    %254 = vector.load %arg1[%c248, %c0_53] : memref<560x32xf32, #tpu.memory_space<vmem>>, vector<1x32xf32>
    %255 = vector.broadcast %254 : vector<1x32xf32> to vector<24x32xf32>
    %256 = arith.addf %253, %255 : vector<24x32xf32>
    %cst_54 = arith.constant 0.000000e+00 : f32
    %257 = vector.broadcast %cst_54 : f32 to vector<24x32xf32>
    %258 = arith.maximumf %256, %257 : vector<24x32xf32>
    %c256 = arith.constant 256 : index
    %c0_55 = arith.constant 0 : index
    %259 = vector.load %arg1[%c256, %c0_55] : memref<560x32xf32, #tpu.memory_space<vmem>>, vector<32x32xf32>
    %cst_56 = arith.constant dense<0.000000e+00> : vector<24x32xf32>
    %260 = tpu.matmul %258, %259, %cst_56 {dimension_numbers = #tpu.dot_dimension_numbers<[1], [0], [0], [1], [0, 0, 1, 1], [], []>, precision = #tpu.contract_precision<fp32>} : vector<24x32xf32>, vector<32x32xf32>, vector<24x32xf32> -> vector<24x32xf32>
    %c288 = arith.constant 288 : index
    %c0_57 = arith.constant 0 : index
    %261 = vector.load %arg1[%c288, %c0_57] : memref<560x32xf32, #tpu.memory_space<vmem>>, vector<1x32xf32>
    %262 = vector.broadcast %261 : vector<1x32xf32> to vector<24x32xf32>
    %263 = arith.addf %260, %262 : vector<24x32xf32>
    %cst_58 = arith.constant 0.000000e+00 : f32
    %264 = vector.broadcast %cst_58 : f32 to vector<24x32xf32>
    %265 = arith.maximumf %263, %264 : vector<24x32xf32>
    %c296 = arith.constant 296 : index
    %c0_59 = arith.constant 0 : index
    %266 = vector.load %arg1[%c296, %c0_59] : memref<560x32xf32, #tpu.memory_space<vmem>>, vector<32x16xf32>
    %cst_60 = arith.constant dense<0.000000e+00> : vector<24x16xf32>
    %267 = tpu.matmul %265, %266, %cst_60 {dimension_numbers = #tpu.dot_dimension_numbers<[1], [0], [0], [1], [0, 0, 1, 1], [], []>, precision = #tpu.contract_precision<fp32>} : vector<24x32xf32>, vector<32x16xf32>, vector<24x16xf32> -> vector<24x16xf32>
    %c328 = arith.constant 328 : index
    %c0_61 = arith.constant 0 : index
    %268 = vector.load %arg1[%c328, %c0_61] : memref<560x32xf32, #tpu.memory_space<vmem>>, vector<1x16xf32>
    %269 = vector.broadcast %268 : vector<1x16xf32> to vector<24x16xf32>
    %270 = arith.addf %267, %269 : vector<24x16xf32>
    %c336 = arith.constant 336 : index
    %c0_62 = arith.constant 0 : index
    %271 = vector.load %arg1[%c336, %c0_62] : memref<560x32xf32, #tpu.memory_space<vmem>>, vector<16x16xf32>
    %cst_63 = arith.constant dense<0.000000e+00> : vector<24x16xf32>
    %272 = tpu.matmul %270, %271, %cst_63 {dimension_numbers = #tpu.dot_dimension_numbers<[1], [0], [0], [1], [0, 0, 1, 1], [], []>, precision = #tpu.contract_precision<fp32>} : vector<24x16xf32>, vector<16x16xf32>, vector<24x16xf32> -> vector<24x16xf32>
    %c352 = arith.constant 352 : index
    %c0_64 = arith.constant 0 : index
    %273 = vector.load %arg1[%c352, %c0_64] : memref<560x32xf32, #tpu.memory_space<vmem>>, vector<1x16xf32>
    %274 = vector.broadcast %273 : vector<1x16xf32> to vector<24x16xf32>
    %275 = arith.addf %272, %274 : vector<24x16xf32>
    %c360 = arith.constant 360 : index
    %c0_65 = arith.constant 0 : index
    %276 = vector.load %arg1[%c360, %c0_65] : memref<560x32xf32, #tpu.memory_space<vmem>>, vector<16x16xf32>
    %cst_66 = arith.constant dense<0.000000e+00> : vector<24x16xf32>
    %277 = tpu.matmul %270, %276, %cst_66 {dimension_numbers = #tpu.dot_dimension_numbers<[1], [0], [0], [1], [0, 0, 1, 1], [], []>, precision = #tpu.contract_precision<fp32>} : vector<24x16xf32>, vector<16x16xf32>, vector<24x16xf32> -> vector<24x16xf32>
    %c376 = arith.constant 376 : index
    %c0_67 = arith.constant 0 : index
    %278 = vector.load %arg1[%c376, %c0_67] : memref<560x32xf32, #tpu.memory_space<vmem>>, vector<1x16xf32>
    %279 = vector.broadcast %278 : vector<1x16xf32> to vector<24x16xf32>
    %280 = arith.addf %277, %279 : vector<24x16xf32>
    %c384 = arith.constant 384 : index
    %c0_68 = arith.constant 0 : index
    %281 = vector.load %arg1[%c384, %c0_68] : memref<560x32xf32, #tpu.memory_space<vmem>>, vector<16x16xf32>
    %cst_69 = arith.constant dense<0.000000e+00> : vector<24x16xf32>
    %282 = tpu.matmul %270, %281, %cst_69 {dimension_numbers = #tpu.dot_dimension_numbers<[1], [0], [0], [1], [0, 0, 1, 1], [], []>, precision = #tpu.contract_precision<fp32>} : vector<24x16xf32>, vector<16x16xf32>, vector<24x16xf32> -> vector<24x16xf32>
    %c400 = arith.constant 400 : index
    %c0_70 = arith.constant 0 : index
    %283 = vector.load %arg1[%c400, %c0_70] : memref<560x32xf32, #tpu.memory_space<vmem>>, vector<1x16xf32>
    %284 = vector.broadcast %283 : vector<1x16xf32> to vector<24x16xf32>
    %285 = arith.addf %282, %284 : vector<24x16xf32>
    %286 = vector.extract_strided_slice %275 {offsets = [0, 0], sizes = [8, 16], strides = [1, 1]} : vector<24x16xf32> to vector<8x16xf32>
    %287 = vector.shape_cast %286 : vector<8x16xf32> to vector<8x16x1xf32>
    %288 = vector.extract_strided_slice %275 {offsets = [8, 0], sizes = [8, 16], strides = [1, 1]} : vector<24x16xf32> to vector<8x16xf32>
    %289 = vector.shape_cast %288 : vector<8x16xf32> to vector<8x16x1xf32>
    %290 = vector.extract_strided_slice %275 {offsets = [16, 0], sizes = [8, 16], strides = [1, 1]} : vector<24x16xf32> to vector<8x16xf32>
    %291 = vector.shape_cast %290 : vector<8x16xf32> to vector<8x16x1xf32>
    %292 = tpu.concatenate %287, %289, %291 in 2 : vector<8x16x1xf32>, vector<8x16x1xf32>, vector<8x16x1xf32> -> vector<8x16x3xf32>
    %293 = vector.extract_strided_slice %280 {offsets = [0, 0], sizes = [8, 16], strides = [1, 1]} : vector<24x16xf32> to vector<8x16xf32>
    %294 = vector.shape_cast %293 : vector<8x16xf32> to vector<8x16x1xf32>
    %295 = vector.extract_strided_slice %280 {offsets = [8, 0], sizes = [8, 16], strides = [1, 1]} : vector<24x16xf32> to vector<8x16xf32>
    %296 = vector.shape_cast %295 : vector<8x16xf32> to vector<8x16x1xf32>
    %297 = vector.extract_strided_slice %280 {offsets = [16, 0], sizes = [8, 16], strides = [1, 1]} : vector<24x16xf32> to vector<8x16xf32>
    %298 = vector.shape_cast %297 : vector<8x16xf32> to vector<8x16x1xf32>
    %299 = tpu.concatenate %294, %296, %298 in 2 : vector<8x16x1xf32>, vector<8x16x1xf32>, vector<8x16x1xf32> -> vector<8x16x3xf32>
    %300 = vector.extract_strided_slice %285 {offsets = [0, 0], sizes = [8, 16], strides = [1, 1]} : vector<24x16xf32> to vector<8x16xf32>
    %301 = vector.shape_cast %300 : vector<8x16xf32> to vector<8x16x1xf32>
    %302 = vector.extract_strided_slice %285 {offsets = [8, 0], sizes = [8, 16], strides = [1, 1]} : vector<24x16xf32> to vector<8x16xf32>
    %303 = vector.shape_cast %302 : vector<8x16xf32> to vector<8x16x1xf32>
    %304 = vector.extract_strided_slice %285 {offsets = [16, 0], sizes = [8, 16], strides = [1, 1]} : vector<24x16xf32> to vector<8x16xf32>
    %305 = vector.shape_cast %304 : vector<8x16xf32> to vector<8x16x1xf32>
    %306 = tpu.concatenate %301, %303, %305 in 2 : vector<8x16x1xf32>, vector<8x16x1xf32>, vector<8x16x1xf32> -> vector<8x16x3xf32>
    "tpu.trace_start"() <{level = 10 : i32, message = "bda,bea->bde"}> : () -> ()
    %cst_71 = arith.constant dense<0.000000e+00> : vector<8x16x16xf32>
    %307 = tpu.matmul %292, %299, %cst_71 {dimension_numbers = #tpu.dot_dimension_numbers<[2], [2], [1], [1], [0, 0, 0, 1, 1, 1], [0], [0]>, precision = #tpu.contract_precision<fp32>} : vector<8x16x3xf32>, vector<8x16x3xf32>, vector<8x16x16xf32> -> vector<8x16x16xf32>
    "tpu.trace_stop"() : () -> ()
    %cst_72 = arith.constant 2.500000e-01 : f32
    %308 = vector.broadcast %cst_72 : f32 to vector<8x16x16xf32>
    %309 = arith.mulf %307, %308 : vector<8x16x16xf32>
    %cst_73 = arith.constant dense<0xFF800000> : vector<8x16xf32>
    %310 = vector.multi_reduction <maximumf>, %309, %cst_73 [2] : vector<8x16x16xf32> to vector<8x16xf32>
    %311 = vector.shape_cast %310 : vector<8x16xf32> to vector<8x16x1xf32>
    %312 = vector.broadcast %311 : vector<8x16x1xf32> to vector<8x16x16xf32>
    %313 = arith.subf %309, %312 : vector<8x16x16xf32>
    %314 = math.exp %313 : vector<8x16x16xf32>
    %cst_74 = arith.constant dense<0.000000e+00> : vector<8x16xf32>
    %315 = vector.multi_reduction <add>, %314, %cst_74 [2] : vector<8x16x16xf32> to vector<8x16xf32>
    %316 = vector.shape_cast %315 : vector<8x16xf32> to vector<8x16x1xf32>
    %317 = vector.broadcast %316 : vector<8x16x1xf32> to vector<8x16x16xf32>
    %318 = arith.divf %314, %317 : vector<8x16x16xf32>
    "tpu.trace_start"() <{level = 10 : i32, message = "bde,bea->bda"}> : () -> ()
    %cst_75 = arith.constant dense<0.000000e+00> : vector<8x16x3xf32>
    %319 = tpu.matmul %318, %306, %cst_75 {dimension_numbers = #tpu.dot_dimension_numbers<[2], [1], [1], [2], [0, 0, 0, 1, 1, 2], [0], [0]>, precision = #tpu.contract_precision<fp32>} : vector<8x16x16xf32>, vector<8x16x3xf32>, vector<8x16x3xf32> -> vector<8x16x3xf32>
    "tpu.trace_stop"() : () -> ()
    %320 = vector.extract_strided_slice %319 {offsets = [0, 0, 0], sizes = [8, 16, 1], strides = [1, 1, 1]} : vector<8x16x3xf32> to vector<8x16x1xf32>
    %321 = vector.shape_cast %320 : vector<8x16x1xf32> to vector<8x16xf32>
    %322 = vector.extract_strided_slice %319 {offsets = [0, 0, 1], sizes = [8, 16, 1], strides = [1, 1, 1]} : vector<8x16x3xf32> to vector<8x16x1xf32>
    %323 = vector.shape_cast %322 : vector<8x16x1xf32> to vector<8x16xf32>
    %324 = vector.extract_strided_slice %319 {offsets = [0, 0, 2], sizes = [8, 16, 1], strides = [1, 1, 1]} : vector<8x16x3xf32> to vector<8x16x1xf32>
    %325 = vector.shape_cast %324 : vector<8x16x1xf32> to vector<8x16xf32>
    %326 = tpu.concatenate %321, %323, %325 in 0 : vector<8x16xf32>, vector<8x16xf32>, vector<8x16xf32> -> vector<24x16xf32>
    %cst_76 = arith.constant dense<0.000000e+00> : vector<24xf32>
    %327 = vector.multi_reduction <add>, %326, %cst_76 [1] : vector<24x16xf32> to vector<24xf32>
    %328 = vector.shape_cast %327 : vector<24xf32> to vector<24x1xf32>
    %cst_77 = arith.constant 1.600000e+01 : f32
    %329 = vector.broadcast %cst_77 : f32 to vector<24x1xf32>
    %330 = arith.divf %328, %329 : vector<24x1xf32>
    %331 = vector.broadcast %330 : vector<24x1xf32> to vector<24x16xf32>
    %332 = arith.subf %326, %331 : vector<24x16xf32>
    %333 = arith.mulf %332, %332 : vector<24x16xf32>
    %cst_78 = arith.constant dense<0.000000e+00> : vector<24xf32>
    %334 = vector.multi_reduction <add>, %333, %cst_78 [1] : vector<24x16xf32> to vector<24xf32>
    %335 = vector.shape_cast %334 : vector<24xf32> to vector<24x1xf32>
    %cst_79 = arith.constant 1.600000e+01 : f32
    %336 = vector.broadcast %cst_79 : f32 to vector<24x1xf32>
    %337 = arith.divf %335, %336 : vector<24x1xf32>
    %338 = vector.broadcast %330 : vector<24x1xf32> to vector<24x16xf32>
    %339 = arith.subf %326, %338 : vector<24x16xf32>
    %cst_80 = arith.constant 9.99999974E-6 : f32
    %340 = vector.broadcast %cst_80 : f32 to vector<24x1xf32>
    %341 = arith.addf %337, %340 : vector<24x1xf32>
    %342 = math.rsqrt %341 : vector<24x1xf32>
    %343 = vector.broadcast %342 : vector<24x1xf32> to vector<24x16xf32>
    %344 = arith.mulf %339, %343 : vector<24x16xf32>
    %c408 = arith.constant 408 : index
    %c0_81 = arith.constant 0 : index
    %345 = vector.load %arg1[%c408, %c0_81] : memref<560x32xf32, #tpu.memory_space<vmem>>, vector<1x16xf32>
    %346 = vector.broadcast %345 : vector<1x16xf32> to vector<24x16xf32>
    %347 = arith.mulf %344, %346 : vector<24x16xf32>
    %c416 = arith.constant 416 : index
    %c0_82 = arith.constant 0 : index
    %348 = vector.load %arg1[%c416, %c0_82] : memref<560x32xf32, #tpu.memory_space<vmem>>, vector<1x16xf32>
    %349 = vector.broadcast %348 : vector<1x16xf32> to vector<24x16xf32>
    %350 = arith.addf %347, %349 : vector<24x16xf32>
    %cst_83 = arith.constant 0.000000e+00 : f32
    %351 = vector.broadcast %cst_83 : f32 to vector<24x16xf32>
    %352 = arith.maximumf %350, %351 : vector<24x16xf32>
    %353 = vector.extract_strided_slice %352 {offsets = [0, 0], sizes = [8, 16], strides = [1, 1]} : vector<24x16xf32> to vector<8x16xf32>
    %354 = vector.extract_strided_slice %352 {offsets = [8, 0], sizes = [8, 16], strides = [1, 1]} : vector<24x16xf32> to vector<8x16xf32>
    %355 = vector.extract_strided_slice %352 {offsets = [16, 0], sizes = [8, 16], strides = [1, 1]} : vector<24x16xf32> to vector<8x16xf32>
    %356 = arith.mulf %353, %354 : vector<8x16xf32>
    %cst_84 = arith.constant dense<0.000000e+00> : vector<8xf32>
    %357 = vector.multi_reduction <add>, %356, %cst_84 [1] : vector<8x16xf32> to vector<8xf32>
    %358 = vector.shape_cast %357 : vector<8xf32> to vector<8x1xf32>
    %cst_85 = arith.constant 2.500000e-01 : f32
    %359 = vector.broadcast %cst_85 : f32 to vector<8x1xf32>
    %360 = arith.mulf %358, %359 : vector<8x1xf32>
    %361 = arith.mulf %353, %355 : vector<8x16xf32>
    %cst_86 = arith.constant dense<0.000000e+00> : vector<8xf32>
    %362 = vector.multi_reduction <add>, %361, %cst_86 [1] : vector<8x16xf32> to vector<8xf32>
    %363 = vector.shape_cast %362 : vector<8xf32> to vector<8x1xf32>
    %cst_87 = arith.constant 2.500000e-01 : f32
    %364 = vector.broadcast %cst_87 : f32 to vector<8x1xf32>
    %365 = arith.mulf %363, %364 : vector<8x1xf32>
    %366 = arith.maximumf %360, %365 : vector<8x1xf32>
    %367 = arith.subf %360, %366 : vector<8x1xf32>
    %368 = math.exp %367 : vector<8x1xf32>
    %369 = arith.subf %365, %366 : vector<8x1xf32>
    %370 = math.exp %369 : vector<8x1xf32>
    %371 = vector.broadcast %368 : vector<8x1xf32> to vector<8x16xf32>
    %372 = arith.mulf %371, %354 : vector<8x16xf32>
    %373 = vector.broadcast %370 : vector<8x1xf32> to vector<8x16xf32>
    %374 = arith.mulf %373, %355 : vector<8x16xf32>
    %375 = arith.addf %372, %374 : vector<8x16xf32>
    %376 = arith.addf %368, %370 : vector<8x1xf32>
    %377 = vector.broadcast %376 : vector<8x1xf32> to vector<8x16xf32>
    %378 = arith.divf %375, %377 : vector<8x16xf32>
    %cst_88 = arith.constant dense<0.000000e+00> : vector<8xf32>
    %379 = vector.multi_reduction <add>, %378, %cst_88 [1] : vector<8x16xf32> to vector<8xf32>
    %380 = vector.shape_cast %379 : vector<8xf32> to vector<8x1xf32>
    %cst_89 = arith.constant 1.600000e+01 : f32
    %381 = vector.broadcast %cst_89 : f32 to vector<8x1xf32>
    %382 = arith.divf %380, %381 : vector<8x1xf32>
    %383 = vector.broadcast %382 : vector<8x1xf32> to vector<8x16xf32>
    %384 = arith.subf %378, %383 : vector<8x16xf32>
    %385 = arith.mulf %384, %384 : vector<8x16xf32>
    %cst_90 = arith.constant dense<0.000000e+00> : vector<8xf32>
    %386 = vector.multi_reduction <add>, %385, %cst_90 [1] : vector<8x16xf32> to vector<8xf32>
    %387 = vector.shape_cast %386 : vector<8xf32> to vector<8x1xf32>
    %cst_91 = arith.constant 1.600000e+01 : f32
    %388 = vector.broadcast %cst_91 : f32 to vector<8x1xf32>
    %389 = arith.divf %387, %388 : vector<8x1xf32>
    %390 = vector.broadcast %382 : vector<8x1xf32> to vector<8x16xf32>
    %391 = arith.subf %378, %390 : vector<8x16xf32>
    %cst_92 = arith.constant 9.99999974E-6 : f32
    %392 = vector.broadcast %cst_92 : f32 to vector<8x1xf32>
    %393 = arith.addf %389, %392 : vector<8x1xf32>
    %394 = math.rsqrt %393 : vector<8x1xf32>
    %395 = vector.broadcast %394 : vector<8x1xf32> to vector<8x16xf32>
    %396 = arith.mulf %391, %395 : vector<8x16xf32>
    %c424 = arith.constant 424 : index
    %c0_93 = arith.constant 0 : index
    %397 = vector.load %arg1[%c424, %c0_93] : memref<560x32xf32, #tpu.memory_space<vmem>>, vector<1x16xf32>
    %398 = vector.broadcast %397 : vector<1x16xf32> to vector<8x16xf32>
    %399 = arith.mulf %396, %398 : vector<8x16xf32>
    %c432 = arith.constant 432 : index
    %c0_94 = arith.constant 0 : index
    %400 = vector.load %arg1[%c432, %c0_94] : memref<560x32xf32, #tpu.memory_space<vmem>>, vector<1x16xf32>
    %401 = vector.broadcast %400 : vector<1x16xf32> to vector<8x16xf32>
    %402 = arith.addf %399, %401 : vector<8x16xf32>
    %cst_95 = arith.constant 0.000000e+00 : f32
    %403 = vector.broadcast %cst_95 : f32 to vector<8x16xf32>
    %404 = arith.maximumf %402, %403 : vector<8x16xf32>
    %405 = vector.extract_strided_slice %270 {offsets = [0, 0], sizes = [8, 16], strides = [1, 1]} : vector<24x16xf32> to vector<8x16xf32>
    %406 = tpu.concatenate %405, %404 in 1 : vector<8x16xf32>, vector<8x16xf32> -> vector<8x32xf32>
    %c440 = arith.constant 440 : index
    %c0_96 = arith.constant 0 : index
    %407 = vector.load %arg1[%c440, %c0_96] : memref<560x32xf32, #tpu.memory_space<vmem>>, vector<32x32xf32>
    %cst_97 = arith.constant dense<0.000000e+00> : vector<8x32xf32>
    %408 = tpu.matmul %406, %407, %cst_97 {dimension_numbers = #tpu.dot_dimension_numbers<[1], [0], [0], [1], [0, 0, 1, 1], [], []>, precision = #tpu.contract_precision<fp32>} : vector<8x32xf32>, vector<32x32xf32>, vector<8x32xf32> -> vector<8x32xf32>
    %c472 = arith.constant 472 : index
    %c0_98 = arith.constant 0 : index
    %409 = vector.load %arg1[%c472, %c0_98] : memref<560x32xf32, #tpu.memory_space<vmem>>, vector<1x32xf32>
    %410 = vector.broadcast %409 : vector<1x32xf32> to vector<8x32xf32>
    %411 = arith.addf %408, %410 : vector<8x32xf32>
    %cst_99 = arith.constant 0.000000e+00 : f32
    %412 = vector.broadcast %cst_99 : f32 to vector<8x32xf32>
    %413 = arith.cmpf ogt, %411, %412 : vector<8x32xf32>
    %cst_100 = arith.constant 0.00999999977 : f32
    %414 = vector.broadcast %cst_100 : f32 to vector<8x32xf32>
    %415 = arith.mulf %414, %411 : vector<8x32xf32>
    %416 = arith.select %413, %411, %415 : vector<8x32xi1>, vector<8x32xf32>
    %c480 = arith.constant 480 : index
    %c0_101 = arith.constant 0 : index
    %417 = vector.load %arg1[%c480, %c0_101] : memref<560x32xf32, #tpu.memory_space<vmem>>, vector<32x32xf32>
    %cst_102 = arith.constant dense<0.000000e+00> : vector<8x32xf32>
    %418 = tpu.matmul %416, %417, %cst_102 {dimension_numbers = #tpu.dot_dimension_numbers<[1], [0], [0], [1], [0, 0, 1, 1], [], []>, precision = #tpu.contract_precision<fp32>} : vector<8x32xf32>, vector<32x32xf32>, vector<8x32xf32> -> vector<8x32xf32>
    %c512 = arith.constant 512 : index
    %c0_103 = arith.constant 0 : index
    %419 = vector.load %arg1[%c512, %c0_103] : memref<560x32xf32, #tpu.memory_space<vmem>>, vector<1x32xf32>
    %420 = vector.broadcast %419 : vector<1x32xf32> to vector<8x32xf32>
    %421 = arith.addf %418, %420 : vector<8x32xf32>
    %cst_104 = arith.constant 0.000000e+00 : f32
    %422 = vector.broadcast %cst_104 : f32 to vector<8x32xf32>
    %423 = arith.cmpf ogt, %421, %422 : vector<8x32xf32>
    %cst_105 = arith.constant 0.00999999977 : f32
    %424 = vector.broadcast %cst_105 : f32 to vector<8x32xf32>
    %425 = arith.mulf %424, %421 : vector<8x32xf32>
    %426 = arith.select %423, %421, %425 : vector<8x32xi1>, vector<8x32xf32>
    %c520 = arith.constant 520 : index
    %c0_106 = arith.constant 0 : index
    %427 = vector.load %arg1[%c520, %c0_106] : memref<560x32xf32, #tpu.memory_space<vmem>>, vector<32x1xf32>
    %cst_107 = arith.constant dense<0.000000e+00> : vector<8x1xf32>
    %428 = tpu.matmul %426, %427, %cst_107 {dimension_numbers = #tpu.dot_dimension_numbers<[1], [0], [0], [1], [0, 0, 1, 1], [], []>, precision = #tpu.contract_precision<fp32>} : vector<8x32xf32>, vector<32x1xf32>, vector<8x1xf32> -> vector<8x1xf32>
    %c552 = arith.constant 552 : index
    %c0_108 = arith.constant 0 : index
    %429 = vector.load %arg1[%c552, %c0_108] : memref<560x32xf32, #tpu.memory_space<vmem>>, vector<1x1xf32>
    %430 = vector.broadcast %429 : vector<1x1xf32> to vector<8x1xf32>
    %431 = arith.addf %428, %430 : vector<8x1xf32>
    %432 = vector.shape_cast %431 : vector<8x1xf32> to vector<8x1xf32>
    %433 = vector.broadcast %432 : vector<8x1xf32> to vector<8x128xf32>
    %c0_109 = arith.constant 0 : index
    %c0_110 = arith.constant 0 : index
    %434 = vector.load %arg2[%c0_109, %c0_110] : memref<8x128xf32, #tpu.memory_space<vmem>>, vector<8x128xf32>
    tpu.vector_store %arg2[%c0_109, %c0_110], %433 {strides = array<i32>} : memref<8x128xf32, #tpu.memory_space<vmem>>, vector<8x128xf32>,
    return
  }
}

</mosaic_0001>

<bundles_post_ra>
// kernel: critic_att1_pallas.1
= control target key start
LH: loop header
LB: loop body
LE: loop exit
PB: predicated region body
PF: predicated region fallthrough
CT: control target
= control target key end

     0   :  { %v21969_v1 = vmov 5   ;;  %v21970_v2 = vmov 4   ;;  %s21971_s11 = smov 116   ;;  %s21972_s12 = smov 104   ;;  %vm19_vm0 = vcmask 97280   ;;  %v21975_v14 = vmov 6   ;;  %s25484_s0 = inlined_call_operand.vmem [shape: f32[8,42], index: 0, kind: input, shape index: {}]   ;;  %s25485_s1 = inlined_call_operand.vmem [shape: f32[560,32], index: 1, kind: input, shape index: {}]   ;;  %s25486_s2 = inlined_call_operand.vmem [shape: f32[8,128], index: 2, kind: output, shape index: {}]  }
   0x1   :  { %v11_v0 = vld [vmem:[%s25484_s0] sm:$0xff]  ;;  %21759 = vset.pattern.permute.xlu1 %v21969_v1  ;;  %21758 = vset.pattern.permute.xlu0 %v21970_v2  ;;  %s21973_s13 = smov 102   ;;  %s21974_s14 = smov 100   ;;  %v853_v9 = vld [vmem:[%s25485_s1 + $0x48] sm:$0xff]  ;;  %v854_v10 = vld [vmem:[%s25485_s1 + $0x50] sm:$0xff]  ;;  %v25506_v16 = vmov 0.0|0.0  }
   0x2   :  { %13 = vrot.lane.b32.xlu0 %v11_v0, %s21971_s11  ;;  %21 = vrot.lane.b32.xlu1 %v11_v0, %s21972_s12  ;;  %v890_v12 = vand.u32 4294901760, %v853_v9  ;;  %v893_v13 = vand.u32 4294901760, %v854_v10  ;;  %v855_v17 = vld [vmem:[%s25485_s1 + $0x58] sm:$0xff]  ;;  %v856_v18 = vld [vmem:[%s25485_s1 + $0x60] sm:$0xff]  ;;  %v21977_v21 = vmov 7   ;;  %vm21978_vm1 = vmmov 0  }
   0x3   :  { %21175 = vmatprep.subr.bf16.mxu1 %v25506_v16  ;;  %20383 = vmatprep.subr.bf16.mxu0 %v25506_v16  ;;  %v896_v19 = vand.u32 4294901760, %v855_v17  ;;  %v899_v20 = vand.u32 4294901760, %v856_v18  ;;  %v25504_v25 = vmov 0.0   ;;  %v25490_v26 = vmov 2   ;;  %v129_v52 = vld [vmem:[%s25485_s1 + $0x10] sm:$0xff]  ;;  %v130_v53 = vld [vmem:[%s25485_s1 + $0x18] sm:$0xff] }
   0x4   :  { %v22028_v15 = vpack.c.bf16 %v893_v13, %v890_v12  ;;  %v22041_v22 = vsub.f32 %v853_v9, %v890_v12  ;;  %v22043_v23 = vsub.f32 %v854_v10, %v893_v13  ;;  %18654 = vmatprep.mubr.msk.f32.mxu1 %vm21978_vm1, %v25504_v25  ;;  %18543 = vmatprep.mubr.msk.f32.mxu0 %vm21978_vm1, %v25504_v25  ;;  %v21981_v29 = vmov 3   ;;  %v131_v59 = vld [vmem:[%s25485_s1 + $0x20] sm:$0xff]  ;;  %v132_v60 = vld [vmem:[%s25485_s1 + $0x28] sm:$0xff]  ;;  %s21990_s3 = smov 32   ;;  %s21991_s15 = smov 16  }
   0x5   :  { %v22045_v24 = vpack.c.bf16 %v899_v20, %v896_v19  ;;  %v22057_v27 = vsub.f32 %v855_v17, %v896_v19  ;;  %v22059_v28 = vsub.f32 %v856_v18, %v899_v20  ;;  %v25492_v30 = vmov 0  }
   0x6   :  { %16 = vrot.lane.b32.xlu0 %v11_v0, %s21973_s13  ;;  %25 = vrot.lane.b32.xlu1 %v11_v0, %s21974_s14  ;;  %v21983_v31 = vmov 13   ;;  %v25503_v32 = vand.u32 4294901760, %v22041_v22  ;;  %v25502_v33 = vand.u32 4294901760, %v22043_v23  ;;  %v25488_v34 = vmov 1  }
   0x7   :  { %21177 = vmatpush3.bf16.msra.mxu1 %v22028_v15  ;;  %v25501_v39 = vand.u32 4294901760, %v22057_v27  ;;  %v25500_v40 = vand.u32 4294901760, %v22059_v28  ;;  %v21985_v47 = vmov 8   ;;  %v21986_v48 = vmov 9  }
   0x8   :  { %21176 = vmatprep.subr.bf16.mxu1 %v25506_v16  ;;  %v1052_v35 = vsub.f32 %v22041_v22, %v25503_v32  ;;  %v1059_v36 = vsub.f32 %v22043_v23, %v25502_v33  ;;  %v21987_v49 = vmov 12   ;;  %v21988_v50 = vmov 10  }
   0x9   :  { %v1066_v42 = vsub.f32 %v22057_v27, %v25501_v39  ;;  %v1073_v43 = vsub.f32 %v22059_v28, %v25500_v40  ;;  %v21989_v51 = vmov 11   ;;  %v149_v54 = vand.u32 4294901760, %v129_v52 }
   0xa   :  { %v1053_v37 = vand.u32 4294901760, %v1052_v35  ;;  %v1060_v38 = vand.u32 4294901760, %v1059_v36  ;;  %v152_v55 = vand.u32 4294901760, %v130_v53  ;;  %v155_v61 = vand.u32 4294901760, %v131_v59 }
   0xb   :  { %21178 = vmatpush3.bf16.msra.mxu1 %v22045_v24  ;;  %v1067_v44 = vand.u32 4294901760, %v1066_v42  ;;  %v1074_v45 = vand.u32 4294901760, %v1073_v43  ;;  %v22120_v57 = vsub.f32 %v129_v52, %v149_v54  ;;  %v158_v62 = vand.u32 4294901760, %v132_v60  ;;  %v722_v43 = vld [vmem:[%s25485_s1 + $0x38] sm:$0x3] }
   0xc   :  { %20425 = vmatprep.subr.bf16.mxu1 %v25506_v16  ;;  %v22086_v41 = vpack.c.bf16 %v1060_v38, %v1053_v37  ;;  %v22118_v56 = vpack.c.bf16 %v152_v55, %v149_v54  ;;  %v22122_v58 = vsub.f32 %v130_v53, %v152_v55  ;;  %vm138_vm2 = vcmask 261120  }
   0xd   :  { %v22096_v46 = vpack.c.bf16 %v1074_v45, %v1067_v44  ;;  %v22134_v63 = vpack.c.bf16 %v158_v62, %v155_v61  ;;  %vm1730_vm3 = vcmask 130048   ;;  %vm2885_vm4 = vcmask 392192  }
   0xe   :  { %20385 = vmatpush3.bf16.msra.mxu0 %v22118_v56  ;;  %vm6605_vm5 = vcmask 7168   ;;  %vm6622_vm6 = vcmask 15360   ;;  %vm7231_vm7 = vcmask 23552   ;;  %vm15675_vm8 = vcmask 130112  }
   0xf   :  { %20386 = vmatprep.subr.bf16.mxu0 %v25506_v16  ;;  %vm15740_vm9 = vcmask 1041409   ;;  %vm15742_vm10 = vcmask 1042434   ;;  %vm15744_vm11 = vcmask 1043459   ;;  %vm15746_vm12 = vcmask 1044484  }
  0x10   :  { %vm15748_vm13 = vcmask 1045509   ;;  %vm15750_vm14 = vcmask 1046534   ;;  %vm15752_vm15 = vcmask 1047559  }
  0x12   :  { %20388 = vmatpush3.bf16.msra.mxu0 %v22134_v63 }
  0x13   :  { %20389 = vmatprep.subr.bf16.mxu0 %v25506_v16 }
  0x74   :  { %v14_v3 = vpop.permute.xlu0 %13  ;;  %v22_v6 = vpop.permute.xlu1 %21 }
  0x75   :  { %v22014_v7 = vsel %vm19_vm0, %v11_v0, %v22_v6  ;;  %v22136_v0 = vsub.f32 %v131_v59, %v155_v61 }
  0x77   :  { %v264_v13 = vand.u32 4294901760, %v22136_v0 }
  0x78   :  { %v17_v4 = vpop.permute.xlu0 %16  ;;  %v26_v8 = vpop.permute.xlu1 %25 }
  0x79   :  { %v22010_v5 = vsel %vm19_vm0, %v14_v3, %v17_v4  ;;  %v22024_v11 = vsel %vm19_vm0, %v22_v6, %v26_v8  ;;  %v20435_v3 = vpack.c.bf16 %v22059_v28, %v22057_v27  ;;  %v250_v4 = vand.u32 4294901760, %v22120_v57 }
  0x7a   :  { %791 = vperm.xlu1 %21759, %v22010_v5   ;;  %776 = vperm.xlu0 %21758, %v22010_v5   ;;  %v257_v6 = vand.u32 4294901760, %v22122_v58  ;;  %v265_v18 = vsub.f32 %v22136_v0, %v264_v13 }
  0x7b   :  { %v251_v8 = vsub.f32 %v22120_v57, %v250_v4 }
  0x7c   :  { %v258_v9 = vsub.f32 %v22122_v58, %v257_v6  ;;  %v266_v20 = vand.u32 4294901760, %v265_v18 }
  0x7d   :  { %v252_v10 = vand.u32 4294901760, %v251_v8 }
  0x7e   :  { %21760 = vset.pattern.permute.xlu1 %v21970_v2  ;;  %21761 = vset.pattern.permute.xlu0 %v21969_v1  ;;  %v20432_v2 = vpack.c.bf16 %v22043_v23, %v22041_v22  ;;  %v259_v12 = vand.u32 4294901760, %v258_v9 }
  0x7f   :  { %780 = vperm.xlu1 %21760, %v22014_v7   ;;  %795 = vperm.xlu0 %21761, %v22014_v7  }
  0x80   :  { %v22159_v17 = vpack.c.bf16 %v259_v12, %v252_v10 }
  0x83   :  { %784 = vperm.xlu1 %21760, %v22024_v11   ;;  %21763 = vset.pattern.permute.xlu0 %v21975_v14 }
  0x84   :  { %815 = vperm.xlu0 %21763, %v22010_v5  }
  0x87   :  { %21762 = vset.pattern.permute.xlu1 %v21969_v1  ;;  %v22138_v1 = vsub.f32 %v132_v60, %v158_v62  ;;  %v22207_v62 = vpack.c.bf16 %v257_v6, %v250_v4 }
  0x88   :  { %799 = vperm.xlu1 %21762, %v22024_v11   ;;  %21766 = vset.pattern.permute.xlu0 %v21977_v21 }
  0x89   :  { %834 = vperm.xlu0 %21766, %v22014_v7  }
  0x8c   :  { %21764 = vset.pattern.permute.xlu1 %v21977_v21 }
  0x8d   :  { %830 = vperm.xlu1 %21764, %v22010_v5   ;;  %21768 = vset.pattern.permute.xlu0 %v25490_v26 }
  0x8e   :  { %725 = vperm.xlu0 %21768, %v22010_v5  }
  0x91   :  { %21765 = vset.pattern.permute.xlu1 %v21975_v14  ;;  %v271_v14 = vand.u32 4294901760, %v22138_v1 }
  0x92   :  { %819 = vperm.xlu1 %21765, %v22014_v7   ;;  %21771 = vset.pattern.permute.xlu0 %v21981_v29 }
  0x93   :  { %748 = vperm.xlu0 %21771, %v22014_v7   ;;  %v272_v19 = vsub.f32 %v22138_v1, %v271_v14  ;;  %v22215_v18 = vpack.c.bf16 %v271_v14, %v264_v13 }
  0x96   :  { %823 = vperm.xlu1 %21765, %v22024_v11  }
  0x97   :  { %21773 = vset.pattern.permute.xlu0 %v25492_v30 }
  0x98   :  { %32 = vperm.xlu0 %21773, %v22010_v5  }
  0x9a   :  { %21767 = vset.pattern.permute.xlu1 %v21977_v21  ;;  %v273_v21 = vand.u32 4294901760, %v272_v19 }
  0x9b   :  { %838 = vperm.xlu1 %21767, %v22024_v11  }
  0x9c   :  { %37 = vperm.xlu0 %21773, %v22014_v7  }
  0x9f   :  { %21769 = vset.pattern.permute.xlu1 %v21981_v29 }
  0xa0   :  { %744 = vperm.xlu1 %21769, %v22010_v5   ;;  %21777 = vset.pattern.permute.xlu0 %v21983_v31 }
  0xa1   :  { %97 = vperm.xlu0 %21777, %v22010_v5  }
  0xa4   :  { %21770 = vset.pattern.permute.xlu1 %v25490_v26 }
  0xa5   :  { %729 = vperm.xlu1 %21770, %v22014_v7   ;;  %21780 = vset.pattern.permute.xlu0 %v25488_v34 }
  0xa6   :  { %61 = vperm.xlu0 %21780, %v22024_v11  }
  0xa9   :  { %733 = vperm.xlu1 %21770, %v22024_v11  }
  0xaa   :  { %21783 = vset.pattern.permute.xlu0 %v21983_v31 }
  0xab   :  { %105 = vperm.xlu0 %21783, %v22024_v11  }
  0xad   :  { %21772 = vset.pattern.permute.xlu1 %v21981_v29  ;;  %v22165_v29 = vpack.c.bf16 %v273_v21, %v266_v20 }
  0xae   :  { %752 = vperm.xlu1 %21772, %v22024_v11  }
  0xaf   :  { %21786 = vset.pattern.permute.xlu0 %v21985_v47 }
  0xb0   :  { %1899 = vperm.xlu0 %21786, %v22014_v7  }
  0xb2   :  { %21774 = vset.pattern.permute.xlu1 %v25488_v34 }
  0xb3   :  { %53 = vperm.xlu1 %21774, %v22010_v5  }
  0xb4   :  { %21788 = vset.pattern.permute.xlu0 %v21986_v48 }
  0xb5   :  { %1922 = vperm.xlu0 %21788, %v22024_v11  }
  0xb7   :  { %21775 = vset.pattern.permute.xlu1 %v21987_v49 }
  0xb8   :  { %75 = vperm.xlu1 %21775, %v22010_v5  }
  0xb9   :  { %21791 = vset.pattern.permute.xlu0 %v21988_v50 }
  0xba   :  { %1950 = vperm.xlu0 %21791, %v22014_v7  }
  0xbc   :  { %21776 = vset.pattern.permute.xlu1 %v25488_v34 }
  0xbd   :  { %57 = vperm.xlu1 %21776, %v22014_v7  }
  0xbe   :  { %21793 = vset.pattern.permute.xlu0 %v21989_v51 }
  0xbf   :  { %1969 = vperm.xlu0 %21793, %v22024_v11  }
  0xc1   :  { %21778 = vset.pattern.permute.xlu1 %v21987_v49 }
  0xc2   :  { %79 = vperm.xlu1 %21778, %v22014_v7  }
  0xc3   :  { %21794 = vset.pattern.permute.xlu0 %v25492_v30 }
  0xc6   :  { %21779 = vset.pattern.permute.xlu1 %v25492_v30 }
  0xc7   :  { %42 = vperm.xlu1 %21779, %v22024_v11  }
  0xcb   :  { %21781 = vset.pattern.permute.xlu1 %v21983_v31  ;;  %v25487_v31 = vlaneseq }
  0xcc   :  { %101 = vperm.xlu1 %21781, %v22014_v7  }
  0xcd   :  { %v22173_v36 = vshrl.u32 %v25487_v31, 7 }
  0xcf   :  { %25522 = vst [vmem:[#allocation2_spill] sm:$0xff] %v22173_v36  ;;  %v22179_v38 = vsub.s32 1, %v22173_v36  ;;  %v22182_v42 = vsub.s32 0, %v22173_v36 }
  0xd0   :  { %21782 = vset.pattern.permute.xlu1 %v21987_v49  ;;  %v22200_v49 = vld [vmem:[%s25485_s1 + $0x40] ss:$0 sm:$0xff] }
  0xd1   :  { %83 = vperm.xlu1 %21782, %v22024_v11   ;;  %v22192_v44 = vrot.slane %v722_v43, %v22182_v42 }
  0xd5   :  { %21784 = vset.pattern.permute.xlu1 %v21985_v47 }
  0xd6   :  { %1895 = vperm.xlu1 %21784, %v22010_v5  }
  0xda   :  { %21785 = vset.pattern.permute.xlu1 %v21986_v48 }
  0xdb   :  { %1914 = vperm.xlu1 %21785, %v22010_v5  }
  0xdf   :  { %1918 = vperm.xlu1 %21785, %v22014_v7  }
  0xe3   :  { %21787 = vset.pattern.permute.xlu1 %v21985_v47 }
  0xe4   :  { %1903 = vperm.xlu1 %21787, %v22024_v11  }
  0xe8   :  { %21789 = vset.pattern.permute.xlu1 %v21988_v50 }
  0xe9   :  { %1946 = vperm.xlu1 %21789, %v22010_v5  }
  0xed   :  { %21790 = vset.pattern.permute.xlu1 %v21989_v51 }
  0xee   :  { %1961 = vperm.xlu1 %21790, %v22010_v5   ;;  %v22189_v5 = vrot.slane %v722_v43, %v22179_v38 }
  0xf2   :  { %1965 = vperm.xlu1 %21790, %v22014_v7  }
  0xf6   :  { %21792 = vset.pattern.permute.xlu1 %v21988_v50 }
  0xf7   :  { %1954 = vperm.xlu1 %21792, %v22024_v11  }
  0xf9   :  { %v792_v7 = vpop.permute.xlu1 %791  ;;  %v777_v45 = vpop.permute.xlu0 %776 }
  0xfa   :  { %v802_v47 = vmul.f32 %v792_v7, %v22189_v5  ;;  %v787_v48 = vmul.f32 %v777_v45, %v22192_v44 }
  0xfb   :  { %21795 = vset.pattern.permute.xlu1 %v25488_v34 }
  0xfc   :  { %v805_v50 = vadd.f32 %v802_v47, %v787_v48 }
  0xfe   :  { %v808_v51 = vadd.f32 %v22200_v49, %v805_v50  ;;  %v781_v52 = vpop.permute.xlu1 %780  ;;  %v796_v53 = vpop.permute.xlu0 %795 }
  0xff   :  { %v788_v11 = vmul.f32 %v781_v52, %v22192_v44  ;;  %v803_v54 = vmul.f32 %v796_v53, %v22189_v5 }
 0x100   :  { %v811_v55 = vmax.f32 %v808_v51, 0.0 }
 0x101   :  { %v806_v59 = vadd.f32 %v803_v54, %v788_v11 }
 0x102   :  { %v872_v60 = vsel %vm138_vm2, %v811_v55, 0  ;;  %v785_v61 = vpop.permute.xlu1 %784 }
 0x103   :  { %v22209_v8 = vand.u32 4294901760, %v872_v60  ;;  %v809_v9 = vadd.f32 %v22200_v49, %v806_v59  ;;  %v789_v4 = vmul.f32 %v785_v61, %v22192_v44  ;;  %v816_v7 = vpop.permute.xlu0 %815 }
 0x104   :  { %v826_v52 = vmul.f32 %v816_v7, %v22192_v44 }
 0x105   :  { %v812_v10 = vmax.f32 %v809_v9, 0.0  ;;  %v22213_v12 = vsub.f32 %v872_v60, %v22209_v8 }
 0x107   :  { %v875_v19 = vsel %vm138_vm2, %v812_v10, 0  ;;  %v800_v20 = vpop.permute.xlu1 %799  ;;  %v25499_v21 = vand.u32 4294901760, %v22213_v12 }
 0x108   :  { %v22219_v43 = vand.u32 4294901760, %v875_v19  ;;  %v804_v6 = vmul.f32 %v800_v20, %v22189_v5  ;;  %v835_v55 = vpop.permute.xlu0 %834 }
 0x109   :  { %v991_v45 = vsub.f32 %v22213_v12, %v25499_v21  ;;  %v842_v20 = vmul.f32 %v835_v55, %v22189_v5 }
 0x10a   :  { %v807_v47 = vadd.f32 %v804_v6, %v789_v4  ;;  %v22227_v13 = vsub.f32 %v875_v19, %v22219_v43 }
 0x10b   :  { %v992_v14 = vand.u32 4294901760, %v991_v45 }
 0x10c   :  { %v810_v48 = vadd.f32 %v22200_v49, %v807_v47  ;;  %v831_v50 = vpop.permute.xlu1 %830  ;;  %v25498_v51 = vand.u32 4294901760, %v22227_v13 }
 0x10d   :  { %v841_v53 = vmul.f32 %v831_v50, %v22189_v5  ;;  %18655 = vmatmul.mubr.f32.vlgmr.msra.gmra.mrb[0].mxu1 %v992_v14 }
 0x10e   :  { %v813_v11 = vmax.f32 %v810_v48, 0.0  ;;  %18657 = vmatprep.mubr.msk.f32.mxu1 %vm21978_vm1, %v25504_v25  ;;  %v1001_v54 = vsub.f32 %v22227_v13, %v25498_v51  ;;  %20427 = vmatpush3.bf16.msra.mxu1 %v22086_v41 }
 0x10f   :  { %v844_v59 = vadd.f32 %v841_v53, %v826_v52  ;;  %20428 = vmatprep.subr.bf16.mxu1 %v25506_v16 }
 0x110   :  { %v878_v60 = vsel %vm138_vm2, %v813_v11, 0  ;;  %v1002_v61 = vand.u32 4294901760, %v1001_v54 }
 0x111   :  { %v22241_v9 = vand.u32 4294901760, %v878_v60  ;;  %v847_v10 = vadd.f32 %v22200_v49, %v844_v59  ;;  %v820_v19 = vpop.permute.xlu1 %819 }
 0x112   :  { %v827_v4 = vmul.f32 %v820_v19, %v22192_v44  ;;  %18658 = vmatmul.mubr.f32.gmra.mrb[2].mxu1 %v1002_v61  ;;  %v726_v19 = vpop.permute.xlu0 %725 }
 0x113   :  { %v850_v6 = vmax.f32 %v847_v10, 0.0  ;;  %18660 = vmatprep.mubr.msk.f32.mxu1 %vm21978_vm1, %v25504_v25  ;;  %v22249_v41 = vsub.f32 %v878_v60, %v22241_v9  ;;  %20430 = vmatpush3.bf16.msra.mxu1 %v22096_v46 }
 0x114   :  { %v845_v7 = vadd.f32 %v842_v20, %v827_v4  ;;  %20431 = vmatprep.subr.bf16.mxu1 %v25506_v16 }
 0x115   :  { %v881_v45 = vsel %vm138_vm2, %v850_v6, 0  ;;  %v824_v47 = vpop.permute.xlu1 %823  ;;  %v25497_v14 = vand.u32 4294901760, %v22249_v41 }
 0x116   :  { %v22255_v48 = vand.u32 4294901760, %v881_v45  ;;  %v848_v50 = vadd.f32 %v22200_v49, %v845_v7  ;;  %v828_v61 = vmul.f32 %v824_v47, %v22192_v44 }
 0x117   :  { %v1011_v52 = vsub.f32 %v22249_v41, %v25497_v14 }
 0x118   :  { %v851_v53 = vmax.f32 %v848_v50, 0.0  ;;  %v22262_v11 = vsub.f32 %v881_v45, %v22255_v48 }
 0x119   :  { %v1012_v46 = vand.u32 4294901760, %v1011_v52  ;;  %v740_v52 = vmul.f32 %v22192_v44, %v726_v19 }
 0x11a   :  { %v884_v54 = vsel %vm138_vm2, %v851_v53, 0  ;;  %v839_v55 = vpop.permute.xlu1 %838  ;;  %v25496_v59 = vand.u32 4294901760, %v22262_v11 }
 0x11b   :  { %v22266_v60 = vand.u32 4294901760, %v884_v54  ;;  %v843_v10 = vmul.f32 %v839_v55, %v22189_v5  ;;  %18661 = vmatmul.mubr.f32.gmra.mrb[4].mxu1 %v1012_v46  ;;  %v749_v55 = vpop.permute.xlu0 %748 }
 0x11c   :  { %18663 = vmatprep.mubr.msk.f32.mxu1 %vm21978_vm1, %v25504_v25  ;;  %v1021_v20 = vsub.f32 %v22262_v11, %v25496_v59  ;;  %v760_v19 = vmul.f32 %v22189_v5, %v749_v55 }
 0x11d   :  { %v846_v4 = vadd.f32 %v843_v10, %v828_v61  ;;  %v22276_v6 = vsub.f32 %v884_v54, %v22266_v60 }
 0x11e   :  { %v1022_v7 = vand.u32 4294901760, %v1021_v20 }
 0x11f   :  { %v849_v45 = vadd.f32 %v22200_v49, %v846_v4  ;;  %v745_v50 = vpop.permute.xlu1 %744  ;;  %v25495_v47 = vand.u32 4294901760, %v22276_v6 }
 0x120   :  { %v759_v53 = vmul.f32 %v22189_v5, %v745_v50  ;;  %18664 = vmatmul.mubr.f32.gmra.mrb[6].mxu1 %v1022_v7 }
 0x121   :  { %v852_v46 = vmax.f32 %v849_v45, 0.0  ;;  %18666 = vmatprep.mubr.msk.f32.mxu1 %vm21978_vm1, %v25504_v25  ;;  %v1031_v54 = vsub.f32 %v22276_v6, %v25495_v47 }
 0x122   :  { %v762_v61 = vadd.f32 %v759_v53, %v740_v52 }
 0x123   :  { %v887_v10 = vsel %vm138_vm2, %v852_v46, 0  ;;  %v1032_v20 = vand.u32 4294901760, %v1031_v54 }
 0x124   :  { %v22288_v4 = vand.u32 4294901760, %v887_v10  ;;  %v730_v31 = vpop.permute.xlu1 %729  ;;  %v769_v7 = vadd.f32 %v22200_v49, %v762_v61  ;;  %v33_v61 = vpop.permute.xlu0 %32 }
 0x125   :  { %v741_v45 = vmul.f32 %v22192_v44, %v730_v31  ;;  %18667 = vmatmul.mubr.f32.gmra.mrb[8].mxu1 %v1032_v20 }
 0x126   :  { %18669 = vmatprep.mubr.msk.f32.mxu1 %vm21978_vm1, %v25504_v25  ;;  %v22296_v50 = vsub.f32 %v887_v10, %v22288_v4  ;;  %v772_v54 = vmax.f32 %v769_v7, 0.0  ;;  %v29_v7 = vld [vmem:[%s25485_s1] sm:$0xf] }
 0x127   :  { %v763_v52 = vadd.f32 %v760_v19, %v741_v45 }
 0x128   :  { %v734_v53 = vpop.permute.xlu1 %733  ;;  %v25494_v46 = vand.u32 4294901760, %v22296_v50  ;;  %v22304_v20 = vsel %vm138_vm2, %v772_v54, 0  ;;  %v22317_v54 = vsub.s32 2, %v22173_v36 }
 0x129   :  { %v770_v34 = vadd.f32 %v22200_v49, %v763_v52  ;;  %v742_v10 = vmul.f32 %v22192_v44, %v734_v53  ;;  %v22314_v45 = vand.u32 4294901760, %v22304_v20  ;;  %v67_v53 = vrot.slane %v29_v7, %v22179_v38 }
 0x12a   :  { %v1041_v55 = vsub.f32 %v22296_v50, %v25494_v46  ;;  %v89_v46 = vrot.slane %v29_v7, %v22317_v54 }
 0x12b   :  { %v773_v26 = vmax.f32 %v770_v34, 0.0  ;;  %v38_v34 = vpop.permute.xlu0 %37 }
 0x12c   :  { %v1042_v31 = vand.u32 4294901760, %v1041_v55 }
 0x12d   :  { %v753_v30 = vpop.permute.xlu1 %752  ;;  %v22320_v44 = vsel %vm138_vm2, %v773_v26, 0 }
 0x12e   :  { %v761_v19 = vmul.f32 %v22189_v5, %v753_v30  ;;  %18670 = vmatmul.mubr.f32.gmra.mrb[10].mxu1 %v1042_v31  ;;  %v48_v30 = vrot.slane %v29_v7, %v22182_v42  ;;  %v22324_v5 = vsub.s32 3, %v22173_v36 }
 0x12f   :  { %18680 = vmatprep.mubr.msk.f32.mxu1 %vm21978_vm1, %v25504_v25  ;;  %v98_v59 = vpop.permute.xlu0 %97 }
 0x130   :  { %v764_v52 = vadd.f32 %v761_v19, %v742_v10  ;;  %v22335_v19 = vand.u32 4294901760, %v22320_v44 }
 0x132   :  { %v771_v55 = vadd.f32 %v22200_v49, %v764_v52  ;;  %v54_v31 = vpop.permute.xlu1 %53  ;;  %18681 = vmatmul.mubr.f32.vlgmr.msra.gmra.mrb[12].mxu1 %v22314_v45  ;;  %v49_v49 = vmul.f32 %v48_v30, %v33_v61  ;;  %v111_v52 = vrot.slane %v29_v7, %v22324_v5 }
 0x133   :  { %18683 = vmatprep.mubr.msk.f32.mxu1 %vm21978_vm1, %v25504_v25  ;;  %20433 = vmatpush3.bf16.msra.mxu1 %v20432_v2  ;;  %v68_v10 = vmul.f32 %v67_v53, %v54_v31 }
 0x134   :  { %v774_v26 = vmax.f32 %v771_v55, 0.0  ;;  %20434 = vmatprep.subr.bf16.mxu1 %v25506_v16  ;;  %v112_v7 = vmul.f32 %v111_v52, %v98_v59 }
 0x135   :  { %v71_v61 = vadd.f32 %v68_v10, %v49_v49 }
 0x136   :  { %v22341_v47 = vsel %vm138_vm2, %v774_v26, 0  ;;  %18684 = vmatmul.mubr.f32.gmra.mrb[14].mxu1 %v22335_v19  ;;  %v17630_v26 = vld [vmem:[%s25485_s1 + $0x8] ss:$0 sm:$0xff] }
 0x137   :  { %v76_v14 = vpop.permute.xlu1 %75  ;;  %18686 = vmatprep.mubr.msk.f32.mxu1 %vm21978_vm1, %v25504_v25  ;;  %v22347_v2 = vand.u32 4294901760, %v22341_v47  ;;  %20436 = vmatpush3.bf16.msra.mxu1 %v20435_v3 }
 0x138   :  { %v90_v55 = vmul.f32 %v89_v46, %v76_v14  ;;  %20437 = vmatprep.subr.bf16.mxu1 %v25506_v16 }
 0x13a   :  { %v93_v31 = vadd.f32 %v90_v55, %v71_v61  ;;  %18687 = vmatmul.mubr.f32.gmra.mrb[16].mxu1 %v22347_v2  ;;  %v50_v55 = vmul.f32 %v48_v30, %v38_v34 }
 0x13b   :  { %18689 = vmatprep.mubr.msk.f32.mxu1 %vm21978_vm1, %v25504_v25 }
 0x13c   :  { %v115_v51 = vadd.f32 %v112_v7, %v93_v31  ;;  %v58_v21 = vpop.permute.xlu1 %57 }
 0x13e   :  { %v123_v40 = vadd.f32 %v17630_v26, %v115_v51  ;;  %18690 = vmatmul.mubr.f32.gmra.mrb[0].mxu1 %v22209_v8  ;;  %v69_v51 = vmul.f32 %v67_v53, %v58_v21 }
 0x13f   :  { %18692 = vmatprep.mubr.msk.f32.mxu1 %vm21978_vm1, %v25504_v25 }
 0x140   :  { %v126_v3 = vmax.f32 %v123_v40, 0.0  ;;  %v72_v39 = vadd.f32 %v69_v51, %v50_v55 }
 0x141   :  { %v80_v14 = vpop.permute.xlu1 %79 }
 0x142   :  { %18693 = vmatmul.mubr.f32.gmra.mrb[2].mxu1 %v22219_v43  ;;  %v140_v59 = vsel %vm138_vm2, %v126_v3, 0  ;;  %v91_v7 = vmul.f32 %v89_v46, %v80_v14  ;;  %v62_v3 = vpop.permute.xlu0 %61 }
 0x143   :  { %18695 = vmatprep.mubr.msk.f32.mxu1 %vm21978_vm1, %v25504_v25  ;;  %v22366_v10 = vand.u32 4294901760, %v140_v59  ;;  %v70_v34 = vmul.f32 %v67_v53, %v62_v3 }
 0x144   :  { %v94_v33 = vadd.f32 %v91_v7, %v72_v39 }
 0x145   :  { %v22369_v49 = vsub.f32 %v140_v59, %v22366_v10 }
 0x146   :  { %v43_v61 = vpop.permute.xlu1 %42  ;;  %18696 = vmatmul.mubr.f32.gmra.mrb[4].mxu1 %v22241_v9  ;;  %v106_v14 = vpop.permute.xlu0 %105 }
 0x147   :  { %18698 = vmatprep.mubr.msk.f32.mxu1 %vm21978_vm1, %v25504_v25  ;;  %v219_v40 = vand.u32 4294901760, %v22369_v49  ;;  %v51_v37 = vmul.f32 %v48_v30, %v43_v61 }
 0x149   :  { %v220_v31 = vsub.f32 %v22369_v49, %v219_v40  ;;  %v73_v39 = vadd.f32 %v70_v34, %v51_v37 }
 0x14a   :  { %18699 = vmatmul.mubr.f32.gmra.mrb[6].mxu1 %v22255_v48 }
 0x14b   :  { %v102_v59 = vpop.permute.xlu1 %101  ;;  %v221_v21 = vand.u32 4294901760, %v220_v31  ;;  %18701 = vmatprep.mubr.msk.f32.mxu1 %vm21978_vm1, %v25504_v25 }
 0x14c   :  { %v113_v32 = vmul.f32 %v111_v52, %v102_v59 }
 0x14d   :  { %18544 = vmatmul.mubr.f32.vlgmr.msra.gmra.mrb[0].mxu0 %v221_v21 }
 0x14e   :  { %v116_v35 = vadd.f32 %v113_v32, %v94_v33  ;;  %18702 = vmatmul.mubr.f32.gmra.mrb[8].mxu1 %v22266_v60  ;;  %18546 = vmatprep.mubr.msk.f32.mxu0 %vm21978_vm1, %v25504_v25  ;;  %v114_v32 = vmul.f32 %v111_v52, %v106_v14 }
 0x14f   :  { %18704 = vmatprep.mubr.msk.f32.mxu1 %vm21978_vm1, %v25504_v25  ;;  %20391 = vmatpush3.bf16.msra.mxu0 %v22159_v17  ;;  %v22394_v17 = vsub.f32 %v22304_v20, %v22314_v45 }
 0x150   :  { %v124_v51 = vadd.f32 %v17630_v26, %v116_v35  ;;  %v84_v55 = vpop.permute.xlu1 %83  ;;  %20392 = vmatprep.subr.bf16.mxu0 %v25506_v16 }
 0x151   :  { %v92_v30 = vmul.f32 %v89_v46, %v84_v55  ;;  %v25523_v55 = vpack.c.bf16 %v22122_v58, %v22120_v57  ;;  %v960_v58 = vand.u32 4294901760, %v22394_v17 }
 0x152   :  { %v127_v61 = vmax.f32 %v124_v51, 0.0  ;;  %18705 = vmatmul.mubr.f32.gmra.mrb[10].mxu1 %v22288_v4 }
 0x153   :  { %v95_v33 = vadd.f32 %v92_v30, %v73_v39  ;;  %18715 = vmatprep.mubr.msk.f32.mxu1 %vm21978_vm1, %v25504_v25  ;;  %20394 = vmatpush3.bf16.msra.mxu0 %v22165_v29  ;;  %v22409_v29 = vsub.f32 %v22320_v44, %v22335_v19  ;;  %v22423_v44 = vsub.f32 %v22341_v47, %v22347_v2 }
 0x154   :  { %v143_v35 = vsel %vm138_vm2, %v127_v61, 0  ;;  %20395 = vmatprep.subr.bf16.mxu0 %v25506_v16  ;;  %v25524_v30 = vpack.c.bf16 %v22138_v1, %v22136_v0  ;;  %v25525_v0 = vand.u32 4294901760, %v22041_v22  ;;  %v25526_v1 = vand.u32 4294901760, %v22043_v23 }
 0x155   :  { %v22398_v37 = vand.u32 4294901760, %v143_v35  ;;  %v117_v46 = vadd.f32 %v114_v32, %v95_v33  ;;  %v22448_v51 = vpop.permute.xlu1 %1895  ;;  %v970_v33 = vand.u32 4294901760, %v22409_v29  ;;  %v25527_v22 = vand.u32 4294901760, %v22057_v27  ;;  %v1900_v27 = vpop.permute.xlu0 %1899 }
 0x156   :  { %18716 = vmatmul.mubr.f32.vlgmr.msra.gmra.mrb[12].mxu1 %v22394_v17  ;;  %v20444_v61 = vpack.c.bf16 %v25526_v1, %v25525_v0  ;;  %v25528_v23 = vand.u32 4294901760, %v22059_v28 }
 0x157   :  { %v125_v53 = vadd.f32 %v17630_v26, %v117_v46  ;;  %18718 = vmatprep.mubr.msk.f32.mxu1 %vm21978_vm1, %v25504_v25  ;;  %v22404_v52 = vsub.f32 %v143_v35, %v22398_v37  ;;  %20439 = vmatpush3.bf16.msra.mxu1 %v22028_v15 }
 0x158   :  { %20440 = vmatprep.subr.bf16.mxu1 %v25506_v16  ;;  %v20447_v35 = vpack.c.bf16 %v25528_v23, %v25527_v22 }
 0x159   :  { %v128_v20 = vmax.f32 %v125_v53, 0.0  ;;  %v229_v7 = vand.u32 4294901760, %v22404_v52  ;;  %v980_v53 = vand.u32 4294901760, %v22423_v44 }
 0x15a   :  { %18719 = vmatmul.mubr.f32.gmra.mrb[14].mxu1 %v22409_v29  ;;  %v1915_v39 = vpop.permute.xlu1 %1914 }
 0x15b   :  { %18721 = vmatprep.mubr.msk.f32.mxu1 %vm21978_vm1, %v25504_v25  ;;  %v230_v26 = vsub.f32 %v22404_v52, %v229_v7  ;;  %v146_v31 = vsel %vm138_vm2, %v128_v20, 0  ;;  %20442 = vmatpush3.bf16.msra.mxu1 %v22045_v24  ;;  %v1923_v20 = vpop.permute.xlu0 %1922 }
 0x15c   :  { %v22425_v3 = vand.u32 4294901760, %v146_v31  ;;  %20443 = vmatprep.subr.bf16.mxu1 %v25506_v16 }
 0x15d   :  { %v231_v59 = vand.u32 4294901760, %v230_v26 }
 0x15e   :  { %18722 = vmatmul.mubr.f32.gmra.mrb[16].mxu1 %v22423_v44  ;;  %v22430_v21 = vsub.f32 %v146_v31, %v22425_v3  ;;  %v1919_v57 = vpop.permute.xlu1 %1918 }
 0x15f   :  { %18547 = vmatmul.mubr.f32.gmra.mrb[2].mxu0 %v231_v59  ;;  %18724 = vmatprep.mubr.msk.f32.mxu1 %vm21978_vm1, %v25504_v25  ;;  %v1951_v59 = vpop.permute.xlu0 %1950 }
 0x160   :  { %18549 = vmatprep.mubr.msk.f32.mxu0 %vm21978_vm1, %v25504_v25  ;;  %v239_v47 = vand.u32 4294901760, %v22430_v21 }
 0x162   :  { %18725 = vmatmul.mubr.f32.gmra.mrb[0].mxu1 %v22213_v12  ;;  %v240_v34 = vsub.f32 %v22430_v21, %v239_v47 }
 0x163   :  { %18727 = vmatprep.mubr.msk.f32.mxu1 %vm21978_vm1, %v25504_v25  ;;  %v1904_v32 = vpop.permute.xlu1 %1903  ;;  %v1970_v23 = vpop.permute.xlu0 %1969 }
 0x164   :  { %v241_v14 = vand.u32 4294901760, %v240_v34 }
 0x166   :  { %18550 = vmatmul.mubr.f32.gmra.mrb[4].mxu0 %v241_v14  ;;  %18728 = vmatmul.mubr.f32.gmra.mrb[2].mxu1 %v22227_v13 }
 0x167   :  { %18560 = vmatprep.mubr.msk.f32.mxu0 %vm21978_vm1, %v25504_v25  ;;  %18730 = vmatprep.mubr.msk.f32.mxu1 %vm21978_vm1, %v25504_v25 }
 0x168   :  { %v1947_v46 = vpop.permute.xlu1 %1946 }
 0x16a   :  { %18561 = vmatmul.mubr.f32.vlgmr.msra.gmra.mrb[0].mxu0 %v22366_v10  ;;  %18731 = vmatmul.mubr.f32.gmra.mrb[4].mxu1 %v22249_v41 }
 0x16b   :  { %20397 = vmatpush3.bf16.msra.mxu0 %v25523_v55  ;;  %18563 = vmatprep.mubr.msk.f32.mxu0 %vm21978_vm1, %v25504_v25 }
 0x16c   :  { %18733 = vmatprep.mubr.msk.f32.mxu1 %vm21978_vm1, %v25504_v25  ;;  %20398 = vmatprep.subr.bf16.mxu0 %v25506_v16 }
 0x16d   :  { %v1962_v28 = vpop.permute.xlu1 %1961 }
 0x16e   :  { %18564 = vmatmul.mubr.f32.gmra.mrb[2].mxu0 %v22398_v37  ;;  %18734 = vmatmul.mubr.f32.gmra.mrb[6].mxu1 %v22262_v11 }
 0x16f   :  { %20400 = vmatpush3.bf16.msra.mxu0 %v25524_v30  ;;  %18566 = vmatprep.mubr.msk.f32.mxu0 %vm21978_vm1, %v25504_v25 }
 0x170   :  { %18736 = vmatprep.mubr.msk.f32.mxu1 %vm21978_vm1, %v25504_v25  ;;  %20401 = vmatprep.subr.bf16.mxu0 %v25506_v16 }
 0x171   :  { %v1966_v26 = vpop.permute.xlu1 %1965 }
 0x172   :  { %18567 = vmatmul.mubr.f32.gmra.mrb[4].mxu0 %v22425_v3  ;;  %18737 = vmatmul.mubr.f32.gmra.mrb[8].mxu1 %v22276_v6 }
 0x173   :  { %18577 = vmatprep.mubr.msk.f32.mxu0 %vm21978_vm1, %v25504_v25  ;;  %18739 = vmatprep.mubr.msk.f32.mxu1 %vm21978_vm1, %v25504_v25 }
 0x176   :  { %18578 = vmatmul.mubr.f32.vlgmr.msra.gmra.mrb[0].mxu0 %v22369_v49  ;;  %18740 = vmatmul.mubr.f32.gmra.mrb[10].mxu1 %v22296_v50  ;;  %v25529_v49 = vand.u32 4294901760, %v22213_v12  ;;  %v1955_v1 = vpop.permute.xlu1 %1954 }
 0x177   :  { %20403 = vmatpush3.bf16.msra.mxu0 %v22118_v56  ;;  %18580 = vmatprep.mubr.msk.f32.mxu0 %vm21978_vm1, %v25504_v25 }
 0x178   :  { %18750 = vmatprep.mubr.msk.f32.mxu1 %vm21978_vm1, %v25504_v25  ;;  %20404 = vmatprep.subr.bf16.mxu0 %v25506_v16 }
 0x17a   :  { %18581 = vmatmul.mubr.f32.gmra.mrb[2].mxu0 %v22404_v52  ;;  %18751 = vmatmul.mubr.f32.vlgmr.msra.gmra.mrb[12].mxu1 %v960_v58 }
 0x17b   :  { %20406 = vmatpush3.bf16.msra.mxu0 %v22134_v63  ;;  %18583 = vmatprep.mubr.msk.f32.mxu0 %vm21978_vm1, %v25504_v25 }
 0x17c   :  { %18753 = vmatprep.mubr.msk.f32.mxu1 %vm21978_vm1, %v25504_v25  ;;  %20407 = vmatprep.subr.bf16.mxu0 %v25506_v16 }
 0x17d   :  { %20445 = vmatpush3.bf16.msra.mxu1 %v20444_v61  ;;  %v1985_v61 = vld [vmem:[%s25485_s1 + $0x98] sm:$0xff] }
 0x17e   :  { %18584 = vmatmul.mubr.f32.gmra.mrb[4].mxu0 %v22430_v21  ;;  %18754 = vmatmul.mubr.f32.gmra.mrb[14].mxu1 %v970_v33  ;;  %v25531_v21 = vand.u32 4294901760, %v22249_v41  ;;  %v1984_v41 = vld [vmem:[%s25485_s1 + $0x90] sm:$0xff] }
 0x17f   :  { %18594 = vmatprep.mubr.msk.f32.mxu0 %vm21978_vm1, %v25504_v25  ;;  %18756 = vmatprep.mubr.msk.f32.mxu1 %vm21978_vm1, %v25504_v25 }
 0x180   :  { %20446 = vmatprep.subr.bf16.mxu1 %v25506_v16 }
 0x181   :  { %20448 = vmatpush3.bf16.msra.mxu1 %v20447_v35  ;;  %v2012_v35 = vand.u32 4294901760, %v1984_v41 }
 0x182   :  { %18595 = vmatmul.mubr.f32.vlgmr.msra.gmra.mrb[0].mxu0 %v219_v40  ;;  %18757 = vmatmul.mubr.f32.gmra.mrb[16].mxu1 %v980_v53 }
 0x183   :  { %20409 = vmatpush3.bf16.msra.mxu0 %v22207_v62  ;;  %18597 = vmatprep.mubr.msk.f32.mxu0 %vm21978_vm1, %v25504_v25  ;;  %v1892_v62 = vld [vmem:[%s25485_s1 + $0x80] sm:$0x3] }
 0x184   :  { %18759 = vmatprep.mubr.msk.f32.mxu1 %vm21978_vm1, %v25504_v25  ;;  %20410 = vmatprep.subr.bf16.mxu0 %v25506_v16  ;;  %v1928_v40 = vrot.slane %v1892_v62, %v22179_v38  ;;  %v1909_v12 = vrot.slane %v1892_v62, %v22182_v42 }
 0x185   :  { %20449 = vmatprep.subr.bf16.mxu1 %v25506_v16 }
 0x186   :  { %18598 = vmatmul.mubr.f32.gmra.mrb[2].mxu0 %v229_v7  ;;  %18760 = vmatmul.mubr.f32.gmra.mrb[0].mxu1 %v25529_v49  ;;  %v1929_v52 = vmul.f32 %v1928_v40, %v1915_v39  ;;  %v25530_v7 = vand.u32 4294901760, %v22227_v13  ;;  %v1930_v31 = vmul.f32 %v1928_v40, %v1919_v57  ;;  %v1912_v14 = vmul.f32 %v1909_v12, %v1904_v32 }
 0x187   :  { %20412 = vmatpush3.bf16.msra.mxu0 %v22215_v18  ;;  %18600 = vmatprep.mubr.msk.f32.mxu0 %vm21978_vm1, %v25504_v25  ;;  %v1910_v18 = vmul.f32 %v1909_v12, %v22448_v51  ;;  %v1911_v13 = vmul.f32 %v1909_v12, %v1900_v27  ;;  %v1931_v51 = vmul.f32 %v1928_v40, %v1923_v20  ;;  %v2015_v49 = vand.u32 4294901760, %v1985_v61 }
 0x188   :  { %18762 = vmatprep.mubr.msk.f32.mxu1 %vm21978_vm1, %v25504_v25  ;;  %20413 = vmatprep.subr.bf16.mxu0 %v25506_v16  ;;  %v1972_v39 = vmul.f32 %v1962_v28, %v1928_v40  ;;  %v1973_v0 = vmul.f32 %v1966_v26, %v1928_v40  ;;  %v1957_v32 = vmul.f32 %v1947_v46, %v1909_v12 }
 0x189   :  { %v1932_v34 = vadd.f32 %v1929_v52, %v1910_v18  ;;  %v1933_v55 = vadd.f32 %v1930_v31, %v1911_v13  ;;  %v1934_v57 = vadd.f32 %v1931_v51, %v1912_v14  ;;  %v1958_v22 = vmul.f32 %v1951_v59, %v1909_v12  ;;  %v1986_v59 = vld [vmem:[%s25485_s1 + $0xa0] sm:$0xff] }
 0x18a   :  { %18601 = vmatmul.mubr.f32.gmra.mrb[4].mxu0 %v239_v47  ;;  %18763 = vmatmul.mubr.f32.gmra.mrb[2].mxu1 %v25530_v7  ;;  %v17636_v47 = vld [vmem:[%s25485_s1 + $0x88] ss:$0 sm:$0xff]  ;;  %v1975_v27 = vadd.f32 %v1972_v39, %v1957_v32  ;;  %v1959_v28 = vmul.f32 %v1955_v1, %v1909_v12  ;;  %v22577_v52 = vsub.f32 %v1984_v41, %v2012_v35 }
 0x18b   :  { %18611 = vmatprep.mubr.msk.f32.mxu0 %vm21978_vm1, %v25504_v25  ;;  %18765 = vmatprep.mubr.msk.f32.mxu1 %vm21978_vm1, %v25504_v25  ;;  %v1939_v30 = vadd.f32 %v17636_v47, %v1932_v34  ;;  %v1941_v20 = vadd.f32 %v17636_v47, %v1934_v57  ;;  %v1976_v46 = vadd.f32 %v1973_v0, %v1958_v22 }
 0x18c   :  { %v1974_v7 = vmul.f32 %v1970_v23, %v1928_v40  ;;  %v22583_v18 = vsub.f32 %v1985_v61, %v2015_v49  ;;  %v1978_v26 = vadd.f32 %v17636_v47, %v1975_v27  ;;  %v2143_v13 = vand.u32 4294901760, %v22577_v52 }
 0x18d   :  { %v1942_v62 = vmax.f32 %v1939_v30, 0.0  ;;  %v1944_v34 = vmax.f32 %v1941_v20, 0.0  ;;  %v1979_v14 = vadd.f32 %v17636_v47, %v1976_v46  ;;  %v961_v22 = vsub.f32 %v22394_v17, %v960_v58 }
 0x18e   :  { %18612 = vmatmul.mubr.f32.vlgmr.msra.gmra.mrb[0].mxu0 %v22366_v10  ;;  %18766 = vmatmul.mubr.f32.gmra.mrb[4].mxu1 %v25531_v21  ;;  %v1977_v31 = vadd.f32 %v1974_v7, %v1959_v28  ;;  %v25534_v21 = vand.u32 4294901760, %v22296_v50  ;;  %v2150_v51 = vand.u32 4294901760, %v22583_v18  ;;  %v1981_v30 = vmax.f32 %v1978_v26, 0.0 }
 0x18f   :  { %20415 = vmatpush3.bf16.msra.mxu0 %v22118_v56  ;;  %18614 = vmatprep.mubr.msk.f32.mxu0 %vm21978_vm1, %v25504_v25  ;;  %v25532_v56 = vand.u32 4294901760, %v22262_v11  ;;  %v1940_v11 = vadd.f32 %v17636_v47, %v1933_v55  ;;  %v1994_v40 = vsel %vm138_vm2, %v1942_v62, 0  ;;  %v22603_v55 = vpack.c.bf16 %v2015_v49, %v2012_v35 }
 0x190   :  { %18768 = vmatprep.mubr.msk.f32.mxu1 %vm21978_vm1, %v25504_v25  ;;  %20416 = vmatprep.subr.bf16.mxu0 %v25506_v16  ;;  %v22605_v50 = vand.u32 4294901760, %v1994_v40  ;;  %v1980_v57 = vadd.f32 %v17636_v47, %v1977_v31  ;;  %v2000_v0 = vsel %vm138_vm2, %v1944_v34, 0  ;;  %v1982_v1 = vmax.f32 %v1979_v14, 0.0 }
 0x191   :  { %v1943_v12 = vmax.f32 %v1940_v11, 0.0  ;;  %v2151_v47 = vsub.f32 %v22583_v18, %v2150_v51  ;;  %v22632_v23 = vand.u32 4294901760, %v2000_v0  ;;  %v2003_v35 = vsel %vm138_vm2, %v1981_v30, 0 }
 0x192   :  { %18615 = vmatmul.mubr.f32.gmra.mrb[2].mxu0 %v22398_v37  ;;  %18769 = vmatmul.mubr.f32.gmra.mrb[6].mxu1 %v25532_v56  ;;  %v2144_v56 = vsub.f32 %v22577_v52, %v2143_v13  ;;  %v1983_v11 = vmax.f32 %v1980_v57, 0.0  ;;  %v22636_v27 = vsub.f32 %v1994_v40, %v22605_v50  ;;  %v2006_v28 = vsel %vm138_vm2, %v1982_v1, 0 }
 0x193   :  { %20418 = vmatpush3.bf16.msra.mxu0 %v22134_v63  ;;  %18617 = vmatprep.mubr.msk.f32.mxu0 %vm21978_vm1, %v25504_v25  ;;  %v25533_v63 = vand.u32 4294901760, %v22276_v6  ;;  %v1987_v6 = vld [vmem:[%s25485_s1 + $0xa8] sm:$0xff]  ;;  %v1997_v41 = vsel %vm138_vm2, %v1943_v12, 0  ;;  %v971_v17 = vsub.f32 %v22409_v29, %v970_v33  ;;  %v2152_v58 = vand.u32 4294901760, %v2151_v47 }
 0x194   :  { %18771 = vmatprep.mubr.msk.f32.mxu1 %vm21978_vm1, %v25504_v25  ;;  %20419 = vmatprep.subr.bf16.mxu0 %v25506_v16  ;;  %v2021_v39 = vand.u32 4294901760, %v1987_v6  ;;  %v2145_v49 = vand.u32 4294901760, %v2144_v56  ;;  %v22654_v20 = vand.u32 4294901760, %v2003_v35  ;;  %v962_v46 = vand.u32 4294901760, %v961_v22 }
 0x195   :  { %v22659_v7 = vand.u32 4294901760, %v2006_v28  ;;  %v2009_v12 = vsel %vm138_vm2, %v1983_v11, 0  ;;  %v2082_v29 = vand.u32 4294901760, %v22636_v27  ;;  %v22664_v33 = vsub.f32 %v2000_v0, %v22632_v23 }
 0x196   :  { %18618 = vmatmul.mubr.f32.gmra.mrb[4].mxu0 %v22425_v3  ;;  %18772 = vmatmul.mubr.f32.gmra.mrb[8].mxu1 %v25533_v63  ;;  %v22622_v32 = vsub.f32 %v1987_v6, %v2021_v39  ;;  %v972_v26 = vand.u32 4294901760, %v971_v17  ;;  %v20463_v31 = vpack.c.bf16 %v2152_v58, %v2145_v49  ;;  %v22678_v40 = vand.u32 4294901760, %v2009_v12 }
 0x197   :  { %18628 = vmatprep.mubr.msk.f32.mxu0 %vm21978_vm1, %v25504_v25  ;;  %18774 = vmatprep.mubr.msk.f32.mxu1 %vm21978_vm1, %v25504_v25  ;;  %v981_v34 = vsub.f32 %v22423_v44, %v980_v53  ;;  %v22687_v14 = vsub.f32 %v2003_v35, %v22654_v20 }
 0x198   :  { %v2164_v62 = vand.u32 4294901760, %v22622_v32  ;;  %v22708_v0 = vsub.f32 %v2009_v12, %v22678_v40  ;;  %v20471_v12 = vpack.c.bf16 %v22583_v18, %v22577_v52 }
 0x199   :  { %v2112_v57 = vand.u32 4294901760, %v22687_v14 }
 0x19a   :  { %18629 = vmatmul.mubr.f32.vlgmr.msra.gmra.mrb[0].mxu0 %v22366_v10  ;;  %18775 = vmatmul.mubr.f32.gmra.mrb[10].mxu1 %v25534_v21  ;;  %v2018_v10 = vand.u32 4294901760, %v1986_v59  ;;  %v2165_v6 = vsub.f32 %v22622_v32, %v2164_v62  ;;  %v2083_v21 = vsub.f32 %v22636_v27, %v2082_v29 }
 0x19b   :  { %20421 = vmatpush3.bf16.msra.mxu0 %v22028_v15  ;;  %18631 = vmatprep.mubr.msk.f32.mxu0 %vm21978_vm1, %v25504_v25  ;;  %v2113_v35 = vsub.f32 %v22687_v14, %v2112_v57 }
 0x19c   :  { %18785 = vmatprep.mubr.msk.f32.mxu1 %vm21978_vm1, %v25504_v25  ;;  %20422 = vmatprep.subr.bf16.mxu0 %v25506_v16  ;;  %v22620_v61 = vsub.f32 %v1986_v59, %v2018_v10  ;;  %v22656_v63 = vpack.c.bf16 %v2021_v39, %v2018_v10  ;;  %v2102_v10 = vand.u32 4294901760, %v22664_v33  ;;  %v22694_v39 = vsub.f32 %v2006_v28, %v22659_v7 }
 0x19d   :  { %v2166_v53 = vand.u32 4294901760, %v2165_v6  ;;  %v2084_v1 = vand.u32 4294901760, %v2083_v21  ;;  %v2132_v28 = vand.u32 4294901760, %v22708_v0  ;;  %v2114_v58 = vand.u32 4294901760, %v2113_v35 }
 0x19e   :  { %18632 = vmatmul.mubr.f32.gmra.mrb[2].mxu0 %v22398_v37  ;;  %18786 = vmatmul.mubr.f32.vlgmr.msra.gmra.mrb[12].mxu1 %v22314_v45  ;;  %v22624_v37 = vand.u32 4294901760, %v1997_v41  ;;  %v2103_v56 = vsub.f32 %v22664_v33, %v2102_v10  ;;  %v2122_v47 = vand.u32 4294901760, %v22694_v39 }
 0x19f   :  { %20424 = vmatpush3.bf16.msra.mxu0 %v22045_v24  ;;  %18634 = vmatprep.mubr.msk.f32.mxu0 %vm21978_vm1, %v25504_v25 }
 0x1a0   :  { %18788 = vmatprep.mubr.msk.f32.mxu1 %vm21978_vm1, %v25504_v25  ;;  %20456 = vmatprep.subr.bf16.mxu0 %v22603_v55  ;;  %v2104_v49 = vand.u32 4294901760, %v2103_v56  ;;  %v2123_v17 = vsub.f32 %v22694_v39, %v2122_v47 }
 0x1a1   :  { %20451 = vmatpush3.bf16.msra.mxu1 %v22028_v15  ;;  %v2157_v15 = vand.u32 4294901760, %v22620_v61 }
 0x1a2   :  { %18635 = vmatmul.mubr.f32.gmra.mrb[4].mxu0 %v22425_v3  ;;  %18789 = vmatmul.mubr.f32.gmra.mrb[14].mxu1 %v22335_v19  ;;  %v22652_v3 = vsub.f32 %v1997_v41, %v22624_v37  ;;  %v982_v41 = vand.u32 4294901760, %v981_v34 }
 0x1a3   :  { %18645 = vmatprep.mubr.msk.f32.mxu0 %vm21978_vm1, %v25504_v25  ;;  %18791 = vmatprep.mubr.msk.f32.mxu1 %vm21978_vm1, %v25504_v25  ;;  %v2158_v59 = vsub.f32 %v22620_v61, %v2157_v15 }
 0x1a4   :  { %20452 = vmatprep.subr.bf16.mxu1 %v25506_v16 }
 0x1a5   :  { %20454 = vmatpush3.bf16.msra.mxu1 %v22045_v24  ;;  %v2092_v24 = vand.u32 4294901760, %v22652_v3  ;;  %v2159_v44 = vand.u32 4294901760, %v2158_v59  ;;  %v20475_v59 = vpack.c.bf16 %v22622_v32, %v22620_v61 }
 0x1a6   :  { %18646 = vmatmul.mubr.f32.vlgmr.msra.gmra.mrb[6].mxu0 %v962_v46  ;;  %18792 = vmatmul.mubr.f32.gmra.mrb[16].mxu1 %v22347_v2  ;;  %v2133_v46 = vsub.f32 %v22708_v0, %v2132_v28 }
 0x1a7   :  { %20458 = vmatpush3.bf16.msra.mxu0 %v22603_v55  ;;  %18648 = vmatprep.mubr.msk.f32.mxu0 %vm21978_vm1, %v25504_v25  ;;  %v2093_v30 = vsub.f32 %v22652_v3, %v2092_v24  ;;  %v20467_v11 = vpack.c.bf16 %v2166_v53, %v2159_v44 }
 0x1a8   :  { %18794 = vmatprep.mubr.msk.f32.mxu1 %vm21978_vm1, %v25504_v25  ;;  %20460 = vmatprep.subr.bf16.mxu0 %v22656_v63 }
 0x1a9   :  { %20593 = vmatprep.subr.bf16.mxu1 %v25506_v16  ;;  %v2094_v22 = vand.u32 4294901760, %v2093_v30  ;;  %v17631_v30 = vld [vmem:[%s25485_s1 + $0x30] ss:$0 sm:$0xff] }
 0x1aa   :  { %18649 = vmatmul.mubr.f32.gmra.mrb[8].mxu0 %v972_v26  ;;  %18795 = vmatmul.mubr.f32.gmra.mrb[0].mxu1 %v22209_v8  ;;  %v2124_v26 = vand.u32 4294901760, %v2123_v17 }
 0x1ab   :  { %20462 = vmatpush3.bf16.msra.mxu0 %v22656_v63  ;;  %18651 = vmatprep.mubr.msk.f32.mxu0 %vm21978_vm1, %v25504_v25 }
 0x1ac   :  { %18797 = vmatprep.mubr.msk.f32.mxu1 %vm21978_vm1, %v25504_v25  ;;  %20464 = vmatprep.subr.bf16.mxu0 %v20463_v31 }
 0x1ae   :  { %18652 = vmatmul.mubr.f32.gmra.mrb[10].mxu0 %v982_v41  ;;  %18798 = vmatmul.mubr.f32.gmra.mrb[2].mxu1 %v22219_v43 }
 0x1af   :  { %18855 = vmatprep.mubr.f32.mxu0 %v2084_v1  ;;  %18800 = vmatprep.mubr.msk.f32.mxu1 %vm21978_vm1, %v25504_v25 }
 0x1b2   :  { %18801 = vmatmul.mubr.f32.gmra.mrb[4].mxu1 %v22241_v9  ;;  %18856 = vmatmul.mubr.f32.vlgmr.msra.gmra.mrb[12].mxu0 %v2094_v22 }
 0x1b3   :  { %20466 = vmatpush3.bf16.msra.mxu0 %v20463_v31  ;;  %18858 = vmatprep.mubr.f32.mxu0 %v2104_v49  ;;  %v2134_v31 = vand.u32 4294901760, %v2133_v46 }
 0x1b4   :  { %18803 = vmatprep.mubr.msk.f32.mxu1 %vm21978_vm1, %v25504_v25  ;;  %20468 = vmatprep.subr.bf16.mxu0 %v20467_v11 }
 0x1b6   :  { %18804 = vmatmul.mubr.f32.gmra.mrb[6].mxu1 %v22255_v48  ;;  %18859 = vmatmul.mubr.f32.gmra.mrb[14].mxu0 %v2114_v58 }
 0x1b7   :  { %18861 = vmatprep.mubr.f32.mxu0 %v2124_v26  ;;  %20470 = vmatpush3.bf16.msra.mxu0 %v20467_v11 }
 0x1b8   :  { %18806 = vmatprep.mubr.msk.f32.mxu1 %vm21978_vm1, %v25504_v25  ;;  %20472 = vmatprep.subr.bf16.mxu0 %v20471_v12 }
 0x1ba   :  { %18807 = vmatmul.mubr.f32.gmra.mrb[8].mxu1 %v22266_v60  ;;  %18862 = vmatmul.mubr.f32.gmra.mrb[16].mxu0 %v2134_v31 }
 0x1bb   :  { %18872 = vmatprep.mubr.f32.mxu0 %v22605_v50  ;;  %18809 = vmatprep.mubr.msk.f32.mxu1 %vm21978_vm1, %v25504_v25 }
 0x1be   :  { %18810 = vmatmul.mubr.f32.gmra.mrb[10].mxu1 %v22288_v4  ;;  %18873 = vmatmul.mubr.f32.vlgmr.msra.gmra.mrb[12].mxu0 %v22624_v37 }
 0x1bf   :  { %20474 = vmatpush3.bf16.msra.mxu0 %v20471_v12  ;;  %18875 = vmatprep.mubr.f32.mxu0 %v22632_v23 }
 0x1c0   :  { %18820 = vmatprep.mubr.msk.f32.mxu1 %vm21978_vm1, %v25504_v25  ;;  %20476 = vmatprep.subr.bf16.mxu0 %v20475_v59 }
 0x1c2   :  { %18821 = vmatmul.mubr.f32.vlgmr.msra.gmra.mrb[12].mxu1 %v22314_v45  ;;  %18876 = vmatmul.mubr.f32.gmra.mrb[14].mxu0 %v22654_v20  ;;  %v20487_v45 = vpack.c.bf16 %v2150_v51, %v2143_v13 }
 0x1c3   :  { %18878 = vmatprep.mubr.f32.mxu0 %v22659_v7  ;;  %20478 = vmatpush3.bf16.msra.mxu0 %v20475_v59 }
 0x1c4   :  { %18823 = vmatprep.mubr.msk.f32.mxu1 %vm21978_vm1, %v25504_v25  ;;  %20480 = vmatprep.subr.bf16.mxu0 %v22603_v55 }
 0x1c6   :  { %18824 = vmatmul.mubr.f32.gmra.mrb[14].mxu1 %v22335_v19  ;;  %18879 = vmatmul.mubr.f32.gmra.mrb[16].mxu0 %v22678_v40 }
 0x1c7   :  { %18889 = vmatprep.mubr.f32.mxu0 %v22636_v27  ;;  %18826 = vmatprep.mubr.msk.f32.mxu1 %vm21978_vm1, %v25504_v25 }
 0x1ca   :  { %18827 = vmatmul.mubr.f32.gmra.mrb[16].mxu1 %v22347_v2  ;;  %18890 = vmatmul.mubr.f32.vlgmr.msra.gmra.mrb[12].mxu0 %v22652_v3 }
 0x1cb   :  { %20482 = vmatpush3.bf16.msra.mxu0 %v22603_v55  ;;  %18892 = vmatprep.mubr.f32.mxu0 %v22664_v33 }
 0x1cc   :  { %18829 = vmatprep.mubr.msk.f32.mxu1 %vm21978_vm1, %v25504_v25  ;;  %20484 = vmatprep.subr.bf16.mxu0 %v22656_v63 }
 0x1ce   :  { %18830 = vmatmul.mubr.f32.gmra.mrb[0].mxu1 %v22209_v8  ;;  %18893 = vmatmul.mubr.f32.gmra.mrb[14].mxu0 %v22687_v14  ;;  %v20491_v8 = vpack.c.bf16 %v2164_v62, %v2157_v15 }
 0x1cf   :  { %18895 = vmatprep.mubr.f32.mxu0 %v22694_v39  ;;  %20486 = vmatpush3.bf16.msra.mxu0 %v22656_v63 }
 0x1d0   :  { %18832 = vmatprep.mubr.msk.f32.mxu1 %vm21978_vm1, %v25504_v25  ;;  %20488 = vmatprep.subr.bf16.mxu0 %v20487_v45 }
 0x1d2   :  { %18833 = vmatmul.mubr.f32.gmra.mrb[2].mxu1 %v22219_v43  ;;  %18896 = vmatmul.mubr.f32.gmra.mrb[16].mxu0 %v22708_v0 }
 0x1d3   :  { %18906 = vmatprep.mubr.f32.mxu0 %v2082_v29  ;;  %18835 = vmatprep.mubr.msk.f32.mxu1 %vm21978_vm1, %v25504_v25 }
 0x1d6   :  { %18836 = vmatmul.mubr.f32.gmra.mrb[4].mxu1 %v22241_v9  ;;  %18907 = vmatmul.mubr.f32.vlgmr.msra.gmra.mrb[12].mxu0 %v2092_v24 }
 0x1d7   :  { %20490 = vmatpush3.bf16.msra.mxu0 %v20487_v45  ;;  %18909 = vmatprep.mubr.f32.mxu0 %v2102_v10 }
 0x1d8   :  { %18838 = vmatprep.mubr.msk.f32.mxu1 %vm21978_vm1, %v25504_v25  ;;  %20492 = vmatprep.subr.bf16.mxu0 %v20491_v8 }
 0x1da   :  { %18839 = vmatmul.mubr.f32.gmra.mrb[6].mxu1 %v22255_v48  ;;  %18910 = vmatmul.mubr.f32.gmra.mrb[14].mxu0 %v2112_v57  ;;  %v22845_v57 = vld [vmem:[%s25485_s1 + $0xb0] ss:$0 sm:$0xff] }
 0x1db   :  { %18912 = vmatprep.mubr.f32.mxu0 %v2122_v47  ;;  %20494 = vmatpush3.bf16.msra.mxu0 %v20491_v8 }
 0x1dc   :  { %18841 = vmatprep.mubr.msk.f32.mxu1 %vm21978_vm1, %v25504_v25  ;;  %20496 = vmatprep.subr.bf16.mxu0 %v22603_v55 }
 0x1de   :  { %18842 = vmatmul.mubr.f32.gmra.mrb[8].mxu1 %v22266_v60  ;;  %18913 = vmatmul.mubr.f32.gmra.mrb[16].mxu0 %v2132_v28 }
 0x1df   :  { %18923 = vmatprep.mubr.f32.mxu0 %v22605_v50  ;;  %18844 = vmatprep.mubr.msk.f32.mxu1 %vm21978_vm1, %v25504_v25 }
 0x1e2   :  { %18845 = vmatmul.mubr.f32.gmra.mrb[10].mxu1 %v22288_v4  ;;  %18924 = vmatmul.mubr.f32.vlgmr.msra.gmra.mrb[12].mxu0 %v22624_v37 }
 0x1e3   :  { %20498 = vmatpush3.bf16.msra.mxu0 %v22603_v55  ;;  %18926 = vmatprep.mubr.f32.mxu0 %v22632_v23 }
 0x1e4   :  { %20500 = vmatprep.subr.bf16.mxu0 %v22656_v63  ;;  %19185 = vmatprep.mubr.msk.f32.mxu1 %vm21978_vm1, %v25504_v25 }
 0x1e6   :  { %18927 = vmatmul.mubr.f32.gmra.mrb[14].mxu0 %v22654_v20 }
 0x1e7   :  { %18929 = vmatprep.mubr.f32.mxu0 %v22659_v7  ;;  %20502 = vmatpush3.bf16.msra.mxu0 %v22656_v63 }
 0x1e8   :  { %20503 = vmatprep.subr.bf16.mxu0 %v25506_v16 }
 0x1ea   :  { %18930 = vmatmul.mubr.f32.gmra.mrb[16].mxu0 %v22678_v40 }
 0x1eb   :  { %18940 = vmatprep.mubr.f32.mxu0 %v22605_v50  ;;  %v22828_v50 = vld [vmem:[%s25485_s1 + $0x68] ss:$0 sm:$0xff] }
 0x1ee   :  { %18941 = vmatmul.mubr.f32.vlgmr.msra.gmra.mrb[12].mxu0 %v22624_v37 }
 0x1ef   :  { %18943 = vmatprep.mubr.f32.mxu0 %v22632_v23 }
 0x1f2   :  { %18944 = vmatmul.mubr.f32.gmra.mrb[14].mxu0 %v22654_v20 }
 0x1f3   :  { %18946 = vmatprep.mubr.f32.mxu0 %v22659_v7 }
 0x1f6   :  { %18947 = vmatmul.mubr.f32.gmra.mrb[16].mxu0 %v22678_v40 }
 0x1f7   :  { %18961 = vmatprep.mubr.msk.f32.mxu0 %vm21978_vm1, %v25504_v25 }
 0x26d   :  { %v703_v43 = vpop.f32.mrb[0].mxu0 }
 0x26e   :  { %v18630_v9 = vpop.f32.mrb[1].mxu0  ;;  %v21179_v0 = vadd.f32 %v17631_v30, %v703_v43 }
 0x270   :  { %v22850_v35 = vmax.f32 %v21179_v0, 0.0 }
 0x271   :  { %v709_v48 = vpop.f32.mrb[2].mxu0 }
 0x272   :  { %v18633_v60 = vpop.f32.mrb[3].mxu0  ;;  %v21180_v47 = vadd.f32 %v17631_v30, %v709_v48 }
 0x274   :  { %v22860_v12 = vmax.f32 %v21180_v47, 0.0 }
 0x275   :  { %v715_v4 = vpop.f32.mrb[4].mxu0 }
 0x276   :  { %v18636_v19 = vpop.f32.mrb[5].mxu0  ;;  %v21181_v60 = vadd.f32 %v17631_v30, %v715_v4 }
 0x279   :  { %v964_v2 = vpop.f32.mrb[6].mxu0 }
 0x27a   :  { %v18647_v52 = vpop.f32.mrb[7].mxu0  ;;  %v965_v61 = vadd.f32 %v22828_v50, %v964_v2 }
 0x27d   :  { %v974_v18 = vpop.f32.mrb[8].mxu0 }
 0x27e   :  { %v18650_v13 = vpop.f32.mrb[9].mxu0  ;;  %v975_v27 = vadd.f32 %v22828_v50, %v974_v18 }
 0x281   :  { %v984_v51 = vpop.f32.mrb[10].mxu0 }
 0x282   :  { %v18653_v55 = vpop.f32.mrb[11].mxu0  ;;  %v985_v20 = vadd.f32 %v22828_v50, %v984_v51 }
 0x295   :  { %v1666_v32 = vpop.f32.mrb[12].mxu1 }
 0x296   :  { %v22831_v37 = vadd.f32 %v1666_v32, %v965_v61  ;;  %v18822_v23 = vpop.f32.mrb[13].mxu1 }
 0x297   :  { %v22894_v23 = vmax.f32 %v21181_v60, 0.0 }
 0x298   :  { %v1718_v31 = vmax.f32 %v22831_v37, 0.0 }
 0x299   :  { %v1672_v15 = vpop.f32.mrb[14].mxu1 }
 0x29a   :  { %v22834_v62 = vadd.f32 %v1672_v15, %v975_v27  ;;  %v18825_v3 = vpop.f32.mrb[15].mxu1  ;;  %v1727_v51 = vmul.f32 %v1718_v31, %v22850_v35 }
 0x29c   :  { %v1719_v11 = vmax.f32 %v22834_v62, 0.0  ;;  %v1731_v3 = vsel %vm1730_vm3, %v1727_v51, 0.0 }
 0x29d   :  { %v1678_v63 = vpop.f32.mrb[16].mxu1 }
 0x29e   :  { %v22837_v7 = vadd.f32 %v1678_v63, %v985_v20  ;;  %v18828_v29 = vpop.f32.mrb[17].mxu1  ;;  %v1728_v48 = vmul.f32 %v1719_v11, %v22860_v12 }
 0x2a0   :  { %v1720_v52 = vmax.f32 %v22837_v7, 0.0  ;;  %v1734_v61 = vsel %vm1730_vm3, %v1728_v48, 0.0 }
 0x2a1   :  { %v1684_v33 = vpop.f32.mrb[0].mxu1 }
 0x2a2   :  { %v18831_v6 = vpop.f32.mrb[1].mxu1  ;;  %v22854_v28 = vadd.f32 %v22828_v50, %v1684_v33  ;;  %v1729_v20 = vmul.f32 %v1720_v52, %v22894_v23 }
 0x2a4   :  { %v1721_v45 = vmax.f32 %v22854_v28, 0.0 }
 0x2a5   :  { %v1690_v24 = vpop.f32.mrb[2].mxu1 }
 0x2a6   :  { %v18834_v40 = vpop.f32.mrb[3].mxu1  ;;  %v22880_v18 = vadd.f32 %v22828_v50, %v1690_v24  ;;  %v1743_v32 = vmul.f32 %v1721_v45, %v22850_v35 }
 0x2a8   :  { %v1722_v27 = vmax.f32 %v22880_v18, 0.0  ;;  %v1746_v33 = vsel %vm1730_vm3, %v1743_v32, 0.0 }
 0x2a9   :  { %v1696_v34 = vpop.f32.mrb[4].mxu1 }
 0x2aa   :  { %v18837_v14 = vpop.f32.mrb[5].mxu1  ;;  %v22869_v8 = vadd.f32 %v22828_v50, %v1696_v34  ;;  %v1737_v34 = vsel %vm1730_vm3, %v1729_v20, 0.0 }
 0x2ab   :  { %v1744_v14 = vmul.f32 %v1722_v27, %v22860_v12 }
 0x2ac   :  { %v1723_v55 = vmax.f32 %v22869_v8, 0.0 }
 0x2ad   :  { %v1702_v21 = vpop.f32.mrb[6].mxu1  ;;  %v1749_v0 = vsel %vm1730_vm3, %v1744_v14, 0.0 }
 0x2ae   :  { %v18840_v10 = vpop.f32.mrb[7].mxu1  ;;  %v22898_v15 = vadd.f32 %v22828_v50, %v1702_v21  ;;  %v1745_v6 = vmul.f32 %v1723_v55, %v22894_v23 }
 0x2b0   :  { %v1724_v24 = vmax.f32 %v22898_v15, 0.0 }
 0x2b1   :  { %v1708_v39 = vpop.f32.mrb[8].mxu1 }
 0x2b2   :  { %v18843_v44 = vpop.f32.mrb[9].mxu1  ;;  %v22888_v4 = vadd.f32 %v22828_v50, %v1708_v39  ;;  %v1752_v39 = vsel %vm1730_vm3, %v1745_v6, 0.0 }
 0x2b4   :  { %v1725_v63 = vmax.f32 %v22888_v4, 0.0 }
 0x2b5   :  { %v1714_v53 = vpop.f32.mrb[10].mxu1 }
 0x2b6   :  { %v18846_v41 = vpop.f32.mrb[11].mxu1  ;;  %v1759_v44 = vmul.f32 %v1725_v63, %v22860_v12 }
 0x2b7   :  { %v22929_v41 = vadd.f32 %v22828_v50, %v1714_v53 }
 0x2b8   :  { %v1764_v47 = vsel %vm1730_vm3, %v1759_v44, 0.0 }
 0x2b9   :  { %v25510_v50 = vmax.f32 %v22929_v41, 0.0  ;;  %v25535_v8 = vmax.f32 %v22929_v41, 0.0 }
 0x2c1   :  { %v18942_v1 = vpop.f32.mrb[12].mxu0 }
 0x2c2   :  { %v2677_v56 = vpop.f32.mrb[13].mxu0  ;;  %v22914_v40 = vadd.f32 %v18942_v1, %v22845_v57  ;;  %v1758_v1 = vmul.f32 %v1724_v24, %v22850_v35 }
 0x2c3   :  { %v22848_v22 = vadd.f32 %v22845_v57, %v2677_v56 }
 0x2c4   :  { %v2712_v30 = vmax.f32 %v22914_v40, 0.0 }
 0x2c5   :  { %v2711_v49 = vmax.f32 %v22848_v22, 0.0  ;;  %v18945_v17 = vpop.f32.mrb[14].mxu0 }
 0x2c6   :  { %v22858_v58 = vadd.f32 %v18945_v17, %v22845_v57  ;;  %v2689_v46 = vpop.f32.mrb[15].mxu0 }
 0x2c7   :  { %v2717_v26 = vmul.f32 %v2711_v49, %v22850_v35  ;;  %v22921_v21 = vadd.f32 %v22845_v57, %v2689_v46  ;;  %v1761_v46 = vsel %vm1730_vm3, %v1758_v1, 0.0 }
 0x2c8   :  { %v2714_v59 = vmax.f32 %v22858_v58, 0.0 }
 0x2c9   :  { %v18948_v43 = vpop.f32.mrb[16].mxu0  ;;  %v2720_v9 = vsel %vm1730_vm3, %v2717_v26, 0.0  ;;  %v25509_v56 = vmax.f32 %v22921_v21, 0.0  ;;  %v2718_v26 = vmul.f32 %v2712_v30, %v22860_v12  ;;  %v25536_v4 = vmax.f32 %v22921_v21, 0.0 }
 0x2ca   :  { %v2701_v19 = vpop.f32.mrb[17].mxu0  ;;  %2721 = vadd.xlane.f32.xlu0 %v2720_v9  ;;  %v2732_v2 = vmul.f32 %v2714_v59, %v22850_v35  ;;  %v22943_v53 = vadd.f32 %v18948_v43, %v22845_v57 }
 0x2cb   :  { %v22906_v29 = vadd.f32 %v22845_v57, %v2701_v19  ;;  %v2719_v48 = vmul.f32 %v25509_v56, %v22894_v23  ;;  %v2723_v19 = vsel %vm1730_vm3, %v2718_v26, 0.0  ;;  %v1760_v57 = vmul.f32 %v25510_v50, %v22894_v23 }
 0x2cc   :  { %v2735_v13 = vsel %vm1730_vm3, %v2732_v2, 0.0  ;;  %v25508_v60 = vmax.f32 %v22943_v53, 0.0 }
 0x2cd   :  { %2736 = vadd.xlane.f32.xlu1 %v2735_v13  ;;  %v2715_v10 = vmax.f32 %v22906_v29, 0.0  ;;  %v2726_v43 = vsel %vm1730_vm3, %v2719_v48, 0.0  ;;  %v1767_v2 = vsel %vm1730_vm3, %v1760_v57, 0.0 }
 0x2ce   :  { %1735 = vadd.xlane.f32.xlu0 %v1734_v61  ;;  %v2734_v13 = vmul.f32 %v25508_v60, %v22894_v23 }
 0x2cf   :  { %v2733_v17 = vmul.f32 %v2715_v10, %v22860_v12 }
 0x2d0   :  { %v2741_v51 = vsel %vm1730_vm3, %v2734_v13, 0.0 }
 0x2d1   :  { %1732 = vadd.xlane.f32.xlu1 %v1731_v3  ;;  %v2738_v9 = vsel %vm1730_vm3, %v2733_v17, 0.0 }
 0x2d2   :  { %1747 = vadd.xlane.f32.xlu0 %v1746_v33 }
 0x2d5   :  { %1738 = vadd.xlane.f32.xlu1 %v1737_v34 }
 0x2d6   :  { %1753 = vadd.xlane.f32.xlu0 %v1752_v39 }
 0x2d9   :  { %1750 = vadd.xlane.f32.xlu1 %v1749_v0 }
 0x2da   :  { %1765 = vadd.xlane.f32.xlu0 %v1764_v47 }
 0x2dd   :  { %1762 = vadd.xlane.f32.xlu1 %v1761_v46 }
 0x2de   :  { %2739 = vadd.xlane.f32.xlu0 %v2738_v9 }
 0x2e1   :  { %2724 = vadd.xlane.f32.xlu1 %v2723_v19 }
 0x2e2   :  { %2727 = vadd.xlane.f32.xlu0 %v2726_v43 }
 0x2e5   :  { %1768 = vadd.xlane.f32.xlu1 %v1767_v2 }
 0x2e9   :  { %2742 = vadd.xlane.f32.xlu1 %v2741_v51 }
 0x357   :  { %v2722_v61 = vpop.xlane.xlu0 %2721 }
 0x358   :  { %v2729_v3 = vmul.f32 0.25, %v2722_v61 }
 0x35a   :  { %v2737_v32 = vpop.xlane.xlu1 %2736 }
 0x35b   :  { %v2744_v20 = vmul.f32 0.25, %v2737_v32  ;;  %v1736_v33 = vpop.xlane.xlu0 %1735 }
 0x35c   :  { %v1741_v26 = vmul.f32 0.25, %v1736_v33 }
 0x35d   :  { %v2747_v6 = vmax.f32 %v2729_v3, %v2744_v20 }
 0x35e   :  { %v1733_v34 = vpop.xlane.xlu1 %1732 }
 0x35f   :  { %v1748_v14 = vpop.xlane.xlu0 %1747  ;;  %v2750_v39 = vsub.f32 %v2729_v3, %v2747_v6  ;;  %v2759_v44 = vsub.f32 %v2744_v20, %v2747_v6  ;;  %v1740_v9 = vmul.f32 0.25, %v1733_v34 }
 0x360   :  { %v1755_v48 = vmul.f32 0.25, %v1748_v14 }
 0x361   :  { %v2753_v47 = vmul.f32 1.442695, %v2750_v39  ;;  %v2762_v17 = vmul.f32 1.442695, %v2759_v44 }
 0x362   :  { %v1739_v0 = vpop.xlane.xlu1 %1738  ;;  %v1773_v51 = vmax.f32 %v1740_v9, %v1755_v48 }
 0x363   :  { %v1754_v1 = vpop.xlane.xlu0 %1753  ;;  %21837 = vpow2.f32 %v2753_v47  ;;  %v1742_v44 = vmul.f32 0.25, %v1739_v0 }
 0x364   :  { %21839 = vpow2.f32 %v2762_v17  ;;  %v1757_v16 = vmul.f32 0.25, %v1754_v1 }
 0x366   :  { %v1751_v46 = vpop.xlane.xlu1 %1750  ;;  %v1775_v0 = vmax.f32 %v1742_v44, %v1757_v16 }
 0x367   :  { %v1756_v19 = vmul.f32 0.25, %v1751_v46  ;;  %v1766_v57 = vpop.xlane.xlu0 %1765 }
 0x368   :  { %v1771_v43 = vmul.f32 0.25, %v1766_v57 }
 0x369   :  { %v1774_v2 = vmax.f32 %v1741_v26, %v1756_v19 }
 0x36a   :  { %v1763_v13 = vpop.xlane.xlu1 %1762 }
 0x36b   :  { %v1777_v61 = vmax.f32 %v1774_v2, %v1771_v43  ;;  %v1770_v32 = vmul.f32 0.25, %v1763_v13  ;;  %v2740_v39 = vpop.xlane.xlu0 %2739 }
 0x36c   :  { %v2745_v17 = vmul.f32 0.25, %v2740_v39 }
 0x36d   :  { %v1780_v3 = vsub.f32 %v1741_v26, %v1777_v61  ;;  %v1789_v20 = vsub.f32 %v1756_v19, %v1777_v61  ;;  %v1798_v6 = vsub.f32 %v1771_v43, %v1777_v61  ;;  %v1776_v25 = vmax.f32 %v1773_v51, %v1770_v32  ;;  %v21838_v2 = vpop.eup %21837 }
 0x36e   :  { %v2725_v33 = vpop.xlane.xlu1 %2724  ;;  %v21840_v51 = vpop.eup %21839 }
 0x36f   :  { %v1784_v34 = vmul.f32 1.442695, %v1780_v3  ;;  %v1793_v14 = vmul.f32 1.442695, %v1789_v20  ;;  %v1802_v46 = vmul.f32 1.442695, %v1798_v6  ;;  %v1779_v60 = vsub.f32 %v1740_v9, %v1776_v25  ;;  %v2728_v9 = vpop.xlane.xlu0 %2727 }
 0x370   :  { %v1788_v47 = vsub.f32 %v1755_v48, %v1776_v25  ;;  %v1797_v57 = vsub.f32 %v1770_v32, %v1776_v25  ;;  %v2730_v56 = vmul.f32 0.25, %v2725_v33  ;;  %v2777_v20 = vadd.f32 %v21840_v51, %v21838_v2 }
 0x371   :  { %21841 = vpow2.f32 %v1784_v34  ;;  %v1782_v50 = vmul.f32 1.442695, %v1779_v60 }
 0x372   :  { %21843 = vpow2.f32 %v1793_v14  ;;  %v1791_v26 = vmul.f32 1.442695, %v1788_v47  ;;  %v1800_v19 = vmul.f32 1.442695, %v1797_v57  ;;  %v2748_v43 = vmax.f32 %v2730_v56, %v2745_v17  ;;  %v1769_v13 = vpop.xlane.xlu1 %1768 }
 0x373   :  { %21845 = vpow2.f32 %v1802_v46  ;;  %v1772_v1 = vmul.f32 0.25, %v1769_v13  ;;  %v2731_v14 = vmul.f32 0.25, %v2728_v9 }
 0x374   :  { %21847 = vpow2.f32 %v1782_v50  ;;  %v2751_v61 = vsub.f32 %v2730_v56, %v2748_v43  ;;  %v2760_v3 = vsub.f32 %v2745_v17, %v2748_v43 }
 0x375   :  { %21849 = vpow2.f32 %v1791_v26  ;;  %v1778_v25 = vmax.f32 %v1775_v0, %v1772_v1 }
 0x376   :  { %21851 = vpow2.f32 %v1800_v19  ;;  %v2755_v48 = vmul.f32 1.442695, %v2751_v61  ;;  %v2764_v32 = vmul.f32 1.442695, %v2760_v3  ;;  %v2743_v60 = vpop.xlane.xlu1 %2742  ;;  %v2768_v61 = vmul.f32 %v21838_v2, %v2711_v49 }
 0x377   :  { %v1781_v6 = vsub.f32 %v1742_v44, %v1778_v25  ;;  %v1790_v39 = vsub.f32 %v1757_v16, %v1778_v25  ;;  %v1799_v33 = vsub.f32 %v1772_v1, %v1778_v25  ;;  %v2746_v34 = vmul.f32 0.25, %v2743_v60 }
 0x378   :  { %21853 = vpow2.f32 %v2755_v48  ;;  %v2771_v3 = vmul.f32 %v21840_v51, %v2714_v59 }
 0x379   :  { %21855 = vpow2.f32 %v2764_v32  ;;  %v1786_v46 = vmul.f32 1.442695, %v1781_v6  ;;  %v1795_v47 = vmul.f32 1.442695, %v1790_v39  ;;  %v1804_v50 = vmul.f32 1.442695, %v1799_v33 }
 0x37a   :  { %v2749_v56 = vmax.f32 %v2731_v14, %v2746_v34  ;;  %21857 = vrcp.f32 %v2777_v20  ;;  %v2774_v6 = vadd.f32 %v2771_v3, %v2768_v61 }
 0x37b   :  { %v21842_v57 = vpop.eup %21841  ;;  %21859 = vpow2.f32 %v1786_v46 }
 0x37c   :  { %v21844_v17 = vpop.eup %21843  ;;  %21861 = vpow2.f32 %v1795_v47  ;;  %v2752_v26 = vsub.f32 %v2731_v14, %v2749_v56  ;;  %v2761_v19 = vsub.f32 %v2746_v34, %v2749_v56  ;;  %v1807_v59 = vmul.f32 %v21842_v57, %v1719_v11 }
 0x37d   :  { %v21846_v43 = vpop.eup %21845  ;;  %v1816_v13 = vadd.f32 %v21844_v17, %v21842_v57  ;;  %21863 = vpow2.f32 %v1804_v50  ;;  %v1810_v2 = vmul.f32 %v21844_v17, %v1722_v27 }
 0x37e   :  { %v21848_v44 = vpop.eup %21847  ;;  %v2757_v16 = vmul.f32 1.442695, %v2752_v26  ;;  %v2766_v0 = vmul.f32 1.442695, %v2761_v19  ;;  %v1819_v15 = vmul.f32 %v21846_v43, %v1725_v63 }
 0x37f   :  { %v21850_v1 = vpop.eup %21849  ;;  %v1825_v9 = vadd.f32 %v21846_v43, %v1816_v13  ;;  %v1806_v22 = vmul.f32 %v21848_v44, %v1718_v31  ;;  %v1813_v31 = vadd.f32 %v1810_v2, %v1807_v59  ;;  %v25537_v43 = vmax.f32 %v22943_v53, 0.0 }
 0x380   :  { %v21852_v25 = vpop.eup %21851  ;;  %21865 = vpow2.f32 %v2757_v16  ;;  %v1815_v48 = vadd.f32 %v21850_v1, %v21848_v44  ;;  %v1809_v49 = vmul.f32 %v21850_v1, %v1721_v45 }
 0x381   :  { %21867 = vpow2.f32 %v2766_v0  ;;  %v1818_v28 = vmul.f32 %v21852_v25, %v1724_v24  ;;  %v1822_v19 = vadd.f32 %v1819_v15, %v1813_v31 }
 0x382   :  { %v21854_v32 = vpop.eup %21853  ;;  %v1824_v60 = vadd.f32 %v21852_v25, %v1815_v48  ;;  %21869 = vrcp.f32 %v1825_v9  ;;  %v1812_v50 = vadd.f32 %v1809_v49, %v1806_v22 }
 0x383   :  { %v21856_v20 = vpop.eup %21855  ;;  %v2769_v62 = vmul.f32 %v21854_v32, %v2712_v30 }
 0x384   :  { %v21858_v39 = vpop.eup %21857  ;;  %21871 = vrcp.f32 %v1824_v60  ;;  %v2778_v33 = vadd.f32 %v21856_v20, %v21854_v32  ;;  %v2772_v11 = vmul.f32 %v21856_v20, %v2715_v10  ;;  %v1821_v17 = vadd.f32 %v1818_v28, %v1812_v50 }
 0x385   :  { %v21860_v34 = vpop.eup %21859  ;;  %v2781_v14 = vmul.f32 %v21858_v39, %v2774_v6 }
 0x386   :  { %v21862_v58 = vpop.eup %21861  ;;  %21873 = vrcp.f32 %v2778_v33  ;;  %v1808_v45 = vmul.f32 %v21860_v34, %v1720_v52  ;;  %v2775_v30 = vadd.f32 %v2772_v11, %v2769_v62 }
 0x387   :  { %v2786_v51 = vsel %vm1730_vm3, %v2781_v14, 0.0  ;;  %v1817_v46 = vadd.f32 %v21862_v58, %v21860_v34  ;;  %v21864_v47 = vpop.eup %21863  ;;  %v1811_v18 = vmul.f32 %v21862_v58, %v1723_v55 }
 0x388   :  { %2787 = vadd.xlane.f32.xlu1 %v2786_v51  ;;  %v1820_v55 = vmul.f32 %v21864_v47, %v25535_v8 }
 0x389   :  { %v1826_v56 = vadd.f32 %v21864_v47, %v1817_v46  ;;  %v1814_v10 = vadd.f32 %v1811_v18, %v1808_v45 }
 0x38a   :  { %v21866_v37 = vpop.eup %21865 }
 0x38b   :  { %v21868_v26 = vpop.eup %21867  ;;  %21875 = vrcp.f32 %v1826_v56  ;;  %v2770_v63 = vmul.f32 %v21866_v37, %v25536_v4  ;;  %v1823_v0 = vadd.f32 %v1820_v55, %v1814_v10 }
 0x38c   :  { %v2779_v27 = vadd.f32 %v21868_v26, %v21866_v37  ;;  %v21870_v57 = vpop.eup %21869  ;;  %v2773_v16 = vmul.f32 %v21868_v26, %v25537_v43  ;;  %v23030_v43 = vld [vmem:[%s25485_s1 + $0xc0] ss:$0 sm:$0xff] }
 0x38d   :  { %v1830_v52 = vmul.f32 %v21870_v57, %v1822_v19 }
 0x38e   :  { %v21872_v24 = vpop.eup %21871  ;;  %21877 = vrcp.f32 %v2779_v27  ;;  %v2776_v9 = vadd.f32 %v2773_v16, %v2770_v63 }
 0x38f   :  { %v1828_v40 = vmul.f32 %v21872_v24, %v1821_v17  ;;  %v1836_v61 = vsel %vm1730_vm3, %v1830_v52, 0.0 }
 0x390   :  { %v21874_v29 = vpop.eup %21873 }
 0x391   :  { %v1833_v13 = vsel %vm1730_vm3, %v1828_v40, 0.0  ;;  %v2783_v7 = vmul.f32 %v21874_v29, %v2775_v30 }
 0x392   :  { %1834 = vadd.xlane.f32.xlu0 %v1833_v13 }
 0x393   :  { %v2789_v44 = vsel %vm1730_vm3, %v2783_v7, 0.0 }
 0x394   :  { %2790 = vadd.xlane.f32.xlu1 %v2789_v44  ;;  %v23025_v44 = vld [vmem:[%s25485_s1 + $0xb8] ss:$0 sm:$0xff] }
 0x395   :  { %v21876_v1 = vpop.eup %21875 }
 0x396   :  { %1837 = vadd.xlane.f32.xlu0 %v1836_v61  ;;  %v1832_v3 = vmul.f32 %v21876_v1, %v1823_v0 }
 0x398   :  { %v21878_v25 = vpop.eup %21877  ;;  %v1839_v41 = vsel %vm1730_vm3, %v1832_v3, 0.0 }
 0x399   :  { %v2785_v48 = vmul.f32 %v21878_v25, %v2776_v9 }
 0x39a   :  { %1840 = vadd.xlane.f32.xlu0 %v1839_v41 }
 0x39b   :  { %v2792_v32 = vsel %vm1730_vm3, %v2785_v48, 0.0 }
 0x39c   :  { %2793 = vadd.xlane.f32.xlu1 %v2792_v32 }
 0x415   :  { %v2788_v21 = vpop.xlane.xlu1 %2787 }
 0x416   :  { %v2795_v60 = vmul.f32 0.0625, %v2788_v21  ;;  %v17634_v21 = vld [vmem:[%s25485_s1 + $0x70] ss:$0 sm:$0xff] }
 0x418   :  { %v2798_v53 = vsub.f32 %v2781_v14, %v2795_v60 }
 0x41a   :  { %v2801_v20 = vmul.f32 %v2798_v53, %v2798_v53 }
 0x41c   :  { %v2804_v6 = vsel %vm1730_vm3, %v2801_v20, 0.0  ;;  %v2875_v20 = vld [vmem:[%s25485_s1 + $0xd0] sm:$0xff] }
 0x41d   :  { %2805 = vadd.xlane.f32.xlu1 %v2804_v6 }
 0x41f   :  { %v1835_v39 = vpop.xlane.xlu0 %1834 }
 0x420   :  { %v1843_v33 = vmul.f32 0.0625, %v1835_v39  ;;  %v17635_v39 = vld [vmem:[%s25485_s1 + $0x78] ss:$0 sm:$0xff] }
 0x421   :  { %v2791_v34 = vpop.xlane.xlu1 %2790 }
 0x422   :  { %v1846_v22 = vsub.f32 %v1828_v40, %v1843_v33  ;;  %v2796_v49 = vmul.f32 0.0625, %v2791_v34  ;;  %v2899_v34 = vand.u32 4294901760, %v2875_v20 }
 0x423   :  { %v1838_v58 = vpop.xlane.xlu0 %1837 }
 0x424   :  { %v23001_v59 = vsub.f32 %v2783_v7, %v2796_v49  ;;  %v1844_v2 = vmul.f32 0.0625, %v1838_v58  ;;  %v1849_v51 = vmul.f32 %v1846_v22, %v1846_v22 }
 0x426   :  { %v23003_v46 = vsub.f32 %v1830_v52, %v1844_v2  ;;  %v1852_v47 = vsel %vm1730_vm3, %v1849_v51, 0.0  ;;  %v2802_v14 = vmul.f32 %v23001_v59, %v23001_v59 }
 0x427   :  { %1853 = vadd.xlane.f32.xlu0 %v1852_v47  ;;  %v1841_v50 = vpop.xlane.xlu0 %1840 }
 0x428   :  { %v1845_v56 = vmul.f32 0.0625, %v1841_v50  ;;  %v2807_v37 = vsel %vm1730_vm3, %v2802_v14, 0.0  ;;  %v1850_v31 = vmul.f32 %v23003_v46, %v23003_v46  ;;  %v2876_v50 = vld [vmem:[%s25485_s1 + $0xd8] sm:$0xff] }
 0x429   :  { %2808 = vadd.xlane.f32.xlu1 %v2807_v37  ;;  %v2794_v26 = vpop.xlane.xlu1 %2793  ;;  %v2902_v37 = vand.u32 4294901760, %v2876_v50 }
 0x42a   :  { %v23011_v28 = vsub.f32 %v1832_v3, %v1845_v56  ;;  %v2797_v62 = vmul.f32 0.0625, %v2794_v26  ;;  %v1855_v11 = vsel %vm1730_vm3, %v1850_v31, 0.0  ;;  %v2877_v56 = vld [vmem:[%s25485_s1 + $0xe0] sm:$0xff] }
 0x42b   :  { %1856 = vadd.xlane.f32.xlu0 %v1855_v11 }
 0x42c   :  { %v23014_v45 = vsub.f32 %v2785_v48, %v2797_v62  ;;  %v1851_v18 = vmul.f32 %v23011_v28, %v23011_v28 }
 0x42e   :  { %v1858_v27 = vsel %vm1730_vm3, %v1851_v18, 0.0  ;;  %v2803_v57 = vmul.f32 %v23014_v45, %v23014_v45  ;;  %v25538_v18 = vmov 0.0|0.0  }
 0x42f   :  { %1859 = vadd.xlane.f32.xlu0 %v1858_v27  ;;  %v23063_v27 = vsub.f32 %v2875_v20, %v2899_v34 }
 0x430   :  { %v2810_v17 = vsel %vm1730_vm3, %v2803_v57, 0.0 }
 0x431   :  { %2811 = vadd.xlane.f32.xlu1 %v2810_v17  ;;  %v23067_v17 = vsub.f32 %v2876_v50, %v2902_v37 }
 0x4aa   :  { %v2806_v15 = vpop.xlane.xlu1 %2805 }
 0x4ab   :  { %v2813_v24 = vmul.f32 0.0625, %v2806_v15 }
 0x4ad   :  { %v2816_v40 = vadd.f32 1e-05, %v2813_v24 }
 0x4af   :  { %21879 = vrsqrt.f32 %v2816_v40 }
 0x4b4   :  { %v1854_v30 = vpop.xlane.xlu0 %1853 }
 0x4b5   :  { %v1861_v19 = vmul.f32 0.0625, %v1854_v30  ;;  %v2878_v30 = vld [vmem:[%s25485_s1 + $0xe8] sm:$0xff] }
 0x4b6   :  { %v2809_v29 = vpop.xlane.xlu1 %2808 }
 0x4b7   :  { %v1864_v10 = vadd.f32 1e-05, %v1861_v19  ;;  %v2814_v13 = vmul.f32 0.0625, %v2809_v29  ;;  %v2879_v19 = vld [vmem:[%s25485_s1 + $0xf0] sm:$0xff] }
 0x4b8   :  { %v1857_v7 = vpop.xlane.xlu0 %1856 }
 0x4b9   :  { %v21880_v52 = vpop.eup %21879  ;;  %21881 = vrsqrt.f32 %v1864_v10  ;;  %v2817_v8 = vadd.f32 1e-05, %v2814_v13  ;;  %v1862_v55 = vmul.f32 0.0625, %v1857_v7  ;;  %v2908_v10 = vand.u32 4294901760, %v2878_v30 }
 0x4ba   :  { %v2822_v4 = vmul.f32 %v21880_v52, %v2798_v53  ;;  %v2874_v53 = vld [vmem:[%s25485_s1 + $0xc8] sm:$0xff]  ;;  %v2911_v13 = vand.u32 4294901760, %v2879_v19  ;;  %v3006_v52 = vand.u32 4294901760, %v23063_v27 }
 0x4bb   :  { %21883 = vrsqrt.f32 %v2817_v8  ;;  %v1865_v63 = vadd.f32 1e-05, %v1862_v55  ;;  %v2896_v33 = vand.u32 4294901760, %v2874_v53 }
 0x4bc   :  { %v2830_v16 = vmul.f32 %v23025_v44, %v2822_v4  ;;  %v1860_v0 = vpop.xlane.xlu0 %1859 }
 0x4bd   :  { %21885 = vrsqrt.f32 %v1865_v63  ;;  %v1863_v1 = vmul.f32 0.0625, %v1860_v0  ;;  %v23060_v11 = vsub.f32 %v2874_v53, %v2896_v33  ;;  %v23084_v63 = vpack.c.bf16 %v2911_v13, %v2908_v10 }
 0x4be   :  { %v2838_v61 = vadd.f32 %v23030_v43, %v2830_v16  ;;  %v2812_v3 = vpop.xlane.xlu1 %2811  ;;  %v23086_v16 = vsub.f32 %v2878_v30, %v2908_v10  ;;  %v23088_v0 = vsub.f32 %v2879_v19, %v2911_v13 }
 0x4bf   :  { %v1866_v9 = vadd.f32 1e-05, %v1863_v1  ;;  %v2815_v25 = vmul.f32 0.0625, %v2812_v3  ;;  %v2999_v7 = vand.u32 4294901760, %v23060_v11 }
 0x4c0   :  { %v2841_v41 = vmax.f32 %v2838_v61, 0.0 }
 0x4c1   :  { %21887 = vrsqrt.f32 %v1866_v9  ;;  %v2818_v48 = vadd.f32 1e-05, %v2815_v25  ;;  %v3000_v1 = vsub.f32 %v23060_v11, %v2999_v7  ;;  %v3007_v9 = vsub.f32 %v23063_v27, %v3006_v52 }
 0x4c2   :  { %2859 = vrot.lane.b32.xlu1 %v2841_v41, %s21990_s3 }
 0x4c3   :  { %v21882_v32 = vpop.eup %21881  ;;  %21889 = vrsqrt.f32 %v2818_v48  ;;  %v3001_v25 = vand.u32 4294901760, %v3000_v1 }
 0x4c4   :  { %v1870_v60 = vmul.f32 %v21882_v32, %v1846_v22  ;;  %v23048_v22 = vpack.c.bf16 %v2899_v34, %v2896_v33  ;;  %v3027_v33 = vand.u32 4294901760, %v23086_v16  ;;  %v3034_v34 = vand.u32 4294901760, %v23088_v0 }
 0x4c5   :  { %v21884_v6 = vpop.eup %21883 }
 0x4c6   :  { %v1878_v49 = vmul.f32 %v17634_v21, %v1870_v60  ;;  %v2823_v58 = vmul.f32 %v21884_v6, %v23001_v59  ;;  %20505 = vmatpush3.bf16.msra.mxu0 %v23048_v22  ;;  %v2905_v59 = vand.u32 4294901760, %v2877_v56 }
 0x4c7   :  { %v21886_v2 = vpop.eup %21885  ;;  %20506 = vmatprep.subr.bf16.mxu0 %v25538_v18 }
 0x4c8   :  { %v1886_v51 = vadd.f32 %v17635_v39, %v1878_v49  ;;  %v2831_v47 = vmul.f32 %v23025_v44, %v2823_v58  ;;  %v1871_v14 = vmul.f32 %v21886_v2, %v23003_v46  ;;  %v23065_v57 = vpack.c.bf16 %v2905_v59, %v2902_v37 }
 0x4c9   :  { %v23069_v15 = vsub.f32 %v2877_v56, %v2905_v59  ;;  %v3028_v49 = vsub.f32 %v23086_v16, %v3027_v33  ;;  %v3035_v58 = vsub.f32 %v23088_v0, %v3034_v34  ;;  %v20528_v56 = vpack.c.bf16 %v23088_v0, %v23086_v16 }
 0x4ca   :  { %v1889_v31 = vmax.f32 %v1886_v51, 0.0  ;;  %v2839_v26 = vadd.f32 %v23030_v43, %v2831_v47  ;;  %v1879_v62 = vmul.f32 %v17634_v21, %v1871_v14  ;;  %20508 = vmatpush3.bf16.msra.mxu0 %v23065_v57  ;;  %v20522_v47 = vpack.c.bf16 %v23063_v27, %v23060_v11 }
 0x4cb   :  { %v21888_v46 = vpop.eup %21887  ;;  %20509 = vmatprep.subr.bf16.mxu0 %v25538_v18  ;;  %v3020_v41 = vand.u32 4294901760, %v23069_v15  ;;  %v3029_v2 = vand.u32 4294901760, %v3028_v49  ;;  %v3036_v51 = vand.u32 4294901760, %v3035_v58  ;;  %v20525_v50 = vpack.c.bf16 %v23069_v15, %v23067_v17 }
 0x4cc   :  { %2847 = vrot.lane.b32.xlu0 %v1889_v31, %s21991_s15  ;;  %v1887_v24 = vadd.f32 %v17635_v39, %v1879_v62  ;;  %v1872_v40 = vmul.f32 %v21888_v46, %v23011_v28  ;;  %v2842_v8 = vmax.f32 %v2839_v26, 0.0  ;;  %v23114_v37 = vpack.c.bf16 %v3006_v52, %v2999_v7 }
 0x4cd   :  { %v21890_v29 = vpop.eup %21889  ;;  %v3021_v53 = vsub.f32 %v23069_v15, %v3020_v41  ;;  %v20519_v14 = vpack.c.bf16 %v3036_v51, %v3029_v2  ;;  %v23118_v31 = vpack.c.bf16 %v3034_v34, %v3027_v33 }
 0x4ce   :  { %v1890_v55 = vmax.f32 %v1887_v24, 0.0  ;;  %v1880_v28 = vmul.f32 %v17634_v21, %v1872_v40  ;;  %v2824_v4 = vmul.f32 %v21890_v29, %v23014_v45  ;;  %v3013_v45 = vand.u32 4294901760, %v23067_v17  ;;  %20511 = vmatpush3.bf16.msra.mxu0 %v23084_v63 }
 0x4cf   :  { %20512 = vmatprep.subr.bf16.mxu0 %v25538_v18  ;;  %v3008_v21 = vand.u32 4294901760, %v3007_v9 }
 0x4d0   :  { %2861 = vrot.lane.b32.xlu0 %v2842_v8, %s21990_s3  ;;  %2849 = vrot.lane.b32.xlu1 %v1890_v55, %s21991_s15  ;;  %v1888_v61 = vadd.f32 %v17635_v39, %v1880_v28  ;;  %v2832_v3 = vmul.f32 %v23025_v44, %v2824_v4  ;;  %v3014_v60 = vsub.f32 %v23067_v17, %v3013_v45  ;;  %v3022_v39 = vand.u32 4294901760, %v3021_v53  ;;  %v3498_v53 = vld [vmem:[%s25485_s1 + $0x118] sm:$0xff] }
 0x4d1   :  { %v20513_v20 = vpack.c.bf16 %v3008_v21, %v3001_v25  ;;  %v23116_v59 = vpack.c.bf16 %v3020_v41, %v3013_v45 }
 0x4d2   :  { %v1891_v48 = vmax.f32 %v1888_v61, 0.0  ;;  %v2840_v32 = vadd.f32 %v23030_v43, %v2832_v3  ;;  %v3015_v6 = vand.u32 4294901760, %v3014_v60  ;;  %v25539_v3 = vmov 0.0   ;;  %v3497_v60 = vld [vmem:[%s25485_s1 + $0x110] sm:$0xff] }
 0x4d4   :  { %2851 = vrot.lane.b32.xlu1 %v1891_v48, %s21991_s15  ;;  %v2843_v44 = vmax.f32 %v2840_v32, 0.0  ;;  %v20516_v43 = vpack.c.bf16 %v3022_v39, %v3015_v6 }
 0x4d6   :  { %2863 = vrot.lane.b32.xlu0 %v2843_v44, %s21990_s3  ;;  %v3520_v44 = vand.u32 4294901760, %v3497_v60 }
 0x4d8   :  { %v23234_v34 = vsub.f32 %v3497_v60, %v3520_v44 }
 0x4da   :  { %v3629_v51 = vand.u32 4294901760, %v23234_v34 }
 0x534   :  { %v2860_v26 = vpop.permute.xlu1 %2859 }
 0x53e   :  { %v2848_v62 = vpop.permute.xlu0 %2847 }
 0x53f   :  { %v2868_v46 = vsel %vm1730_vm3, %v22850_v35, %v2848_v62 }
 0x540   :  { %v2871_v11 = vsel %vm138_vm2, %v2868_v46, %v2860_v26 }
 0x541   :  { %v2887_v27 = vsel %vm2885_vm4, %v2871_v11, 0 }
 0x542   :  { %v23124_v17 = vand.u32 4294901760, %v2887_v27  ;;  %v2850_v15 = vpop.permute.xlu1 %2849  ;;  %v2862_v24 = vpop.permute.xlu0 %2861 }
 0x543   :  { %v2869_v40 = vsel %vm1730_vm3, %v22860_v12, %v2850_v15  ;;  %v4088_v15 = vld [vmem:[%s25485_s1 + $0x130] sm:$0xff] }
 0x544   :  { %v2967_v30 = vsub.f32 %v2887_v27, %v23124_v17  ;;  %v2872_v19 = vsel %vm138_vm2, %v2869_v40, %v2862_v24  ;;  %v4089_v24 = vld [vmem:[%s25485_s1 + $0x138] sm:$0xff] }
 0x545   :  { %v2890_v29 = vsel %vm2885_vm4, %v2872_v19, 0  ;;  %v4090_v19 = vld [vmem:[%s25485_s1 + $0x140] sm:$0xff] }
 0x546   :  { %v2968_v10 = vand.u32 4294901760, %v2967_v30  ;;  %v23131_v13 = vand.u32 4294901760, %v2890_v29  ;;  %v2852_v35 = vpop.permute.xlu1 %2851 }
 0x547   :  { %v2870_v7 = vsel %vm1730_vm3, %v22894_v23, %v2852_v35 }
 0x548   :  { %v2969_v52 = vsub.f32 %v2967_v30, %v2968_v10  ;;  %v2977_v8 = vsub.f32 %v2890_v29, %v23131_v13  ;;  %v2864_v55 = vpop.permute.xlu0 %2863  ;;  %v4112_v29 = vand.u32 4294901760, %v4089_v24 }
 0x549   :  { %v2873_v28 = vsel %vm138_vm2, %v2870_v7, %v2864_v55 }
 0x54a   :  { %v2970_v12 = vand.u32 4294901760, %v2969_v52  ;;  %v2893_v4 = vsel %vm2885_vm4, %v2873_v28, 0  ;;  %v2978_v16 = vand.u32 4294901760, %v2977_v8  ;;  %v23272_v52 = vsub.f32 %v4089_v24, %v4112_v29  ;;  %v17640_v28 = vld [vmem:[%s25485_s1 + $0xf8] ss:$0 sm:$0xff] }
 0x54b   :  { %v23138_v0 = vand.u32 4294901760, %v2893_v4 }
 0x54c   :  { %18962 = vmatmul.mubr.f32.vlgmr.msra.gmra.mrb[18].mxu0 %v2970_v12  ;;  %v2979_v1 = vsub.f32 %v2977_v8, %v2978_v16 }
 0x54d   :  { %v2987_v61 = vsub.f32 %v2893_v4, %v23138_v0  ;;  %20514 = vmatpush3.bf16.msra.mxu0 %v20513_v20  ;;  %18964 = vmatprep.mubr.msk.f32.mxu0 %vm21978_vm1, %v25539_v3  ;;  %v3523_v20 = vand.u32 4294901760, %v3498_v53 }
 0x54e   :  { %v2980_v23 = vand.u32 4294901760, %v2979_v1  ;;  %20515 = vmatprep.subr.bf16.mxu0 %v25538_v18 }
 0x54f   :  { %v2988_v9 = vand.u32 4294901760, %v2987_v61  ;;  %v23232_v33 = vpack.c.bf16 %v3523_v20, %v3520_v44 }
 0x550   :  { %18965 = vmatmul.mubr.f32.gmra.mrb[20].mxu0 %v2980_v23 }
 0x551   :  { %20517 = vmatpush3.bf16.msra.mxu0 %v20516_v43  ;;  %18967 = vmatprep.mubr.msk.f32.mxu0 %vm21978_vm1, %v25539_v3  ;;  %v2989_v45 = vsub.f32 %v2987_v61, %v2988_v9  ;;  %v23236_v43 = vsub.f32 %v3498_v53, %v3523_v20 }
 0x552   :  { %20518 = vmatprep.subr.bf16.mxu0 %v25538_v18 }
 0x553   :  { %v2990_v25 = vand.u32 4294901760, %v2989_v45  ;;  %v20573_v46 = vpack.c.bf16 %v23236_v43, %v23234_v34 }
 0x555   :  { %18968 = vmatmul.mubr.f32.gmra.mrb[22].mxu0 %v2990_v25 }
 0x556   :  { %20520 = vmatpush3.bf16.msra.mxu0 %v20519_v14  ;;  %18982 = vmatprep.mubr.msk.f32.mxu0 %vm21978_vm1, %v25539_v3 }
 0x557   :  { %20521 = vmatprep.subr.bf16.mxu0 %v25538_v18 }
 0x559   :  { %18983 = vmatmul.mubr.f32.vlgmr.msra.gmra.mrb[18].mxu0 %v23124_v17 }
 0x55a   :  { %20523 = vmatpush3.bf16.msra.mxu0 %v20522_v47  ;;  %18985 = vmatprep.mubr.msk.f32.mxu0 %vm21978_vm1, %v25539_v3  ;;  %v3636_v47 = vand.u32 4294901760, %v23236_v43 }
 0x55b   :  { %20524 = vmatprep.subr.bf16.mxu0 %v25538_v18 }
 0x55c   :  { %v23252_v27 = vpack.c.bf16 %v3636_v47, %v3629_v51 }
 0x55d   :  { %18986 = vmatmul.mubr.f32.gmra.mrb[20].mxu0 %v23131_v13 }
 0x55e   :  { %20526 = vmatpush3.bf16.msra.mxu0 %v20525_v50  ;;  %18988 = vmatprep.mubr.msk.f32.mxu0 %vm21978_vm1, %v25539_v3  ;;  %v3630_v50 = vsub.f32 %v23234_v34, %v3629_v51 }
 0x55f   :  { %20527 = vmatprep.subr.bf16.mxu0 %v25538_v18 }
 0x561   :  { %18989 = vmatmul.mubr.f32.gmra.mrb[22].mxu0 %v23138_v0 }
 0x562   :  { %20529 = vmatpush3.bf16.msra.mxu0 %v20528_v56  ;;  %19003 = vmatprep.mubr.msk.f32.mxu0 %vm21978_vm1, %v25539_v3  ;;  %v3637_v56 = vsub.f32 %v23236_v43, %v3636_v47 }
 0x563   :  { %20530 = vmatprep.subr.bf16.mxu0 %v25538_v18 }
 0x565   :  { %19004 = vmatmul.mubr.f32.vlgmr.msra.gmra.mrb[18].mxu0 %v2967_v30  ;;  %v4109_v30 = vand.u32 4294901760, %v4088_v15 }
 0x566   :  { %20532 = vmatpush3.bf16.msra.mxu0 %v23048_v22  ;;  %19006 = vmatprep.mubr.msk.f32.mxu0 %vm21978_vm1, %v25539_v3 }
 0x567   :  { %20533 = vmatprep.subr.bf16.mxu0 %v25538_v18  ;;  %v23270_v7 = vsub.f32 %v4088_v15, %v4109_v30 }
 0x569   :  { %19007 = vmatmul.mubr.f32.gmra.mrb[20].mxu0 %v2977_v8 }
 0x56a   :  { %20535 = vmatpush3.bf16.msra.mxu0 %v23065_v57  ;;  %19009 = vmatprep.mubr.msk.f32.mxu0 %vm21978_vm1, %v25539_v3 }
 0x56b   :  { %20536 = vmatprep.subr.bf16.mxu0 %v25538_v18 }
 0x56d   :  { %19010 = vmatmul.mubr.f32.gmra.mrb[22].mxu0 %v2987_v61 }
 0x56e   :  { %20538 = vmatpush3.bf16.msra.mxu0 %v23084_v63  ;;  %19024 = vmatprep.mubr.msk.f32.mxu0 %vm21978_vm1, %v25539_v3 }
 0x56f   :  { %20539 = vmatprep.subr.bf16.mxu0 %v25538_v18 }
 0x571   :  { %19025 = vmatmul.mubr.f32.vlgmr.msra.gmra.mrb[18].mxu0 %v2968_v10  ;;  %v4115_v10 = vand.u32 4294901760, %v4090_v19 }
 0x572   :  { %20541 = vmatpush3.bf16.msra.mxu0 %v23114_v37  ;;  %19027 = vmatprep.mubr.msk.f32.mxu0 %vm21978_vm1, %v25539_v3 }
 0x573   :  { %20542 = vmatprep.subr.bf16.mxu0 %v25538_v18  ;;  %v23274_v8 = vsub.f32 %v4090_v19, %v4115_v10  ;;  %v23277_v55 = vpack.c.bf16 %v4115_v10, %v4112_v29  ;;  %v17641_v29 = vld [vmem:[%s25485_s1 + $0x120] ss:$0 sm:$0xff] }
 0x575   :  { %19028 = vmatmul.mubr.f32.gmra.mrb[20].mxu0 %v2978_v16 }
 0x576   :  { %20544 = vmatpush3.bf16.msra.mxu0 %v23116_v59  ;;  %19030 = vmatprep.mubr.msk.f32.mxu0 %vm21978_vm1, %v25539_v3  ;;  %v3631_v59 = vand.u32 4294901760, %v3630_v50 }
 0x577   :  { %20545 = vmatprep.subr.bf16.mxu0 %v25538_v18 }
 0x579   :  { %19031 = vmatmul.mubr.f32.gmra.mrb[22].mxu0 %v2988_v9 }
 0x57a   :  { %20547 = vmatpush3.bf16.msra.mxu0 %v23118_v31  ;;  %19045 = vmatprep.mubr.msk.f32.mxu0 %vm21978_vm1, %v25539_v3  ;;  %v3638_v31 = vand.u32 4294901760, %v3637_v56 }
 0x57b   :  { %20548 = vmatprep.subr.bf16.mxu0 %v25538_v18 }
 0x57c   :  { %v20567_v26 = vpack.c.bf16 %v3638_v31, %v3631_v59 }
 0x57d   :  { %19046 = vmatmul.mubr.f32.vlgmr.msra.gmra.mrb[18].mxu0 %v23124_v17 }
 0x57e   :  { %20550 = vmatpush3.bf16.msra.mxu0 %v23048_v22  ;;  %19048 = vmatprep.mubr.msk.f32.mxu0 %vm21978_vm1, %v25539_v3  ;;  %v3495_v22 = vld [vmem:[%s25485_s1 + $0x100] sm:$0xff] }
 0x57f   :  { %20551 = vmatprep.subr.bf16.mxu0 %v25538_v18 }
 0x581   :  { %19049 = vmatmul.mubr.f32.gmra.mrb[20].mxu0 %v23131_v13 }
 0x582   :  { %20553 = vmatpush3.bf16.msra.mxu0 %v23065_v57  ;;  %19051 = vmatprep.mubr.msk.f32.mxu0 %vm21978_vm1, %v25539_v3  ;;  %v3496_v57 = vld [vmem:[%s25485_s1 + $0x108] sm:$0xff] }
 0x583   :  { %20554 = vmatprep.subr.bf16.mxu0 %v25538_v18  ;;  %v3517_v41 = vand.u32 4294901760, %v3496_v57 }
 0x585   :  { %19052 = vmatmul.mubr.f32.gmra.mrb[22].mxu0 %v23138_v0  ;;  %v23220_v21 = vsub.f32 %v3496_v57, %v3517_v41 }
 0x586   :  { %20556 = vmatpush3.bf16.msra.mxu0 %v23084_v63  ;;  %19066 = vmatprep.mubr.msk.f32.mxu0 %vm21978_vm1, %v25539_v3  ;;  %v3514_v63 = vand.u32 4294901760, %v3495_v22 }
 0x587   :  { %20557 = vmatprep.subr.bf16.mxu0 %v25538_v18  ;;  %v3622_v39 = vand.u32 4294901760, %v23220_v21 }
 0x588   :  { %v23216_v48 = vpack.c.bf16 %v3517_v41, %v3514_v63  ;;  %v23218_v32 = vsub.f32 %v3495_v22, %v3514_v63 }
 0x589   :  { %19067 = vmatmul.mubr.f32.vlgmr.msra.gmra.mrb[18].mxu0 %v23124_v17  ;;  %v3623_v58 = vsub.f32 %v23220_v21, %v3622_v39  ;;  %v4087_v17 = vld [vmem:[%s25485_s1 + $0x128] sm:$0xff] }
 0x58a   :  { %19069 = vmatprep.mubr.msk.f32.mxu0 %vm21978_vm1, %v25539_v3  ;;  %20559 = vmatpush3.bf16.msra.mxu0 %v23216_v48  ;;  %v3615_v6 = vand.u32 4294901760, %v23218_v32  ;;  %v20570_v62 = vpack.c.bf16 %v23220_v21, %v23218_v32  ;;  %v4106_v40 = vand.u32 4294901760, %v4087_v17 }
 0x58b   :  { %20560 = vmatprep.subr.bf16.mxu0 %v25538_v18  ;;  %v3624_v14 = vand.u32 4294901760, %v3623_v58 }
 0x58c   :  { %v3616_v49 = vsub.f32 %v23218_v32, %v3615_v6  ;;  %v23250_v11 = vpack.c.bf16 %v3622_v39, %v3615_v6  ;;  %v23268_v35 = vsub.f32 %v4087_v17, %v4106_v40  ;;  %v4214_v32 = vand.u32 4294901760, %v23270_v7 }
 0x58d   :  { %19070 = vmatmul.mubr.f32.gmra.mrb[20].mxu0 %v23131_v13  ;;  %v23266_v13 = vpack.c.bf16 %v4109_v30, %v4106_v40  ;;  %v20609_v40 = vpack.c.bf16 %v23274_v8, %v23272_v52 }
 0x58e   :  { %19072 = vmatprep.mubr.msk.f32.mxu0 %vm21978_vm1, %v25539_v3  ;;  %20562 = vmatpush3.bf16.msra.mxu0 %v23232_v33  ;;  %v3617_v2 = vand.u32 4294901760, %v3616_v49  ;;  %v20606_v24 = vpack.c.bf16 %v23270_v7, %v23268_v35 }
 0x58f   :  { %20563 = vmatprep.subr.bf16.mxu0 %v25538_v18  ;;  %20595 = vmatpush3.bf16.msra.mxu1 %v23266_v13 }
 0x590   :  { %v20564_v37 = vpack.c.bf16 %v3624_v14, %v3617_v2  ;;  %20596 = vmatprep.subr.bf16.mxu1 %v25538_v18 }
 0x591   :  { %19073 = vmatmul.mubr.f32.gmra.mrb[22].mxu0 %v23138_v0 }
 0x592   :  { %19083 = vmatprep.mubr.msk.f32.mxu0 %vm21978_vm1, %v25539_v3 }
 0x593   :  { %20598 = vmatpush3.bf16.msra.mxu1 %v23277_v55 }
 0x594   :  { %20599 = vmatprep.subr.bf16.mxu1 %v25538_v18 }
 0x65c   :  { %v3476_v12 = vpop.f32.mrb[18].mxu0 }
 0x65d   :  { %v21200_v4 = vadd.f32 %v17640_v28, %v3476_v12  ;;  %v19068_v16 = vpop.f32.mrb[19].mxu0 }
 0x65f   :  { %v3492_v0 = vmax.f32 %v21200_v4, 0.0 }
 0x660   :  { %v3482_v1 = vpop.f32.mrb[20].mxu0 }
 0x661   :  { %v3505_v61 = vsel %vm138_vm2, %v3492_v0, 0  ;;  %v21201_v23 = vadd.f32 %v17640_v28, %v3482_v1  ;;  %v19071_v9 = vpop.f32.mrb[21].mxu0 }
 0x662   :  { %v23286_v45 = vand.u32 4294901760, %v3505_v61 }
 0x663   :  { %v3493_v25 = vmax.f32 %v21201_v23, 0.0 }
 0x664   :  { %v3583_v22 = vsub.f32 %v3505_v61, %v23286_v45  ;;  %v3488_v57 = vpop.f32.mrb[22].mxu0 }
 0x665   :  { %v3508_v63 = vsel %vm138_vm2, %v3493_v25, 0  ;;  %v21202_v41 = vadd.f32 %v17640_v28, %v3488_v57  ;;  %v19074_v60 = vpop.f32.mrb[23].mxu0 }
 0x666   :  { %v3584_v53 = vand.u32 4294901760, %v3583_v22  ;;  %v23290_v44 = vand.u32 4294901760, %v3508_v63 }
 0x667   :  { %v3494_v20 = vmax.f32 %v21202_v41, 0.0 }
 0x668   :  { %v3585_v6 = vsub.f32 %v3583_v22, %v3584_v53  ;;  %v3593_v39 = vsub.f32 %v3508_v63, %v23290_v44 }
 0x669   :  { %v3511_v49 = vsel %vm138_vm2, %v3494_v20, 0 }
 0x66a   :  { %v3586_v58 = vand.u32 4294901760, %v3585_v6  ;;  %v3602_v2 = vand.u32 4294901760, %v3511_v49  ;;  %v3594_v51 = vand.u32 4294901760, %v3593_v39 }
 0x66c   :  { %v3603_v47 = vsub.f32 %v3511_v49, %v3602_v2  ;;  %19084 = vmatmul.mubr.f32.vlgmr.msra.gmra.mrb[24].mxu0 %v3586_v58  ;;  %v3595_v14 = vsub.f32 %v3593_v39, %v3594_v51 }
 0x66d   :  { %20565 = vmatpush3.bf16.msra.mxu0 %v20564_v37  ;;  %19086 = vmatprep.mubr.msk.f32.mxu0 %vm21978_vm1, %v25539_v3  ;;  %v4221_v37 = vand.u32 4294901760, %v23272_v52 }
 0x66e   :  { %v3596_v50 = vand.u32 4294901760, %v3595_v14  ;;  %20566 = vmatprep.subr.bf16.mxu0 %v25538_v18  ;;  %v3604_v56 = vand.u32 4294901760, %v3603_v47 }
 0x670   :  { %19087 = vmatmul.mubr.f32.gmra.mrb[26].mxu0 %v3596_v50  ;;  %v3605_v59 = vsub.f32 %v3603_v47, %v3604_v56  ;;  %v4676_v50 = vld [vmem:[%s25485_s1 + $0x150] sm:$0xff] }
 0x671   :  { %20568 = vmatpush3.bf16.msra.mxu0 %v20567_v26  ;;  %19089 = vmatprep.mubr.msk.f32.mxu0 %vm21978_vm1, %v25539_v3  ;;  %v4228_v26 = vand.u32 4294901760, %v23274_v8 }
 0x672   :  { %v3606_v31 = vand.u32 4294901760, %v3605_v59  ;;  %20569 = vmatprep.subr.bf16.mxu0 %v25538_v18 }
 0x673   :  { %v23372_v19 = vpack.c.bf16 %v4228_v26, %v4221_v37 }
 0x674   :  { %19090 = vmatmul.mubr.f32.gmra.mrb[28].mxu0 %v3606_v31 }
 0x675   :  { %19100 = vmatprep.mubr.msk.f32.mxu0 %vm21978_vm1, %v25539_v3 }
 0x678   :  { %19101 = vmatmul.mubr.f32.vlgmr.msra.gmra.mrb[24].mxu0 %v23286_v45 }
 0x679   :  { %20571 = vmatpush3.bf16.msra.mxu0 %v20570_v62  ;;  %19103 = vmatprep.mubr.msk.f32.mxu0 %vm21978_vm1, %v25539_v3 }
 0x67a   :  { %20572 = vmatprep.subr.bf16.mxu0 %v25538_v18 }
 0x67c   :  { %19104 = vmatmul.mubr.f32.gmra.mrb[26].mxu0 %v23290_v44 }
 0x67d   :  { %20574 = vmatpush3.bf16.msra.mxu0 %v20573_v46  ;;  %19106 = vmatprep.mubr.msk.f32.mxu0 %vm21978_vm1, %v25539_v3  ;;  %v4222_v46 = vsub.f32 %v23272_v52, %v4221_v37 }
 0x67e   :  { %20575 = vmatprep.subr.bf16.mxu0 %v25538_v18 }
 0x680   :  { %19107 = vmatmul.mubr.f32.gmra.mrb[28].mxu0 %v3602_v2 }
 0x681   :  { %19117 = vmatprep.mubr.msk.f32.mxu0 %vm21978_vm1, %v25539_v3 }
 0x684   :  { %19118 = vmatmul.mubr.f32.vlgmr.msra.gmra.mrb[24].mxu0 %v3583_v22 }
 0x685   :  { %20577 = vmatpush3.bf16.msra.mxu0 %v23216_v48  ;;  %19120 = vmatprep.mubr.msk.f32.mxu0 %vm21978_vm1, %v25539_v3 }
 0x686   :  { %20578 = vmatprep.subr.bf16.mxu0 %v25538_v18 }
 0x688   :  { %19121 = vmatmul.mubr.f32.gmra.mrb[26].mxu0 %v3593_v39 }
 0x689   :  { %20580 = vmatpush3.bf16.msra.mxu0 %v23232_v33  ;;  %19123 = vmatprep.mubr.msk.f32.mxu0 %vm21978_vm1, %v25539_v3 }
 0x68a   :  { %20581 = vmatprep.subr.bf16.mxu0 %v25538_v18 }
 0x68c   :  { %19124 = vmatmul.mubr.f32.gmra.mrb[28].mxu0 %v3603_v47 }
 0x68d   :  { %19134 = vmatprep.mubr.msk.f32.mxu0 %vm21978_vm1, %v25539_v3 }
 0x690   :  { %19135 = vmatmul.mubr.f32.vlgmr.msra.gmra.mrb[24].mxu0 %v3584_v53 }
 0x691   :  { %20583 = vmatpush3.bf16.msra.mxu0 %v23250_v11  ;;  %19137 = vmatprep.mubr.msk.f32.mxu0 %vm21978_vm1, %v25539_v3  ;;  %v4229_v11 = vsub.f32 %v23274_v8, %v4228_v26 }
 0x692   :  { %20584 = vmatprep.subr.bf16.mxu0 %v25538_v18 }
 0x693   :  { %v4230_v17 = vand.u32 4294901760, %v4229_v11 }
 0x694   :  { %19138 = vmatmul.mubr.f32.gmra.mrb[26].mxu0 %v3594_v51 }
 0x695   :  { %20586 = vmatpush3.bf16.msra.mxu0 %v23252_v27  ;;  %19140 = vmatprep.mubr.msk.f32.mxu0 %vm21978_vm1, %v25539_v3  ;;  %v4223_v27 = vand.u32 4294901760, %v4222_v46 }
 0x696   :  { %20587 = vmatprep.subr.bf16.mxu0 %v25538_v18 }
 0x697   :  { %v20603_v15 = vpack.c.bf16 %v4230_v17, %v4223_v27 }
 0x698   :  { %19141 = vmatmul.mubr.f32.gmra.mrb[28].mxu0 %v3604_v56  ;;  %v4677_v56 = vld [vmem:[%s25485_s1 + $0x158] sm:$0xff] }
 0x699   :  { %19151 = vmatprep.mubr.msk.f32.mxu0 %vm21978_vm1, %v25539_v3 }
 0x69c   :  { %19152 = vmatmul.mubr.f32.vlgmr.msra.gmra.mrb[24].mxu0 %v23286_v45 }
 0x69d   :  { %20589 = vmatpush3.bf16.msra.mxu0 %v23216_v48  ;;  %19154 = vmatprep.mubr.msk.f32.mxu0 %vm21978_vm1, %v25539_v3  ;;  %v4207_v48 = vand.u32 4294901760, %v23268_v35 }
 0x69e   :  { %20590 = vmatprep.subr.bf16.mxu0 %v25538_v18 }
 0x69f   :  { %v4208_v21 = vsub.f32 %v23268_v35, %v4207_v48  ;;  %v23370_v30 = vpack.c.bf16 %v4214_v32, %v4207_v48 }
 0x6a0   :  { %19155 = vmatmul.mubr.f32.gmra.mrb[26].mxu0 %v23290_v44 }
 0x6a1   :  { %20592 = vmatpush3.bf16.msra.mxu0 %v23232_v33  ;;  %19157 = vmatprep.mubr.msk.f32.mxu0 %vm21978_vm1, %v25539_v3  ;;  %v4215_v33 = vsub.f32 %v23270_v7, %v4214_v32  ;;  %v4209_v34 = vand.u32 4294901760, %v4208_v21  ;;  %v4693_v32 = vand.u32 4294901760, %v4676_v50  ;;  %v4696_v21 = vand.u32 4294901760, %v4677_v56 }
 0x6a2   :  { %20629 = vmatprep.subr.bf16.mxu0 %v25538_v18 }
 0x6a3   :  { %v4216_v43 = vand.u32 4294901760, %v4215_v33  ;;  %v23463_v33 = vsub.f32 %v4676_v50, %v4693_v32  ;;  %v5790_v50 = vld [vmem:[%s25485_s1 + $0x188] sm:$0xff] }
 0x6a4   :  { %19158 = vmatmul.mubr.f32.gmra.mrb[28].mxu0 %v3602_v2 }
 0x6a5   :  { %19168 = vmatprep.mubr.msk.f32.mxu0 %vm21978_vm1, %v25539_v3  ;;  %v20600_v62 = vpack.c.bf16 %v4216_v43, %v4209_v34  ;;  %v23465_v34 = vpack.c.bf16 %v4696_v21, %v4693_v32  ;;  %v23467_v43 = vsub.f32 %v4677_v56, %v4696_v21  ;;  %v4792_v17 = vand.u32 4294901760, %v23463_v33 }
 0x6a8   :  { %19169 = vmatmul.mubr.f32.vlgmr.msra.gmra.mrb[24].mxu0 %v23286_v45 }
 0x6a9   :  { %19171 = vmatprep.mubr.msk.f32.mxu0 %vm21978_vm1, %v25539_v3  ;;  %20631 = vmatpush3.bf16.msra.mxu0 %v23465_v34 }
 0x6aa   :  { %20632 = vmatprep.subr.bf16.mxu0 %v25538_v18 }
 0x6ac   :  { %19172 = vmatmul.mubr.f32.gmra.mrb[26].mxu0 %v23290_v44 }
 0x6ad   :  { %19174 = vmatprep.mubr.msk.f32.mxu0 %vm21978_vm1, %v25539_v3 }
 0x6b0   :  { %19175 = vmatmul.mubr.f32.gmra.mrb[28].mxu0 %v3602_v2 }
 0x6b1   :  { %19283 = vmatprep.mubr.msk.f32.mxu0 %vm21978_vm1, %v25539_v3 }
 0x77b   :  { %v4068_v10 = vpop.f32.mrb[24].mxu0 }
 0x77c   :  { %v21203_v28 = vadd.f32 %v17641_v29, %v4068_v10  ;;  %v19170_v12 = vpop.f32.mrb[25].mxu0 }
 0x77d   :  { %v20636_v12 = vpack.c.bf16 %v23467_v43, %v23463_v33 }
 0x77e   :  { %v4084_v4 = vmax.f32 %v21203_v28, 0.0 }
 0x77f   :  { %v4074_v16 = vpop.f32.mrb[26].mxu0 }
 0x780   :  { %v4097_v0 = vsel %vm138_vm2, %v4084_v4, 0  ;;  %v21204_v1 = vadd.f32 %v17641_v29, %v4074_v16  ;;  %v19173_v35 = vpop.f32.mrb[27].mxu0 }
 0x781   :  { %v23378_v7 = vand.u32 4294901760, %v4097_v0 }
 0x782   :  { %v4085_v52 = vmax.f32 %v21204_v1, 0.0 }
 0x783   :  { %v4175_v8 = vsub.f32 %v4097_v0, %v23378_v7  ;;  %v4080_v61 = vpop.f32.mrb[28].mxu0  ;;  %v17642_v0 = vld [vmem:[%s25485_s1 + $0x148] ss:$0 sm:$0xff] }
 0x784   :  { %v4100_v23 = vsel %vm138_vm2, %v4085_v52, 0  ;;  %v21205_v9 = vadd.f32 %v17641_v29, %v4080_v61  ;;  %v19176_v45 = vpop.f32.mrb[29].mxu0 }
 0x785   :  { %v4176_v25 = vand.u32 4294901760, %v4175_v8  ;;  %v23382_v22 = vand.u32 4294901760, %v4100_v23 }
 0x786   :  { %v4086_v57 = vmax.f32 %v21205_v9, 0.0 }
 0x787   :  { %v4177_v63 = vsub.f32 %v4175_v8, %v4176_v25  ;;  %v4185_v41 = vsub.f32 %v4100_v23, %v23382_v22 }
 0x788   :  { %v4103_v60 = vsel %vm138_vm2, %v4086_v57, 0 }
 0x789   :  { %v4178_v53 = vand.u32 4294901760, %v4177_v63  ;;  %v4194_v44 = vand.u32 4294901760, %v4103_v60  ;;  %v4186_v20 = vand.u32 4294901760, %v4185_v41 }
 0x78b   :  { %v4195_v6 = vsub.f32 %v4103_v60, %v4194_v44  ;;  %19186 = vmatmul.mubr.f32.vlgmr.msra.gmra.mrb[18].mxu1 %v4178_v53  ;;  %v4187_v39 = vsub.f32 %v4185_v41, %v4186_v20 }
 0x78c   :  { %20601 = vmatpush3.bf16.msra.mxu1 %v20600_v62  ;;  %19188 = vmatprep.mubr.msk.f32.mxu1 %vm21978_vm1, %v25539_v3 }
 0x78d   :  { %v4188_v49 = vand.u32 4294901760, %v4187_v39  ;;  %20602 = vmatprep.subr.bf16.mxu1 %v25538_v18  ;;  %v4196_v58 = vand.u32 4294901760, %v4195_v6 }
 0x78f   :  { %19189 = vmatmul.mubr.f32.gmra.mrb[20].mxu1 %v4188_v49  ;;  %v4197_v2 = vsub.f32 %v4195_v6, %v4196_v58 }
 0x790   :  { %20604 = vmatpush3.bf16.msra.mxu1 %v20603_v15  ;;  %19191 = vmatprep.mubr.msk.f32.mxu1 %vm21978_vm1, %v25539_v3  ;;  %v4799_v15 = vand.u32 4294901760, %v23467_v43 }
 0x791   :  { %v4198_v51 = vand.u32 4294901760, %v4197_v2  ;;  %20605 = vmatprep.subr.bf16.mxu1 %v25538_v18 }
 0x792   :  { %v23486_v16 = vpack.c.bf16 %v4799_v15, %v4792_v17 }
 0x793   :  { %19192 = vmatmul.mubr.f32.gmra.mrb[22].mxu1 %v4198_v51 }
 0x794   :  { %19202 = vmatprep.mubr.msk.f32.mxu1 %vm21978_vm1, %v25539_v3 }
 0x797   :  { %19203 = vmatmul.mubr.f32.vlgmr.msra.gmra.mrb[18].mxu1 %v23378_v7 }
 0x798   :  { %20607 = vmatpush3.bf16.msra.mxu1 %v20606_v24  ;;  %19205 = vmatprep.mubr.msk.f32.mxu1 %vm21978_vm1, %v25539_v3 }
 0x799   :  { %20608 = vmatprep.subr.bf16.mxu1 %v25538_v18 }
 0x79b   :  { %19206 = vmatmul.mubr.f32.gmra.mrb[20].mxu1 %v23382_v22 }
 0x79c   :  { %20610 = vmatpush3.bf16.msra.mxu1 %v20609_v40  ;;  %19208 = vmatprep.mubr.msk.f32.mxu1 %vm21978_vm1, %v25539_v3  ;;  %v4793_v40 = vsub.f32 %v23463_v33, %v4792_v17  ;;  %v17643_v17 = vld [vmem:[%s25485_s1 + $0x160] ss:$0 sm:$0xff] }
 0x79d   :  { %20611 = vmatprep.subr.bf16.mxu1 %v25538_v18 }
 0x79f   :  { %19209 = vmatmul.mubr.f32.gmra.mrb[22].mxu1 %v4194_v44 }
 0x7a0   :  { %19219 = vmatprep.mubr.msk.f32.mxu1 %vm21978_vm1, %v25539_v3 }
 0x7a3   :  { %19220 = vmatmul.mubr.f32.vlgmr.msra.gmra.mrb[18].mxu1 %v4175_v8 }
 0x7a4   :  { %20613 = vmatpush3.bf16.msra.mxu1 %v23266_v13  ;;  %19222 = vmatprep.mubr.msk.f32.mxu1 %vm21978_vm1, %v25539_v3 }
 0x7a5   :  { %20614 = vmatprep.subr.bf16.mxu1 %v25538_v18 }
 0x7a7   :  { %19223 = vmatmul.mubr.f32.gmra.mrb[20].mxu1 %v4185_v41 }
 0x7a8   :  { %20616 = vmatpush3.bf16.msra.mxu1 %v23277_v55  ;;  %19225 = vmatprep.mubr.msk.f32.mxu1 %vm21978_vm1, %v25539_v3 }
 0x7a9   :  { %20617 = vmatprep.subr.bf16.mxu1 %v25538_v18 }
 0x7ab   :  { %19226 = vmatmul.mubr.f32.gmra.mrb[22].mxu1 %v4195_v6 }
 0x7ac   :  { %19236 = vmatprep.mubr.msk.f32.mxu1 %vm21978_vm1, %v25539_v3 }
 0x7af   :  { %19237 = vmatmul.mubr.f32.vlgmr.msra.gmra.mrb[18].mxu1 %v4176_v25 }
 0x7b0   :  { %20619 = vmatpush3.bf16.msra.mxu1 %v23370_v30  ;;  %19239 = vmatprep.mubr.msk.f32.mxu1 %vm21978_vm1, %v25539_v3  ;;  %v4800_v30 = vsub.f32 %v23467_v43, %v4799_v15 }
 0x7b1   :  { %20620 = vmatprep.subr.bf16.mxu1 %v25538_v18 }
 0x7b2   :  { %v4801_v29 = vand.u32 4294901760, %v4800_v30 }
 0x7b3   :  { %19240 = vmatmul.mubr.f32.gmra.mrb[20].mxu1 %v4186_v20 }
 0x7b4   :  { %20622 = vmatpush3.bf16.msra.mxu1 %v23372_v19  ;;  %19242 = vmatprep.mubr.msk.f32.mxu1 %vm21978_vm1, %v25539_v3  ;;  %v4794_v19 = vand.u32 4294901760, %v4793_v40 }
 0x7b5   :  { %20623 = vmatprep.subr.bf16.mxu1 %v25538_v18 }
 0x7b6   :  { %v20633_v10 = vpack.c.bf16 %v4801_v29, %v4794_v19 }
 0x7b7   :  { %19243 = vmatmul.mubr.f32.gmra.mrb[22].mxu1 %v4196_v58 }
 0x7b8   :  { %19253 = vmatprep.mubr.msk.f32.mxu1 %vm21978_vm1, %v25539_v3 }
 0x7bb   :  { %19254 = vmatmul.mubr.f32.vlgmr.msra.gmra.mrb[18].mxu1 %v23378_v7 }
 0x7bc   :  { %20625 = vmatpush3.bf16.msra.mxu1 %v23266_v13  ;;  %19256 = vmatprep.mubr.msk.f32.mxu1 %vm21978_vm1, %v25539_v3  ;;  %v5237_v13 = vld [vmem:[%s25485_s1 + $0x168] sm:$0xff] }
 0x7bd   :  { %20626 = vmatprep.subr.bf16.mxu1 %v25538_v18  ;;  %v5245_v47 = vand.u32 4294901760, %v5237_v13 }
 0x7bf   :  { %19257 = vmatmul.mubr.f32.gmra.mrb[20].mxu1 %v23382_v22  ;;  %v23458_v31 = vsub.f32 %v5237_v13, %v5245_v47 }
 0x7c0   :  { %20628 = vmatpush3.bf16.msra.mxu1 %v23277_v55  ;;  %19259 = vmatprep.mubr.msk.f32.mxu1 %vm21978_vm1, %v25539_v3  ;;  %v5238_v55 = vld [vmem:[%s25485_s1 + $0x170] sm:$0xff] }
 0x7c1   :  { %20647 = vmatprep.subr.bf16.mxu1 %v25538_v18  ;;  %v5248_v14 = vand.u32 4294901760, %v5238_v55  ;;  %v5344_v37 = vand.u32 4294901760, %v23458_v31 }
 0x7c3   :  { %19260 = vmatmul.mubr.f32.gmra.mrb[22].mxu1 %v4194_v44  ;;  %v23456_v59 = vpack.c.bf16 %v5248_v14, %v5245_v47  ;;  %v23460_v48 = vsub.f32 %v5238_v55, %v5248_v14  ;;  %v5345_v62 = vsub.f32 %v23458_v31, %v5344_v37  ;;  %v5789_v14 = vld [vmem:[%s25485_s1 + $0x180] sm:$0xff] }
 0x7c4   :  { %19270 = vmatprep.mubr.msk.f32.mxu1 %vm21978_vm1, %v25539_v3  ;;  %v5797_v56 = vand.u32 4294901760, %v5789_v14 }
 0x7c5   :  { %v5351_v26 = vand.u32 4294901760, %v23460_v48  ;;  %v5346_v11 = vand.u32 4294901760, %v5345_v62  ;;  %v20654_v28 = vpack.c.bf16 %v23460_v48, %v23458_v31  ;;  %v5800_v31 = vand.u32 4294901760, %v5790_v50 }
 0x7c7   :  { %19271 = vmatmul.mubr.f32.vlgmr.msra.gmra.mrb[18].mxu1 %v23378_v7  ;;  %v5352_v46 = vsub.f32 %v23460_v48, %v5351_v26  ;;  %v23484_v4 = vpack.c.bf16 %v5351_v26, %v5344_v37  ;;  %v5902_v48 = vsub.f32 %v5790_v50, %v5800_v31  ;;  %v20666_v33 = vpack.c.bf16 %v5800_v31, %v5797_v56 }
 0x7c8   :  { %19273 = vmatprep.mubr.msk.f32.mxu1 %vm21978_vm1, %v25539_v3  ;;  %20649 = vmatpush3.bf16.msra.mxu1 %v23456_v59 }
 0x7c9   :  { %20650 = vmatprep.subr.bf16.mxu1 %v25538_v18  ;;  %v5353_v27 = vand.u32 4294901760, %v5352_v46  ;;  %v5903_v21 = vand.u32 4294901760, %v5902_v48 }
 0x7cb   :  { %19274 = vmatmul.mubr.f32.gmra.mrb[20].mxu1 %v23382_v22  ;;  %v20651_v24 = vpack.c.bf16 %v5353_v27, %v5346_v11  ;;  %v5904_v43 = vsub.f32 %v5902_v48, %v5903_v21  ;;  %v17644_v27 = vld [vmem:[%s25485_s1 + $0x178] ss:$0 sm:$0xff] }
 0x7cc   :  { %19276 = vmatprep.mubr.msk.f32.mxu1 %vm21978_vm1, %v25539_v3 }
 0x7cd   :  { %v5905_v26 = vand.u32 4294901760, %v5904_v43  ;;  %v23790_v43 = vsub.s32 4, %v22173_v36 }
 0x7cf   :  { %19277 = vmatmul.mubr.f32.gmra.mrb[22].mxu1 %v4194_v44 }
 0x7d0   :  { %19361 = vmatprep.mubr.msk.f32.mxu1 %vm21978_vm1, %v25539_v3 }
 0x89a   :  { %v4660_v1 = vpop.f32.mrb[18].mxu1 }
 0x89b   :  { %v23491_v35 = vadd.f32 %v17642_v0, %v4660_v1  ;;  %v19272_v7 = vpop.f32.mrb[19].mxu1 }
 0x89d   :  { %25540 = vst [vmem:[#allocation3_spill] sm:$0xff] %v23491_v35  ;;  %v4684_v52 = vsel %vm1730_vm3, %v23491_v35, 0 }
 0x89e   :  { %v23495_v8 = vand.u32 4294901760, %v4684_v52  ;;  %v4666_v61 = vpop.f32.mrb[20].mxu1 }
 0x89f   :  { %v21207_v23 = vadd.f32 %v17642_v0, %v4666_v61  ;;  %v19275_v9 = vpop.f32.mrb[21].mxu1 }
 0x8a0   :  { %v23498_v45 = vsub.f32 %v4684_v52, %v23495_v8 }
 0x8a1   :  { %v4687_v25 = vsel %vm1730_vm3, %v21207_v23, 0 }
 0x8a2   :  { %v23502_v22 = vand.u32 4294901760, %v23498_v45  ;;  %v23504_v57 = vand.u32 4294901760, %v4687_v25  ;;  %v4672_v63 = vpop.f32.mrb[22].mxu1 }
 0x8a3   :  { %v21208_v41 = vadd.f32 %v17642_v0, %v4672_v63  ;;  %v19278_v60 = vpop.f32.mrb[23].mxu1 }
 0x8a4   :  { %v23507_v53 = vsub.f32 %v4687_v25, %v23504_v57  ;;  %v4762_v44 = vsub.f32 %v23498_v45, %v23502_v22 }
 0x8a5   :  { %v4690_v20 = vsel %vm1730_vm3, %v21208_v41, 0 }
 0x8a6   :  { %v23512_v6 = vand.u32 4294901760, %v4690_v20  ;;  %v23514_v39 = vand.u32 4294901760, %v4762_v44  ;;  %v23517_v49 = vand.u32 4294901760, %v23507_v53 }
 0x8a8   :  { %v23520_v58 = vsub.f32 %v4690_v20, %v23512_v6  ;;  %19284 = vmatmul.mubr.f32.vlgmr.msra.gmra.mrb[30].mxu0 %v23514_v39  ;;  %19362 = vmatmul.mubr.f32.vlgmr.msra.gmra.mrb[24].mxu1 %v23514_v39  ;;  %v4772_v2 = vsub.f32 %v23507_v53, %v23517_v49 }
 0x8a9   :  { %20652 = vmatpush3.bf16.msra.mxu1 %v20651_v24  ;;  %19286 = vmatprep.mubr.msk.f32.mxu0 %vm21978_vm1, %v25539_v3 }
 0x8aa   :  { %19364 = vmatprep.mubr.msk.f32.mxu1 %vm21978_vm1, %v25539_v3  ;;  %v23530_v51 = vand.u32 4294901760, %v4772_v2  ;;  %20634 = vmatpush3.bf16.msra.mxu0 %v20633_v10  ;;  %v23533_v13 = vand.u32 4294901760, %v23520_v58 }
 0x8ab   :  { %20653 = vmatprep.subr.bf16.mxu1 %v25538_v18  ;;  %20635 = vmatprep.subr.bf16.mxu0 %v25538_v18 }
 0x8ac   :  { %19287 = vmatmul.mubr.f32.gmra.mrb[32].mxu0 %v23530_v51  ;;  %19365 = vmatmul.mubr.f32.gmra.mrb[26].mxu1 %v23530_v51  ;;  %v4782_v55 = vsub.f32 %v23520_v58, %v23533_v13 }
 0x8ad   :  { %19289 = vmatprep.mubr.msk.f32.mxu0 %vm21978_vm1, %v25539_v3  ;;  %19367 = vmatprep.mubr.msk.f32.mxu1 %vm21978_vm1, %v25539_v3 }
 0x8ae   :  { %v23545_v47 = vand.u32 4294901760, %v4782_v55 }
 0x8b0   :  { %19290 = vmatmul.mubr.f32.gmra.mrb[34].mxu0 %v23545_v47  ;;  %19368 = vmatmul.mubr.f32.gmra.mrb[28].mxu1 %v23545_v47 }
 0x8b1   :  { %19296 = vmatprep.mubr.msk.f32.mxu0 %vm21978_vm1, %v25539_v3  ;;  %19374 = vmatprep.mubr.msk.f32.mxu1 %vm21978_vm1, %v25539_v3 }
 0x8b4   :  { %19297 = vmatmul.mubr.f32.vlgmr.msra.gmra.mrb[30].mxu0 %v23495_v8  ;;  %19375 = vmatmul.mubr.f32.vlgmr.msra.gmra.mrb[24].mxu1 %v23495_v8 }
 0x8b5   :  { %20655 = vmatpush3.bf16.msra.mxu1 %v20654_v28  ;;  %19299 = vmatprep.mubr.msk.f32.mxu0 %vm21978_vm1, %v25539_v3 }
 0x8b6   :  { %19377 = vmatprep.mubr.msk.f32.mxu1 %vm21978_vm1, %v25539_v3  ;;  %20637 = vmatpush3.bf16.msra.mxu0 %v20636_v12 }
 0x8b7   :  { %20656 = vmatprep.subr.bf16.mxu1 %v25538_v18  ;;  %20638 = vmatprep.subr.bf16.mxu0 %v25538_v18 }
 0x8b8   :  { %19300 = vmatmul.mubr.f32.gmra.mrb[32].mxu0 %v23504_v57  ;;  %19378 = vmatmul.mubr.f32.gmra.mrb[26].mxu1 %v23504_v57 }
 0x8b9   :  { %19302 = vmatprep.mubr.msk.f32.mxu0 %vm21978_vm1, %v25539_v3  ;;  %19380 = vmatprep.mubr.msk.f32.mxu1 %vm21978_vm1, %v25539_v3 }
 0x8bc   :  { %19303 = vmatmul.mubr.f32.gmra.mrb[34].mxu0 %v23512_v6  ;;  %19381 = vmatmul.mubr.f32.gmra.mrb[28].mxu1 %v23512_v6 }
 0x8bd   :  { %19309 = vmatprep.mubr.msk.f32.mxu0 %vm21978_vm1, %v25539_v3  ;;  %19387 = vmatprep.mubr.msk.f32.mxu1 %vm21978_vm1, %v25539_v3 }
 0x8c0   :  { %19310 = vmatmul.mubr.f32.vlgmr.msra.gmra.mrb[30].mxu0 %v23498_v45  ;;  %19388 = vmatmul.mubr.f32.vlgmr.msra.gmra.mrb[24].mxu1 %v23498_v45 }
 0x8c1   :  { %20658 = vmatpush3.bf16.msra.mxu1 %v23456_v59  ;;  %19312 = vmatprep.mubr.msk.f32.mxu0 %vm21978_vm1, %v25539_v3 }
 0x8c2   :  { %19390 = vmatprep.mubr.msk.f32.mxu1 %vm21978_vm1, %v25539_v3  ;;  %20640 = vmatpush3.bf16.msra.mxu0 %v23465_v34 }
 0x8c3   :  { %20659 = vmatprep.subr.bf16.mxu1 %v25538_v18  ;;  %20641 = vmatprep.subr.bf16.mxu0 %v25538_v18 }
 0x8c4   :  { %19313 = vmatmul.mubr.f32.gmra.mrb[32].mxu0 %v23507_v53  ;;  %19391 = vmatmul.mubr.f32.gmra.mrb[26].mxu1 %v23507_v53 }
 0x8c5   :  { %19315 = vmatprep.mubr.msk.f32.mxu0 %vm21978_vm1, %v25539_v3  ;;  %19393 = vmatprep.mubr.msk.f32.mxu1 %vm21978_vm1, %v25539_v3 }
 0x8c8   :  { %19316 = vmatmul.mubr.f32.gmra.mrb[34].mxu0 %v23520_v58  ;;  %19394 = vmatmul.mubr.f32.gmra.mrb[28].mxu1 %v23520_v58 }
 0x8c9   :  { %19322 = vmatprep.mubr.msk.f32.mxu0 %vm21978_vm1, %v25539_v3  ;;  %19400 = vmatprep.mubr.msk.f32.mxu1 %vm21978_vm1, %v25539_v3 }
 0x8cc   :  { %19323 = vmatmul.mubr.f32.vlgmr.msra.gmra.mrb[30].mxu0 %v23502_v22  ;;  %19401 = vmatmul.mubr.f32.vlgmr.msra.gmra.mrb[24].mxu1 %v23502_v22 }
 0x8cd   :  { %20661 = vmatpush3.bf16.msra.mxu1 %v23484_v4  ;;  %19325 = vmatprep.mubr.msk.f32.mxu0 %vm21978_vm1, %v25539_v3 }
 0x8ce   :  { %19403 = vmatprep.mubr.msk.f32.mxu1 %vm21978_vm1, %v25539_v3  ;;  %20643 = vmatpush3.bf16.msra.mxu0 %v23486_v16 }
 0x8cf   :  { %20662 = vmatprep.subr.bf16.mxu1 %v25538_v18  ;;  %20644 = vmatprep.subr.bf16.mxu0 %v25538_v18 }
 0x8d0   :  { %19326 = vmatmul.mubr.f32.gmra.mrb[32].mxu0 %v23517_v49  ;;  %19404 = vmatmul.mubr.f32.gmra.mrb[26].mxu1 %v23517_v49 }
 0x8d1   :  { %19328 = vmatprep.mubr.msk.f32.mxu0 %vm21978_vm1, %v25539_v3  ;;  %19406 = vmatprep.mubr.msk.f32.mxu1 %vm21978_vm1, %v25539_v3 }
 0x8d4   :  { %19329 = vmatmul.mubr.f32.gmra.mrb[34].mxu0 %v23533_v13  ;;  %19407 = vmatmul.mubr.f32.gmra.mrb[28].mxu1 %v23533_v13 }
 0x8d5   :  { %19335 = vmatprep.mubr.msk.f32.mxu0 %vm21978_vm1, %v25539_v3  ;;  %19413 = vmatprep.mubr.msk.f32.mxu1 %vm21978_vm1, %v25539_v3 }
 0x8d8   :  { %19336 = vmatmul.mubr.f32.vlgmr.msra.gmra.mrb[30].mxu0 %v23495_v8  ;;  %19414 = vmatmul.mubr.f32.vlgmr.msra.gmra.mrb[24].mxu1 %v23495_v8 }
 0x8d9   :  { %20664 = vmatpush3.bf16.msra.mxu1 %v23456_v59  ;;  %19338 = vmatprep.mubr.msk.f32.mxu0 %vm21978_vm1, %v25539_v3  ;;  %v5895_v59 = vsub.f32 %v5789_v14, %v5797_v56 }
 0x8da   :  { %19416 = vmatprep.mubr.msk.f32.mxu1 %vm21978_vm1, %v25539_v3  ;;  %20646 = vmatpush3.bf16.msra.mxu0 %v23465_v34 }
 0x8db   :  { %20665 = vmatprep.subr.bf16.mxu0 %v25538_v18  ;;  %v5896_v32 = vand.u32 4294901760, %v5895_v59  ;;  %v20672_v46 = vpack.c.bf16 %v5902_v48, %v5895_v59 }
 0x8dc   :  { %19339 = vmatmul.mubr.f32.gmra.mrb[32].mxu0 %v23504_v57  ;;  %19417 = vmatmul.mubr.f32.gmra.mrb[26].mxu1 %v23504_v57 }
 0x8dd   :  { %19341 = vmatprep.mubr.msk.f32.mxu0 %vm21978_vm1, %v25539_v3  ;;  %19419 = vmatprep.mubr.msk.f32.mxu1 %vm21978_vm1, %v25539_v3  ;;  %v5897_v34 = vsub.f32 %v5895_v59, %v5896_v32  ;;  %v20678_v11 = vpack.c.bf16 %v5903_v21, %v5896_v32 }
 0x8df   :  { %v5898_v37 = vand.u32 4294901760, %v5897_v34 }
 0x8e0   :  { %19342 = vmatmul.mubr.f32.gmra.mrb[34].mxu0 %v23512_v6  ;;  %19420 = vmatmul.mubr.f32.gmra.mrb[28].mxu1 %v23512_v6 }
 0x8e1   :  { %19348 = vmatprep.mubr.msk.f32.mxu0 %vm21978_vm1, %v25539_v3  ;;  %19426 = vmatprep.mubr.msk.f32.mxu1 %vm21978_vm1, %v25539_v3  ;;  %v20669_v62 = vpack.c.bf16 %v5905_v26, %v5898_v37 }
 0x8e4   :  { %19349 = vmatmul.mubr.f32.vlgmr.msra.gmra.mrb[30].mxu0 %v23495_v8  ;;  %19427 = vmatmul.mubr.f32.vlgmr.msra.gmra.mrb[24].mxu1 %v23495_v8 }
 0x8e5   :  { %19351 = vmatprep.mubr.msk.f32.mxu0 %vm21978_vm1, %v25539_v3  ;;  %19429 = vmatprep.mubr.msk.f32.mxu1 %vm21978_vm1, %v25539_v3 }
 0x8e6   :  { %20667 = vmatpush3.bf16.msra.mxu0 %v20666_v33 }
 0x8e7   :  { %20668 = vmatprep.subr.bf16.mxu0 %v25538_v18 }
 0x8e8   :  { %19352 = vmatmul.mubr.f32.gmra.mrb[32].mxu0 %v23504_v57  ;;  %19430 = vmatmul.mubr.f32.gmra.mrb[26].mxu1 %v23504_v57 }
 0x8e9   :  { %19354 = vmatprep.mubr.msk.f32.mxu0 %vm21978_vm1, %v25539_v3  ;;  %19432 = vmatprep.mubr.msk.f32.mxu1 %vm21978_vm1, %v25539_v3 }
 0x8ec   :  { %19355 = vmatmul.mubr.f32.gmra.mrb[34].mxu0 %v23512_v6  ;;  %19433 = vmatmul.mubr.f32.gmra.mrb[28].mxu1 %v23512_v6 }
 0x8ed   :  { %19439 = vmatprep.mubr.msk.f32.mxu0 %vm21978_vm1, %v25539_v3 }
 0x8f0   :  { %19440 = vmatmul.mubr.f32.vlgmr.msra.gmra.mrb[36].mxu0 %v23514_v39 }
 0x8f1   :  { %19442 = vmatprep.mubr.msk.f32.mxu0 %vm21978_vm1, %v25539_v3  ;;  %20670 = vmatpush3.bf16.msra.mxu0 %v20669_v62  ;;  %v23797_v62 = vsub.s32 5, %v22173_v36 }
 0x8f2   :  { %20671 = vmatprep.subr.bf16.mxu0 %v25538_v18 }
 0x8f4   :  { %19443 = vmatmul.mubr.f32.gmra.mrb[38].mxu0 %v23530_v51 }
 0x8f5   :  { %19445 = vmatprep.mubr.msk.f32.mxu0 %vm21978_vm1, %v25539_v3 }
 0x8f8   :  { %19446 = vmatmul.mubr.f32.gmra.mrb[40].mxu0 %v23545_v47 }
 0x8f9   :  { %19452 = vmatprep.mubr.msk.f32.mxu0 %vm21978_vm1, %v25539_v3 }
 0x8fc   :  { %19453 = vmatmul.mubr.f32.vlgmr.msra.gmra.mrb[36].mxu0 %v23495_v8 }
 0x8fd   :  { %19455 = vmatprep.mubr.msk.f32.mxu0 %vm21978_vm1, %v25539_v3  ;;  %20673 = vmatpush3.bf16.msra.mxu0 %v20672_v46 }
 0x8fe   :  { %20674 = vmatprep.subr.bf16.mxu0 %v25538_v18 }
 0x900   :  { %19456 = vmatmul.mubr.f32.gmra.mrb[38].mxu0 %v23504_v57 }
 0x901   :  { %19458 = vmatprep.mubr.msk.f32.mxu0 %vm21978_vm1, %v25539_v3 }
 0x904   :  { %19459 = vmatmul.mubr.f32.gmra.mrb[40].mxu0 %v23512_v6 }
 0x905   :  { %19465 = vmatprep.mubr.msk.f32.mxu0 %vm21978_vm1, %v25539_v3 }
 0x908   :  { %19466 = vmatmul.mubr.f32.vlgmr.msra.gmra.mrb[36].mxu0 %v23498_v45 }
 0x909   :  { %19468 = vmatprep.mubr.msk.f32.mxu0 %vm21978_vm1, %v25539_v3  ;;  %20676 = vmatpush3.bf16.msra.mxu0 %v20666_v33 }
 0x90a   :  { %20677 = vmatprep.subr.bf16.mxu0 %v25538_v18 }
 0x90c   :  { %19469 = vmatmul.mubr.f32.gmra.mrb[38].mxu0 %v23507_v53 }
 0x90d   :  { %19471 = vmatprep.mubr.msk.f32.mxu0 %vm21978_vm1, %v25539_v3 }
 0x910   :  { %19472 = vmatmul.mubr.f32.gmra.mrb[40].mxu0 %v23520_v58 }
 0x911   :  { %19478 = vmatprep.mubr.msk.f32.mxu0 %vm21978_vm1, %v25539_v3 }
 0x914   :  { %19479 = vmatmul.mubr.f32.vlgmr.msra.gmra.mrb[36].mxu0 %v23502_v22 }
 0x915   :  { %19481 = vmatprep.mubr.msk.f32.mxu0 %vm21978_vm1, %v25539_v3  ;;  %20679 = vmatpush3.bf16.msra.mxu0 %v20678_v11 }
 0x916   :  { %20680 = vmatprep.subr.bf16.mxu0 %v25538_v18 }
 0x918   :  { %19482 = vmatmul.mubr.f32.gmra.mrb[38].mxu0 %v23517_v49 }
 0x919   :  { %19484 = vmatprep.mubr.msk.f32.mxu0 %vm21978_vm1, %v25539_v3 }
 0x91c   :  { %19485 = vmatmul.mubr.f32.gmra.mrb[40].mxu0 %v23533_v13 }
 0x91d   :  { %19491 = vmatprep.mubr.msk.f32.mxu0 %vm21978_vm1, %v25539_v3 }
 0x920   :  { %19492 = vmatmul.mubr.f32.vlgmr.msra.gmra.mrb[36].mxu0 %v23495_v8 }
 0x921   :  { %19494 = vmatprep.mubr.msk.f32.mxu0 %vm21978_vm1, %v25539_v3  ;;  %20682 = vmatpush3.bf16.msra.mxu0 %v20666_v33 }
 0x924   :  { %19495 = vmatmul.mubr.f32.gmra.mrb[38].mxu0 %v23504_v57 }
 0x925   :  { %19497 = vmatprep.mubr.msk.f32.mxu0 %vm21978_vm1, %v25539_v3 }
 0x928   :  { %19498 = vmatmul.mubr.f32.gmra.mrb[40].mxu0 %v23512_v6 }
 0x929   :  { %19504 = vmatprep.mubr.msk.f32.mxu0 %vm21978_vm1, %v25539_v3 }
 0x92c   :  { %19505 = vmatmul.mubr.f32.vlgmr.msra.gmra.mrb[36].mxu0 %v23495_v8 }
 0x92d   :  { %19507 = vmatprep.mubr.msk.f32.mxu0 %vm21978_vm1, %v25539_v3 }
 0x930   :  { %19508 = vmatmul.mubr.f32.gmra.mrb[38].mxu0 %v23504_v57 }
 0x931   :  { %19510 = vmatprep.mubr.msk.f32.mxu0 %vm21978_vm1, %v25539_v3 }
 0x934   :  { %19511 = vmatmul.mubr.f32.gmra.mrb[40].mxu0 %v23512_v6 }
 0x9b7   :  { %v5221_v15 = vpop.f32.mrb[30].mxu0  ;;  %v5773_v24 = vpop.f32.mrb[24].mxu1 }
 0x9b8   :  { %v23723_v40 = vadd.f32 %v17644_v27, %v5773_v24  ;;  %v19350_v30 = vpop.f32.mrb[31].mxu0  ;;  %v19428_v19 = vpop.f32.mrb[25].mxu1  ;;  %v23725_v29 = vadd.f32 %v17643_v17, %v5221_v15 }
 0x9ba   :  { %v6642_v10 = vrot.slane %v23723_v40, %v22182_v42  ;;  %v6344_v52 = vrot.slane %v23725_v29, %v22182_v42  ;;  %v6653_v41 = vrot.slane %v23723_v40, %v22179_v38  ;;  %v6355_v44 = vrot.slane %v23725_v29, %v22179_v38 }
 0x9bb   :  { %v5227_v28 = vpop.f32.mrb[32].mxu0  ;;  %v5779_v12 = vpop.f32.mrb[26].mxu1  ;;  %v6664_v39 = vrot.slane %v23723_v40, %v22317_v54  ;;  %v6675_v58 = vrot.slane %v23723_v40, %v22324_v5  ;;  %v6366_v13 = vrot.slane %v23725_v29, %v22317_v54  ;;  %v6377_v55 = vrot.slane %v23725_v29, %v22324_v5 }
 0x9bc   :  { %v23729_v4 = vadd.f32 %v17644_v27, %v5779_v12  ;;  %6648 = vbcast.lane.b32.xlu0 %v6642_v10, 264  ;;  %6644 = vbcast.lane.b32.xlu1 %v6642_v10, 256  ;;  %v19353_v16 = vpop.f32.mrb[33].mxu0  ;;  %v19431_v0 = vpop.f32.mrb[27].mxu1  ;;  %v23731_v1 = vadd.f32 %v17643_v17, %v5227_v28  ;;  %v6686_v37 = vrot.slane %v23723_v40, %v23790_v43 }
 0x9bd   :  { %v6697_v46 = vrot.slane %v23723_v40, %v23797_v62  ;;  %v6399_v30 = vrot.slane %v23725_v29, %v23797_v62 }
 0x9be   :  { %v6730_v7 = vrot.slane %v23729_v4, %v22182_v42  ;;  %v6432_v45 = vrot.slane %v23731_v1, %v22182_v42  ;;  %v6741_v60 = vrot.slane %v23729_v4, %v22179_v38  ;;  %v6443_v53 = vrot.slane %v23731_v1, %v22179_v38 }
 0x9bf   :  { %v5233_v8 = vpop.f32.mrb[34].mxu0  ;;  %v5785_v61 = vpop.f32.mrb[28].mxu1  ;;  %v6752_v49 = vrot.slane %v23729_v4, %v22317_v54  ;;  %v6763_v2 = vrot.slane %v23729_v4, %v22324_v5  ;;  %v6454_v51 = vrot.slane %v23731_v1, %v22317_v54  ;;  %v6465_v50 = vrot.slane %v23731_v1, %v22324_v5 }
 0x9c0   :  { %6736 = vbcast.lane.b32.xlu0 %v6730_v7, 264  ;;  %v19434_v23 = vpop.f32.mrb[29].mxu1  ;;  %6346 = vbcast.lane.b32.xlu1 %v6344_v52, 256  ;;  %v19356_v9 = vpop.f32.mrb[35].mxu0  ;;  %v23739_v25 = vadd.f32 %v17644_v27, %v5785_v61  ;;  %v23741_v22 = vadd.f32 %v17643_v17, %v5233_v8  ;;  %v6774_v26 = vrot.slane %v23729_v4, %v23790_v43 }
 0x9c1   :  { %v6785_v11 = vrot.slane %v23729_v4, %v23797_v62  ;;  %v6476_v27 = vrot.slane %v23731_v1, %v23790_v43  ;;  %v6388_v17 = vrot.slane %v23725_v29, %v23790_v43  ;;  %v6487_v28 = vrot.slane %v23731_v1, %v23797_v62 }
 0x9c2   :  { %v6818_v57 = vrot.slane %v23739_v25, %v22182_v42  ;;  %v6520_v63 = vrot.slane %v23741_v22, %v22182_v42  ;;  %v6829_v20 = vrot.slane %v23739_v25, %v22179_v38  ;;  %v6531_v6 = vrot.slane %v23741_v22, %v22179_v38 }
 0x9c3   :  { %v6840_v32 = vrot.slane %v23739_v25, %v22317_v54  ;;  %v6851_v21 = vrot.slane %v23739_v25, %v22324_v5  ;;  %v6542_v33 = vrot.slane %v23741_v22, %v22317_v54  ;;  %v6553_v34 = vrot.slane %v23741_v22, %v22324_v5 }
 0x9c4   :  { %6350 = vbcast.lane.b32.xlu1 %v6344_v52, 264  ;;  %6434 = vbcast.lane.b32.xlu0 %v6432_v45, 256  ;;  %v6862_v52 = vrot.slane %v23739_v25, %v23790_v43 }
 0x9c8   :  { %6732 = vbcast.lane.b32.xlu1 %v6730_v7, 256  ;;  %6438 = vbcast.lane.b32.xlu0 %v6432_v45, 264  ;;  %v6873_v45 = vrot.slane %v23739_v25, %v23797_v62 }
 0x9cc   :  { %6820 = vbcast.lane.b32.xlu1 %v6818_v57, 256  ;;  %6824 = vbcast.lane.b32.xlu0 %v6818_v57, 264 }
 0x9d0   :  { %6526 = vbcast.lane.b32.xlu0 %v6520_v63, 264  ;;  %6522 = vbcast.lane.b32.xlu1 %v6520_v63, 256 }
 0x9d4   :  { %6659 = vbcast.lane.b32.xlu0 %v6653_v41, 264  ;;  %6655 = vbcast.lane.b32.xlu1 %v6653_v41, 256 }
 0x9d8   :  { %6747 = vbcast.lane.b32.xlu0 %v6741_v60, 264  ;;  %6743 = vbcast.lane.b32.xlu1 %v6741_v60, 256 }
 0x9dc   :  { %6445 = vbcast.lane.b32.xlu0 %v6443_v53, 256  ;;  %6357 = vbcast.lane.b32.xlu1 %v6355_v44, 256 }
 0x9e0   :  { %6449 = vbcast.lane.b32.xlu0 %v6443_v53, 264  ;;  %6361 = vbcast.lane.b32.xlu1 %v6355_v44, 264 }
 0x9e4   :  { %6835 = vbcast.lane.b32.xlu0 %v6829_v20, 264  ;;  %6831 = vbcast.lane.b32.xlu1 %v6829_v20, 256 }
 0x9e8   :  { %6537 = vbcast.lane.b32.xlu0 %v6531_v6, 264  ;;  %6533 = vbcast.lane.b32.xlu1 %v6531_v6, 256 }
 0x9ec   :  { %6670 = vbcast.lane.b32.xlu0 %v6664_v39, 264  ;;  %6666 = vbcast.lane.b32.xlu1 %v6664_v39, 256 }
 0x9f0   :  { %6758 = vbcast.lane.b32.xlu0 %v6752_v49, 264  ;;  %6754 = vbcast.lane.b32.xlu1 %v6752_v49, 256 }
 0x9f4   :  { %6681 = vbcast.lane.b32.xlu0 %v6675_v58, 264  ;;  %6677 = vbcast.lane.b32.xlu1 %v6675_v58, 256  ;;  %v6564_v58 = vrot.slane %v23741_v22, %v23790_v43 }
 0x9f8   :  { %6769 = vbcast.lane.b32.xlu0 %v6763_v2, 264  ;;  %6765 = vbcast.lane.b32.xlu1 %v6763_v2, 256 }
 0x9fc   :  { %6456 = vbcast.lane.b32.xlu0 %v6454_v51, 256  ;;  %6368 = vbcast.lane.b32.xlu1 %v6366_v13, 256 }
 0x9ff   :  { %v23773_v47 = vpop.f32.mrb[36].mxu0 }
 0xa00   :  { %6379 = vbcast.lane.b32.xlu0 %v6377_v55, 256  ;;  %6372 = vbcast.lane.b32.xlu1 %v6366_v13, 264  ;;  %v19506_v14 = vpop.f32.mrb[37].mxu0 }
 0xa03   :  { %v23777_v56 = vpop.f32.mrb[38].mxu0 }
 0xa04   :  { %6467 = vbcast.lane.b32.xlu0 %v6465_v50, 256  ;;  %6460 = vbcast.lane.b32.xlu1 %v6454_v51, 264  ;;  %v19509_v31 = vpop.f32.mrb[39].mxu0 }
 0xa07   :  { %v23779_v59 = vpop.f32.mrb[40].mxu0 }
 0xa08   :  { %6383 = vbcast.lane.b32.xlu0 %v6377_v55, 264  ;;  %6471 = vbcast.lane.b32.xlu1 %v6465_v50, 264  ;;  %v19512_v48 = vpop.f32.mrb[41].mxu0 }
 0xa0c   :  { %6846 = vbcast.lane.b32.xlu0 %v6840_v32, 264  ;;  %6842 = vbcast.lane.b32.xlu1 %v6840_v32, 256 }
 0xa10   :  { %6857 = vbcast.lane.b32.xlu0 %v6851_v21, 264  ;;  %6853 = vbcast.lane.b32.xlu1 %v6851_v21, 256 }
 0xa14   :  { %6548 = vbcast.lane.b32.xlu0 %v6542_v33, 264  ;;  %6544 = vbcast.lane.b32.xlu1 %v6542_v33, 256 }
 0xa18   :  { %6559 = vbcast.lane.b32.xlu0 %v6553_v34, 264  ;;  %6555 = vbcast.lane.b32.xlu1 %v6553_v34, 256 }
 0xa1c   :  { %6692 = vbcast.lane.b32.xlu0 %v6686_v37, 264  ;;  %6688 = vbcast.lane.b32.xlu1 %v6686_v37, 256 }
 0xa20   :  { %6780 = vbcast.lane.b32.xlu0 %v6774_v26, 264  ;;  %6776 = vbcast.lane.b32.xlu1 %v6774_v26, 256  ;;  %v6575_v26 = vrot.slane %v23741_v22, %v23797_v62 }
 0xa24   :  { %6703 = vbcast.lane.b32.xlu0 %v6697_v46, 264  ;;  %6699 = vbcast.lane.b32.xlu1 %v6697_v46, 256  ;;  %v23846_v46 = vsub.s32 6, %v22173_v36 }
 0xa28   :  { %6791 = vbcast.lane.b32.xlu0 %v6785_v11, 264  ;;  %6787 = vbcast.lane.b32.xlu1 %v6785_v11, 256 }
 0xa2c   :  { %6478 = vbcast.lane.b32.xlu0 %v6476_v27, 256  ;;  %6390 = vbcast.lane.b32.xlu1 %v6388_v17, 256 }
 0xa2e   :  { %v6649_v15 = vpop.permute.xlu0 %6648  ;;  %v6645_v24 = vpop.permute.xlu1 %6644 }
 0xa30   :  { %6401 = vbcast.lane.b32.xlu0 %v6399_v30, 256  ;;  %6394 = vbcast.lane.b32.xlu1 %v6388_v17, 264 }
 0xa32   :  { %v6737_v19 = vpop.permute.xlu0 %6736  ;;  %v6347_v10 = vpop.permute.xlu1 %6346 }
 0xa33   :  { %v6904_v8 = vsel %vm6605_vm5, %v6649_v15, %v6737_v19 }
 0xa34   :  { %6489 = vbcast.lane.b32.xlu0 %v6487_v28, 256  ;;  %6482 = vbcast.lane.b32.xlu1 %v6476_v27, 264 }
 0xa36   :  { %v6351_v12 = vpop.permute.xlu1 %6350  ;;  %v6435_v16 = vpop.permute.xlu0 %6434 }
 0xa37   :  { %v6606_v20 = vsel %vm6605_vm5, %v6347_v10, %v6435_v16 }
 0xa38   :  { %6405 = vbcast.lane.b32.xlu0 %v6399_v30, 264  ;;  %6493 = vbcast.lane.b32.xlu1 %v6487_v28, 264 }
 0xa3a   :  { %v6733_v0 = vpop.permute.xlu1 %6732  ;;  %v6439_v7 = vpop.permute.xlu0 %6438 }
 0xa3b   :  { %v6903_v61 = vsel %vm6605_vm5, %v6645_v24, %v6733_v0  ;;  %v6607_v6 = vsel %vm6605_vm5, %v6351_v12, %v6439_v7  ;;  %v6708_v12 = vrot.slane %v23723_v40, %v23846_v46 }
 0xa3c   :  { %6868 = vbcast.lane.b32.xlu0 %v6862_v52, 264  ;;  %6864 = vbcast.lane.b32.xlu1 %v6862_v52, 256 }
 0xa3e   :  { %v6821_v23 = vpop.permute.xlu1 %6820  ;;  %v6825_v9 = vpop.permute.xlu0 %6824 }
 0xa3f   :  { %v6919_v57 = vsel %vm6622_vm6, %v6903_v61, %v6821_v23  ;;  %v6920_v63 = vsel %vm6622_vm6, %v6904_v8, %v6825_v9 }
 0xa40   :  { %v7239_v41 = vsel %vm7231_vm7, %v6919_v57, 0  ;;  %v7242_v60 = vsel %vm7231_vm7, %v6920_v63, 0  ;;  %6879 = vbcast.lane.b32.xlu0 %v6873_v45, 264  ;;  %6875 = vbcast.lane.b32.xlu1 %v6873_v45, 256  ;;  %v6796_v45 = vrot.slane %v23729_v4, %v23846_v46 }
 0xa41   :  { %v7245_v53 = vand.u32 4294901760, %v7239_v41  ;;  %v7248_v44 = vand.u32 4294901760, %v7242_v60 }
 0xa42   :  { %v6527_v39 = vpop.permute.xlu0 %6526  ;;  %v6523_v49 = vpop.permute.xlu1 %6522 }
 0xa43   :  { %v23825_v2 = vsub.f32 %v7239_v41, %v7245_v53  ;;  %v23827_v51 = vpack.c.bf16 %v7248_v44, %v7245_v53  ;;  %v23829_v13 = vsub.f32 %v7242_v60, %v7248_v44  ;;  %v6624_v55 = vsel %vm6622_vm6, %v6607_v6, %v6527_v39 }
 0xa44   :  { %v7236_v14 = vsel %vm7231_vm7, %v6624_v55, 0  ;;  %v6623_v50 = vsel %vm6622_vm6, %v6606_v20, %v6523_v49  ;;  %6570 = vbcast.lane.b32.xlu0 %v6564_v58, 264  ;;  %6566 = vbcast.lane.b32.xlu1 %v6564_v58, 256  ;;  %v6498_v60 = vrot.slane %v23731_v1, %v23846_v46  ;;  %v23876_v53 = vsub.s32 7, %v22173_v36 }
 0xa45   :  { %v7334_v31 = vand.u32 4294901760, %v23825_v2  ;;  %v7341_v48 = vand.u32 4294901760, %v23829_v13  ;;  %v23836_v32 = vand.u32 4294901760, %v7236_v14  ;;  %v7233_v21 = vsel %vm7231_vm7, %v6623_v50, 0  ;;  %20684 = vmatprep.subr.bf16.mxu1 %v23827_v51 }
 0xa46   :  { %v23840_v33 = vand.u32 4294901760, %v7233_v21  ;;  %20686 = vmatpush3.bf16.xpose.msra.mxu1 %v23827_v51  ;;  %v6660_v34 = vpop.permute.xlu0 %6659  ;;  %v6656_v37 = vpop.permute.xlu1 %6655  ;;  %v20691_v57 = vpack.c.bf16 %v23829_v13, %v23825_v2  ;;  %v6410_v44 = vrot.slane %v23725_v29, %v23846_v46  ;;  %v6719_v39 = vrot.slane %v23723_v40, %v23876_v53 }
 0xa47   :  { %v23849_v11 = vsub.f32 %v7236_v14, %v23836_v32  ;;  %v7335_v27 = vsub.f32 %v23825_v2, %v7334_v31  ;;  %v7342_v17 = vsub.f32 %v23829_v13, %v7341_v48  ;;  %v6807_v55 = vrot.slane %v23729_v4, %v23876_v53 }
 0xa48   :  { %v23858_v15 = vsub.f32 %v7233_v21, %v23840_v33  ;;  %6581 = vbcast.lane.b32.xlu0 %v6575_v26, 264  ;;  %6577 = vbcast.lane.b32.xlu1 %v6575_v26, 256  ;;  %v6421_v26 = vrot.slane %v23725_v29, %v23876_v53 }
 0xa49   :  { %v7323_v24 = vand.u32 4294901760, %v23849_v11  ;;  %v7336_v30 = vand.u32 4294901760, %v7335_v27  ;;  %v7343_v19 = vand.u32 4294901760, %v7342_v17 }
 0xa4a   :  { %v6748_v10 = vpop.permute.xlu0 %6747  ;;  %v6744_v28 = vpop.permute.xlu1 %6743  ;;  %v7313_v16 = vand.u32 4294901760, %v23858_v15 }
 0xa4b   :  { %v7324_v0 = vsub.f32 %v23849_v11, %v7323_v24  ;;  %v20687_v7 = vpack.c.bf16 %v7343_v19, %v7336_v30  ;;  %v6906_v14 = vsel %vm6605_vm5, %v6660_v34, %v6748_v10  ;;  %v6905_v40 = vsel %vm6605_vm5, %v6656_v37, %v6744_v28 }
 0xa4c   :  { %6714 = vbcast.lane.b32.xlu0 %v6708_v12, 264  ;;  %6710 = vbcast.lane.b32.xlu1 %v6708_v12, 256  ;;  %v7314_v52 = vsub.f32 %v23858_v15, %v7313_v16  ;;  %v20699_v34 = vpack.c.bf16 %v7341_v48, %v7334_v31  ;;  %v6509_v10 = vrot.slane %v23731_v1, %v23876_v53 }
 0xa4d   :  { %v7325_v8 = vand.u32 4294901760, %v7324_v0  ;;  %20688 = vmatprep.subr.bf16.mxu1 %v20687_v7 }
 0xa4e   :  { %v6446_v61 = vpop.permute.xlu0 %6445  ;;  %v6358_v23 = vpop.permute.xlu1 %6357  ;;  %v7315_v9 = vand.u32 4294901760, %v7314_v52 }
 0xa4f   :  { %v6608_v4 = vsel %vm6605_vm5, %v6358_v23, %v6446_v61  ;;  %v6884_v61 = vrot.slane %v23739_v25, %v23846_v46 }
 0xa50   :  { %19517 = vmatprep.mubr.f32.mxu1 %v7315_v9  ;;  %6802 = vbcast.lane.b32.xlu0 %v6796_v45, 264 }
 0xa51   :  { %6798 = vbcast.lane.b32.xlu1 %v6796_v45, 256  ;;  %19518 = vmatmul.mubr.f32.vlgmr.msra.gmra.mrb[30].mxu1 %v7325_v8 }
 0xa52   :  { %20690 = vmatpush3.bf16.xpose.msra.mxu1 %v20687_v7  ;;  %19524 = vmatprep.mubr.f32.mxu1 %v23840_v33  ;;  %v6450_v63 = vpop.permute.xlu0 %6449  ;;  %v6362_v41 = vpop.permute.xlu1 %6361 }
 0xa53   :  { %20692 = vmatprep.subr.bf16.mxu1 %v20691_v57  ;;  %v6609_v12 = vsel %vm6605_vm5, %v6362_v41, %v6450_v63  ;;  %v6895_v63 = vrot.slane %v23739_v25, %v23876_v53 }
 0xa54   :  { %6500 = vbcast.lane.b32.xlu0 %v6498_v60, 256 }
 0xa55   :  { %6412 = vbcast.lane.b32.xlu1 %v6410_v44, 256 }
 0xa56   :  { %v6836_v20 = vpop.permute.xlu0 %6835  ;;  %v6832_v6 = vpop.permute.xlu1 %6831 }
 0xa57   :  { %v6922_v27 = vsel %vm6622_vm6, %v6906_v14, %v6836_v20  ;;  %v6921_v17 = vsel %vm6622_vm6, %v6905_v40, %v6832_v6 }
 0xa58   :  { %6725 = vbcast.lane.b32.xlu0 %v6719_v39, 264  ;;  %v7756_v37 = vsel %vm7231_vm7, %v6922_v27, 0 }
 0xa59   :  { %6721 = vbcast.lane.b32.xlu1 %v6719_v39, 256  ;;  %19525 = vmatmul.mubr.f32.vlgmr.msra.gmra.mrb[30].mxu1 %v23836_v32  ;;  %v7762_v2 = vand.u32 4294901760, %v7756_v37 }
 0xa5a   :  { %20694 = vmatpush3.bf16.xpose.msra.mxu1 %v20691_v57  ;;  %19531 = vmatprep.mubr.f32.mxu1 %v23858_v15  ;;  %v6538_v49 = vpop.permute.xlu0 %6537  ;;  %v6534_v58 = vpop.permute.xlu1 %6533  ;;  %v7753_v15 = vsel %vm7231_vm7, %v6921_v17, 0  ;;  %v6597_v17 = vrot.slane %v23741_v22, %v23876_v53 }
 0xa5b   :  { %20696 = vmatprep.subr.bf16.mxu1 %v23827_v51  ;;  %v6625_v29 = vsel %vm6622_vm6, %v6608_v4, %v6534_v58  ;;  %v7759_v13 = vand.u32 4294901760, %v7753_v15  ;;  %v23921_v0 = vsub.f32 %v7756_v37, %v7762_v2  ;;  %v6626_v1 = vsel %vm6622_vm6, %v6609_v12, %v6538_v49  ;;  %v23969_v58 = vld [vmem:[%s25485_s1 + $0x190] ss:$0 sm:$0xff] }
 0xa5c   :  { %6813 = vbcast.lane.b32.xlu0 %v6807_v55, 264  ;;  %v7747_v31 = vsel %vm7231_vm7, %v6625_v29, 0  ;;  %v7750_v23 = vsel %vm7231_vm7, %v6626_v1, 0  ;;  %v23980_v40 = vadd.f32 %v23969_v58, %v23773_v47 }
 0xa5d   :  { %6809 = vbcast.lane.b32.xlu1 %v6807_v55, 256  ;;  %v23923_v7 = vsub.f32 %v7753_v15, %v7759_v13  ;;  %v23948_v41 = vand.u32 4294901760, %v7750_v23  ;;  %v23953_v20 = vpack.c.bf16 %v7762_v2, %v7759_v13 }
 0xa5e   :  { %v23889_v50 = vpop.permute.xlu0 %6670  ;;  %v23891_v21 = vpop.permute.xlu1 %6666  ;;  %v6938_v29 = vrot.slane %v23980_v40, %v22182_v42 }
 0xa5f   :  { %v23972_v55 = vsub.f32 %v7750_v23, %v23948_v41 }
 0xa60   :  { %6423 = vbcast.lane.b32.xlu0 %v6421_v26, 256 }
 0xa61   :  { %6416 = vbcast.lane.b32.xlu1 %v6410_v44, 264  ;;  %19532 = vmatmul.mubr.f32.vlgmr.msra.gmra.mrb[30].mxu1 %v23849_v11  ;;  %v7855_v11 = vand.u32 4294901760, %v23921_v0  ;;  %v7837_v4 = vand.u32 4294901760, %v23972_v55 }
 0xa62   :  { %20698 = vmatpush3.bf16.xpose.msra.mxu1 %v23827_v51  ;;  %19538 = vmatprep.mubr.f32.mxu1 %v7313_v16  ;;  %v23907_v30 = vpop.permute.xlu0 %6758  ;;  %v23909_v19 = vpop.permute.xlu1 %6754  ;;  %v23919_v16 = vand.u32 4294901760, %v7747_v31 }
 0xa63   :  { %20700 = vmatprep.subr.bf16.mxu1 %v20699_v34  ;;  %v7856_v25 = vsub.f32 %v23921_v0, %v7855_v11 }
 0xa64   :  { %6511 = vbcast.lane.b32.xlu0 %v6509_v10, 256  ;;  %v23938_v9 = vsub.f32 %v7747_v31, %v23919_v16  ;;  %v6949_v31 = vrot.slane %v23980_v40, %v22179_v38 }
 0xa65   :  { %6504 = vbcast.lane.b32.xlu1 %v6498_v60, 264  ;;  %v6586_v60 = vrot.slane %v23741_v22, %v23846_v46  ;;  %v7857_v14 = vand.u32 4294901760, %v7856_v25  ;;  %v7838_v22 = vsub.f32 %v23972_v55, %v7837_v4 }
 0xa66   :  { %v23914_v48 = vpop.permute.xlu0 %6681  ;;  %v23916_v28 = vpop.permute.xlu1 %6677  ;;  %v7827_v44 = vand.u32 4294901760, %v23938_v9 }
 0xa68   :  { %6427 = vbcast.lane.b32.xlu0 %v6421_v26, 264 }
 0xa69   :  { %6515 = vbcast.lane.b32.xlu1 %v6509_v10, 264  ;;  %19539 = vmatmul.mubr.f32.vlgmr.msra.gmra.mrb[30].mxu1 %v7323_v24  ;;  %v7848_v24 = vand.u32 4294901760, %v23923_v7  ;;  %v6907_v10 = vsel %vm6605_vm5, %v23891_v21, %v23909_v19  ;;  %v20715_v21 = vpack.c.bf16 %v23921_v0, %v23923_v7 }
 0xa6a   :  { %20702 = vmatpush3.bf16.xpose.msra.mxu1 %v20699_v34  ;;  %19545 = vmatprep.mubr.f32.mxu1 %v23840_v33  ;;  %v23929_v52 = vpop.permute.xlu0 %6769  ;;  %v23931_v8 = vpop.permute.xlu1 %6765 }
 0xa6b   :  { %20704 = vmatprep.subr.bf16.mxu1 %v23827_v51  ;;  %v7849_v6 = vsub.f32 %v23923_v7, %v7848_v24 }
 0xa6c   :  { %6890 = vbcast.lane.b32.xlu0 %v6884_v61, 264 }
 0xa6d   :  { %6886 = vbcast.lane.b32.xlu1 %v6884_v61, 256  ;;  %v7839_v61 = vand.u32 4294901760, %v7838_v22 }
 0xa6e   :  { %v23942_v45 = vpop.permute.xlu0 %6456  ;;  %v23944_v57 = vpop.permute.xlu1 %6368 }
 0xa70   :  { %6897 = vbcast.lane.b32.xlu0 %v6895_v63, 256 }
 0xa71   :  { %6588 = vbcast.lane.b32.xlu1 %v6586_v60, 256  ;;  %19546 = vmatmul.mubr.f32.vlgmr.msra.gmra.mrb[30].mxu1 %v23836_v32 }
 0xa72   :  { %20706 = vmatpush3.bf16.xpose.msra.mxu1 %v23827_v51  ;;  %19552 = vmatprep.mubr.f32.mxu1 %v23840_v33  ;;  %v23964_v39 = vpop.permute.xlu0 %6379  ;;  %v6373_v49 = vpop.permute.xlu1 %6372  ;;  %v7828_v51 = vsub.f32 %v23938_v9, %v7827_v44  ;;  %v7850_v33 = vand.u32 4294901760, %v7849_v6  ;;  %v6960_v6 = vrot.slane %v23980_v40, %v22317_v54 }
 0xa73   :  { %20708 = vmatprep.subr.bf16.mxu1 %v23953_v20 }
 0xa74   :  { %6592 = vbcast.lane.b32.xlu0 %v6586_v60, 264  ;;  %v7829_v34 = vand.u32 4294901760, %v7828_v51  ;;  %v20711_v37 = vpack.c.bf16 %v7857_v14, %v7850_v33 }
 0xa75   :  { %6901 = vbcast.lane.b32.xlu1 %v6895_v63, 264 }
 0xa76   :  { %v23982_v26 = vpop.permute.xlu0 %6467  ;;  %v6461_v27 = vpop.permute.xlu1 %6460 }
 0xa78   :  { %6603 = vbcast.lane.b32.xlu0 %v6597_v17, 264 }
 0xa79   :  { %6599 = vbcast.lane.b32.xlu1 %v6597_v17, 256  ;;  %19553 = vmatmul.mubr.f32.vlgmr.msra.gmra.mrb[30].mxu1 %v23836_v32  ;;  %v6908_v32 = vsel %vm6605_vm5, %v23889_v50, %v23907_v30  ;;  %v6610_v17 = vsel %vm6605_vm5, %v23944_v57, %v23942_v45 }
 0xa7a   :  { %20710 = vmatpush3.bf16.xpose.msra.mxu1 %v23953_v20  ;;  %19559 = vmatprep.mubr.f32.mxu1 %v7829_v34  ;;  %v23989_v15 = vpop.permute.xlu0 %6383  ;;  %v23991_v47 = vpop.permute.xlu1 %6471  ;;  %v6611_v34 = vsel %vm6605_vm5, %v6373_v49, %v6461_v27 }
 0xa7b   :  { %20712 = vmatprep.subr.bf16.mxu1 %v20711_v37 }
 0xa7c   :  { %6940 = vbcast.lane.b32.xlu0 %v6938_v29, 256 }
 0xa7d   :  { %6944 = vbcast.lane.b32.xlu1 %v6938_v29, 264 }
 0xa7e   :  { %v6847_v2 = vpop.permute.xlu0 %6846  ;;  %v6843_v13 = vpop.permute.xlu1 %6842 }
 0xa7f   :  { %v6924_v12 = vsel %vm6622_vm6, %v6908_v32, %v6847_v2  ;;  %v6923_v1 = vsel %vm6622_vm6, %v6907_v10, %v6843_v13  ;;  %v6971_v32 = vrot.slane %v23980_v40, %v22324_v5 }
 0xa80   :  { %v8270_v23 = vsel %vm7231_vm7, %v6924_v12, 0  ;;  %v8267_v63 = vsel %vm7231_vm7, %v6923_v1, 0  ;;  %6951 = vbcast.lane.b32.xlu0 %v6949_v31, 256  ;;  %v6982_v1 = vrot.slane %v23980_v40, %v23790_v43 }
 0xa81   :  { %v8276_v50 = vand.u32 4294901760, %v8270_v23  ;;  %v8273_v30 = vand.u32 4294901760, %v8267_v63  ;;  %19560 = vmatmul.mubr.f32.vlgmr.msra.gmra.mrb[32].mxu1 %v7839_v61  ;;  %6955 = vbcast.lane.b32.xlu1 %v6949_v31, 264 }
 0xa82   :  { %20714 = vmatpush3.bf16.xpose.msra.mxu1 %v20711_v37  ;;  %19566 = vmatprep.mubr.f32.mxu1 %v23919_v16  ;;  %v6858_v19 = vpop.permute.xlu0 %6857  ;;  %v6854_v60 = vpop.permute.xlu1 %6853 }
 0xa83   :  { %v24015_v25 = vsub.f32 %v8270_v23, %v8276_v50  ;;  %v24017_v51 = vpack.c.bf16 %v8276_v50, %v8273_v30  ;;  %v24019_v33 = vsub.f32 %v8267_v63, %v8273_v30  ;;  %20716 = vmatprep.subr.bf16.mxu1 %v20715_v21 }
 0xa84   :  { %6962 = vbcast.lane.b32.xlu0 %v6960_v6, 256 }
 0xa85   :  { %v8362_v14 = vand.u32 4294901760, %v24019_v33  ;;  %6966 = vbcast.lane.b32.xlu1 %v6960_v6, 264  ;;  %20732 = vmatprep.subr.bf16.mxu0 %v24017_v51  ;;  %v8369_v37 = vand.u32 4294901760, %v24015_v25  ;;  %v6993_v6 = vrot.slane %v23980_v40, %v23797_v62  ;;  %v20739_v7 = vpack.c.bf16 %v24015_v25, %v24019_v33 }
 0xa86   :  { %v6549_v29 = vpop.permute.xlu0 %6548  ;;  %20734 = vmatpush3.bf16.xpose.msra.mxu0 %v24017_v51  ;;  %v6545_v22 = vpop.permute.xlu1 %6544 }
 0xa87   :  { %v6628_v10 = vsel %vm6622_vm6, %v6611_v34, %v6549_v29  ;;  %v6627_v2 = vsel %vm6622_vm6, %v6610_v17, %v6545_v22  ;;  %v8363_v13 = vsub.f32 %v24019_v33, %v8362_v14  ;;  %v8370_v23 = vsub.f32 %v24015_v25, %v8369_v37 }
 0xa88   :  { %v8264_v45 = vsel %vm7231_vm7, %v6628_v10, 0  ;;  %v8261_v57 = vsel %vm7231_vm7, %v6627_v2, 0  ;;  %6977 = vbcast.lane.b32.xlu0 %v6971_v32, 264  ;;  %v24062_v34 = vadd.f32 %v23969_v58, %v23777_v56  ;;  %v6910_v29 = vsel %vm6605_vm5, %v23914_v48, %v23929_v52 }
 0xa89   :  { %v24038_v49 = vand.u32 4294901760, %v8264_v45  ;;  %v24040_v27 = vand.u32 4294901760, %v8261_v57  ;;  %19567 = vmatmul.mubr.f32.vlgmr.msra.gmra.mrb[32].mxu1 %v23948_v41  ;;  %6973 = vbcast.lane.b32.xlu1 %v6971_v32, 256  ;;  %v8364_v61 = vand.u32 4294901760, %v8363_v13  ;;  %v8371_v30 = vand.u32 4294901760, %v8370_v23 }
 0xa8a   :  { %20718 = vmatpush3.bf16.xpose.msra.mxu1 %v20715_v21  ;;  %19573 = vmatprep.mubr.f32.mxu1 %v23938_v9  ;;  %v6560_v31 = vpop.permute.xlu0 %6559  ;;  %v6556_v12 = vpop.permute.xlu1 %6555  ;;  %v6909_v22 = vsel %vm6605_vm5, %v23916_v28, %v23931_v8  ;;  %v6926_v13 = vsel %vm6622_vm6, %v6910_v29, %v6858_v19  ;;  %v6612_v28 = vsel %vm6605_vm5, %v23964_v39, %v23982_v26 }
 0xa8b   :  { %v24050_v63 = vsub.f32 %v8264_v45, %v24038_v49  ;;  %v24053_v50 = vsub.f32 %v8261_v57, %v24040_v27  ;;  %20720 = vmatprep.subr.bf16.mxu1 %v23953_v20  ;;  %v20735_v32 = vpack.c.bf16 %v8371_v30, %v8364_v61  ;;  %v6925_v45 = vsel %vm6622_vm6, %v6909_v22, %v6854_v60 }
 0xa8c   :  { %6984 = vbcast.lane.b32.xlu0 %v6982_v1, 256  ;;  %v20723_v8 = vpack.c.bf16 %v7855_v11, %v7848_v24  ;;  %v8784_v60 = vsel %vm7231_vm7, %v6926_v13, 0  ;;  %v8781_v57 = vsel %vm7231_vm7, %v6925_v45, 0  ;;  %v7026_v0 = vrot.slane %v24062_v34, %v22182_v42 }
 0xa8d   :  { %v8351_v21 = vand.u32 4294901760, %v24050_v63  ;;  %6988 = vbcast.lane.b32.xlu1 %v6982_v1, 264  ;;  %v8341_v17 = vand.u32 4294901760, %v24053_v50  ;;  %20736 = vmatprep.subr.bf16.mxu0 %v20735_v32  ;;  %v6629_v1 = vsel %vm6622_vm6, %v6612_v28, %v6556_v12  ;;  %v8790_v11 = vand.u32 4294901760, %v8784_v60 }
 0xa8e   :  { %v24070_v10 = vpop.permute.xlu0 %6692  ;;  %v24072_v2 = vpop.permute.xlu1 %6688  ;;  %v8787_v24 = vand.u32 4294901760, %v8781_v57  ;;  %v8775_v12 = vsel %vm7231_vm7, %v6629_v1, 0  ;;  %v7037_v61 = vrot.slane %v24062_v34, %v22179_v38  ;;  %v6613_v23 = vsel %vm6605_vm5, %v23989_v15, %v23991_v47 }
 0xa8f   :  { %v8352_v56 = vsub.f32 %v24050_v63, %v8351_v21  ;;  %v8342_v48 = vsub.f32 %v24053_v50, %v8341_v17  ;;  %v24115_v30 = vand.u32 4294901760, %v8775_v12  ;;  %v6630_v22 = vsel %vm6622_vm6, %v6613_v23, %v6560_v31 }
 0xa90   :  { %6999 = vbcast.lane.b32.xlu0 %v6993_v6, 264  ;;  %v24119_v29 = vsub.f32 %v8781_v57, %v8787_v24  ;;  %v7048_v15 = vrot.slane %v24062_v34, %v22317_v54  ;;  %v8778_v47 = vsel %vm7231_vm7, %v6630_v22, 0 }
 0xa91   :  { %v8353_v52 = vand.u32 4294901760, %v8352_v56  ;;  %19574 = vmatmul.mubr.f32.vlgmr.msra.gmra.mrb[32].mxu1 %v23972_v55  ;;  %6995 = vbcast.lane.b32.xlu1 %v6993_v6, 256  ;;  %v8343_v19 = vand.u32 4294901760, %v8342_v48  ;;  %v24117_v6 = vsub.f32 %v8784_v60, %v8790_v11  ;;  %v24134_v31 = vsub.f32 %v8775_v12, %v24115_v30 }
 0xa92   :  { %20722 = vmatpush3.bf16.xpose.msra.mxu1 %v23953_v20  ;;  %19580 = vmatprep.mubr.f32.mxu1 %v7827_v44  ;;  %v24096_v39 = vpop.permute.xlu0 %6780  ;;  %v24098_v26 = vpop.permute.xlu1 %6776  ;;  %v7059_v48 = vrot.slane %v24062_v34, %v22324_v5  ;;  %v24147_v28 = vand.u32 4294901760, %v8778_v47  ;;  %v24182_v12 = vadd.f32 %v23969_v58, %v23779_v59 }
 0xa93   :  { %20724 = vmatprep.subr.bf16.mxu1 %v20723_v8  ;;  %19601 = vmatprep.mubr.f32.mxu0 %v8343_v19  ;;  %v8883_v55 = vand.u32 4294901760, %v24117_v6  ;;  %v6911_v22 = vsel %vm6605_vm5, %v24072_v2, %v24098_v26 }
 0xa94   :  { %19602 = vmatmul.mubr.f32.vlgmr.msra.gmra.mrb[42].mxu0 %v8353_v52  ;;  %7032 = vbcast.lane.b32.xlu0 %v7026_v0, 264  ;;  %v8855_v52 = vand.u32 4294901760, %v24134_v31 }
 0xa95   :  { %20738 = vmatpush3.bf16.xpose.msra.mxu0 %v20735_v32  ;;  %7028 = vbcast.lane.b32.xlu1 %v7026_v0, 256  ;;  %v8884_v60 = vsub.f32 %v24117_v6, %v8883_v55  ;;  %v7070_v0 = vrot.slane %v24062_v34, %v23790_v43 }
 0xa96   :  { %19608 = vmatprep.mubr.f32.mxu0 %v24040_v27  ;;  %20740 = vmatprep.subr.bf16.mxu0 %v20739_v7  ;;  %v24106_v9 = vpop.permute.xlu0 %6703  ;;  %v24108_v44 = vpop.permute.xlu1 %6699 }
 0xa98   :  { %7043 = vbcast.lane.b32.xlu0 %v7037_v61, 264 }
 0xa99   :  { %19581 = vmatmul.mubr.f32.vlgmr.msra.gmra.mrb[32].mxu1 %v7837_v4  ;;  %7039 = vbcast.lane.b32.xlu1 %v7037_v61, 256  ;;  %v8876_v4 = vand.u32 4294901760, %v24119_v29 }
 0xa9a   :  { %20726 = vmatpush3.bf16.xpose.msra.mxu1 %v20723_v8  ;;  %19587 = vmatprep.mubr.f32.mxu1 %v23919_v16  ;;  %v24125_v32 = vpop.permute.xlu0 %6791  ;;  %v24127_v13 = vpop.permute.xlu1 %6787  ;;  %v24150_v8 = vpack.c.bf16 %v8790_v11, %v8787_v24  ;;  %v8885_v24 = vand.u32 4294901760, %v8884_v60 }
 0xa9b   :  { %20728 = vmatprep.subr.bf16.mxu1 %v23953_v20  ;;  %v8877_v19 = vsub.f32 %v24119_v29, %v8876_v4 }
 0xa9c   :  { %19609 = vmatmul.mubr.f32.vlgmr.msra.gmra.mrb[42].mxu0 %v24038_v49  ;;  %7054 = vbcast.lane.b32.xlu0 %v7048_v15, 264 }
 0xa9d   :  { %20742 = vmatpush3.bf16.xpose.msra.mxu0 %v20739_v7  ;;  %7050 = vbcast.lane.b32.xlu1 %v7048_v15, 256  ;;  %v24168_v7 = vsub.f32 %v8778_v47, %v24147_v28  ;;  %v8878_v11 = vand.u32 4294901760, %v8877_v19  ;;  %v20763_v19 = vpack.c.bf16 %v24117_v6, %v24119_v29 }
 0xa9e   :  { %19615 = vmatprep.mubr.f32.mxu0 %v24053_v50  ;;  %20744 = vmatprep.subr.bf16.mxu0 %v24017_v51  ;;  %v24141_v45 = vpop.permute.xlu0 %6478  ;;  %v24143_v56 = vpop.permute.xlu1 %6390  ;;  %v7114_v50 = vrot.slane %v24182_v12, %v22182_v42 }
 0xa9f   :  { %v20759_v23 = vpack.c.bf16 %v8885_v24, %v8878_v11 }
 0xaa0   :  { %7065 = vbcast.lane.b32.xlu0 %v7059_v48, 264 }
 0xaa1   :  { %19588 = vmatmul.mubr.f32.vlgmr.msra.gmra.mrb[32].mxu1 %v23948_v41  ;;  %7061 = vbcast.lane.b32.xlu1 %v7059_v48, 256 }
 0xaa2   :  { %20730 = vmatpush3.bf16.xpose.msra.mxu1 %v23953_v20  ;;  %19594 = vmatprep.mubr.f32.mxu1 %v23919_v16  ;;  %v24161_v57 = vpop.permute.xlu0 %6401  ;;  %v24163_v1 = vpop.permute.xlu1 %6394  ;;  %v20747_v16 = vpack.c.bf16 %v8369_v37, %v8362_v14  ;;  %v8856_v20 = vsub.f32 %v24134_v31, %v8855_v52  ;;  %v7081_v14 = vrot.slane %v24062_v34, %v23797_v62  ;;  %v8865_v37 = vand.u32 4294901760, %v24168_v7 }
 0xaa3   :  { %20756 = vmatprep.subr.bf16.mxu1 %v24150_v8 }
 0xaa4   :  { %19616 = vmatmul.mubr.f32.vlgmr.msra.gmra.mrb[42].mxu0 %v24050_v63  ;;  %7076 = vbcast.lane.b32.xlu0 %v7070_v0, 264  ;;  %v8857_v61 = vand.u32 4294901760, %v8856_v20  ;;  %v7125_v63 = vrot.slane %v24182_v12, %v22179_v38 }
 0xaa5   :  { %20746 = vmatpush3.bf16.xpose.msra.mxu0 %v24017_v51  ;;  %7072 = vbcast.lane.b32.xlu1 %v7070_v0, 256  ;;  %v7136_v0 = vrot.slane %v24182_v12, %v22317_v54 }
 0xaa6   :  { %19622 = vmatprep.mubr.f32.mxu0 %v8341_v17  ;;  %20748 = vmatprep.subr.bf16.mxu0 %v20747_v16  ;;  %v24186_v33 = vpop.permute.xlu0 %6489  ;;  %v6483_v25 = vpop.permute.xlu1 %6482  ;;  %v8866_v17 = vsub.f32 %v24168_v7, %v8865_v37 }
 0xaa7   :  { %v6615_v54 = vsel %vm6605_vm5, %v24163_v1, %v6483_v25 }
 0xaa8   :  { %7087 = vbcast.lane.b32.xlu0 %v7081_v14, 264  ;;  %v8867_v48 = vand.u32 4294901760, %v8866_v17  ;;  %v7147_v17 = vrot.slane %v24182_v12, %v22324_v5 }
 0xaa9   :  { %19595 = vmatmul.mubr.f32.vlgmr.msra.gmra.mrb[32].mxu1 %v23948_v41  ;;  %7083 = vbcast.lane.b32.xlu1 %v7081_v14, 256  ;;  %v6912_v41 = vsel %vm6605_vm5, %v24070_v10, %v24096_v39  ;;  %v6614_v14 = vsel %vm6605_vm5, %v24143_v56, %v24141_v45 }
 0xaaa   :  { %20758 = vmatpush3.bf16.xpose.msra.mxu1 %v24150_v8  ;;  %19643 = vmatprep.mubr.f32.mxu1 %v8857_v61  ;;  %v24193_v59 = vpop.permute.xlu0 %6405  ;;  %v24195_v58 = vpop.permute.xlu1 %6493 }
 0xaab   :  { %20760 = vmatprep.subr.bf16.mxu1 %v20759_v23 }
 0xaac   :  { %19623 = vmatmul.mubr.f32.vlgmr.msra.gmra.mrb[42].mxu0 %v8351_v21  ;;  %7120 = vbcast.lane.b32.xlu0 %v7114_v50, 264 }
 0xaad   :  { %20750 = vmatpush3.bf16.xpose.msra.mxu0 %v20747_v16  ;;  %7116 = vbcast.lane.b32.xlu1 %v7114_v50, 256 }
 0xaae   :  { %19629 = vmatprep.mubr.f32.mxu0 %v24040_v27  ;;  %20752 = vmatprep.subr.bf16.mxu0 %v24017_v51  ;;  %v6869_v42 = vpop.permute.xlu0 %6868  ;;  %v6865_v15 = vpop.permute.xlu1 %6864 }
 0xaaf   :  { %v6928_v21 = vsel %vm6622_vm6, %v6912_v41, %v6869_v42  ;;  %v6927_v47 = vsel %vm6622_vm6, %v6911_v22, %v6865_v15  ;;  %v7158_v42 = vrot.slane %v24182_v12, %v23790_v43 }
 0xab0   :  { %v9298_v10 = vsel %vm7231_vm7, %v6928_v21, 0  ;;  %v9295_v39 = vsel %vm7231_vm7, %v6927_v47, 0  ;;  %7131 = vbcast.lane.b32.xlu0 %v7125_v63, 264 }
 0xab1   :  { %v9304_v2 = vand.u32 4294901760, %v9298_v10  ;;  %v9301_v26 = vand.u32 4294901760, %v9295_v39  ;;  %19644 = vmatmul.mubr.f32.vlgmr.msra.gmra.mrb[34].mxu1 %v8867_v48  ;;  %7127 = vbcast.lane.b32.xlu1 %v7125_v63, 256 }
 0xab2   :  { %20762 = vmatpush3.bf16.xpose.msra.mxu1 %v20759_v23  ;;  %19650 = vmatprep.mubr.f32.mxu1 %v24115_v30  ;;  %v6880_v38 = vpop.permute.xlu0 %6879  ;;  %v6876_v60 = vpop.permute.xlu1 %6875 }
 0xab3   :  { %v24223_v16 = vsub.f32 %v9298_v10, %v9304_v2  ;;  %v24225_v20 = vpack.c.bf16 %v9304_v2, %v9301_v26  ;;  %v24227_v11 = vsub.f32 %v9295_v39, %v9301_v26  ;;  %20764 = vmatprep.subr.bf16.mxu1 %v20763_v19  ;;  %v6914_v39 = vsel %vm6605_vm5, %v24106_v9, %v24125_v32 }
 0xab4   :  { %19630 = vmatmul.mubr.f32.vlgmr.msra.gmra.mrb[42].mxu0 %v24038_v49  ;;  %7142 = vbcast.lane.b32.xlu0 %v7136_v0, 264  ;;  %v6913_v2 = vsel %vm6605_vm5, %v24108_v44, %v24127_v13  ;;  %v6616_v32 = vsel %vm6605_vm5, %v24161_v57, %v24186_v33 }
 0xab5   :  { %v9390_v24 = vand.u32 4294901760, %v24227_v11  ;;  %20754 = vmatpush3.bf16.xpose.msra.mxu0 %v24017_v51  ;;  %7138 = vbcast.lane.b32.xlu1 %v7136_v0, 256  ;;  %v9397_v61 = vand.u32 4294901760, %v24223_v16  ;;  %v7169_v0 = vrot.slane %v24182_v12, %v23797_v62  ;;  %v20771_v62 = vpack.c.bf16 %v8883_v55, %v8876_v4 }
 0xab6   :  { %19636 = vmatprep.mubr.f32.mxu0 %v24040_v27  ;;  %20780 = vmatprep.subr.bf16.mxu0 %v24225_v20  ;;  %v6571_v23 = vpop.permute.xlu0 %6570  ;;  %v6567_v50 = vpop.permute.xlu1 %6566  ;;  %v20787_v6 = vpack.c.bf16 %v24223_v16, %v24227_v11 }
 0xab7   :  { %v6632_v51 = vsel %vm6622_vm6, %v6615_v54, %v6571_v23  ;;  %v6631_v41 = vsel %vm6622_vm6, %v6614_v14, %v6567_v50  ;;  %v9391_v45 = vsub.f32 %v24227_v11, %v9390_v24  ;;  %v9398_v63 = vsub.f32 %v24223_v16, %v9397_v61 }
 0xab8   :  { %v9292_v56 = vsel %vm7231_vm7, %v6632_v51, 0  ;;  %v9289_v1 = vsel %vm7231_vm7, %v6631_v41, 0  ;;  %7153 = vbcast.lane.b32.xlu0 %v7147_v17, 264  ;;  %v6930_v14 = vsel %vm6622_vm6, %v6914_v39, %v6880_v38  ;;  %v6929_v54 = vsel %vm6622_vm6, %v6913_v2, %v6876_v60 }
 0xab9   :  { %v24249_v27 = vand.u32 4294901760, %v9292_v56  ;;  %v24251_v25 = vand.u32 4294901760, %v9289_v1  ;;  %19651 = vmatmul.mubr.f32.vlgmr.msra.gmra.mrb[34].mxu1 %v24147_v28  ;;  %7149 = vbcast.lane.b32.xlu1 %v7147_v17, 256  ;;  %v9392_v15 = vand.u32 4294901760, %v9391_v45  ;;  %v9399_v48 = vand.u32 4294901760, %v9398_v63 }
 0xaba   :  { %20766 = vmatpush3.bf16.xpose.msra.mxu1 %v20763_v19  ;;  %19657 = vmatprep.mubr.f32.mxu1 %v24134_v31  ;;  %v6582_v5 = vpop.permute.xlu0 %6581  ;;  %v6578_v22 = vpop.permute.xlu1 %6577  ;;  %v9812_v60 = vsel %vm7231_vm7, %v6930_v14, 0  ;;  %v9809_v23 = vsel %vm7231_vm7, %v6929_v54, 0  ;;  %v6617_v17 = vsel %vm6605_vm5, %v24193_v59, %v24195_v58  ;;  %v20795_v54 = vpack.c.bf16 %v9397_v61, %v9390_v24 }
 0xabb   :  { %v24261_v21 = vsub.f32 %v9292_v56, %v24249_v27  ;;  %v24264_v47 = vsub.f32 %v9289_v1, %v24251_v25  ;;  %20768 = vmatprep.subr.bf16.mxu1 %v24150_v8  ;;  %v20783_v26 = vpack.c.bf16 %v9399_v48, %v9392_v15  ;;  %v6633_v50 = vsel %vm6622_vm6, %v6616_v32, %v6578_v22 }
 0xabc   :  { %19637 = vmatmul.mubr.f32.vlgmr.msra.gmra.mrb[42].mxu0 %v24038_v49  ;;  %7164 = vbcast.lane.b32.xlu0 %v7158_v42, 264  ;;  %v9818_v55 = vand.u32 4294901760, %v9812_v60  ;;  %v9815_v4 = vand.u32 4294901760, %v9809_v23  ;;  %v9803_v33 = vsel %vm7231_vm7, %v6633_v50, 0  ;;  %v6634_v56 = vsel %vm6622_vm6, %v6617_v17, %v6582_v5 }
 0xabd   :  { %v9379_v10 = vand.u32 4294901760, %v24261_v21  ;;  %20782 = vmatpush3.bf16.xpose.msra.mxu0 %v24225_v20  ;;  %7160 = vbcast.lane.b32.xlu1 %v7158_v42, 256  ;;  %v9369_v43 = vand.u32 4294901760, %v24264_v47  ;;  %v24320_v51 = vand.u32 4294901760, %v9803_v33  ;;  %v9806_v59 = vsel %vm7231_vm7, %v6634_v56, 0 }
 0xabe   :  { %v24277_v19 = vpop.permute.xlu0 %6714  ;;  %v24279_v49 = vpop.permute.xlu1 %6710  ;;  %20784 = vmatprep.subr.bf16.mxu0 %v20783_v26  ;;  %v24322_v41 = vsub.f32 %v9812_v60, %v9818_v55  ;;  %v24324_v45 = vsub.f32 %v9809_v23, %v9815_v4  ;;  %v24346_v42 = vand.u32 4294901760, %v9806_v59  ;;  %v24351_v48 = vpack.c.bf16 %v9818_v55, %v9815_v4 }
 0xabf   :  { %v9370_v9 = vsub.f32 %v24264_v47, %v9369_v43  ;;  %v9380_v44 = vsub.f32 %v24261_v21, %v9379_v10  ;;  %v24337_v58 = vsub.f32 %v9803_v33, %v24320_v51 }
 0xac0   :  { %7175 = vbcast.lane.b32.xlu0 %v7169_v0, 264  ;;  %v9911_v5 = vand.u32 4294901760, %v24322_v41 }
 0xac1   :  { %19658 = vmatmul.mubr.f32.vlgmr.msra.gmra.mrb[34].mxu1 %v24168_v7  ;;  %7171 = vbcast.lane.b32.xlu1 %v7169_v0, 256  ;;  %v9371_v13 = vand.u32 4294901760, %v9370_v9  ;;  %v9381_v38 = vand.u32 4294901760, %v9380_v44  ;;  %v9904_v7 = vand.u32 4294901760, %v24324_v45  ;;  %v9883_v63 = vand.u32 4294901760, %v24337_v58 }
 0xac2   :  { %20770 = vmatpush3.bf16.xpose.msra.mxu1 %v24150_v8  ;;  %19664 = vmatprep.mubr.f32.mxu1 %v8855_v52  ;;  %v24305_v57 = vpop.permute.xlu0 %6802  ;;  %v9912_v2 = vsub.f32 %v24322_v41, %v9911_v5  ;;  %v24365_v0 = vsub.f32 %v9806_v59, %v24346_v42 }
 0xac3   :  { %20772 = vmatprep.subr.bf16.mxu1 %v20771_v62  ;;  %v24307_v29 = vpop.permute.xlu1 %6798  ;;  %19685 = vmatprep.mubr.f32.mxu0 %v9371_v13  ;;  %v9905_v39 = vsub.f32 %v24324_v45, %v9904_v7 }
 0xac4   :  { %19686 = vmatmul.mubr.f32.vlgmr.msra.gmra.mrb[44].mxu0 %v9381_v38  ;;  %v9913_v9 = vand.u32 4294901760, %v9912_v2  ;;  %v9893_v32 = vand.u32 4294901760, %v24365_v0  ;;  %v6915_v13 = vsel %vm6605_vm5, %v24279_v49, %v24307_v29 }
 0xac5   :  { %20786 = vmatpush3.bf16.xpose.msra.mxu0 %v20783_v26  ;;  %19692 = vmatprep.mubr.f32.mxu0 %v24251_v25 }
 0xac6   :  { %20788 = vmatprep.subr.bf16.mxu0 %v20787_v6  ;;  %v24313_v31 = vpop.permute.xlu0 %6500 }
 0xac7   :  { %v24315_v52 = vpop.permute.xlu1 %6412 }
 0xac8   :  { %v6618_v29 = vsel %vm6605_vm5, %v24315_v52, %v24313_v31 }
 0xac9   :  { %19665 = vmatmul.mubr.f32.vlgmr.msra.gmra.mrb[34].mxu1 %v8865_v37 }
 0xaca   :  { %20774 = vmatpush3.bf16.xpose.msra.mxu1 %v20771_v62  ;;  %19671 = vmatprep.mubr.f32.mxu1 %v24115_v30  ;;  %v24330_v1 = vpop.permute.xlu0 %6725 }
 0xacb   :  { %20776 = vmatprep.subr.bf16.mxu1 %v24150_v8  ;;  %v24333_v22 = vpop.permute.xlu1 %6721 }
 0xacc   :  { %19693 = vmatmul.mubr.f32.vlgmr.msra.gmra.mrb[44].mxu0 %v24249_v27 }
 0xacd   :  { %20790 = vmatpush3.bf16.xpose.msra.mxu0 %v20787_v6  ;;  %19699 = vmatprep.mubr.f32.mxu0 %v24264_v47  ;;  %v9894_v47 = vsub.f32 %v24365_v0, %v9893_v32 }
 0xace   :  { %20792 = vmatprep.subr.bf16.mxu0 %v24225_v20  ;;  %v24344_v37 = vpop.permute.xlu0 %6813 }
 0xacf   :  { %v24348_v15 = vpop.permute.xlu1 %6809  ;;  %v9895_v23 = vand.u32 4294901760, %v9894_v47 }
 0xad1   :  { %19672 = vmatmul.mubr.f32.vlgmr.msra.gmra.mrb[34].mxu1 %v24147_v28 }
 0xad2   :  { %20778 = vmatpush3.bf16.xpose.msra.mxu1 %v24150_v8  ;;  %19678 = vmatprep.mubr.f32.mxu1 %v24115_v30  ;;  %v24362_v26 = vpop.permute.xlu0 %6423  ;;  %v9884_v8 = vsub.f32 %v24337_v58, %v9883_v63  ;;  %v9906_v30 = vand.u32 4294901760, %v9905_v39 }
 0xad3   :  { %20804 = vmatprep.subr.bf16.mxu1 %v24351_v48  ;;  %v6417_v14 = vpop.permute.xlu1 %6416 }
 0xad4   :  { %19700 = vmatmul.mubr.f32.vlgmr.msra.gmra.mrb[44].mxu0 %v24261_v21  ;;  %v9885_v62 = vand.u32 4294901760, %v9884_v8  ;;  %v20807_v16 = vpack.c.bf16 %v9913_v9, %v9906_v30 }
 0xad5   :  { %20794 = vmatpush3.bf16.xpose.msra.mxu0 %v24225_v20  ;;  %19706 = vmatprep.mubr.f32.mxu0 %v9369_v43 }
 0xad6   :  { %20796 = vmatprep.subr.bf16.mxu0 %v20795_v54  ;;  %v24379_v44 = vpop.permute.xlu0 %6511 }
 0xad7   :  { %v6505_v11 = vpop.permute.xlu1 %6504 }
 0xad8   :  { %v6619_v31 = vsel %vm6605_vm5, %v6417_v14, %v6505_v11 }
 0xad9   :  { %19679 = vmatmul.mubr.f32.vlgmr.msra.gmra.mrb[34].mxu1 %v24147_v28  ;;  %v6916_v28 = vsel %vm6605_vm5, %v24277_v19, %v24305_v57  ;;  %v20811_v19 = vpack.c.bf16 %v24322_v41, %v24324_v45 }
 0xada   :  { %20806 = vmatpush3.bf16.xpose.msra.mxu1 %v24351_v48  ;;  %19727 = vmatprep.mubr.f32.mxu1 %v9885_v62  ;;  %v24384_v24 = vpop.permute.xlu0 %6427 }
 0xadb   :  { %20808 = vmatprep.subr.bf16.mxu1 %v20807_v16  ;;  %v24386_v61 = vpop.permute.xlu1 %6515 }
 0xadc   :  { %19707 = vmatmul.mubr.f32.vlgmr.msra.gmra.mrb[44].mxu0 %v9379_v10 }
 0xadd   :  { %20798 = vmatpush3.bf16.xpose.msra.mxu0 %v20795_v54  ;;  %19713 = vmatprep.mubr.f32.mxu0 %v24251_v25 }
 0xade   :  { %20800 = vmatprep.subr.bf16.mxu0 %v24225_v20  ;;  %v6891_v43 = vpop.permute.xlu0 %6890 }
 0xadf   :  { %v6932_v38 = vsel %vm6622_vm6, %v6916_v28, %v6891_v43  ;;  %v6887_v60 = vpop.permute.xlu1 %6886 }
 0xae0   :  { %v10326_v21 = vsel %vm7231_vm7, %v6932_v38, 0  ;;  %v6931_v10 = vsel %vm6622_vm6, %v6915_v13, %v6887_v60 }
 0xae1   :  { %v10332_v50 = vand.u32 4294901760, %v10326_v21  ;;  %v10323_v6 = vsel %vm7231_vm7, %v6931_v10, 0  ;;  %19728 = vmatmul.mubr.f32.vlgmr.msra.gmra.mrb[36].mxu1 %v9895_v23  ;;  %v6918_v23 = vsel %vm6605_vm5, %v24330_v1, %v24344_v37  ;;  %v6620_v37 = vsel %vm6605_vm5, %v24362_v26, %v24379_v44 }
 0xae2   :  { %v10329_v57 = vand.u32 4294901760, %v10323_v6  ;;  %20810 = vmatpush3.bf16.xpose.msra.mxu1 %v20807_v16  ;;  %19734 = vmatprep.mubr.f32.mxu1 %v24320_v51  ;;  %v6898_v49 = vpop.permute.xlu0 %6897  ;;  %v6621_v44 = vsel %vm6605_vm5, %v24384_v24, %v24386_v61 }
 0xae3   :  { %v24411_v55 = vsub.f32 %v10326_v21, %v10332_v50  ;;  %20812 = vmatprep.subr.bf16.mxu1 %v20811_v19  ;;  %v6589_v4 = vpop.permute.xlu1 %6588 }
 0xae4   :  { %v24413_v33 = vpack.c.bf16 %v10332_v50, %v10329_v57  ;;  %v24415_v17 = vsub.f32 %v10323_v6, %v10329_v57  ;;  %v6635_v56 = vsel %vm6622_vm6, %v6618_v29, %v6589_v4  ;;  %19714 = vmatmul.mubr.f32.vlgmr.msra.gmra.mrb[44].mxu0 %v24249_v27  ;;  %v20819_v29 = vpack.c.bf16 %v9911_v5, %v9904_v7 }
 0xae5   :  { %v10425_v59 = vand.u32 4294901760, %v24411_v55  ;;  %v10317_v39 = vsel %vm7231_vm7, %v6635_v56, 0  ;;  %20802 = vmatpush3.bf16.xpose.msra.mxu0 %v24225_v20  ;;  %19720 = vmatprep.mubr.f32.mxu0 %v24251_v25 }
 0xae6   :  { %v10418_v52 = vand.u32 4294901760, %v24415_v17  ;;  %v24425_v2 = vand.u32 4294901760, %v10317_v39  ;;  %20828 = vmatprep.subr.bf16.mxu0 %v24413_v33  ;;  %v6593_v54 = vpop.permute.xlu0 %6592  ;;  %v20835_v41 = vpack.c.bf16 %v24411_v55, %v24415_v17 }
 0xae7   :  { %v6636_v8 = vsel %vm6622_vm6, %v6619_v31, %v6593_v54  ;;  %v6902_v30 = vpop.permute.xlu1 %6901  ;;  %v10426_v9 = vsub.f32 %v24411_v55, %v10425_v59 }
 0xae8   :  { %v24433_v20 = vsub.f32 %v10317_v39, %v24425_v2  ;;  %v10320_v25 = vsel %vm7231_vm7, %v6636_v8, 0  ;;  %v10419_v14 = vsub.f32 %v24415_v17, %v10418_v52  ;;  %v6934_v50 = vsel %vm6622_vm6, %v6918_v23, %v6902_v30 }
 0xae9   :  { %v24439_v11 = vand.u32 4294901760, %v10320_v25  ;;  %19735 = vmatmul.mubr.f32.vlgmr.msra.gmra.mrb[36].mxu1 %v24346_v42  ;;  %v10427_v62 = vand.u32 4294901760, %v10426_v9  ;;  %v10840_v56 = vsel %vm7231_vm7, %v6934_v50, 0 }
 0xaea   :  { %20814 = vmatpush3.bf16.xpose.msra.mxu1 %v20811_v19  ;;  %19741 = vmatprep.mubr.f32.mxu1 %v24337_v58  ;;  %v6604_v16 = vpop.permute.xlu0 %6603  ;;  %v10420_v47 = vand.u32 4294901760, %v10419_v14  ;;  %v10397_v28 = vand.u32 4294901760, %v24433_v20  ;;  %v6917_v19 = vsel %vm6605_vm5, %v24333_v22, %v24348_v15  ;;  %v10846_v5 = vand.u32 4294901760, %v10840_v56 }
 0xaeb   :  { %v24445_v43 = vsub.f32 %v10320_v25, %v24439_v11  ;;  %20816 = vmatprep.subr.bf16.mxu1 %v24351_v48  ;;  %v6600_v13 = vpop.permute.xlu1 %6599  ;;  %v6933_v57 = vsel %vm6622_vm6, %v6917_v19, %v6898_v49  ;;  %v6638_v54 = vsel %vm6622_vm6, %v6621_v44, %v6604_v16 }
 0xaec   :  { %19721 = vmatmul.mubr.f32.vlgmr.msra.gmra.mrb[44].mxu0 %v24249_v27  ;;  %v20831_v60 = vpack.c.bf16 %v10427_v62, %v10420_v47  ;;  %v10398_v10 = vsub.f32 %v24433_v20, %v10397_v28  ;;  %v6637_v39 = vsel %vm6622_vm6, %v6620_v37, %v6600_v13  ;;  %v10837_v45 = vsel %vm7231_vm7, %v6933_v57, 0 }
 0xaed   :  { %v10407_v38 = vand.u32 4294901760, %v24445_v43  ;;  %20830 = vmatpush3.bf16.xpose.msra.mxu0 %v24413_v33  ;;  %v10831_v7 = vsel %vm7231_vm7, %v6637_v39, 0  ;;  %v10843_v58 = vand.u32 4294901760, %v10837_v45  ;;  %v24500_v31 = vsub.f32 %v10840_v56, %v10846_v5 }
 0xaee   :  { %v24454_v21 = vpop.permute.xlu0 %6940  ;;  %20832 = vmatprep.subr.bf16.mxu0 %v20831_v60  ;;  %v10399_v1 = vand.u32 4294901760, %v10398_v10  ;;  %v24498_v49 = vand.u32 4294901760, %v10831_v7  ;;  %v10834_v24 = vsel %vm7231_vm7, %v6638_v54, 0 }
 0xaef   :  { %v24460_v6 = vpop.permute.xlu1 %6944  ;;  %v10408_v27 = vsub.f32 %v24445_v43, %v10407_v38  ;;  %v24508_v30 = vsub.f32 %v10837_v45, %v10843_v58  ;;  %v24524_v14 = vand.u32 4294901760, %v10834_v24  ;;  %v24529_v47 = vpack.c.bf16 %v10846_v5, %v10843_v58 }
 0xaf0   :  { %19769 = vmatprep.mubr.f32.mxu0 %v10399_v1  ;;  %v24515_v61 = vsub.f32 %v10831_v7, %v24498_v49 }
 0xaf1   :  { %19742 = vmatmul.mubr.f32.vlgmr.msra.gmra.mrb[36].mxu1 %v24365_v0  ;;  %v10409_v4 = vand.u32 4294901760, %v10408_v27  ;;  %v10939_v0 = vand.u32 4294901760, %v24500_v31  ;;  %v10932_v25 = vand.u32 4294901760, %v24508_v30  ;;  %v24540_v23 = vsub.f32 %v10834_v24, %v24524_v14 }
 0xaf2   :  { %20818 = vmatpush3.bf16.xpose.msra.mxu1 %v24351_v48  ;;  %v24480_v22 = vpop.permute.xlu0 %6951  ;;  %19748 = vmatprep.mubr.f32.mxu1 %v9883_v63  ;;  %v10911_v16 = vand.u32 4294901760, %v24515_v61 }
 0xaf3   :  { %20820 = vmatprep.subr.bf16.mxu1 %v20819_v29  ;;  %v24484_v15 = vpop.permute.xlu1 %6955  ;;  %v10940_v13 = vsub.f32 %v24500_v31, %v10939_v0  ;;  %v10933_v50 = vsub.f32 %v24508_v30, %v10932_v25  ;;  %v10921_v1 = vand.u32 4294901760, %v24540_v23 }
 0xaf4   :  { %19770 = vmatmul.mubr.f32.vlgmr.msra.gmra.mrb[46].mxu0 %v10409_v4  ;;  %v20859_v4 = vpack.c.bf16 %v24500_v31, %v24508_v30 }
 0xaf5   :  { %20834 = vmatpush3.bf16.xpose.msra.mxu0 %v20831_v60  ;;  %19776 = vmatprep.mubr.f32.mxu0 %v24425_v2  ;;  %v10941_v27 = vand.u32 4294901760, %v10940_v13  ;;  %v10934_v57 = vand.u32 4294901760, %v10933_v50 }
 0xaf6   :  { %20836 = vmatprep.subr.bf16.mxu0 %v20835_v41  ;;  %v24491_v26 = vpop.permute.xlu0 %6962 }
 0xaf7   :  { %v24493_v63 = vpop.permute.xlu1 %6966  ;;  %v20855_v55 = vpack.c.bf16 %v10941_v27, %v10934_v57 }
 0xaf9   :  { %19749 = vmatmul.mubr.f32.vlgmr.msra.gmra.mrb[36].mxu1 %v9893_v32 }
 0xafa   :  { %20822 = vmatpush3.bf16.xpose.msra.mxu1 %v20819_v29  ;;  %19755 = vmatprep.mubr.f32.mxu1 %v24320_v51  ;;  %v24506_v8 = vpop.permute.xlu0 %6977 }
 0xafb   :  { %20824 = vmatprep.subr.bf16.mxu1 %v24351_v48  ;;  %v24511_v9 = vpop.permute.xlu1 %6973 }
 0xafc   :  { %19777 = vmatmul.mubr.f32.vlgmr.msra.gmra.mrb[46].mxu0 %v24439_v11 }
 0xafd   :  { %20838 = vmatpush3.bf16.xpose.msra.mxu0 %v20835_v41  ;;  %19783 = vmatprep.mubr.f32.mxu0 %v24433_v20  ;;  %v10922_v20 = vsub.f32 %v24540_v23, %v10921_v1 }
 0xafe   :  { %20840 = vmatprep.subr.bf16.mxu0 %v24413_v33  ;;  %v24521_v32 = vpop.permute.xlu0 %6984 }
 0xaff   :  { %v24526_v62 = vpop.permute.xlu1 %6988  ;;  %v10923_v29 = vand.u32 4294901760, %v10922_v20 }
 0xb01   :  { %19756 = vmatmul.mubr.f32.vlgmr.msra.gmra.mrb[36].mxu1 %v24346_v42 }
 0xb02   :  { %20826 = vmatpush3.bf16.xpose.msra.mxu1 %v24351_v48  ;;  %19762 = vmatprep.mubr.f32.mxu1 %v24320_v51  ;;  %v24537_v60 = vpop.permute.xlu0 %6999  ;;  %v20843_v51 = vpack.c.bf16 %v10425_v59, %v10418_v52  ;;  %v10912_v48 = vsub.f32 %v24515_v61, %v10911_v16 }
 0xb03   :  { %20852 = vmatprep.subr.bf16.mxu1 %v24529_v47  ;;  %v24543_v10 = vpop.permute.xlu1 %6995 }
 0xb04   :  { %25541 = vst [vmem:[#allocation4_spill] sm:$0xff] %v24543_v10  ;;  %19784 = vmatmul.mubr.f32.vlgmr.msra.gmra.mrb[46].mxu0 %v24445_v43  ;;  %v10913_v17 = vand.u32 4294901760, %v10912_v48 }
 0xb05   :  { %20842 = vmatpush3.bf16.xpose.msra.mxu0 %v24413_v33  ;;  %19790 = vmatprep.mubr.f32.mxu0 %v10397_v28 }
 0xb06   :  { %20844 = vmatprep.subr.bf16.mxu0 %v20843_v51  ;;  %v7033_v19 = vpop.permute.xlu0 %7032 }
 0xb07   :  { %v7029_v37 = vpop.permute.xlu1 %7028 }
 0xb09   :  { %19763 = vmatmul.mubr.f32.vlgmr.msra.gmra.mrb[36].mxu1 %v24346_v42 }
 0xb0a   :  { %20854 = vmatpush3.bf16.xpose.msra.mxu1 %v24529_v47  ;;  %19811 = vmatprep.mubr.f32.mxu1 %v10913_v17  ;;  %v24562_v59 = vpop.permute.xlu0 %7043 }
 0xb0b   :  { %20856 = vmatprep.subr.bf16.mxu1 %v20855_v55  ;;  %v24564_v52 = vpop.permute.xlu1 %7039 }
 0xb0c   :  { %19791 = vmatmul.mubr.f32.vlgmr.msra.gmra.mrb[46].mxu0 %v10407_v38 }
 0xb0d   :  { %20846 = vmatpush3.bf16.xpose.msra.mxu0 %v20843_v51  ;;  %19797 = vmatprep.mubr.f32.mxu0 %v24425_v2 }
 0xb0e   :  { %20848 = vmatprep.subr.bf16.mxu0 %v24413_v33  ;;  %v7055_v42 = vpop.permute.xlu0 %7054 }
 0xb0f   :  { %v7051_v28 = vpop.permute.xlu1 %7050  ;;  %v7204_v30 = vsel %vm6605_vm5, %v24493_v63, %v7055_v42 }
 0xb11   :  { %19812 = vmatmul.mubr.f32.vlgmr.msra.gmra.mrb[38].mxu1 %v10923_v29 }
 0xb12   :  { %20858 = vmatpush3.bf16.xpose.msra.mxu1 %v20855_v55  ;;  %19818 = vmatprep.mubr.f32.mxu1 %v24498_v49  ;;  %v24576_v56 = vpop.permute.xlu0 %7065 }
 0xb13   :  { %20860 = vmatprep.subr.bf16.mxu1 %v20859_v4  ;;  %v24578_v43 = vpop.permute.xlu1 %7061 }
 0xb14   :  { %19798 = vmatmul.mubr.f32.vlgmr.msra.gmra.mrb[46].mxu0 %v24439_v11 }
 0xb15   :  { %20850 = vmatpush3.bf16.xpose.msra.mxu0 %v24413_v33  ;;  %19804 = vmatprep.mubr.f32.mxu0 %v24425_v2  ;;  %v7200_v33 = vsel %vm6605_vm5, %v24460_v6, %v7033_v19  ;;  %v7199_v2 = vsel %vm6605_vm5, %v24454_v21, %v7029_v37 }
 0xb16   :  { %v7077_v38 = vpop.permute.xlu0 %7076 }
 0xb17   :  { %v7073_v39 = vpop.permute.xlu1 %7072 }
 0xb19   :  { %19819 = vmatmul.mubr.f32.vlgmr.msra.gmra.mrb[38].mxu1 %v24524_v14 }
 0xb1a   :  { %20862 = vmatpush3.bf16.xpose.msra.mxu1 %v20859_v4  ;;  %19825 = vmatprep.mubr.f32.mxu1 %v24515_v61  ;;  %v24585_v45 = vpop.permute.xlu0 %7087 }
 0xb1b   :  { %20864 = vmatprep.subr.bf16.mxu1 %v24529_v47  ;;  %v24588_v41 = vpop.permute.xlu1 %7083 }
 0xb1c   :  { %19805 = vmatmul.mubr.f32.vlgmr.msra.gmra.mrb[46].mxu0 %v24439_v11  ;;  %v20867_v11 = vpack.c.bf16 %v10939_v0, %v10932_v25  ;;  %v7203_v25 = vsel %vm6605_vm5, %v24491_v26, %v7051_v28 }
 0xb1e   :  { %v7121_v5 = vpop.permute.xlu0 %7120 }
 0xb1f   :  { %v7216_v7 = vsel %vm6622_vm6, %v7200_v33, %v7121_v5  ;;  %v7117_v58 = vpop.permute.xlu1 %7116 }
 0xb20   :  { %v11546_v44 = vand.u32 4294901760, %v7216_v7  ;;  %v7215_v54 = vsel %vm6622_vm6, %v7199_v2, %v7117_v58  ;;  %v7207_v58 = vsel %vm6605_vm5, %v24521_v32, %v7073_v39 }
 0xb21   :  { %v11543_v24 = vand.u32 4294901760, %v7215_v54  ;;  %19826 = vmatmul.mubr.f32.vlgmr.msra.gmra.mrb[38].mxu1 %v24540_v23 }
 0xb22   :  { %v11638_v13 = vsub.f32 %v7216_v7, %v11546_v44  ;;  %20866 = vmatpush3.bf16.xpose.msra.mxu1 %v24529_v47  ;;  %19832 = vmatprep.mubr.f32.mxu1 %v10911_v16  ;;  %v24605_v21 = vpop.permute.xlu0 %7131 }
 0xb23   :  { %v24607_v6 = vpack.c.bf16 %v11546_v44, %v11543_v24  ;;  %v11631_v50 = vsub.f32 %v7215_v54, %v11543_v24  ;;  %20868 = vmatprep.subr.bf16.mxu1 %v20867_v11  ;;  %v24609_v51 = vpop.permute.xlu1 %7127 }
 0xb24   :  { %v11639_v48 = vand.u32 4294901760, %v11638_v13 }
 0xb25   :  { %v11632_v27 = vand.u32 4294901760, %v11631_v50  ;;  %20876 = vmatprep.subr.bf16.mxu0 %v24607_v6  ;;  %v24612_v31 = vpack.c.bf16 %v11638_v13, %v11631_v50 }
 0xb26   :  { %20878 = vmatpush3.bf16.msra.mxu0 %v24607_v6  ;;  %v7143_v61 = vpop.permute.xlu0 %7142  ;;  %v11640_v0 = vsub.f32 %v11638_v13, %v11639_v48 }
 0xb27   :  { %v7220_v16 = vsel %vm6622_vm6, %v7204_v30, %v7143_v61  ;;  %v7139_v19 = vpop.permute.xlu1 %7138  ;;  %v11633_v37 = vsub.f32 %v11631_v50, %v11632_v27  ;;  %v24623_v42 = vpack.c.bf16 %v11639_v48, %v11632_v27 }
 0xb28   :  { %v12562_v57 = vand.u32 4294901760, %v7220_v16  ;;  %v7219_v17 = vsel %vm6622_vm6, %v7203_v25, %v7139_v19  ;;  %v11641_v55 = vand.u32 4294901760, %v11640_v0 }
 0xb29   :  { %v12559_v20 = vand.u32 4294901760, %v7219_v17  ;;  %19833 = vmatmul.mubr.f32.vlgmr.msra.gmra.mrb[38].mxu1 %v10921_v1  ;;  %v11634_v63 = vand.u32 4294901760, %v11633_v37  ;;  %v7208_v1 = vsel %vm6605_vm5, %v24526_v62, %v7077_v38 }
 0xb2a   :  { %v12654_v29 = vsub.f32 %v7220_v16, %v12562_v57  ;;  %20870 = vmatpush3.bf16.xpose.msra.mxu1 %v20867_v11  ;;  %19839 = vmatprep.mubr.f32.mxu1 %v24498_v49  ;;  %v24626_v26 = vpop.permute.xlu0 %7153 }
 0xb2b   :  { %v12647_v28 = vsub.f32 %v7219_v17, %v12559_v20  ;;  %20872 = vmatprep.subr.bf16.mxu1 %v24529_v47  ;;  %v24629_v4 = vpop.permute.xlu1 %7149  ;;  %v24631_v33 = vpack.c.bf16 %v11641_v55, %v11634_v63  ;;  %v24643_v24 = vpack.c.bf16 %v12562_v57, %v12559_v20  ;;  %v7004_v17 = vrot.slane %v23980_v40, %v23846_v46 }
 0xb2c   :  { %v12655_v5 = vand.u32 4294901760, %v12654_v29 }
 0xb2d   :  { %v12648_v2 = vand.u32 4294901760, %v12647_v28  ;;  %20880 = vmatprep.subr.bf16.mxu0 %v24631_v33  ;;  %v24634_v23 = vpack.c.bf16 %v12654_v29, %v12647_v28 }
 0xb2e   :  { %v7165_v7 = vpop.permute.xlu0 %7164  ;;  %v12656_v38 = vsub.f32 %v12654_v29, %v12655_v5 }
 0xb2f   :  { %v24641_v44 = vsel %vm6622_vm6, %v7208_v1, %v7165_v7  ;;  %v7161_v54 = vpop.permute.xlu1 %7160  ;;  %v12649_v62 = vsub.f32 %v12647_v28, %v12648_v2  ;;  %v24651_v48 = vpack.c.bf16 %v12655_v5, %v12648_v2 }
 0xb30   :  { %v25511_v11 = vand.u32 4294901760, %v24641_v44  ;;  %v24647_v13 = vsel %vm6622_vm6, %v7207_v58, %v7161_v54  ;;  %v12657_v0 = vand.u32 4294901760, %v12656_v38 }
 0xb31   :  { %v25512_v50 = vand.u32 4294901760, %v24647_v13  ;;  %19840 = vmatmul.mubr.f32.vlgmr.msra.gmra.mrb[38].mxu1 %v24524_v14  ;;  %v12650_v61 = vand.u32 4294901760, %v12649_v62 }
 0xb32   :  { %v24656_v32 = vsub.f32 %v24641_v44, %v25511_v11  ;;  %20874 = vmatpush3.bf16.xpose.msra.mxu1 %v24529_v47  ;;  %19846 = vmatprep.mubr.f32.mxu1 %v24498_v49 }
 0xb33   :  { %v24663_v39 = vsub.f32 %v24647_v13, %v25512_v50  ;;  %20924 = vmatprep.subr.bf16.mxu1 %v24643_v24  ;;  %v24679_v47 = vpack.c.bf16 %v12657_v0, %v12650_v61 }
 0xb34   :  { %v25513_v27 = vand.u32 4294901760, %v24656_v32 }
 0xb35   :  { %v25514_v30 = vand.u32 4294901760, %v24663_v39  ;;  %v24670_v25 = vpack.c.bf16 %v24656_v32, %v24663_v39 }
 0xb37   :  { %v24676_v49 = vpack.c.bf16 %v25513_v27, %v25514_v30 }
 0xb39   :  { %19847 = vmatmul.mubr.f32.vlgmr.msra.gmra.mrb[38].mxu1 %v24524_v14 }
 0xb3a   :  { %20926 = vmatpush3.bf16.msra.mxu1 %v24643_v24 }
 0xb3b   :  { %20928 = vmatprep.subr.bf16.mxu1 %v24679_v47 }
 0xb4c   :  { %v19554_v16 = vpop.f32.mrb[30].mxu1 }
 0xb4d   :  { %v11345_v19 = vmul.f32 0.25, %v19554_v16  ;;  %v7736_v37 = vpop.f32.mrb[31].mxu1 }
 0xb4e   :  { %v24690_v5 = vmul.f32 0.25, %v7736_v37 }
 0xb4f   :  { %v11363_v57 = vsel %vm1730_vm3, %v11345_v19, -inf }
 0xb50   :  { %11364 = vmax.xlane.f32.xlu0 %v11363_v57  ;;  %v11360_v7 = vsel %vm1730_vm3, %v24690_v5, -inf }
 0xb66   :  { %7006 = vbcast.lane.b32.xlu0 %v7004_v17, 256 }
 0xb7c   :  { %v19596_v55 = vpop.f32.mrb[32].mxu1 }
 0xb7d   :  { %v8250_v20 = vpop.f32.mrb[33].mxu1  ;;  %v24706_v57 = vmul.f32 0.25, %v19596_v55 }
 0xb7e   :  { %v24700_v0 = vmul.f32 0.25, %v8250_v20 }
 0xb80   :  { %v11366_v37 = vsel %vm1730_vm3, %v24700_v0, -inf }
 0xb8f   :  { %v19638_v63 = vpop.f32.mrb[42].mxu0 }
 0xb90   :  { %v24686_v14 = vmul.f32 0.25, %v19638_v63  ;;  %v8764_v29 = vpop.f32.mrb[43].mxu0  ;;  %v7092_v63 = vrot.slane %v24062_v34, %v23846_v46 }
 0xb91   :  { %v24688_v28 = vmul.f32 0.25, %v8764_v29 }
 0xb92   :  { %v11375_v2 = vsel %vm1730_vm3, %v24686_v14, -inf }
 0xb93   :  { %11376 = vmax.xlane.f32.xlu1 %v11375_v2  ;;  %v11372_v1 = vsel %vm1730_vm3, %v24688_v28, -inf  ;;  %v24712_v2 = vpop.permute.xlu0 %7175 }
 0xb94   :  { %11373 = vmax.xlane.f32.xlu0 %v11372_v1  ;;  %25542 = vst [vmem:[#allocation5_spill] sm:$0xff] %v24712_v2 }
 0xb97   :  { %11361 = vmax.xlane.f32.xlu1 %v11360_v7 }
 0xba8   :  { %7010 = vbcast.lane.b32.xlu1 %v7004_v17, 264  ;;  %v11369_v17 = vsel %vm1730_vm3, %v24706_v57, -inf }
 0xbac   :  { %v19680_v58 = vpop.f32.mrb[34].mxu1 }
 0xbad   :  { %v9278_v54 = vpop.f32.mrb[35].mxu1  ;;  %v24714_v55 = vmul.f32 0.25, %v19680_v58 }
 0xbae   :  { %v24722_v27 = vmul.f32 0.25, %v9278_v54 }
 0xbbf   :  { %v19722_v62 = vpop.f32.mrb[44].mxu0 }
 0xbc0   :  { %v24698_v38 = vmul.f32 0.25, %v19722_v62  ;;  %v9792_v61 = vpop.f32.mrb[45].mxu0 }
 0xbc1   :  { %v24720_v50 = vmul.f32 0.25, %v9792_v61 }
 0xbc2   :  { %v11387_v16 = vsel %vm1730_vm3, %v24698_v38, -inf }
 0xbc3   :  { %11388 = vmax.xlane.f32.xlu0 %v11387_v16 }
 0xbc7   :  { %11367 = vmax.xlane.f32.xlu0 %v11366_v37 }
 0xbcc   :  { %11370 = vmax.xlane.f32.xlu1 %v11369_v17  ;;  %v11381_v17 = vsel %vm1730_vm3, %v24714_v55, -inf }
 0xbdc   :  { %v19764_v29 = vpop.f32.mrb[36].mxu1 }
 0xbdd   :  { %v10306_v20 = vpop.f32.mrb[37].mxu1  ;;  %7094 = vbcast.lane.b32.xlu1 %v7092_v63, 256  ;;  %7098 = vbcast.lane.b32.xlu0 %v7092_v63, 264  ;;  %v11365_v7 = vpop.xlane.xlu0 %11364  ;;  %v24730_v58 = vmul.f32 0.25, %v19764_v29 }
 0xbde   :  { %v11409_v16 = vsub.f32 %v11345_v19, %v11365_v7  ;;  %v11384_v19 = vsel %vm1730_vm3, %v24720_v50, -inf  ;;  %v24738_v7 = vmul.f32 0.25, %v10306_v20 }
 0xbe0   :  { %v11426_v37 = vmul.f32 1.442695, %v11409_v16  ;;  %v11390_v16 = vsel %vm1730_vm3, %v24738_v7, -inf }
 0xbe2   :  { %21891 = vpow2.f32 %v11426_v37 }
 0xbec   :  { %v24736_v61 = vpop.eup %21891 }
 0xbed   :  { %v11459_v29 = vsel %vm1730_vm3, %v24736_v61, 0.0 }
 0xbef   :  { %v19806_v1 = vpop.f32.mrb[46].mxu0 }
 0xbf0   :  { %v10820_v62 = vpop.f32.mrb[47].mxu0  ;;  %v24716_v11 = vmul.f32 0.25, %v19806_v1  ;;  %v11378_v1 = vsel %vm1730_vm3, %v24722_v27, -inf }
 0xbf1   :  { %v24726_v30 = vmul.f32 0.25, %v10820_v62  ;;  %v11393_v62 = vsel %vm1730_vm3, %v24730_v58, -inf }
 0xbf2   :  { %v11399_v63 = vsel %vm1730_vm3, %v24716_v11, -inf }
 0xbf3   :  { %v11396_v54 = vsel %vm1730_vm3, %v24726_v30, -inf }
 0xbfc   :  { %11382 = vmax.xlane.f32.xlu0 %v11381_v17 }
 0xc00   :  { %11400 = vmax.xlane.f32.xlu0 %v11399_v63  ;;  %v24746_v63 = vpop.permute.xlu1 %7171 }
 0xc01   :  { %11385 = vmax.xlane.f32.xlu1 %v11384_v19  ;;  %25543 = vst [vmem:[#allocation6_spill] sm:$0xff] %v24746_v63  ;;  %v24748_v19 = vpop.permute.xlu0 %7006 }
 0xc02   :  { %25544 = vst [vmem:[#allocation7_spill] sm:$0xff] %v24748_v19 }
 0xc04   :  { %11379 = vmax.xlane.f32.xlu0 %v11378_v1 }
 0xc05   :  { %11397 = vmax.xlane.f32.xlu1 %v11396_v54 }
 0xc08   :  { %11394 = vmax.xlane.f32.xlu0 %v11393_v62 }
 0xc09   :  { %11460 = vadd.xlane.f32.xlu1 %v11459_v29 }
 0xc0c   :  { %v19848_v37 = vpop.f32.mrb[38].mxu1  ;;  %11391 = vmax.xlane.f32.xlu0 %v11390_v16 }
 0xc0d   :  { %v11334_v17 = vpop.f32.mrb[39].mxu1 }
 0xc20   :  { %v11377_v20 = vpop.xlane.xlu1 %11376 }
 0xc21   :  { %v11413_v1 = vsub.f32 %v24686_v14, %v11377_v20  ;;  %v11374_v54 = vpop.xlane.xlu0 %11373  ;;  %v24763_v20 = vmul.f32 0.25, %v11334_v17 }
 0xc22   :  { %v11412_v62 = vsub.f32 %v24688_v28, %v11374_v54  ;;  %v24761_v28 = vmul.f32 0.25, %v19848_v37 }
 0xc23   :  { %v11434_v35 = vmul.f32 1.442695, %v11413_v1 }
 0xc24   :  { %v11432_v36 = vmul.f32 1.442695, %v11412_v62  ;;  %v11362_v3 = vpop.xlane.xlu1 %11361 }
 0xc25   :  { %21893 = vpow2.f32 %v11434_v35  ;;  %v11408_v29 = vsub.f32 %v24690_v5, %v11362_v3  ;;  %v11402_v35 = vsel %vm1730_vm3, %v24763_v20, -inf }
 0xc26   :  { %21895 = vpow2.f32 %v11432_v36 }
 0xc27   :  { %v11424_v18 = vmul.f32 1.442695, %v11408_v29 }
 0xc29   :  { %21897 = vpow2.f32 %v11424_v18  ;;  %v11405_v18 = vsel %vm1730_vm3, %v24761_v28, -inf }
 0xc2f   :  { %v24753_v16 = vpop.eup %21893 }
 0xc30   :  { %v11471_v19 = vsel %vm1730_vm3, %v24753_v16, 0.0  ;;  %v24757_v63 = vpop.eup %21895 }
 0xc31   :  { %11472 = vadd.xlane.f32.xlu0 %v11471_v19  ;;  %v11468_v3 = vsel %vm1730_vm3, %v24757_v63, 0.0  ;;  %v24774_v19 = vpop.permute.xlu1 %7010 }
 0xc32   :  { %25545 = vst [vmem:[#allocation8_spill] sm:$0xff] %v24774_v19 }
 0xc33   :  { %v24759_v14 = vpop.eup %21897 }
 0xc34   :  { %v11456_v36 = vsel %vm1730_vm3, %v24759_v14, 0.0 }
 0xc35   :  { %11469 = vadd.xlane.f32.xlu0 %v11468_v3  ;;  %11457 = vadd.xlane.f32.xlu1 %v11456_v36 }
 0xc39   :  { %11406 = vmax.xlane.f32.xlu0 %v11405_v18  ;;  %11403 = vmax.xlane.f32.xlu1 %v11402_v35 }
 0xc50   :  { %v11389_v5 = vpop.xlane.xlu0 %11388 }
 0xc51   :  { %v11417_v37 = vsub.f32 %v24698_v38, %v11389_v5 }
 0xc53   :  { %v11442_v17 = vmul.f32 1.442695, %v11417_v37 }
 0xc54   :  { %v11368_v1 = vpop.xlane.xlu0 %11367 }
 0xc55   :  { %21899 = vpow2.f32 %v11442_v17  ;;  %v11410_v54 = vsub.f32 %v24700_v0, %v11368_v1 }
 0xc57   :  { %v11428_v3 = vmul.f32 1.442695, %v11410_v54 }
 0xc58   :  { %v24792_v37 = vpop.permute.xlu0 %7098 }
 0xc59   :  { %v11371_v62 = vpop.xlane.xlu1 %11370  ;;  %25546 = vst [vmem:[#allocation9_spill] sm:$0xff] %v24792_v37 }
 0xc5a   :  { %v11411_v29 = vsub.f32 %v24706_v57, %v11371_v62  ;;  %v7015_v57 = vrot.slane %v23980_v40, %v23876_v53 }
 0xc5c   :  { %v11430_v36 = vmul.f32 1.442695, %v11411_v29 }
 0xc5d   :  { %v24794_v1 = vpop.permute.xlu1 %7094 }
 0xc5e   :  { %21901 = vpow2.f32 %v11430_v36  ;;  %25547 = vst [vmem:[#allocation10_spill] sm:$0xff] %v24794_v1 }
 0xc5f   :  { %v24778_v2 = vpop.eup %21899  ;;  %21903 = vpow2.f32 %v11428_v3 }
 0xc60   :  { %v11483_v18 = vsel %vm1730_vm3, %v24778_v2, 0.0 }
 0xc61   :  { %11484 = vadd.xlane.f32.xlu0 %v11483_v18 }
 0xc68   :  { %v24782_v38 = vpop.eup %21901 }
 0xc69   :  { %v11465_v35 = vsel %vm1730_vm3, %v24782_v38, 0.0  ;;  %v24786_v5 = vpop.eup %21903 }
 0xc6a   :  { %11466 = vadd.xlane.f32.xlu1 %v11465_v35  ;;  %v11462_v0 = vsel %vm1730_vm3, %v24786_v5, 0.0 }
 0xc6e   :  { %11463 = vadd.xlane.f32.xlu1 %v11462_v0 }
 0xc77   :  { %7021 = vbcast.lane.b32.xlu0 %v7015_v57, 264 }
 0xc7f   :  { %7017 = vbcast.lane.b32.xlu1 %v7015_v57, 256 }
 0xc89   :  { %v11383_v17 = vpop.xlane.xlu0 %11382 }
 0xc8a   :  { %v11415_v18 = vsub.f32 %v24714_v55, %v11383_v17 }
 0xc8c   :  { %v11438_v40 = vmul.f32 1.442695, %v11415_v18 }
 0xc8d   :  { %v11401_v54 = vpop.xlane.xlu0 %11400 }
 0xc8e   :  { %v11421_v62 = vsub.f32 %v24716_v11, %v11401_v54  ;;  %v11386_v29 = vpop.xlane.xlu1 %11385 }
 0xc8f   :  { %v11416_v3 = vsub.f32 %v24720_v50, %v11386_v29  ;;  %v7103_v29 = vrot.slane %v24062_v34, %v23876_v53 }
 0xc90   :  { %v11450_v36 = vmul.f32 1.442695, %v11421_v62 }
 0xc91   :  { %v11440_v35 = vmul.f32 1.442695, %v11416_v3  ;;  %v11380_v0 = vpop.xlane.xlu0 %11379 }
 0xc92   :  { %21905 = vpow2.f32 %v11450_v36  ;;  %v11414_v57 = vsub.f32 %v24722_v27, %v11380_v0  ;;  %v11398_v62 = vpop.xlane.xlu1 %11397 }
 0xc93   :  { %21907 = vpow2.f32 %v11440_v35 }
 0xc94   :  { %21909 = vpow2.f32 %v11438_v40  ;;  %v11436_v19 = vmul.f32 1.442695, %v11414_v57 }
 0xc95   :  { %v11395_v3 = vpop.xlane.xlu0 %11394 }
 0xc96   :  { %21911 = vpow2.f32 %v11436_v19  ;;  %v11461_v36 = vpop.xlane.xlu1 %11460 }
 0xc97   :  { %21913 = vrcp.f32 %v11461_v36  ;;  %v11420_v36 = vsub.f32 %v24726_v30, %v11398_v62 }
 0xc99   :  { %v11392_v18 = vpop.xlane.xlu0 %11391 }
 0xc9a   :  { %v11418_v35 = vsub.f32 %v24738_v7, %v11392_v18 }
 0xc9c   :  { %v24800_v37 = vpop.eup %21905  ;;  %v11444_v57 = vmul.f32 1.442695, %v11418_v35  ;;  %v11448_v35 = vmul.f32 1.442695, %v11420_v36 }
 0xc9d   :  { %25548 = vst [vmem:[#allocation11_spill] sm:$0xff] %v24800_v37  ;;  %v11495_v11 = vsel %vm1730_vm3, %v24800_v37, 0.0  ;;  %v24804_v50 = vpop.eup %21907 }
 0xc9e   :  { %11496 = vadd.xlane.f32.xlu0 %v11495_v11  ;;  %v11480_v55 = vsel %vm1730_vm3, %v24804_v50, 0.0  ;;  %v24808_v17 = vpop.eup %21909 }
 0xc9f   :  { %v11477_v27 = vsel %vm1730_vm3, %v24808_v17, 0.0 }
 0xca0   :  { %v24812_v54 = vpop.eup %21911 }
 0xca1   :  { %v11474_v19 = vsel %vm1730_vm3, %v24812_v54, 0.0  ;;  %v21914_v40 = vpop.eup %21913 }
 0xca3   :  { %11481 = vadd.xlane.f32.xlu1 %v11480_v55 }
 0xca7   :  { %11478 = vadd.xlane.f32.xlu1 %v11477_v27  ;;  %v11507_v27 = vmul.f32 %v21914_v40, %v24736_v61  ;;  %v11419_v61 = vsub.f32 %v24730_v58, %v11395_v3 }
 0xca9   :  { %v11540_v34 = vsel %vm1730_vm3, %v11507_v27, 0  ;;  %v11446_v58 = vmul.f32 1.442695, %v11419_v61 }
 0xcaa   :  { %v24823_v1 = vand.u32 4294901760, %v11540_v34 }
 0xcab   :  { %11475 = vadd.xlane.f32.xlu1 %v11474_v19 }
 0xcac   :  { %v24834_v30 = vsub.f32 %v11540_v34, %v24823_v1 }
 0xcae   :  { %v11621_v36 = vand.u32 4294901760, %v24834_v30 }
 0xcb0   :  { %v11622_v61 = vsub.f32 %v24834_v30, %v11621_v36 }
 0xcb4   :  { %7109 = vbcast.lane.b32.xlu0 %v7103_v29, 264 }
 0xcbc   :  { %7105 = vbcast.lane.b32.xlu1 %v7103_v29, 256 }
 0xcbe   :  { %v11473_v0 = vpop.xlane.xlu0 %11472 }
 0xcbf   :  { %21915 = vrcp.f32 %v11473_v0 }
 0xcc2   :  { %v11470_v11 = vpop.xlane.xlu0 %11469  ;;  %v11458_v55 = vpop.xlane.xlu1 %11457 }
 0xcc3   :  { %21917 = vrcp.f32 %v11470_v11 }
 0xcc4   :  { %21919 = vrcp.f32 %v11458_v55 }
 0xcc5   :  { %21921 = vpow2.f32 %v11444_v57 }
 0xcc6   :  { %21923 = vpow2.f32 %v11448_v35 }
 0xcc7   :  { %21925 = vpow2.f32 %v11446_v58 }
 0xcc9   :  { %v21916_v19 = vpop.eup %21915 }
 0xcca   :  { %v11515_v29 = vmul.f32 %v21916_v19, %v24753_v16 }
 0xccc   :  { %v12556_v7 = vsel %vm1730_vm3, %v11515_v29, 0 }
 0xccd   :  { %v21918_v18 = vpop.eup %21917  ;;  %v24826_v0 = vand.u32 4294901760, %v12556_v7 }
 0xcce   :  { %v21920_v11 = vpop.eup %21919  ;;  %v11513_v40 = vmul.f32 %v21918_v18, %v24757_v63 }
 0xccf   :  { %v24830_v57 = vpop.eup %21921  ;;  %v11505_v55 = vmul.f32 %v21920_v11, %v24759_v14  ;;  %v24837_v16 = vsub.f32 %v12556_v7, %v24826_v0 }
 0xcd0   :  { %25549 = vst [vmem:[#allocation12_spill] sm:$0xff] %v24830_v57  ;;  %v12553_v62 = vsel %vm1730_vm3, %v11513_v40, 0  ;;  %v11486_v63 = vsel %vm1730_vm3, %v24830_v57, 0.0  ;;  %v24853_v10 = vpop.eup %21923 }
 0xcd1   :  { %v11537_v27 = vsel %vm1730_vm3, %v11505_v55, 0  ;;  %v24841_v19 = vand.u32 4294901760, %v12553_v62  ;;  %v12637_v14 = vand.u32 4294901760, %v24837_v16  ;;  %v24862_v58 = vpop.eup %21925 }
 0xcd2   :  { %v24845_v3 = vand.u32 4294901760, %v11537_v27 }
 0xcd3   :  { %11487 = vadd.xlane.f32.xlu0 %v11486_v63  ;;  %v12626_v34 = vsub.f32 %v12553_v62, %v24841_v19  ;;  %v12638_v35 = vsub.f32 %v24837_v16, %v12637_v14  ;;  %v11623_v62 = vand.u32 4294901760, %v11622_v61 }
 0xcd4   :  { %v11610_v29 = vsub.f32 %v11537_v27, %v24845_v3  ;;  %v11492_v27 = vsel %vm1730_vm3, %v24853_v10, 0.0 }
 0xcd5   :  { %v12627_v7 = vand.u32 4294901760, %v12626_v34  ;;  %v12639_v57 = vand.u32 4294901760, %v12638_v35 }
 0xcd6   :  { %v11611_v18 = vand.u32 4294901760, %v11610_v29 }
 0xcd7   :  { %v12628_v11 = vsub.f32 %v12626_v34, %v12627_v7 }
 0xcd8   :  { %v11612_v40 = vsub.f32 %v11610_v29, %v11611_v18 }
 0xcd9   :  { %v12629_v55 = vand.u32 4294901760, %v12628_v11 }
 0xcda   :  { %v11613_v37 = vand.u32 4294901760, %v11612_v40 }
 0xcdb   :  { %19937 = vmatprep.mubr.f32.mxu1 %v12629_v55 }
 0xcdc   :  { %19853 = vmatprep.mubr.f32.mxu0 %v11613_v37  ;;  %19938 = vmatmul.mubr.f32.vlgmr.msra.gmra.mrb[40].mxu1 %v12639_v57  ;;  %v11489_v37 = vsel %vm1730_vm3, %v24862_v58, 0.0  ;;  %v11404_v57 = vpop.xlane.xlu1 %11403 }
 0xcdd   :  { %19854 = vmatmul.mubr.f32.vlgmr.msra.gmra.mrb[48].mxu0 %v11623_v62  ;;  %20930 = vmatpush3.bf16.msra.mxu1 %v24679_v47 }
 0xcde   :  { %20882 = vmatpush3.bf16.msra.mxu0 %v24631_v33  ;;  %19860 = vmatprep.mubr.f32.mxu0 %v24845_v3  ;;  %v7180_v33 = vrot.slane %v24182_v12, %v23846_v46 }
 0xcdf   :  { %20884 = vmatprep.subr.bf16.mxu0 %v24612_v31  ;;  %19944 = vmatprep.mubr.f32.mxu1 %v24841_v19 }
 0xce0   :  { %20932 = vmatprep.subr.bf16.mxu1 %v24634_v23  ;;  %11493 = vadd.xlane.f32.xlu1 %v11492_v27 }
 0xce4   :  { %19945 = vmatmul.mubr.f32.vlgmr.msra.gmra.mrb[40].mxu1 %v24826_v0  ;;  %11490 = vadd.xlane.f32.xlu1 %v11489_v37 }
 0xce5   :  { %20934 = vmatpush3.bf16.msra.mxu1 %v24634_v23  ;;  %19861 = vmatmul.mubr.f32.vlgmr.msra.gmra.mrb[48].mxu0 %v24823_v1  ;;  %v7202_v23 = vsel %vm6605_vm5, %v24484_v15, %v24562_v59  ;;  %v11422_v59 = vsub.f32 %v24763_v20, %v11404_v57 }
 0xce6   :  { %20886 = vmatpush3.bf16.msra.mxu0 %v24612_v31  ;;  %19867 = vmatprep.mubr.f32.mxu0 %v11610_v29  ;;  %v7201_v31 = vsel %vm6605_vm5, %v24480_v22, %v24564_v52  ;;  %v7218_v46 = vsel %vm6622_vm6, %v7202_v23, %v24605_v21 }
 0xce7   :  { %20888 = vmatprep.subr.bf16.mxu0 %v24607_v6  ;;  %19951 = vmatprep.mubr.f32.mxu1 %v12626_v34  ;;  %v7217_v47 = vsel %vm6622_vm6, %v7201_v31, %v24609_v51  ;;  %v12054_v22 = vand.u32 4294901760, %v7218_v46  ;;  %v11452_v51 = vmul.f32 1.442695, %v11422_v59 }
 0xce8   :  { %20936 = vmatprep.subr.bf16.mxu1 %v24643_v24  ;;  %v12051_v15 = vand.u32 4294901760, %v7217_v47 }
 0xce9   :  { %7186 = vbcast.lane.b32.xlu0 %v7180_v33, 264  ;;  %v24892_v52 = vsub.f32 %v7218_v46, %v12054_v22 }
 0xcea   :  { %v24894_v21 = vsub.f32 %v7217_v47, %v12051_v15 }
 0xceb   :  { %v12147_v20 = vand.u32 4294901760, %v24892_v52 }
 0xcec   :  { %19952 = vmatmul.mubr.f32.vlgmr.msra.gmra.mrb[40].mxu1 %v24837_v16  ;;  %v12140_v16 = vand.u32 4294901760, %v24894_v21 }
 0xced   :  { %19868 = vmatmul.mubr.f32.vlgmr.msra.gmra.mrb[48].mxu0 %v24834_v30  ;;  %20938 = vmatpush3.bf16.msra.mxu1 %v24643_v24 }
 0xcee   :  { %20890 = vmatpush3.bf16.msra.mxu0 %v24607_v6  ;;  %19874 = vmatprep.mubr.f32.mxu0 %v11611_v18  ;;  %v12141_v29 = vsub.f32 %v24894_v21, %v12140_v16  ;;  %v25553_v18 = vand.u32 4294901760, %v24641_v44 }
 0xcef   :  { %20892 = vmatprep.subr.bf16.mxu0 %v24623_v42  ;;  %19958 = vmatprep.mubr.f32.mxu1 %v12627_v7  ;;  %v12148_v7 = vsub.f32 %v24892_v52, %v12147_v20 }
 0xcf0   :  { %20940 = vmatprep.subr.bf16.mxu1 %v24651_v48  ;;  %v12142_v11 = vand.u32 4294901760, %v12141_v29 }
 0xcf1   :  { %v12149_v61 = vand.u32 4294901760, %v12148_v7 }
 0xcf4   :  { %19959 = vmatmul.mubr.f32.vlgmr.msra.gmra.mrb[40].mxu1 %v12637_v14  ;;  %v25551_v14 = vand.u32 4294901760, %v24656_v32 }
 0xcf5   :  { %19875 = vmatmul.mubr.f32.vlgmr.msra.gmra.mrb[48].mxu0 %v11621_v36  ;;  %20942 = vmatpush3.bf16.msra.mxu1 %v24651_v48  ;;  %v24911_v36 = vpack.c.bf16 %v12054_v22, %v12051_v15 }
 0xcf6   :  { %20894 = vmatpush3.bf16.msra.mxu0 %v24623_v42  ;;  %19965 = vmatprep.mubr.f32.mxu1 %v24841_v19  ;;  %v25550_v42 = vand.u32 4294901760, %v24663_v39  ;;  %v13672_v34 = vsub.f32 %v24656_v32, %v25551_v14  ;;  %v7205_v14 = vsel %vm6605_vm5, %v24511_v9, %v24578_v43 }
 0xcf7   :  { %20944 = vmatprep.subr.bf16.mxu1 %v24643_v24  ;;  %7182 = vbcast.lane.b32.xlu1 %v7180_v33, 256  ;;  %v11467_v30 = vpop.xlane.xlu1 %11466 }
 0xcf8   :  { %19881 = vmatprep.mubr.f32.mxu0 %v24845_v3  ;;  %20896 = vmatprep.subr.bf16.mxu0 %v24607_v6  ;;  %21927 = vrcp.f32 %v11467_v30  ;;  %v13665_v63 = vsub.f32 %v24663_v39, %v25550_v42  ;;  %v25552_v39 = vand.u32 4294901760, %v24647_v13  ;;  %v13673_v32 = vand.u32 4294901760, %v13672_v34  ;;  %v11407_v13 = vpop.xlane.xlu0 %11406 }
 0xcf9   :  { %21929 = vpow2.f32 %v11452_v51  ;;  %v7221_v34 = vsel %vm6622_vm6, %v7205_v14, %v24629_v4 }
 0xcfa   :  { %v24925_v35 = vpack.c.bf16 %v25553_v18, %v25552_v39  ;;  %v13067_v29 = vand.u32 4294901760, %v7221_v34 }
 0xcfb   :  { %v11464_v48 = vpop.xlane.xlu1 %11463 }
 0xcfc   :  { %21931 = vrcp.f32 %v11464_v48  ;;  %19966 = vmatmul.mubr.f32.vlgmr.msra.gmra.mrb[40].mxu1 %v24826_v0  ;;  %v7191_v48 = vrot.slane %v24182_v12, %v23876_v53  ;;  %v11485_v42 = vpop.xlane.xlu0 %11484  ;;  %v20915_v53 = vpack.c.bf16 %v12147_v20, %v12140_v16 }
 0xcfd   :  { %19882 = vmatmul.mubr.f32.vlgmr.msra.gmra.mrb[48].mxu0 %v24823_v1  ;;  %20946 = vmatpush3.bf16.msra.mxu1 %v24643_v24  ;;  %v13666_v24 = vand.u32 4294901760, %v13665_v63  ;;  %v7206_v63 = vsel %vm6605_vm5, %v24506_v8, %v24576_v56 }
 0xcfe   :  { %20898 = vmatpush3.bf16.msra.mxu0 %v24607_v6  ;;  %19888 = vmatprep.mubr.f32.mxu0 %v24845_v3  ;;  %v11423_v3 = vsub.f32 %v24761_v28, %v11407_v13  ;;  %v7222_v12 = vsel %vm6622_vm6, %v7206_v63, %v24626_v26 }
 0xcff   :  { %20900 = vmatprep.subr.bf16.mxu0 %v24911_v36  ;;  %19972 = vmatprep.mubr.f32.mxu1 %v24841_v19  ;;  %v24936_v6 = vpack.c.bf16 %v13673_v32, %v13666_v24  ;;  %v20903_v19 = vpack.c.bf16 %v12149_v61, %v12142_v11  ;;  %v13070_v56 = vand.u32 4294901760, %v7222_v12  ;;  %v7018_v43 = vpop.permute.xlu1 %7017 }
 0xd00   :  { %20972 = vmatprep.subr.bf16.mxu1 %v24925_v35  ;;  %v11454_v37 = vmul.f32 1.442695, %v11423_v3  ;;  %v7022_v8 = vpop.permute.xlu0 %7021 }
 0xd01   :  { %v24989_v24 = vpack.c.bf16 %v13070_v56, %v13067_v29 }
 0xd02   :  { %v21928_v40 = vpop.eup %21927  ;;  %21933 = vpow2.f32 %v11454_v37 }
 0xd03   :  { %v11511_v44 = vmul.f32 %v21928_v40, %v24782_v38  ;;  %v24933_v55 = vpop.eup %21929  ;;  %21935 = vrcp.f32 %v11485_v42 }
 0xd04   :  { %19973 = vmatmul.mubr.f32.vlgmr.msra.gmra.mrb[40].mxu1 %v24826_v0  ;;  %v11498_v28 = vsel %vm1730_vm3, %v24933_v55, 0.0 }
 0xd05   :  { %19889 = vmatmul.mubr.f32.vlgmr.msra.gmra.mrb[48].mxu0 %v24823_v1  ;;  %20974 = vmatpush3.bf16.msra.mxu1 %v24925_v35  ;;  %v12048_v62 = vsel %vm1730_vm3, %v11511_v44, 0 }
 0xd06   :  { %v21932_v27 = vpop.eup %21931  ;;  %20902 = vmatpush3.bf16.msra.mxu0 %v24911_v36  ;;  %20976 = vmatprep.subr.bf16.mxu1 %v24936_v6  ;;  %v24944_v38 = vand.u32 4294901760, %v12048_v62 }
 0xd07   :  { %v11509_v0 = vmul.f32 %v21932_v27, %v24786_v5  ;;  %20904 = vmatprep.subr.bf16.mxu0 %v20903_v19  ;;  %v20907_v5 = vpack.c.bf16 %v24892_v52, %v24894_v21  ;;  %v24978_v21 = vsub.f32 %v7222_v12, %v13070_v56  ;;  %v24980_v52 = vsub.f32 %v7221_v34, %v13067_v29  ;;  %v25554_v29 = vld [vmem:[#allocation4_spill] sm:$0xff] }
 0xd08   :  { %11499 = vadd.xlane.f32.xlu0 %v11498_v28  ;;  %v12128_v1 = vsub.f32 %v12048_v62, %v24944_v38 }
 0xd09   :  { %v12045_v33 = vsel %vm1730_vm3, %v11509_v0, 0  ;;  %v13163_v7 = vand.u32 4294901760, %v24978_v21  ;;  %v13156_v39 = vand.u32 4294901760, %v24980_v52  ;;  %v20955_v56 = vpack.c.bf16 %v24978_v21, %v24980_v52 }
 0xd0a   :  { %v12117_v23 = vand.u32 4294901760, %v12045_v33  ;;  %v12129_v31 = vand.u32 4294901760, %v12128_v1 }
 0xd0b   :  { %v13157_v11 = vsub.f32 %v24980_v52, %v13156_v39  ;;  %v13164_v61 = vsub.f32 %v24978_v21, %v13163_v7 }
 0xd0c   :  { %v12118_v46 = vsub.f32 %v12045_v33, %v12117_v23  ;;  %v12130_v57 = vsub.f32 %v12128_v1, %v12129_v31  ;;  %v24953_v51 = vpop.eup %21933 }
 0xd0d   :  { %v11501_v30 = vsel %vm1730_vm3, %v24953_v51, 0.0  ;;  %v21936_v26 = vpop.eup %21935  ;;  %v13158_v44 = vand.u32 4294901760, %v13157_v11  ;;  %v13165_v3 = vand.u32 4294901760, %v13164_v61  ;;  %v25559_v61 = vld [vmem:[#allocation12_spill] sm:$0xff] }
 0xd0e   :  { %v12119_v47 = vand.u32 4294901760, %v12118_v46  ;;  %v12131_v59 = vand.u32 4294901760, %v12130_v57  ;;  %v11523_v18 = vmul.f32 %v21936_v26, %v24778_v2  ;;  %v20963_v26 = vpack.c.bf16 %v13163_v7, %v13156_v39 }
 0xd10   :  { %v12120_v22 = vsub.f32 %v12118_v46, %v12119_v47  ;;  %v13572_v40 = vsel %vm1730_vm3, %v11523_v18, 0 }
 0xd11   :  { %v25001_v13 = vand.u32 4294901760, %v13572_v40 }
 0xd12   :  { %v12121_v15 = vand.u32 4294901760, %v12120_v22 }
 0xd13   :  { %v13652_v0 = vsub.f32 %v13572_v40, %v25001_v13 }
 0xd14   :  { %19895 = vmatprep.mubr.f32.mxu0 %v12121_v15 }
 0xd15   :  { %19896 = vmatmul.mubr.f32.vlgmr.msra.gmra.mrb[50].mxu0 %v12131_v59 }
 0xd16   :  { %20906 = vmatpush3.bf16.msra.mxu0 %v20903_v19  ;;  %19902 = vmatprep.mubr.f32.mxu0 %v12117_v23 }
 0xd17   :  { %20908 = vmatprep.subr.bf16.mxu0 %v20907_v5 }
 0xd1b   :  { %11502 = vadd.xlane.f32.xlu1 %v11501_v30 }
 0xd1d   :  { %19903 = vmatmul.mubr.f32.vlgmr.msra.gmra.mrb[50].mxu0 %v24944_v38 }
 0xd1e   :  { %20910 = vmatpush3.bf16.msra.mxu0 %v20907_v5  ;;  %7197 = vbcast.lane.b32.xlu0 %v7191_v48, 264 }
 0xd1f   :  { %19909 = vmatprep.mubr.f32.mxu0 %v12118_v46  ;;  %20912 = vmatprep.subr.bf16.mxu0 %v24911_v36 }
 0xd25   :  { %19910 = vmatmul.mubr.f32.vlgmr.msra.gmra.mrb[50].mxu0 %v12128_v1 }
 0xd26   :  { %20914 = vmatpush3.bf16.msra.mxu0 %v24911_v36  ;;  %19916 = vmatprep.mubr.f32.mxu0 %v12119_v47 }
 0xd27   :  { %20916 = vmatprep.subr.bf16.mxu0 %v20915_v53 }
 0xd2b   :  { %v24976_v9 = vpop.xlane.xlu0 %11496 }
 0xd2c   :  { %7193 = vbcast.lane.b32.xlu1 %v7191_v48, 256 }
 0xd2d   :  { %19917 = vmatmul.mubr.f32.vlgmr.msra.gmra.mrb[50].mxu0 %v12129_v31 }
 0xd2e   :  { %20918 = vmatpush3.bf16.msra.mxu0 %v20915_v53  ;;  %19923 = vmatprep.mubr.f32.mxu0 %v12117_v23 }
 0xd2f   :  { %20920 = vmatprep.subr.bf16.mxu0 %v24911_v36  ;;  %v7110_v4 = vpop.permute.xlu0 %7109 }
 0xd30   :  { %v24984_v20 = vsel %vm6605_vm5, %v7022_v8, %v7110_v4  ;;  %v11482_v16 = vpop.xlane.xlu1 %11481  ;;  %v25555_v4 = vld [vmem:[#allocation5_spill] sm:$0xff] }
 0xd31   :  { %21937 = vrcp.f32 %v11482_v16  ;;  %v25556_v16 = vld [vmem:[#allocation6_spill] sm:$0xff] }
 0xd34   :  { %v11479_v32 = vpop.xlane.xlu1 %11478 }
 0xd35   :  { %21939 = vrcp.f32 %v11479_v32  ;;  %19924 = vmatmul.mubr.f32.vlgmr.msra.gmra.mrb[50].mxu0 %v24944_v38  ;;  %v25557_v32 = vld [vmem:[#allocation9_spill] sm:$0xff] }
 0xd36   :  { %20922 = vmatpush3.bf16.msra.mxu0 %v24911_v36  ;;  %19930 = vmatprep.mubr.f32.mxu0 %v12117_v23  ;;  %v20951_v36 = vpack.c.bf16 %v13165_v3, %v13158_v44  ;;  %v25560_v44 = vld [vmem:[#allocation11_spill] sm:$0xff] }
 0xd37   :  { %20948 = vmatprep.subr.bf16.mxu0 %v24989_v24 }
 0xd38   :  { %v11476_v2 = vpop.xlane.xlu1 %11475 }
 0xd39   :  { %21941 = vrcp.f32 %v11476_v2 }
 0xd3a   :  { %21943 = vrcp.f32 %v24976_v9 }
 0xd3b   :  { %v21938_v19 = vpop.eup %21937 }
 0xd3c   :  { %v11521_v62 = vmul.f32 %v21938_v19, %v24804_v50  ;;  %v7106_v27 = vpop.permute.xlu1 %7105  ;;  %v13653_v50 = vand.u32 4294901760, %v13652_v0 }
 0xd3d   :  { %v25006_v28 = vsel %vm6605_vm5, %v7018_v43, %v7106_v27  ;;  %19931 = vmatmul.mubr.f32.vlgmr.msra.gmra.mrb[50].mxu0 %v24944_v38  ;;  %v7209_v43 = vsel %vm6605_vm5, %v25554_v29, %v24588_v41 }
 0xd3e   :  { %20950 = vmatpush3.bf16.msra.mxu0 %v24989_v24  ;;  %v13569_v1 = vsel %vm1730_vm3, %v11521_v62, 0  ;;  %v13654_v15 = vsub.f32 %v13652_v0, %v13653_v50  ;;  %v7225_v18 = vsel %vm6622_vm6, %v7209_v43, %v25556_v16 }
 0xd3f   :  { %v21940_v37 = vpop.eup %21939  ;;  %20952 = vmatprep.subr.bf16.mxu0 %v20951_v36  ;;  %v25011_v33 = vand.u32 4294901760, %v13569_v1 }
 0xd40   :  { %v11519_v23 = vmul.f32 %v21940_v37, %v24808_v17  ;;  %v13655_v17 = vand.u32 4294901760, %v13654_v15 }
 0xd41   :  { %v13642_v31 = vsub.f32 %v13569_v1, %v25011_v33 }
 0xd42   :  { %v13064_v46 = vsel %vm1730_vm3, %v11519_v23, 0 }
 0xd43   :  { %v21942_v47 = vpop.eup %21941  ;;  %v13643_v57 = vand.u32 4294901760, %v13642_v31  ;;  %v25016_v22 = vand.u32 4294901760, %v13064_v46 }
 0xd44   :  { %v11517_v38 = vmul.f32 %v21942_v47, %v24812_v54  ;;  %v21944_v21 = vpop.eup %21943 }
 0xd45   :  { %v13644_v59 = vsub.f32 %v13642_v31, %v13643_v57  ;;  %v13144_v5 = vsub.f32 %v13064_v46, %v25016_v22  ;;  %v11531_v3 = vmul.f32 %v21944_v21, %v25560_v44 }
 0xd46   :  { %v13061_v30 = vsel %vm1730_vm3, %v11517_v38, 0  ;;  %v25562_v38 = vld [vmem:[#allocation7_spill] sm:$0xff] }
 0xd47   :  { %v13645_v48 = vand.u32 4294901760, %v13644_v59  ;;  %v25021_v42 = vand.u32 4294901760, %v13061_v30  ;;  %v13145_v63 = vand.u32 4294901760, %v13144_v5  ;;  %v14588_v23 = vsel %vm1730_vm3, %v11531_v3, 0 }
 0xd49   :  { %20021 = vmatprep.mubr.f32.mxu1 %v13645_v48  ;;  %v13134_v14 = vsub.f32 %v13061_v30, %v25021_v42  ;;  %v13146_v53 = vsub.f32 %v13144_v5, %v13145_v63 }
 0xd4a   :  { %20022 = vmatmul.mubr.f32.vlgmr.msra.gmra.mrb[42].mxu1 %v13655_v17 }
 0xd4b   :  { %20978 = vmatpush3.bf16.msra.mxu1 %v24936_v6  ;;  %20028 = vmatprep.mubr.f32.mxu1 %v25011_v33  ;;  %v13135_v54 = vand.u32 4294901760, %v13134_v14  ;;  %v13147_v8 = vand.u32 4294901760, %v13146_v53  ;;  %v7210_v6 = vsel %vm6605_vm5, %v24537_v60, %v24585_v45  ;;  %v14083_v45 = vand.u32 4294901760, %v7225_v18 }
 0xd4c   :  { %20980 = vmatprep.subr.bf16.mxu1 %v24670_v25  ;;  %v7226_v9 = vsel %vm6622_vm6, %v7210_v6, %v25555_v4 }
 0xd4d   :  { %v13136_v12 = vsub.f32 %v13134_v14, %v13135_v54  ;;  %v14086_v60 = vand.u32 4294901760, %v7226_v9  ;;  %v25058_v7 = vsub.f32 %v7225_v18, %v14083_v45 }
 0xd4f   :  { %v13137_v34 = vand.u32 4294901760, %v13136_v12  ;;  %v25056_v52 = vsub.f32 %v7226_v9, %v14086_v60  ;;  %v14172_v27 = vand.u32 4294901760, %v25058_v7 }
 0xd51   :  { %19979 = vmatprep.mubr.f32.mxu0 %v13137_v34  ;;  %v14179_v62 = vand.u32 4294901760, %v25056_v52  ;;  %v21003_v3 = vpack.c.bf16 %v25056_v52, %v25058_v7 }
 0xd52   :  { %19980 = vmatmul.mubr.f32.vlgmr.msra.gmra.mrb[52].mxu0 %v13147_v8  ;;  %20029 = vmatmul.mubr.f32.vlgmr.msra.gmra.mrb[42].mxu1 %v25001_v13 }
 0xd53   :  { %20954 = vmatpush3.bf16.msra.mxu0 %v20951_v36  ;;  %20982 = vmatpush3.bf16.msra.mxu1 %v24670_v25 }
 0xd54   :  { %19986 = vmatprep.mubr.f32.mxu0 %v25021_v42  ;;  %20956 = vmatprep.subr.bf16.mxu0 %v20955_v56 }
 0xd55   :  { %20035 = vmatprep.mubr.f32.mxu1 %v13642_v31  ;;  %20984 = vmatprep.subr.bf16.mxu1 %v24925_v35  ;;  %v14180_v31 = vsub.f32 %v25056_v52, %v14179_v62 }
 0xd57   :  { %v14181_v48 = vand.u32 4294901760, %v14180_v31 }
 0xd5a   :  { %19987 = vmatmul.mubr.f32.vlgmr.msra.gmra.mrb[52].mxu0 %v25016_v22  ;;  %20036 = vmatmul.mubr.f32.vlgmr.msra.gmra.mrb[42].mxu1 %v13652_v0 }
 0xd5b   :  { %20958 = vmatpush3.bf16.msra.mxu0 %v20955_v56  ;;  %20986 = vmatpush3.bf16.msra.mxu1 %v24925_v35 }
 0xd5c   :  { %19993 = vmatprep.mubr.f32.mxu0 %v13134_v14  ;;  %20960 = vmatprep.subr.bf16.mxu0 %v24989_v24 }
 0xd5d   :  { %20042 = vmatprep.mubr.f32.mxu1 %v13643_v57  ;;  %20988 = vmatprep.subr.bf16.mxu1 %v24676_v49  ;;  %v25094_v57 = vand.u32 4294901760, %v14588_v23 }
 0xd5f   :  { %v25104_v14 = vsub.f32 %v14588_v23, %v25094_v57 }
 0xd60   :  { %v11488_v25 = vpop.xlane.xlu0 %11487 }
 0xd61   :  { %21945 = vrcp.f32 %v11488_v25  ;;  %v14669_v4 = vand.u32 4294901760, %v25104_v14 }
 0xd62   :  { %19994 = vmatmul.mubr.f32.vlgmr.msra.gmra.mrb[52].mxu0 %v13144_v5  ;;  %20043 = vmatmul.mubr.f32.vlgmr.msra.gmra.mrb[42].mxu1 %v13653_v50  ;;  %v25080_v50 = vpack.c.bf16 %v14086_v60, %v14083_v45 }
 0xd63   :  { %20962 = vmatpush3.bf16.msra.mxu0 %v24989_v24  ;;  %20990 = vmatpush3.bf16.msra.mxu1 %v24676_v49  ;;  %v25558_v49 = vld [vmem:[#allocation8_spill] sm:$0xff] }
 0xd64   :  { %20000 = vmatprep.mubr.f32.mxu0 %v13135_v54  ;;  %20964 = vmatprep.subr.bf16.mxu0 %v20963_v26  ;;  %v7187_v41 = vpop.permute.xlu0 %7186  ;;  %v7212_v11 = vsel %vm6605_vm5, %v25558_v49, %v25557_v32  ;;  %v14670_v32 = vsub.f32 %v25104_v14, %v14669_v4 }
 0xd65   :  { %20049 = vmatprep.mubr.f32.mxu1 %v25011_v33  ;;  %20992 = vmatprep.subr.bf16.mxu1 %v24925_v35  ;;  %v7228_v2 = vsel %vm6622_vm6, %v7212_v11, %v7187_v41 }
 0xd66   :  { %v14594_v0 = vand.u32 4294901760, %v7228_v2 }
 0xd68   :  { %v14686_v46 = vsub.f32 %v7228_v2, %v14594_v0 }
 0xd6a   :  { %20001 = vmatmul.mubr.f32.vlgmr.msra.gmra.mrb[52].mxu0 %v13145_v63  ;;  %20050 = vmatmul.mubr.f32.vlgmr.msra.gmra.mrb[42].mxu1 %v25001_v13 }
 0xd6b   :  { %v21946_v39 = vpop.eup %21945  ;;  %20966 = vmatpush3.bf16.msra.mxu0 %v20963_v26  ;;  %20994 = vmatpush3.bf16.msra.mxu1 %v24925_v35 }
 0xd6c   :  { %v11525_v40 = vmul.f32 %v21946_v39, %v25559_v61  ;;  %20007 = vmatprep.mubr.f32.mxu0 %v25021_v42  ;;  %20968 = vmatprep.subr.bf16.mxu0 %v24989_v24 }
 0xd6d   :  { %20056 = vmatprep.mubr.f32.mxu1 %v25011_v33  ;;  %v11494_v19 = vpop.xlane.xlu1 %11493  ;;  %v14173_v33 = vsub.f32 %v25058_v7, %v14172_v27 }
 0xd6e   :  { %21947 = vrcp.f32 %v11494_v19  ;;  %v14077_v35 = vsel %vm1730_vm3, %v11525_v40, 0  ;;  %v14671_v40 = vand.u32 4294901760, %v14670_v32  ;;  %v25569_v32 = vld [vmem:[#allocation2_spill] sm:$0xff] }
 0xd6f   :  { %v25074_v36 = vand.u32 4294901760, %v14077_v35 }
 0xd71   :  { %v11491_v1 = vpop.xlane.xlu1 %11490  ;;  %v25077_v37 = vsub.f32 %v14077_v35, %v25074_v36  ;;  %v21011_v35 = vpack.c.bf16 %v14179_v62, %v14172_v27 }
 0xd72   :  { %21949 = vrcp.f32 %v11491_v1  ;;  %20008 = vmatmul.mubr.f32.vlgmr.msra.gmra.mrb[52].mxu0 %v25016_v22  ;;  %20057 = vmatmul.mubr.f32.vlgmr.msra.gmra.mrb[42].mxu1 %v25001_v13  ;;  %v25561_v13 = vld [vmem:[#allocation10_spill] sm:$0xff] }
 0xd73   :  { %20970 = vmatpush3.bf16.msra.mxu0 %v24989_v24  ;;  %20014 = vmatprep.mubr.f32.mxu0 %v25021_v42  ;;  %v14151_v47 = vand.u32 4294901760, %v25077_v37  ;;  %v7211_v15 = vsel %vm6605_vm5, %v25562_v38, %v25561_v13  ;;  %v14174_v24 = vand.u32 4294901760, %v14173_v33  ;;  %v14687_v42 = vand.u32 4294901760, %v14686_v46 }
 0xd74   :  { %20996 = vmatprep.subr.bf16.mxu0 %v25080_v50  ;;  %v25563_v33 = vmov 0.0|0.0  }
 0xd75   :  { %v7183_v59 = vpop.permute.xlu1 %7182  ;;  %v14152_v5 = vsub.f32 %v25077_v37, %v14151_v47  ;;  %v20999_v8 = vpack.c.bf16 %v14181_v48, %v14174_v24  ;;  %v14688_v25 = vsub.f32 %v14686_v46, %v14687_v42 }
 0xd76   :  { %v7227_v30 = vsel %vm6622_vm6, %v7211_v15, %v7183_v59 }
 0xd77   :  { %v14591_v17 = vand.u32 4294901760, %v7227_v30  ;;  %v14153_v34 = vand.u32 4294901760, %v14152_v5  ;;  %v14689_v60 = vand.u32 4294901760, %v14688_v25 }
 0xd78   :  { %v21948_v63 = vpop.eup %21947 }
 0xd79   :  { %v11529_v54 = vmul.f32 %v21948_v63, %v24853_v10  ;;  %v25107_v53 = vpack.c.bf16 %v14594_v0, %v14591_v17  ;;  %v14679_v12 = vsub.f32 %v7227_v30, %v14591_v17  ;;  %v25564_v30 = vmov 0.0  }
 0xd7a   :  { %20015 = vmatmul.mubr.f32.vlgmr.msra.gmra.mrb[52].mxu0 %v25016_v22 }
 0xd7b   :  { %v14680_v56 = vand.u32 4294901760, %v14679_v12  ;;  %20998 = vmatpush3.bf16.msra.mxu0 %v25080_v50  ;;  %20063 = vmatprep.mubr.f32.mxu0 %v14153_v34  ;;  %v14585_v6 = vsel %vm1730_vm3, %v11529_v54, 0  ;;  %v21027_v29 = vpack.c.bf16 %v14686_v46, %v14679_v12 }
 0xd7c   :  { %v21950_v43 = vpop.eup %21949  ;;  %21000 = vmatprep.subr.bf16.mxu0 %v20999_v8  ;;  %21020 = vmatprep.subr.bf16.mxu1 %v25107_v53  ;;  %v25113_v10 = vand.u32 4294901760, %v14585_v6 }
 0xd7d   :  { %v11527_v26 = vmul.f32 %v21950_v43, %v24862_v58  ;;  %21022 = vmatpush3.bf16.msra.mxu1 %v25107_v53  ;;  %v14681_v22 = vsub.f32 %v14679_v12, %v14680_v56  ;;  %v21035_v9 = vpack.c.bf16 %v14687_v42, %v14680_v56 }
 0xd7e   :  { %v14658_v16 = vsub.f32 %v14585_v6, %v25113_v10 }
 0xd7f   :  { %v14682_v18 = vand.u32 4294901760, %v14681_v22  ;;  %v14080_v45 = vsel %vm1730_vm3, %v11527_v26, 0  ;;  %v25566_v26 = vmov 2   ;;  %v25567_v22 = vmov 1  }
 0xd80   :  { %v14659_v41 = vand.u32 4294901760, %v14658_v16  ;;  %v25120_v21 = vand.u32 4294901760, %v14080_v45 }
 0xd81   :  { %v21023_v39 = vpack.c.bf16 %v14689_v60, %v14682_v18  ;;  %v25568_v60 = vlaneseq }
 0xd82   :  { %v14660_v49 = vsub.f32 %v14658_v16, %v14659_v41  ;;  %v14160_v58 = vsub.f32 %v14080_v45, %v25120_v21 }
 0xd83   :  { %21024 = vmatprep.subr.bf16.mxu1 %v21023_v39  ;;  %v15665_v45 = vand.u32 127, %v25568_v60 }
 0xd84   :  { %v14661_v11 = vand.u32 4294901760, %v14660_v49  ;;  %v14161_v61 = vand.u32 4294901760, %v14160_v58 }
 0xd86   :  { %20105 = vmatprep.mubr.f32.mxu1 %v14661_v11  ;;  %v14162_v2 = vsub.f32 %v14160_v58, %v14161_v61 }
 0xd87   :  { %20106 = vmatmul.mubr.f32.vlgmr.msra.gmra.mrb[44].mxu1 %v14671_v40 }
 0xd88   :  { %21026 = vmatpush3.bf16.msra.mxu1 %v21023_v39  ;;  %20112 = vmatprep.mubr.f32.mxu1 %v25113_v10  ;;  %v14163_v44 = vand.u32 4294901760, %v14162_v2  ;;  %v15670_v39 = vadd.s32 4294967288, %v15665_v45 }
 0xd89   :  { %21028 = vmatprep.subr.bf16.mxu1 %v21027_v29 }
 0xd8a   :  { %20064 = vmatmul.mubr.f32.vlgmr.msra.gmra.mrb[54].mxu0 %v14163_v44  ;;  %v25196_v49 = vsub.s32 %v15670_v39, %v25569_v32 }
 0xd8b   :  { %21002 = vmatpush3.bf16.msra.mxu0 %v20999_v8  ;;  %20070 = vmatprep.mubr.f32.mxu0 %v25074_v36 }
 0xd8c   :  { %21004 = vmatprep.subr.bf16.mxu0 %v21003_v3 }
 0xd8f   :  { %20113 = vmatmul.mubr.f32.vlgmr.msra.gmra.mrb[44].mxu1 %v25094_v57 }
 0xd90   :  { %21030 = vmatpush3.bf16.msra.mxu1 %v21027_v29  ;;  %20119 = vmatprep.mubr.f32.mxu1 %v14658_v16 }
 0xd91   :  { %21032 = vmatprep.subr.bf16.mxu1 %v25107_v53 }
 0xd92   :  { %20071 = vmatmul.mubr.f32.vlgmr.msra.gmra.mrb[54].mxu0 %v25120_v21 }
 0xd93   :  { %21006 = vmatpush3.bf16.msra.mxu0 %v21003_v3  ;;  %20077 = vmatprep.mubr.f32.mxu0 %v25077_v37 }
 0xd94   :  { %21008 = vmatprep.subr.bf16.mxu0 %v25080_v50 }
 0xd95   :  { %v11500_v19 = vpop.xlane.xlu0 %11499 }
 0xd96   :  { %21951 = vrcp.f32 %v11500_v19 }
 0xd97   :  { %20120 = vmatmul.mubr.f32.vlgmr.msra.gmra.mrb[44].mxu1 %v25104_v14 }
 0xd98   :  { %21034 = vmatpush3.bf16.msra.mxu1 %v25107_v53  ;;  %20126 = vmatprep.mubr.f32.mxu1 %v14659_v41 }
 0xd99   :  { %21036 = vmatprep.subr.bf16.mxu1 %v21035_v9  ;;  %v7198_v1 = vpop.permute.xlu0 %7197 }
 0xd9a   :  { %20078 = vmatmul.mubr.f32.vlgmr.msra.gmra.mrb[54].mxu0 %v14160_v58  ;;  %v7230_v52 = vsel %vm6622_vm6, %v24984_v20, %v7198_v1 }
 0xd9b   :  { %21010 = vmatpush3.bf16.msra.mxu0 %v25080_v50  ;;  %20084 = vmatprep.mubr.f32.mxu0 %v14151_v47  ;;  %v15102_v27 = vand.u32 4294901760, %v7230_v52 }
 0xd9c   :  { %21012 = vmatprep.subr.bf16.mxu0 %v21011_v35 }
 0xd9d   :  { %v15194_v31 = vsub.f32 %v7230_v52, %v15102_v27 }
 0xd9f   :  { %20127 = vmatmul.mubr.f32.vlgmr.msra.gmra.mrb[44].mxu1 %v14669_v4  ;;  %v15195_v38 = vand.u32 4294901760, %v15194_v31 }
 0xda0   :  { %v21952_v0 = vpop.eup %21951  ;;  %21038 = vmatpush3.bf16.msra.mxu1 %v21035_v9  ;;  %20133 = vmatprep.mubr.f32.mxu1 %v25113_v10 }
 0xda1   :  { %v11533_v23 = vmul.f32 %v21952_v0, %v24933_v55  ;;  %21040 = vmatprep.subr.bf16.mxu1 %v25107_v53 }
 0xda2   :  { %20085 = vmatmul.mubr.f32.vlgmr.msra.gmra.mrb[54].mxu0 %v14161_v61 }
 0xda3   :  { %21014 = vmatpush3.bf16.msra.mxu0 %v21011_v35  ;;  %20091 = vmatprep.mubr.f32.mxu0 %v25074_v36  ;;  %v15093_v7 = vsel %vm1730_vm3, %v11533_v23, 0  ;;  %v25204_v35 = vsub.s32 %v15665_v45, %v25569_v32 }
 0xda4   :  { %21016 = vmatprep.subr.bf16.mxu0 %v25080_v50  ;;  %v25150_v62 = vand.u32 4294901760, %v15093_v7 }
 0xda6   :  { %v15166_v37 = vsub.f32 %v15093_v7, %v25150_v62 }
 0xda7   :  { %20134 = vmatmul.mubr.f32.vlgmr.msra.gmra.mrb[44].mxu1 %v25094_v57 }
 0xda8   :  { %v11503_v55 = vpop.xlane.xlu1 %11502  ;;  %21042 = vmatpush3.bf16.msra.mxu1 %v25107_v53  ;;  %20140 = vmatprep.mubr.f32.mxu1 %v25113_v10  ;;  %v15167_v20 = vand.u32 4294901760, %v15166_v37  ;;  %v25565_v10 = vmov 0  }
 0xda9   :  { %21953 = vrcp.f32 %v11503_v55  ;;  %21067 = vmatprep.subr.bf16.mxu1 %v25563_v33 }
 0xdaa   :  { %20092 = vmatmul.mubr.f32.vlgmr.msra.gmra.mrb[54].mxu0 %v25120_v21  ;;  %v15168_v13 = vsub.f32 %v15166_v37, %v15167_v20 }
 0xdab   :  { %21018 = vmatpush3.bf16.msra.mxu0 %v25080_v50  ;;  %20098 = vmatprep.mubr.f32.mxu0 %v25074_v36  ;;  %v15196_v36 = vsub.f32 %v15194_v31, %v15195_v38 }
 0xdac   :  { %v7194_v46 = vpop.permute.xlu1 %7193  ;;  %v15169_v24 = vand.u32 4294901760, %v15168_v13 }
 0xdad   :  { %v7229_v47 = vsel %vm6622_vm6, %v25006_v28, %v7194_v46  ;;  %v15197_v14 = vand.u32 4294901760, %v15196_v36 }
 0xdae   :  { %v15099_v15 = vand.u32 4294901760, %v7229_v47 }
 0xdaf   :  { %20141 = vmatmul.mubr.f32.vlgmr.msra.gmra.mrb[44].mxu1 %v25094_v57 }
 0xdb0   :  { %v21043_v59 = vpack.c.bf16 %v15102_v27, %v15099_v15  ;;  %v15187_v5 = vsub.f32 %v7229_v47, %v15099_v15  ;;  %20193 = vmatprep.mubr.msk.f32.mxu1 %vm21978_vm1, %v25564_v30 }
 0xdb2   :  { %v15188_v48 = vand.u32 4294901760, %v15187_v5  ;;  %21044 = vmatprep.subr.bf16.mxu0 %v21043_v59  ;;  %20099 = vmatmul.mubr.f32.vlgmr.msra.gmra.mrb[54].mxu0 %v25120_v21  ;;  %v21051_v50 = vpack.c.bf16 %v15194_v31, %v15187_v5 }
 0xdb3   :  { %v21954_v42 = vpop.eup %21953  ;;  %21046 = vmatpush3.bf16.msra.mxu0 %v21043_v59  ;;  %20147 = vmatprep.mubr.f32.mxu0 %v15169_v24 }
 0xdb4   :  { %v11535_v28 = vmul.f32 %v21954_v42, %v24953_v51  ;;  %v15189_v17 = vsub.f32 %v15187_v5, %v15188_v48  ;;  %v21059_v63 = vpack.c.bf16 %v15195_v38, %v15188_v48 }
 0xdb6   :  { %v15190_v57 = vand.u32 4294901760, %v15189_v17  ;;  %v15096_v54 = vsel %vm1730_vm3, %v11535_v28, 0 }
 0xdb7   :  { %v15175_v53 = vand.u32 4294901760, %v15096_v54 }
 0xdb8   :  { %v21047_v12 = vpack.c.bf16 %v15197_v14, %v15190_v57 }
 0xdb9   :  { %v15176_v34 = vsub.f32 %v15096_v54, %v15175_v53 }
 0xdba   :  { %21048 = vmatprep.subr.bf16.mxu0 %v21047_v12 }
 0xdbb   :  { %v15177_v8 = vand.u32 4294901760, %v15176_v34 }
 0xdbd   :  { %v15178_v56 = vsub.f32 %v15176_v34, %v15177_v8 }
 0xdbf   :  { %v15179_v25 = vand.u32 4294901760, %v15178_v56 }
 0xdc1   :  { %20148 = vmatmul.mubr.f32.vlgmr.msra.gmra.mrb[56].mxu0 %v15179_v25 }
 0xdc2   :  { %21050 = vmatpush3.bf16.msra.mxu0 %v21047_v12  ;;  %20154 = vmatprep.mubr.f32.mxu0 %v25150_v62 }
 0xdc3   :  { %21052 = vmatprep.subr.bf16.mxu0 %v21051_v50 }
 0xdc9   :  { %20155 = vmatmul.mubr.f32.vlgmr.msra.gmra.mrb[56].mxu0 %v15175_v53 }
 0xdca   :  { %21054 = vmatpush3.bf16.msra.mxu0 %v21051_v50  ;;  %20161 = vmatprep.mubr.f32.mxu0 %v15166_v37 }
 0xdcb   :  { %21056 = vmatprep.subr.bf16.mxu0 %v21043_v59 }
 0xdd1   :  { %20162 = vmatmul.mubr.f32.vlgmr.msra.gmra.mrb[56].mxu0 %v15176_v34 }
 0xdd2   :  { %21058 = vmatpush3.bf16.msra.mxu0 %v21043_v59  ;;  %20168 = vmatprep.mubr.f32.mxu0 %v15167_v20 }
 0xdd3   :  { %21060 = vmatprep.subr.bf16.mxu0 %v21059_v63 }
 0xdd7   :  { %v19974_v51 = vpop.f32.mrb[40].mxu1 }
 0xdd8   :  { %v19890_v6 = vpop.f32.mrb[48].mxu0  ;;  %v13050_v29 = vpop.f32.mrb[41].mxu1 }
 0xdd9   :  { %20169 = vmatmul.mubr.f32.vlgmr.msra.gmra.mrb[56].mxu0 %v15177_v8  ;;  %15759 = vperm.xlu1 %21795, %v19890_v6   ;;  %v12034_v43 = vpop.f32.mrb[49].mxu0 }
 0xdda   :  { %21062 = vmatpush3.bf16.msra.mxu0 %v21059_v63  ;;  %15620 = vperm.xlu0 %21794, %v19890_v6  }
 0xddb   :  { %20175 = vmatprep.mubr.f32.mxu0 %v25150_v62  ;;  %21064 = vmatprep.subr.bf16.mxu0 %v21043_v59 }
 0xddd   :  { %21797 = vset.pattern.permute.xlu1 %v25565_v10 }
 0xdde   :  { %21796 = vset.pattern.permute.xlu0 %v25566_v26  ;;  %15632 = vperm.xlu1 %21797, %v19974_v51  }
 0xddf   :  { %15887 = vperm.xlu0 %21796, %v19890_v6  }
 0xde1   :  { %20176 = vmatmul.mubr.f32.vlgmr.msra.gmra.mrb[56].mxu0 %v15175_v53 }
 0xde2   :  { %21066 = vmatpush3.bf16.msra.mxu0 %v21043_v59  ;;  %20182 = vmatprep.mubr.f32.mxu0 %v25150_v62 }
 0xde3   :  { %21799 = vset.pattern.permute.xlu1 %v25566_v26  ;;  %21798 = vset.pattern.permute.xlu0 %v25567_v22 }
 0xde4   :  { %15899 = vperm.xlu1 %21799, %v19974_v51   ;;  %15771 = vperm.xlu0 %21798, %v19974_v51  }
 0xde5   :  { %21103 = vmatprep.subr.bf16.mxu0 %v25563_v33 }
 0xde8   :  { %21800 = vset.pattern.permute.xlu1 %v25565_v10  ;;  %15756 = vperm.xlu0 %21798, %v12034_v43  }
 0xde9   :  { %15617 = vperm.xlu1 %21800, %v12034_v43   ;;  %20183 = vmatmul.mubr.f32.vlgmr.msra.gmra.mrb[56].mxu0 %v15175_v53 }
 0xdea   :  { %20259 = vmatprep.mubr.msk.f32.mxu0 %vm21978_vm1, %v25564_v30 }
 0xdec   :  { %21802 = vset.pattern.permute.xlu0 %v25565_v10 }
 0xded   :  { %21801 = vset.pattern.permute.xlu1 %v25566_v26  ;;  %15629 = vperm.xlu0 %21802, %v13050_v29  }
 0xdee   :  { %15884 = vperm.xlu1 %21801, %v12034_v43  }
 0xdf1   :  { %21806 = vset.pattern.permute.xlu0 %v25567_v22 }
 0xdf2   :  { %21803 = vset.pattern.permute.xlu1 %v25567_v22 }
 0xdf3   :  { %15768 = vperm.xlu1 %21803, %v13050_v29  }
 0xdf7   :  { %21804 = vset.pattern.permute.xlu1 %v25566_v26 }
 0xdf8   :  { %15896 = vperm.xlu1 %21804, %v13050_v29  }
 0xdfc   :  { %21805 = vset.pattern.permute.xlu1 %v25565_v10 }
 0xe10   :  { %v19932_v4 = vpop.f32.mrb[50].mxu0 }
 0xe11   :  { %15765 = vperm.xlu0 %21806, %v19932_v4   ;;  %15626 = vperm.xlu1 %21805, %v19932_v4   ;;  %v12542_v9 = vpop.f32.mrb[51].mxu0 }
 0xe15   :  { %21807 = vset.pattern.permute.xlu1 %v25566_v26 }
 0xe16   :  { %15893 = vperm.xlu1 %21807, %v19932_v4  }
 0xe1a   :  { %21808 = vset.pattern.permute.xlu1 %v25565_v10 }
 0xe45   :  { %v20058_v16 = vpop.f32.mrb[42].mxu1 }
 0xe46   :  { %15783 = vperm.xlu0 %21806, %v20058_v16   ;;  %15644 = vperm.xlu1 %21808, %v20058_v16   ;;  %v14066_v18 = vpop.f32.mrb[43].mxu1 }
 0xe4a   :  { %21813 = vset.pattern.permute.xlu0 %v25565_v10  ;;  %21809 = vset.pattern.permute.xlu1 %v25566_v26 }
 0xe4b   :  { %15911 = vperm.xlu1 %21809, %v20058_v16   ;;  %15641 = vperm.xlu0 %21813, %v14066_v18  }
 0xe4d   :  { %v20016_v41 = vpop.f32.mrb[52].mxu0 }
 0xe4e   :  { %v25190_v21 = vpop.f32.mrb[53].mxu0 }
 0xe4f   :  { %21810 = vset.pattern.permute.xlu1 %v25565_v10  ;;  %21817 = vset.pattern.permute.xlu0 %v25567_v22 }
 0xe50   :  { %15623 = vperm.xlu1 %21810, %v12542_v9   ;;  %15777 = vperm.xlu0 %21817, %v20016_v41  }
 0xe54   :  { %21811 = vset.pattern.permute.xlu1 %v25567_v22 }
 0xe55   :  { %15762 = vperm.xlu1 %21811, %v12542_v9  }
 0xe58   :  { %v15760_v58 = vpop.permute.xlu1 %15759 }
 0xe59   :  { %v15621_v11 = vpop.permute.xlu0 %15620  ;;  %v15810_v61 = vrot.slane %v15760_v58, %v25196_v49  ;;  %21812 = vset.pattern.permute.xlu1 %v25566_v26 }
 0xe5a   :  { %15890 = vperm.xlu1 %21812, %v12542_v9   ;;  %v15674_v7 = vrot.slane %v15621_v11, %v25196_v49 }
 0xe5d   :  { %v15633_v40 = vpop.permute.xlu1 %15632 }
 0xe5e   :  { %v15888_v2 = vpop.permute.xlu0 %15887  ;;  %v15693_v44 = vrot.slane %v15633_v40, %v25196_v49  ;;  %21814 = vset.pattern.permute.xlu1 %v25567_v22 }
 0xe5f   :  { %15780 = vperm.xlu1 %21814, %v14066_v18   ;;  %v15938_v46 = vrot.slane %v15888_v2, %v25196_v49 }
 0xe63   :  { %v15772_v3 = vpop.permute.xlu0 %15771  ;;  %v15900_v19 = vpop.permute.xlu1 %15899  ;;  %21815 = vset.pattern.permute.xlu1 %v25566_v26 }
 0xe64   :  { %v15956_v0 = vrot.slane %v15900_v19, %v25196_v49  ;;  %15908 = vperm.xlu1 %21815, %v14066_v18   ;;  %v15828_v59 = vrot.slane %v15772_v3, %v25196_v49 }
 0xe67   :  { %v15757_v1 = vpop.permute.xlu0 %15756 }
 0xe68   :  { %v15806_v23 = vrot.slane %v15757_v1, %v25204_v35  ;;  %v15618_v52 = vpop.permute.xlu1 %15617  ;;  %21816 = vset.pattern.permute.xlu1 %v25565_v10 }
 0xe69   :  { %v15669_v62 = vrot.slane %v15618_v52, %v25204_v35  ;;  %15638 = vperm.xlu1 %21816, %v20016_v41  }
 0xe6a   :  { %v25212_v27 = vsel %vm15675_vm8, %v15810_v61, %v15806_v23 }
 0xe6b   :  { %v25215_v37 = vsel %vm15675_vm8, %v15674_v7, %v15669_v62 }
 0xe6c   :  { %v15630_v55 = vpop.permute.xlu0 %15629 }
 0xe6d   :  { %v15689_v20 = vrot.slane %v15630_v55, %v25204_v35  ;;  %v15885_v31 = vpop.permute.xlu1 %15884  ;;  %21818 = vset.pattern.permute.xlu1 %v25566_v26 }
 0xe6e   :  { %v15934_v47 = vrot.slane %v15885_v31, %v25204_v35  ;;  %15905 = vperm.xlu1 %21818, %v20016_v41  }
 0xe6f   :  { %v25222_v13 = vsel %vm15675_vm8, %v15693_v44, %v15689_v20 }
 0xe70   :  { %v25225_v38 = vsel %vm15675_vm8, %v15938_v46, %v15934_v47 }
 0xe72   :  { %v15769_v15 = vpop.permute.xlu1 %15768  ;;  %21819 = vset.pattern.permute.xlu1 %v25565_v10 }
 0xe73   :  { %v15824_v5 = vrot.slane %v15769_v15, %v25204_v35 }
 0xe75   :  { %v25231_v24 = vsel %vm15675_vm8, %v15828_v59, %v15824_v5 }
 0xe77   :  { %v15897_v48 = vpop.permute.xlu1 %15896 }
 0xe78   :  { %v15952_v36 = vrot.slane %v15897_v48, %v25204_v35 }
 0xe7a   :  { %v25235_v50 = vsel %vm15675_vm8, %v15956_v0, %v15952_v36 }
 0xe82   :  { %v20142_v42 = vpop.f32.mrb[44].mxu1 }
 0xe83   :  { %15795 = vperm.xlu0 %21817, %v20142_v42   ;;  %15656 = vperm.xlu1 %21819, %v20142_v42   ;;  %v15082_v28 = vpop.f32.mrb[45].mxu1 }
 0xe85   :  { %v20100_v17 = vpop.f32.mrb[54].mxu0 }
 0xe86   :  { %v14574_v63 = vpop.f32.mrb[55].mxu0 }
 0xe87   :  { %21821 = vset.pattern.permute.xlu0 %v25565_v10  ;;  %21820 = vset.pattern.permute.xlu1 %v25566_v26 }
 0xe88   :  { %15635 = vperm.xlu0 %21821, %v25190_v21   ;;  %15923 = vperm.xlu1 %21820, %v20142_v42  }
 0xe8c   :  { %21822 = vset.pattern.permute.xlu1 %v25567_v22  ;;  %15653 = vperm.xlu0 %21821, %v15082_v28  }
 0xe8d   :  { %15774 = vperm.xlu1 %21822, %v25190_v21  }
 0xe90   :  { %21827 = vset.pattern.permute.xlu0 %v25567_v22  ;;  %v15627_v57 = vpop.permute.xlu1 %15626  ;;  %v15766_v8 = vpop.permute.xlu0 %15765 }
 0xe91   :  { %v15684_v14 = vrot.slane %v15627_v57, %v25196_v49  ;;  %21823 = vset.pattern.permute.xlu1 %v25566_v26  ;;  %15789 = vperm.xlu0 %21827, %v20100_v17   ;;  %v15819_v45 = vrot.slane %v15766_v8, %v25196_v49 }
 0xe92   :  { %15902 = vperm.xlu1 %21823, %v25190_v21  }
 0xe95   :  { %21829 = vset.pattern.permute.xlu0 %v25565_v10  ;;  %v15894_v54 = vpop.permute.xlu1 %15893 }
 0xe96   :  { %v15947_v53 = vrot.slane %v15894_v54, %v25196_v49  ;;  %21824 = vset.pattern.permute.xlu1 %v25567_v22  ;;  %15647 = vperm.xlu0 %21829, %v14574_v63  }
 0xe97   :  { %15792 = vperm.xlu1 %21824, %v15082_v28  }
 0xe9b   :  { %21825 = vset.pattern.permute.xlu1 %v25566_v26 }
 0xe9c   :  { %15920 = vperm.xlu1 %21825, %v15082_v28  }
 0xea0   :  { %21826 = vset.pattern.permute.xlu1 %v25565_v10 }
 0xea1   :  { %15650 = vperm.xlu1 %21826, %v20100_v17  }
 0xea5   :  { %21828 = vset.pattern.permute.xlu1 %v25566_v26 }
 0xea6   :  { %15917 = vperm.xlu1 %21828, %v20100_v17  }
 0xeaa   :  { %21830 = vset.pattern.permute.xlu1 %v25567_v22 }
 0xeab   :  { %15786 = vperm.xlu1 %21830, %v14574_v63  }
 0xeaf   :  { %21831 = vset.pattern.permute.xlu1 %v25566_v26 }
 0xeb0   :  { %15914 = vperm.xlu1 %21831, %v14574_v63  }
 0xeb4   :  { %21832 = vset.pattern.permute.xlu1 %v25565_v10 }
 0xebc   :  { %v20184_v12 = vpop.f32.mrb[56].mxu0 }
 0xebd   :  { %15662 = vperm.xlu1 %21832, %v20184_v12   ;;  %v15590_v34 = vpop.f32.mrb[57].mxu0 }
 0xebe   :  { %15659 = vperm.xlu0 %21829, %v15590_v34  }
 0xec1   :  { %21834 = vset.pattern.permute.xlu1 %v25567_v22 }
 0xec2   :  { %15798 = vperm.xlu1 %21834, %v15590_v34   ;;  %21833 = vset.pattern.permute.xlu0 %v25567_v22 }
 0xec3   :  { %15801 = vperm.xlu0 %21833, %v20184_v12  }
 0xec5   :  { %v15784_v56 = vpop.permute.xlu0 %15783  ;;  %v15645_v25 = vpop.permute.xlu1 %15644 }
 0xec6   :  { %21835 = vset.pattern.permute.xlu1 %v25566_v26  ;;  %v15711_v51 = vrot.slane %v15645_v25, %v25196_v49  ;;  %v15846_v5 = vrot.slane %v15784_v56, %v25196_v49 }
 0xec7   :  { %15926 = vperm.xlu1 %21835, %v15590_v34   ;;  %21836 = vset.pattern.permute.xlu0 %v25565_v10 }
 0xeca   :  { %v15642_v6 = vpop.permute.xlu0 %15641  ;;  %v15912_v29 = vpop.permute.xlu1 %15911 }
 0xecb   :  { %15929 = vperm.xlu1 %21835, %v20184_v12   ;;  %v15707_v43 = vrot.slane %v15642_v6, %v25204_v35  ;;  %v15974_v4 = vrot.slane %v15912_v29, %v25196_v49 }
 0xecd   :  { %v15712_v9 = vsel %vm15675_vm8, %v15711_v51, %v15707_v43 }
 0xecf   :  { %v15624_v22 = vpop.permute.xlu1 %15623  ;;  %v15778_v23 = vpop.permute.xlu0 %15777 }
 0xed0   :  { %v15680_v16 = vrot.slane %v15624_v22, %v25204_v35  ;;  %v15837_v15 = vrot.slane %v15778_v23, %v25196_v49 }
 0xed2   :  { %v15685_v26 = vsel %vm15675_vm8, %v15684_v14, %v15680_v16 }
 0xed3   :  { %v15741_v18 = vsel %vm15740_vm9, %v15685_v26, %v25215_v37 }
 0xed4   :  { %v15763_v60 = vpop.permute.xlu1 %15762  ;;  %v15743_v10 = vsel %vm15742_vm10, %v25222_v13, %v15741_v18 }
 0xed5   :  { %v15815_v41 = vrot.slane %v15763_v60, %v25204_v35 }
 0xed7   :  { %v15820_v21 = vsel %vm15675_vm8, %v15819_v45, %v15815_v41 }
 0xed8   :  { %v15875_v39 = vsel %vm15740_vm9, %v15820_v21, %v25212_v27 }
 0xed9   :  { %v15891_v32 = vpop.permute.xlu1 %15890  ;;  %v15876_v58 = vsel %vm15742_vm10, %v25231_v24, %v15875_v39 }
 0xeda   :  { %v15943_v11 = vrot.slane %v15891_v32, %v25204_v35 }
 0xedc   :  { %v15948_v61 = vsel %vm15675_vm8, %v15947_v53, %v15943_v11 }
 0xedd   :  { %v16003_v40 = vsel %vm15740_vm9, %v15948_v61, %v25225_v38 }
 0xede   :  { %v15781_v2 = vpop.permute.xlu1 %15780  ;;  %v16004_v44 = vsel %vm15742_vm10, %v25235_v50, %v16003_v40 }
 0xedf   :  { %v15842_v47 = vrot.slane %v15781_v2, %v25204_v35 }
 0xee1   :  { %v15847_v48 = vsel %vm15675_vm8, %v15846_v5, %v15842_v47 }
 0xee3   :  { %v15909_v3 = vpop.permute.xlu1 %15908 }
 0xee4   :  { %v15970_v19 = vrot.slane %v15909_v3, %v25204_v35 }
 0xee6   :  { %v15975_v0 = vsel %vm15675_vm8, %v15974_v4, %v15970_v19 }
 0xee8   :  { %v15639_v1 = vpop.permute.xlu1 %15638 }
 0xee9   :  { %v15702_v55 = vrot.slane %v15639_v1, %v25196_v49 }
 0xeed   :  { %v15906_v52 = vpop.permute.xlu1 %15905 }
 0xeee   :  { %v15965_v28 = vrot.slane %v15906_v52, %v25196_v49 }
 0xf02   :  { %v15796_v7 = vpop.permute.xlu0 %15795  ;;  %v15657_v62 = vpop.permute.xlu1 %15656 }
 0xf03   :  { %v15729_v29 = vrot.slane %v15657_v62, %v25196_v49  ;;  %v15864_v45 = vrot.slane %v15796_v7, %v25196_v49 }
 0xf07   :  { %v15636_v27 = vpop.permute.xlu0 %15635  ;;  %v15924_v37 = vpop.permute.xlu1 %15923 }
 0xf08   :  { %v15698_v20 = vrot.slane %v15636_v27, %v25204_v35  ;;  %v15992_v2 = vrot.slane %v15924_v37, %v25196_v49 }
 0xf0a   :  { %v15703_v31 = vsel %vm15675_vm8, %v15702_v55, %v15698_v20 }
 0xf0b   :  { %v15745_v46 = vsel %vm15744_vm11, %v15703_v31, %v15743_v10  ;;  %v15654_v17 = vpop.permute.xlu0 %15653 }
 0xf0c   :  { %v15775_v13 = vpop.permute.xlu1 %15774  ;;  %v15747_v38 = vsel %vm15746_vm12, %v15712_v9, %v15745_v46  ;;  %v15725_v56 = vrot.slane %v15654_v17, %v25204_v35 }
 0xf0d   :  { %v15833_v59 = vrot.slane %v15775_v13, %v25204_v35 }
 0xf0e   :  { %v15730_v4 = vsel %vm15675_vm8, %v15729_v29, %v15725_v56 }
 0xf0f   :  { %v15838_v24 = vsel %vm15675_vm8, %v15837_v15, %v15833_v59 }
 0xf10   :  { %v15877_v36 = vsel %vm15744_vm11, %v15838_v24, %v15876_v58  ;;  %v15790_v12 = vpop.permute.xlu0 %15789 }
 0xf11   :  { %v15903_v50 = vpop.permute.xlu1 %15902  ;;  %v15878_v42 = vsel %vm15746_vm12, %v15847_v48, %v15877_v36  ;;  %v15855_v60 = vrot.slane %v15790_v12, %v25196_v49 }
 0xf12   :  { %v15961_v63 = vrot.slane %v15903_v50, %v25204_v35 }
 0xf14   :  { %v15966_v57 = vsel %vm15675_vm8, %v15965_v28, %v15961_v63 }
 0xf15   :  { %v16005_v14 = vsel %vm15744_vm11, %v15966_v57, %v16004_v44  ;;  %v15648_v8 = vpop.permute.xlu0 %15647 }
 0xf16   :  { %v15793_v54 = vpop.permute.xlu1 %15792  ;;  %v16006_v53 = vsel %vm15746_vm12, %v15975_v0, %v16005_v14  ;;  %v15716_v51 = vrot.slane %v15648_v8, %v25204_v35 }
 0xf17   :  { %v15860_v26 = vrot.slane %v15793_v54, %v25204_v35 }
 0xf19   :  { %v15865_v21 = vsel %vm15675_vm8, %v15864_v45, %v15860_v26 }
 0xf1b   :  { %v15921_v34 = vpop.permute.xlu1 %15920 }
 0xf1c   :  { %v15988_v32 = vrot.slane %v15921_v34, %v25204_v35 }
 0xf1e   :  { %v15993_v3 = vsel %vm15675_vm8, %v15992_v2, %v15988_v32 }
 0xf20   :  { %v15651_v25 = vpop.permute.xlu1 %15650 }
 0xf21   :  { %v15720_v6 = vrot.slane %v15651_v25, %v25196_v49 }
 0xf23   :  { %v15721_v43 = vsel %vm15675_vm8, %v15720_v6, %v15716_v51 }
 0xf24   :  { %v15749_v9 = vsel %vm15748_vm13, %v15721_v43, %v15747_v38 }
 0xf25   :  { %v15918_v22 = vpop.permute.xlu1 %15917  ;;  %v15751_v16 = vsel %vm15750_vm14, %v15730_v4, %v15749_v9 }
 0xf26   :  { %v15983_v61 = vrot.slane %v15918_v22, %v25196_v49 }
 0xf2a   :  { %v15787_v18 = vpop.permute.xlu1 %15786 }
 0xf2b   :  { %v15851_v10 = vrot.slane %v15787_v18, %v25204_v35 }
 0xf2d   :  { %v15856_v41 = vsel %vm15675_vm8, %v15855_v60, %v15851_v10  ;;  %v17646_v10 = vld [vmem:[%s25485_s1 + $0x198] ss:$0 sm:$0xff] }
 0xf2e   :  { %v15879_v39 = vsel %vm15748_vm13, %v15856_v41, %v15878_v42 }
 0xf2f   :  { %v15915_v58 = vpop.permute.xlu1 %15914  ;;  %v15880_v11 = vsel %vm15750_vm14, %v15865_v21, %v15879_v39  ;;  %v17647_v21 = vld [vmem:[%s25485_s1 + $0x1a0] ss:$0 sm:$0xff] }
 0xf30   :  { %v15979_v40 = vrot.slane %v15915_v58, %v25204_v35 }
 0xf32   :  { %v15984_v44 = vsel %vm15675_vm8, %v15983_v61, %v15979_v40 }
 0xf33   :  { %v16007_v19 = vsel %vm15748_vm13, %v15984_v44, %v16006_v53 }
 0xf34   :  { %v16008_v0 = vsel %vm15750_vm14, %v15993_v3, %v16007_v19 }
 0xf3c   :  { %v15663_v1 = vpop.permute.xlu1 %15662 }
 0xf3d   :  { %v15738_v23 = vrot.slane %v15663_v1, %v25196_v49  ;;  %v15660_v52 = vpop.permute.xlu0 %15659 }
 0xf3e   :  { %v15734_v7 = vrot.slane %v15660_v52, %v25204_v35 }
 0xf40   :  { %v15739_v62 = vsel %vm15675_vm8, %v15738_v23, %v15734_v7 }
 0xf41   :  { %v15799_v27 = vpop.permute.xlu1 %15798  ;;  %v15753_v37 = vsel %vm15752_vm15, %v15739_v62, %v15751_v16 }
 0xf42   :  { %v15869_v55 = vrot.slane %v15799_v27, %v25204_v35  ;;  %v15802_v20 = vpop.permute.xlu0 %15801  ;;  %v16011_v31 = vsel %vm1730_vm3, %v15753_v37, 0.0 }
 0xf43   :  { %v15873_v46 = vrot.slane %v15802_v20, %v25196_v49  ;;  %16012 = vadd.xlane.f32.xlu0 %v16011_v31 }
 0xf45   :  { %v15874_v47 = vsel %vm15675_vm8, %v15873_v46, %v15869_v55 }
 0xf46   :  { %v15927_v13 = vpop.permute.xlu1 %15926  ;;  %v15881_v38 = vsel %vm15752_vm15, %v15874_v47, %v15880_v11 }
 0xf47   :  { %v16014_v15 = vsel %vm1730_vm3, %v15881_v38, 0.0  ;;  %v15997_v5 = vrot.slane %v15927_v13, %v25204_v35 }
 0xf48   :  { %16015 = vadd.xlane.f32.xlu1 %v16014_v15 }
 0xf4a   :  { %v15930_v59 = vpop.permute.xlu1 %15929 }
 0xf4b   :  { %v16001_v24 = vrot.slane %v15930_v59, %v25196_v49 }
 0xf4d   :  { %v16002_v48 = vsel %vm15675_vm8, %v16001_v24, %v15997_v5 }
 0xf4e   :  { %v16009_v36 = vsel %vm15752_vm15, %v16002_v48, %v16008_v0 }
 0xf4f   :  { %v16017_v50 = vsel %vm1730_vm3, %v16009_v36, 0.0 }
 0xf50   :  { %16018 = vadd.xlane.f32.xlu0 %v16017_v50 }
 0xfd0   :  { %v16013_v42 = vpop.xlane.xlu0 %16012 }
 0xfd1   :  { %v16020_v28 = vmul.f32 0.0625, %v16013_v42 }
 0xfd3   :  { %v16023_v17 = vsub.f32 %v15753_v37, %v16020_v28 }
 0xfd5   :  { %v16016_v63 = vpop.xlane.xlu1 %16015  ;;  %v16026_v57 = vmul.f32 %v16023_v17, %v16023_v17 }
 0xfd6   :  { %v16021_v14 = vmul.f32 0.0625, %v16016_v63 }
 0xfd7   :  { %v16029_v54 = vsel %vm1730_vm3, %v16026_v57, 0.0 }
 0xfd8   :  { %v16024_v53 = vsub.f32 %v15881_v38, %v16021_v14  ;;  %16030 = vadd.xlane.f32.xlu0 %v16029_v54 }
 0xfda   :  { %v16027_v35 = vmul.f32 %v16024_v53, %v16024_v53 }
 0xfdc   :  { %v16032_v49 = vsel %vm1730_vm3, %v16027_v35, 0.0 }
 0xfdd   :  { %v16019_v12 = vpop.xlane.xlu0 %16018  ;;  %16033 = vadd.xlane.f32.xlu1 %v16032_v49 }
 0xfde   :  { %v16022_v34 = vmul.f32 0.0625, %v16019_v12  ;;  %v17648_v12 = vld [vmem:[%s25485_s1 + $0x1a8] ss:$0 sm:$0xff] }
 0xfe0   :  { %v16025_v8 = vsub.f32 %v16009_v36, %v16022_v34 }
 0xfe2   :  { %v16028_v56 = vmul.f32 %v16025_v8, %v16025_v8 }
 0xfe4   :  { %v16035_v25 = vsel %vm1730_vm3, %v16028_v56, 0.0  ;;  %v16123_v56 = vld [vmem:[%s25485_s1 + $0x1b8] sm:$0xff] }
 0xfe5   :  { %16036 = vadd.xlane.f32.xlu0 %v16035_v25  ;;  %v16124_v25 = vld [vmem:[%s25485_s1 + $0x1c0] sm:$0xff] }
0x1065   :  { %v16031_v51 = vpop.xlane.xlu0 %16030 }
0x1066   :  { %v16038_v6 = vmul.f32 0.0625, %v16031_v51  ;;  %v16125_v51 = vld [vmem:[%s25485_s1 + $0x1c8] sm:$0xff] }
0x1068   :  { %v16041_v29 = vadd.f32 1e-05, %v16038_v6 }
0x106a   :  { %21955 = vrsqrt.f32 %v16041_v29  ;;  %v16034_v43 = vpop.xlane.xlu1 %16033  ;;  %v16136_v29 = vand.u32 4294901760, %v16123_v56 }
0x106b   :  { %v16039_v4 = vmul.f32 0.0625, %v16034_v43  ;;  %v16139_v43 = vand.u32 4294901760, %v16124_v25 }
0x106d   :  { %v16042_v9 = vadd.f32 1e-05, %v16039_v4  ;;  %v16126_v4 = vld [vmem:[%s25485_s1 + $0x1d0] sm:$0xff] }
0x106f   :  { %21957 = vrsqrt.f32 %v16042_v9  ;;  %v16142_v9 = vand.u32 4294901760, %v16125_v51 }
0x1072   :  { %v16037_v22 = vpop.xlane.xlu0 %16036 }
0x1073   :  { %v16040_v16 = vmul.f32 0.0625, %v16037_v22  ;;  %v16145_v22 = vand.u32 4294901760, %v16126_v4 }
0x1074   :  { %v21956_v26 = vpop.eup %21955 }
0x1075   :  { %v16043_v18 = vadd.f32 1e-05, %v16040_v16  ;;  %v16047_v60 = vmul.f32 %v21956_v26, %v16023_v17  ;;  %v21068_v26 = vpack.c.bf16 %v16139_v43, %v16136_v29 }
0x1077   :  { %21959 = vrsqrt.f32 %v16043_v18  ;;  %v16055_v45 = vmul.f32 %v17646_v10, %v16047_v60  ;;  %v16216_v18 = vsub.f32 %v16123_v56, %v16136_v29  ;;  %v16223_v60 = vsub.f32 %v16124_v25, %v16139_v43  ;;  %21069 = vmatpush3.bf16.msra.mxu1 %v21068_v26 }
0x1078   :  { %21070 = vmatprep.subr.bf16.mxu1 %v25563_v33 }
0x1079   :  { %v21958_v41 = vpop.eup %21957  ;;  %v16063_v58 = vadd.f32 %v17647_v21, %v16055_v45  ;;  %v16237_v45 = vsub.f32 %v16126_v4, %v16145_v22 }
0x107a   :  { %v16048_v39 = vmul.f32 %v21958_v41, %v16024_v53 }
0x107b   :  { %v16066_v61 = vmax.f32 %v16063_v58, 0.0 }
0x107c   :  { %v16056_v32 = vmul.f32 %v17646_v10, %v16048_v39  ;;  %v16217_v39 = vand.u32 4294901760, %v16216_v18 }
0x107e   :  { %v16064_v11 = vadd.f32 %v17647_v21, %v16056_v32  ;;  %v16224_v32 = vand.u32 4294901760, %v16223_v60  ;;  %v16218_v58 = vsub.f32 %v16216_v18, %v16217_v39 }
0x1080   :  { %v16067_v40 = vmax.f32 %v16064_v11, 0.0  ;;  %v16225_v11 = vsub.f32 %v16223_v60, %v16224_v32 }
0x1081   :  { %v21960_v2 = vpop.eup %21959 }
0x1082   :  { %v16069_v44 = vmul.f32 %v16067_v40, %v16066_v61  ;;  %v16049_v3 = vmul.f32 %v21960_v2, %v16025_v8  ;;  %v17649_v8 = vld [vmem:[%s25485_s1 + $0x1b0] ss:$0 sm:$0xff]  ;;  %v16219_v2 = vand.u32 4294901760, %v16218_v58 }
0x1084   :  { %v16070_v19 = vsel %vm1730_vm3, %v16069_v44, 0.0  ;;  %v16057_v0 = vmul.f32 %v17646_v10, %v16049_v3  ;;  %v16230_v10 = vsub.f32 %v16125_v51, %v16142_v9  ;;  %v16226_v44 = vand.u32 4294901760, %v16225_v11 }
0x1085   :  { %16071 = vadd.xlane.f32.xlu1 %v16070_v19 }
0x1086   :  { %v16065_v1 = vadd.f32 %v17647_v21, %v16057_v0  ;;  %v21071_v21 = vpack.c.bf16 %v16145_v22, %v16142_v9  ;;  %v21074_v0 = vpack.c.bf16 %v16226_v44, %v16219_v2 }
0x1088   :  { %v16068_v23 = vmax.f32 %v16065_v1, 0.0  ;;  %21072 = vmatpush3.bf16.msra.mxu1 %v21071_v21 }
0x1089   :  { %21073 = vmatprep.subr.bf16.mxu1 %v25563_v33 }
0x108a   :  { %v16074_v52 = vmul.f32 %v16068_v23, %v16066_v61  ;;  %v16231_v61 = vand.u32 4294901760, %v16230_v10 }
0x108c   :  { %v16075_v7 = vsel %vm1730_vm3, %v16074_v52, 0.0  ;;  %v16232_v3 = vsub.f32 %v16230_v10, %v16231_v61 }
0x108d   :  { %16076 = vadd.xlane.f32.xlu0 %v16075_v7  ;;  %v21080_v7 = vpack.c.bf16 %v16223_v60, %v16216_v18 }
0x108e   :  { %v16233_v1 = vand.u32 4294901760, %v16232_v3 }
0x1112   :  { %v16072_v62 = vpop.xlane.xlu1 %16071 }
0x1113   :  { %v16073_v37 = vmul.f32 0.25, %v16072_v62  ;;  %v21083_v62 = vpack.c.bf16 %v16237_v45, %v16230_v10 }
0x111a   :  { %v16077_v27 = vpop.xlane.xlu0 %16076 }
0x111b   :  { %v16078_v55 = vmul.f32 0.25, %v16077_v27  ;;  %v21092_v27 = vpack.c.bf16 %v16224_v32, %v16217_v39 }
0x111d   :  { %v16079_v20 = vmax.f32 %v16073_v37, %v16078_v55 }
0x111f   :  { %v16080_v31 = vsub.f32 %v16073_v37, %v16079_v20  ;;  %v16083_v46 = vsub.f32 %v16078_v55, %v16079_v20  ;;  %v25570_v20 = vld [vmem:[#allocation3_spill] sm:$0xff] }
0x1121   :  { %v16081_v47 = vmul.f32 1.442695, %v16080_v31  ;;  %v16084_v13 = vmul.f32 1.442695, %v16083_v46 }
0x1123   :  { %21961 = vpow2.f32 %v16081_v47 }
0x1124   :  { %21963 = vpow2.f32 %v16084_v13 }
0x112d   :  { %v21962_v38 = vpop.eup %21961 }
0x112e   :  { %v21964_v15 = vpop.eup %21963  ;;  %v16086_v5 = vmul.f32 %v21962_v38, %v16067_v40  ;;  %v16238_v40 = vand.u32 4294901760, %v16237_v45 }
0x112f   :  { %v16089_v59 = vadd.f32 %v21964_v15, %v21962_v38  ;;  %v16087_v24 = vmul.f32 %v21964_v15, %v16068_v23 }
0x1130   :  { %v16239_v19 = vsub.f32 %v16237_v45, %v16238_v40  ;;  %v21095_v37 = vpack.c.bf16 %v16238_v40, %v16231_v61  ;;  %v17650_v45 = vld [vmem:[%s25485_s1 + $0x1d8] ss:$0 sm:$0xff] }
0x1131   :  { %21965 = vrcp.f32 %v16089_v59  ;;  %v16088_v48 = vadd.f32 %v16087_v24, %v16086_v5  ;;  %v16623_v5 = vld [vmem:[%s25485_s1 + $0x1e0] sm:$0xff]  ;;  %v16624_v24 = vld [vmem:[%s25485_s1 + $0x1e8] sm:$0xff] }
0x1132   :  { %v16240_v23 = vand.u32 4294901760, %v16239_v19  ;;  %v17123_v19 = vld [vmem:[%s25485_s1 + $0x208] sm:$0xff] }
0x1134   :  { %v21077_v52 = vpack.c.bf16 %v16240_v23, %v16233_v1  ;;  %v17125_v1 = vld [vmem:[%s25485_s1 + $0x218] sm:$0xff]  ;;  %v17136_v23 = vand.u32 4294901760, %v17123_v19 }
0x113b   :  { %v21966_v36 = vpop.eup %21965 }
0x113c   :  { %v16091_v50 = vmul.f32 %v21966_v36, %v16088_v48  ;;  %v16625_v48 = vld [vmem:[%s25485_s1 + $0x1f0] sm:$0xff]  ;;  %v16636_v36 = vand.u32 4294901760, %v16623_v5 }
0x113e   :  { %v16092_v42 = vsel %vm1730_vm3, %v16091_v50, 0.0 }
0x113f   :  { %16093 = vadd.xlane.f32.xlu1 %v16092_v42  ;;  %v16626_v42 = vld [vmem:[%s25485_s1 + $0x1f8] sm:$0xff] }
0x11cc   :  { %v16094_v28 = vpop.xlane.xlu1 %16093 }
0x11cd   :  { %v16095_v17 = vmul.f32 0.0625, %v16094_v28  ;;  %v16642_v28 = vand.u32 4294901760, %v16625_v48 }
0x11cf   :  { %v16096_v63 = vsub.f32 %v16091_v50, %v16095_v17  ;;  %v16639_v50 = vand.u32 4294901760, %v16624_v24  ;;  %v16645_v17 = vand.u32 4294901760, %v16626_v42 }
0x11d1   :  { %v16097_v57 = vmul.f32 %v16096_v63, %v16096_v63 }
0x11d3   :  { %v16098_v14 = vsel %vm1730_vm3, %v16097_v57, 0.0  ;;  %v16716_v57 = vsub.f32 %v16623_v5, %v16636_v36 }
0x11d4   :  { %16099 = vadd.xlane.f32.xlu0 %v16098_v14  ;;  %v16723_v14 = vsub.f32 %v16624_v24, %v16639_v50 }
0x1261   :  { %v16100_v54 = vpop.xlane.xlu0 %16099 }
0x1262   :  { %v16101_v53 = vmul.f32 0.0625, %v16100_v54  ;;  %v16730_v54 = vsub.f32 %v16625_v48, %v16642_v28 }
0x1264   :  { %v16102_v35 = vadd.f32 1e-05, %v16101_v53  ;;  %v16737_v53 = vsub.f32 %v16626_v42, %v16645_v17  ;;  %v16731_v56 = vand.u32 4294901760, %v16730_v54 }
0x1266   :  { %21967 = vrsqrt.f32 %v16102_v35  ;;  %v21107_v35 = vpack.c.bf16 %v16645_v17, %v16642_v28  ;;  %v16738_v25 = vand.u32 4294901760, %v16737_v53  ;;  %v16732_v29 = vsub.f32 %v16730_v54, %v16731_v56 }
0x1267   :  { %v21119_v18 = vpack.c.bf16 %v16737_v53, %v16730_v54 }
0x1268   :  { %v16739_v43 = vsub.f32 %v16737_v53, %v16738_v25  ;;  %v16733_v9 = vand.u32 4294901760, %v16732_v29  ;;  %v21131_v10 = vpack.c.bf16 %v16738_v25, %v16731_v56 }
0x126a   :  { %v16740_v22 = vand.u32 4294901760, %v16739_v43 }
0x1270   :  { %v21968_v49 = vpop.eup %21967 }
0x1271   :  { %v16104_v34 = vmul.f32 %v21968_v49, %v16096_v63  ;;  %v25406_v63 = vpack.c.bf16 %v16639_v50, %v16636_v36  ;;  %v16717_v49 = vand.u32 4294901760, %v16716_v57 }
0x1273   :  { %v16110_v6 = vmul.f32 %v17648_v12, %v16104_v34  ;;  %21105 = vmatpush3.bf16.msra.mxu0 %v25406_v63  ;;  %v16724_v12 = vand.u32 4294901760, %v16723_v14  ;;  %v16718_v34 = vsub.f32 %v16716_v57, %v16717_v49 }
0x1274   :  { %21106 = vmatprep.subr.bf16.mxu0 %v25563_v33 }
0x1275   :  { %v16116_v16 = vadd.f32 %v17649_v8, %v16110_v6  ;;  %v16725_v8 = vsub.f32 %v16723_v14, %v16724_v12  ;;  %v16719_v51 = vand.u32 4294901760, %v16718_v34  ;;  %v21128_v60 = vpack.c.bf16 %v16724_v12, %v16717_v49  ;;  %v17651_v49 = vld [vmem:[%s25485_s1 + $0x200] ss:$0 sm:$0xff] }
0x1277   :  { %v16117_v41 = vmax.f32 %v16116_v16, 0.0  ;;  %21108 = vmatpush3.bf16.msra.mxu0 %v21107_v35  ;;  %v16726_v6 = vand.u32 4294901760, %v16725_v8  ;;  %v21113_v16 = vpack.c.bf16 %v16740_v22, %v16733_v9  ;;  %v17652_v22 = vld [vmem:[%s25485_s1 + $0x228] ss:$0 sm:$0xff] }
0x1278   :  { %21109 = vmatprep.subr.bf16.mxu0 %v25563_v33 }
0x1279   :  { %16119 = vrot.lane.b32.xlu1 %v16117_v41, %s21991_s15  ;;  %v21110_v4 = vpack.c.bf16 %v16726_v6, %v16719_v51 }
0x12eb   :  { %v16120_v55 = vpop.permute.xlu1 %16119 }
0x12ec   :  { %v16122_v31 = vsel %vm1730_vm3, %v25570_v20, %v16120_v55  ;;  %v17216_v55 = vsub.f32 %v17123_v19, %v17136_v23 }
0x12ed   :  { %v16133_v46 = vsel %vm138_vm2, %v16122_v31, 0 }
0x12ee   :  { %v16204_v47 = vand.u32 4294901760, %v16133_v46 }
0x12f0   :  { %v16205_v13 = vsub.f32 %v16133_v46, %v16204_v47 }
0x12f2   :  { %v16206_v38 = vand.u32 4294901760, %v16205_v13 }
0x12f4   :  { %v16207_v15 = vsub.f32 %v16205_v13, %v16206_v38 }
0x12f6   :  { %v16208_v59 = vand.u32 4294901760, %v16207_v15 }
0x12f8   :  { %20194 = vmatmul.mubr.f32.vlgmr.msra.gmra.mrb[46].mxu1 %v16208_v59 }
0x12f9   :  { %21075 = vmatpush3.bf16.msra.mxu1 %v21074_v0  ;;  %20204 = vmatprep.mubr.msk.f32.mxu1 %vm21978_vm1, %v25564_v30  ;;  %v17124_v0 = vld [vmem:[%s25485_s1 + $0x210] sm:$0xff] }
0x12fa   :  { %21076 = vmatprep.subr.bf16.mxu1 %v25563_v33 }
0x12fd   :  { %21078 = vmatpush3.bf16.msra.mxu1 %v21077_v52  ;;  %v17139_v52 = vand.u32 4294901760, %v17124_v0 }
0x12fe   :  { %21079 = vmatprep.subr.bf16.mxu1 %v25563_v33 }
0x12ff   :  { %v17223_v20 = vsub.f32 %v17124_v0, %v17139_v52 }
0x1300   :  { %20205 = vmatmul.mubr.f32.vlgmr.msra.gmra.mrb[46].mxu1 %v16204_v47 }
0x1301   :  { %21081 = vmatpush3.bf16.msra.mxu1 %v21080_v7  ;;  %20215 = vmatprep.mubr.msk.f32.mxu1 %vm21978_vm1, %v25564_v30  ;;  %v17126_v7 = vld [vmem:[%s25485_s1 + $0x220] sm:$0xff] }
0x1302   :  { %21082 = vmatprep.subr.bf16.mxu1 %v25563_v33 }
0x1305   :  { %21084 = vmatpush3.bf16.msra.mxu1 %v21083_v62  ;;  %v17142_v62 = vand.u32 4294901760, %v17125_v1 }
0x1306   :  { %21085 = vmatprep.subr.bf16.mxu1 %v25563_v33 }
0x1307   :  { %v17230_v31 = vsub.f32 %v17125_v1, %v17142_v62 }
0x1308   :  { %20216 = vmatmul.mubr.f32.vlgmr.msra.gmra.mrb[46].mxu1 %v16205_v13  ;;  %v17217_v13 = vand.u32 4294901760, %v17216_v55 }
0x1309   :  { %21087 = vmatpush3.bf16.msra.mxu1 %v21068_v26  ;;  %20226 = vmatprep.mubr.msk.f32.mxu1 %vm21978_vm1, %v25564_v30  ;;  %v17231_v5 = vand.u32 4294901760, %v17230_v31 }
0x130a   :  { %21088 = vmatprep.subr.bf16.mxu1 %v25563_v33  ;;  %v17218_v15 = vsub.f32 %v17216_v55, %v17217_v13 }
0x130b   :  { %v17232_v50 = vsub.f32 %v17230_v31, %v17231_v5 }
0x130c   :  { %v17219_v48 = vand.u32 4294901760, %v17218_v15 }
0x130d   :  { %21090 = vmatpush3.bf16.msra.mxu1 %v21071_v21  ;;  %v17233_v17 = vand.u32 4294901760, %v17232_v50 }
0x130e   :  { %21091 = vmatprep.subr.bf16.mxu1 %v25563_v33 }
0x1310   :  { %20227 = vmatmul.mubr.f32.vlgmr.msra.gmra.mrb[46].mxu1 %v16206_v38  ;;  %v17224_v38 = vand.u32 4294901760, %v17223_v20 }
0x1311   :  { %21093 = vmatpush3.bf16.msra.mxu1 %v21092_v27  ;;  %20237 = vmatprep.mubr.msk.f32.mxu1 %vm21978_vm1, %v25564_v30  ;;  %v17145_v27 = vand.u32 4294901760, %v17126_v7 }
0x1312   :  { %21094 = vmatprep.subr.bf16.mxu1 %v25563_v33  ;;  %v17225_v59 = vsub.f32 %v17223_v20, %v17224_v38  ;;  %v21164_v53 = vpack.c.bf16 %v17224_v38, %v17217_v13 }
0x1313   :  { %v17237_v46 = vsub.f32 %v17126_v7, %v17145_v27 }
0x1314   :  { %v17226_v36 = vand.u32 4294901760, %v17225_v59 }
0x1315   :  { %21096 = vmatpush3.bf16.msra.mxu1 %v21095_v37  ;;  %v25448_v37 = vpack.c.bf16 %v17139_v52, %v17136_v23  ;;  %v17238_v24 = vand.u32 4294901760, %v17237_v46  ;;  %v21155_v54 = vpack.c.bf16 %v17237_v46, %v17230_v31 }
0x1316   :  { %21097 = vmatprep.subr.bf16.mxu1 %v25563_v33  ;;  %v21146_v28 = vpack.c.bf16 %v17226_v36, %v17219_v48 }
0x1317   :  { %v17239_v42 = vsub.f32 %v17237_v46, %v17238_v24 }
0x1318   :  { %20238 = vmatmul.mubr.f32.vlgmr.msra.gmra.mrb[46].mxu1 %v16204_v47 }
0x1319   :  { %21099 = vmatpush3.bf16.msra.mxu1 %v21068_v26  ;;  %20248 = vmatprep.mubr.msk.f32.mxu1 %vm21978_vm1, %v25564_v30  ;;  %v21116_v26 = vpack.c.bf16 %v16723_v14, %v16716_v57  ;;  %v21152_v14 = vpack.c.bf16 %v17223_v20, %v17216_v55 }
0x131a   :  { %21100 = vmatprep.subr.bf16.mxu1 %v25563_v33 }
0x131d   :  { %21102 = vmatpush3.bf16.msra.mxu1 %v21071_v21 }
0x131e   :  { %21139 = vmatprep.subr.bf16.mxu1 %v25563_v33 }
0x1320   :  { %20249 = vmatmul.mubr.f32.vlgmr.msra.gmra.mrb[46].mxu1 %v16204_v47  ;;  %v21143_v47 = vpack.c.bf16 %v17145_v27, %v17142_v62 }
0x1321   :  { %20325 = vmatprep.mubr.msk.f32.mxu1 %vm21978_vm1, %v25564_v30  ;;  %21141 = vmatpush3.bf16.msra.mxu1 %v25448_v37 }
0x1322   :  { %21142 = vmatprep.subr.bf16.mxu1 %v25563_v33 }
0x1325   :  { %21144 = vmatpush3.bf16.msra.mxu1 %v21143_v47 }
0x1326   :  { %21145 = vmatprep.subr.bf16.mxu1 %v25563_v33 }
0x13f3   :  { %v16616_v41 = vpop.f32.mrb[46].mxu1 }
0x13f4   :  { %v21218_v21 = vadd.f32 %v17650_v45, %v16616_v41  ;;  %v20250_v39 = vpop.f32.mrb[47].mxu1 }
0x13f6   :  { %vm16620_vm0 = vcmp.gt.f32.partialorder %v21218_v21, 0.0  ;;  %v16621_v32 = vmul.f32 0.01, %v21218_v21 }
0x13f8   :  { %v16622_v58 = vsel %vm16620_vm0, %v21218_v21, %v16621_v32 }
0x13f9   :  { %v16633_v11 = vsel %vm138_vm2, %v16622_v58, 0 }
0x13fa   :  { %v16704_v61 = vand.u32 4294901760, %v16633_v11 }
0x13fc   :  { %v16705_v40 = vsub.f32 %v16633_v11, %v16704_v61 }
0x13fe   :  { %v16706_v2 = vand.u32 4294901760, %v16705_v40 }
0x1400   :  { %v16707_v44 = vsub.f32 %v16705_v40, %v16706_v2 }
0x1402   :  { %v16708_v3 = vand.u32 4294901760, %v16707_v44 }
0x1404   :  { %20260 = vmatmul.mubr.f32.vlgmr.msra.gmra.mrb[58].mxu0 %v16708_v3 }
0x1405   :  { %21111 = vmatpush3.bf16.msra.mxu0 %v21110_v4  ;;  %20270 = vmatprep.mubr.msk.f32.mxu0 %vm21978_vm1, %v25564_v30 }
0x1406   :  { %21112 = vmatprep.subr.bf16.mxu0 %v25563_v33 }
0x1409   :  { %21114 = vmatpush3.bf16.msra.mxu0 %v21113_v16 }
0x140a   :  { %21115 = vmatprep.subr.bf16.mxu0 %v25563_v33 }
0x140c   :  { %20271 = vmatmul.mubr.f32.vlgmr.msra.gmra.mrb[58].mxu0 %v16704_v61 }
0x140d   :  { %21117 = vmatpush3.bf16.msra.mxu0 %v21116_v26  ;;  %20281 = vmatprep.mubr.msk.f32.mxu0 %vm21978_vm1, %v25564_v30 }
0x140e   :  { %21118 = vmatprep.subr.bf16.mxu0 %v25563_v33 }
0x1411   :  { %21120 = vmatpush3.bf16.msra.mxu0 %v21119_v18 }
0x1412   :  { %21121 = vmatprep.subr.bf16.mxu0 %v25563_v33 }
0x1414   :  { %20282 = vmatmul.mubr.f32.vlgmr.msra.gmra.mrb[58].mxu0 %v16705_v40 }
0x1415   :  { %21123 = vmatpush3.bf16.msra.mxu0 %v25406_v63  ;;  %20292 = vmatprep.mubr.msk.f32.mxu0 %vm21978_vm1, %v25564_v30 }
0x1416   :  { %21124 = vmatprep.subr.bf16.mxu0 %v25563_v33 }
0x1419   :  { %21126 = vmatpush3.bf16.msra.mxu0 %v21107_v35 }
0x141a   :  { %21127 = vmatprep.subr.bf16.mxu0 %v25563_v33 }
0x141c   :  { %20293 = vmatmul.mubr.f32.vlgmr.msra.gmra.mrb[58].mxu0 %v16706_v2 }
0x141d   :  { %21129 = vmatpush3.bf16.msra.mxu0 %v21128_v60  ;;  %20303 = vmatprep.mubr.msk.f32.mxu0 %vm21978_vm1, %v25564_v30 }
0x141e   :  { %21130 = vmatprep.subr.bf16.mxu0 %v25563_v33 }
0x1421   :  { %21132 = vmatpush3.bf16.msra.mxu0 %v21131_v10 }
0x1422   :  { %21133 = vmatprep.subr.bf16.mxu0 %v25563_v33 }
0x1424   :  { %20304 = vmatmul.mubr.f32.vlgmr.msra.gmra.mrb[58].mxu0 %v16704_v61 }
0x1425   :  { %21135 = vmatpush3.bf16.msra.mxu0 %v25406_v63  ;;  %20314 = vmatprep.mubr.msk.f32.mxu0 %vm21978_vm1, %v25564_v30  ;;  %v17240_v63 = vand.u32 4294901760, %v17239_v42 }
0x1426   :  { %21136 = vmatprep.subr.bf16.mxu0 %v25563_v33 }
0x1427   :  { %v21149_v57 = vpack.c.bf16 %v17240_v63, %v17233_v17 }
0x1429   :  { %21138 = vmatpush3.bf16.msra.mxu0 %v21107_v35  ;;  %v21167_v35 = vpack.c.bf16 %v17238_v24, %v17231_v5 }
0x142c   :  { %20315 = vmatmul.mubr.f32.vlgmr.msra.gmra.mrb[58].mxu0 %v16704_v61 }
0x14ff   :  { %v17116_v12 = vpop.f32.mrb[58].mxu0 }
0x1500   :  { %v21219_v34 = vadd.f32 %v17651_v49, %v17116_v12  ;;  %v20316_v8 = vpop.f32.mrb[59].mxu0 }
0x1502   :  { %vm17120_vm3 = vcmp.gt.f32.partialorder %v21219_v34, 0.0  ;;  %v17121_v56 = vmul.f32 0.01, %v21219_v34 }
0x1504   :  { %v17122_v25 = vsel %vm17120_vm3, %v21219_v34, %v17121_v56 }
0x1505   :  { %v17133_v51 = vsel %vm138_vm2, %v17122_v25, 0 }
0x1506   :  { %v17204_v6 = vand.u32 4294901760, %v17133_v51 }
0x1508   :  { %v17205_v29 = vsub.f32 %v17133_v51, %v17204_v6 }
0x150a   :  { %v17206_v43 = vand.u32 4294901760, %v17205_v29 }
0x150c   :  { %v17207_v4 = vsub.f32 %v17205_v29, %v17206_v43 }
0x150e   :  { %v17208_v9 = vand.u32 4294901760, %v17207_v4 }
0x1510   :  { %20326 = vmatmul.mubr.f32.vlgmr.msra.gmra.mrb[48].mxu1 %v17208_v9 }
0x1511   :  { %21147 = vmatpush3.bf16.msra.mxu1 %v21146_v28  ;;  %20336 = vmatprep.mubr.msk.f32.mxu1 %vm21978_vm1, %v25564_v30 }
0x1512   :  { %21148 = vmatprep.subr.bf16.mxu1 %v25563_v33 }
0x1515   :  { %21150 = vmatpush3.bf16.msra.mxu1 %v21149_v57 }
0x1516   :  { %21151 = vmatprep.subr.bf16.mxu1 %v25563_v33 }
0x1518   :  { %20337 = vmatmul.mubr.f32.vlgmr.msra.gmra.mrb[48].mxu1 %v17204_v6 }
0x1519   :  { %21153 = vmatpush3.bf16.msra.mxu1 %v21152_v14  ;;  %20347 = vmatprep.mubr.msk.f32.mxu1 %vm21978_vm1, %v25564_v30 }
0x151a   :  { %21154 = vmatprep.subr.bf16.mxu1 %v25563_v33 }
0x151d   :  { %21156 = vmatpush3.bf16.msra.mxu1 %v21155_v54 }
0x151e   :  { %21157 = vmatprep.subr.bf16.mxu1 %v25563_v33 }
0x1520   :  { %20348 = vmatmul.mubr.f32.vlgmr.msra.gmra.mrb[48].mxu1 %v17205_v29 }
0x1521   :  { %21159 = vmatpush3.bf16.msra.mxu1 %v25448_v37  ;;  %20358 = vmatprep.mubr.msk.f32.mxu1 %vm21978_vm1, %v25564_v30 }
0x1522   :  { %21160 = vmatprep.subr.bf16.mxu1 %v25563_v33 }
0x1525   :  { %21162 = vmatpush3.bf16.msra.mxu1 %v21143_v47 }
0x1526   :  { %21163 = vmatprep.subr.bf16.mxu1 %v25563_v33 }
0x1528   :  { %20359 = vmatmul.mubr.f32.vlgmr.msra.gmra.mrb[48].mxu1 %v17206_v43 }
0x1529   :  { %21165 = vmatpush3.bf16.msra.mxu1 %v21164_v53  ;;  %20369 = vmatprep.mubr.msk.f32.mxu1 %vm21978_vm1, %v25564_v30 }
0x152a   :  { %21166 = vmatprep.subr.bf16.mxu1 %v25563_v33 }
0x152d   :  { %21168 = vmatpush3.bf16.msra.mxu1 %v21167_v35 }
0x152e   :  { %21169 = vmatprep.subr.bf16.mxu1 %v25563_v33 }
0x1530   :  { %20370 = vmatmul.mubr.f32.vlgmr.msra.gmra.mrb[48].mxu1 %v17204_v6 }
0x1531   :  { %21171 = vmatpush3.bf16.msra.mxu1 %v25448_v37  ;;  %20380 = vmatprep.mubr.msk.f32.mxu1 %vm21978_vm1, %v25564_v30 }
0x1532   :  { %21172 = vmatprep.subr.bf16.mxu1 %v25563_v33 }
0x1535   :  { %21174 = vmatpush3.bf16.msra.mxu1 %v21143_v47 }
0x1538   :  { %20381 = vmatmul.mubr.f32.vlgmr.msra.gmra.mrb[48].mxu1 %v17204_v6 }
0x160b   :  { %v17616_v16 = vpop.f32.mrb[48].mxu1 }
0x160c   :  { %v21220_v26 = vadd.f32 %v17652_v22, %v17616_v16  ;;  %v20382_v18 = vpop.f32.mrb[49].mxu1 }
0x160e   :  { %17622 = vperm.xlu0 %21836, %v21220_v26  }
0x168d   :  { %v17623_v60 = vpop.permute.xlu0 %17622 }
0x168e   :  { %17625 = vst [vmem:[%s25486_s2] sm:$0xff] %v17623_v60 }

</bundles_post_ra>
